<compile_context>
chip_gen: v7x
topology: tpu7x:2x2x1
jax: 0.10.0
libtpu: 0.0.40
codegen_flags: <defaults>
</compile_context>

<pallas_src>
import functools
import math
import types

import jax
import jax.numpy as jnp
from jax import lax
from jax.experimental import pallas as pl
from jax.experimental.pallas import tpu as pltpu


# ----------------------------------------------------------------------------
# Helpers
# ----------------------------------------------------------------------------
def _round_up(x, m):
    return (x + m - 1) // m * m


def _pick_tile(dim, pref, quantum):
    """Largest tile <= pref that divides dim (dim is a multiple of quantum)."""
    if dim <= pref:
        return dim
    t = (pref // quantum) * quantum
    while dim % t:
        t -= quantum
    return max(t, quantum)


def _divisors(n, quantum):
    """Divisors of n that are multiples of quantum (plus n itself), descending."""
    return sorted({d for d in range(quantum, n + 1, quantum) if n % d == 0} | {n},
                  reverse=True)


def _vmem_limit_bytes():
    """Generation-aware scoped-VMEM limit (review item); safe fallback."""
    try:
        info = pltpu.get_tpu_info()
        cap = int(getattr(info, "vmem_capacity_bytes"))
        if cap > 0:
            return max(32 * 1024 * 1024, min(cap * 3 // 4, 112 * 1024 * 1024))
    except Exception:
        pass
    return 32 * 1024 * 1024


_VMEM_LIMIT = _vmem_limit_bytes()
_K_SINGLE_TILE = 1024  # full-K (no accumulator loop) up to this contraction width


# ----------------------------------------------------------------------------
# Dense kernels: y = x @ W + b [+ residual]; bf16 MXU operands, f32 accumulate.
# ----------------------------------------------------------------------------
def _dense_k1_kernel(x_ref, w_ref, b_ref, o_ref):
    acc = jnp.dot(x_ref[...], w_ref[...], preferred_element_type=jnp.float32)
    o_ref[...] = (acc + b_ref[...]).astype(o_ref.dtype)


def _dense_k1_res_kernel(x_ref, w_ref, b_ref, r_ref, o_ref):
    acc = jnp.dot(x_ref[...], w_ref[...], preferred_element_type=jnp.float32)
    o_ref[...] = (acc + b_ref[...] + r_ref[...].astype(jnp.float32)).astype(o_ref.dtype)


def _dense_acc_kernel(x_ref, w_ref, b_ref, o_ref, acc_ref):
    k = pl.program_id(2)

    @pl.when(k == 0)
    def _init():
        acc_ref[...] = jnp.broadcast_to(b_ref[...], acc_ref.shape)

    acc_ref[...] += jnp.dot(x_ref[...], w_ref[...],
                            preferred_element_type=jnp.float32)

    @pl.when(k == pl.num_programs(2) - 1)
    def _store():
        o_ref[...] = acc_ref[...].astype(o_ref.dtype)


def _dense_acc_res_kernel(x_ref, w_ref, b_ref, r_ref, o_ref, acc_ref):
    k = pl.program_id(2)

    @pl.when(k == 0)
    def _init():
        acc_ref[...] = (jnp.broadcast_to(b_ref[...], acc_ref.shape)
                        + r_ref[...].astype(jnp.float32))

    acc_ref[...] += jnp.dot(x_ref[...], w_ref[...],
                            preferred_element_type=jnp.float32)

    @pl.when(k == pl.num_programs(2) - 1)
    def _store():
        o_ref[...] = acc_ref[...].astype(o_ref.dtype)


def dense(x, w, b, residual=None, out_dtype=jnp.bfloat16):
    """x: (..., Kp) already lane-padded -> (..., Np) lane-padded.

    w: (Kp, Np) bf16, b: (1, Np) f32, residual: (..., Np) (optional).
    No slicing of the output: padded lane widths flow between layers.
    """
    Kp, Np = w.shape
    assert x.shape[-1] == Kp, (x.shape, w.shape)
    lead = x.shape[:-1]
    x2 = x.reshape(-1, Kp).astype(jnp.bfloat16)
    M = x2.shape[0]

    Mp = _round_up(M, 8)
    tm = _pick_tile(Mp, 256, 8)
    tn = _pick_tile(Np, 512, 128)
    if Mp != M:
        x2 = jnp.zeros((Mp, Kp), jnp.bfloat16).at[:M].set(x2)

    r2 = None
    if residual is not None:
        assert residual.shape[-1] == Np
        r2 = residual.reshape(-1, Np).astype(jnp.bfloat16)
        if Mp != M:
            r2 = jnp.zeros((Mp, Np), jnp.bfloat16).at[:M].set(r2)

    out_shape = jax.ShapeDtypeStruct((Mp, Np), out_dtype)

    if Kp <= _K_SINGLE_TILE:
        grid = (Mp // tm, Np // tn)
        params = pltpu.CompilerParams(
            dimension_semantics=("parallel", "parallel"),
            vmem_limit_bytes=_VMEM_LIMIT)
        x_spec = pl.BlockSpec((tm, Kp), lambda i, j: (i, 0))
        w_spec = pl.BlockSpec((Kp, tn), lambda i, j: (0, j))
        b_spec = pl.BlockSpec((1, tn), lambda i, j: (0, j))
        o_spec = pl.BlockSpec((tm, tn), lambda i, j: (i, j))
        if residual is None:
            out = pl.pallas_call(
                _dense_k1_kernel, out_shape=out_shape, grid=grid,
                in_specs=[x_spec, w_spec, b_spec], out_specs=o_spec,
                compiler_params=params)(x2, w, b)
        else:
            r_spec = pl.BlockSpec((tm, tn), lambda i, j: (i, j))
            out = pl.pallas_call(
                _dense_k1_res_kernel, out_shape=out_shape, grid=grid,
                in_specs=[x_spec, w_spec, b_spec, r_spec], out_specs=o_spec,
                compiler_params=params)(x2, w, b, r2)
    else:
        tk = _pick_tile(Kp, 512, 128)
        grid = (Mp // tm, Np // tn, Kp // tk)
        params = pltpu.CompilerParams(
            dimension_semantics=("parallel", "parallel", "arbitrary"),
            vmem_limit_bytes=_VMEM_LIMIT)
        x_spec = pl.BlockSpec((tm, tk), lambda i, j, k: (i, k))
        w_spec = pl.BlockSpec((tk, tn), lambda i, j, k: (k, j))
        b_spec = pl.BlockSpec((1, tn), lambda i, j, k: (0, j))
        o_spec = pl.BlockSpec((tm, tn), lambda i, j, k: (i, j))
        scratch = [pltpu.VMEM((tm, tn), jnp.float32)]
        if residual is None:
            out = pl.pallas_call(
                _dense_acc_kernel, out_shape=out_shape, grid=grid,
                in_specs=[x_spec, w_spec, b_spec], out_specs=o_spec,
                scratch_shapes=scratch, compiler_params=params)(x2, w, b)
        else:
            r_spec = pl.BlockSpec((tm, tn), lambda i, j, k: (i, j))
            out = pl.pallas_call(
                _dense_acc_res_kernel, out_shape=out_shape, grid=grid,
                in_specs=[x_spec, w_spec, b_spec, r_spec], out_specs=o_spec,
                scratch_shapes=scratch, compiler_params=params)(x2, w, b, r2)

    if Mp != M:
        out = out[:M]
    return out.reshape(*lead, Np)


# ----------------------------------------------------------------------------
# Fused concat([x1, x2], -1) @ W + b (two K-halves, one accumulator) — softmax.
# ----------------------------------------------------------------------------
def _dense2_k1_kernel(x1_ref, w1_ref, x2_ref, w2_ref, b_ref, o_ref):
    acc = jnp.dot(x1_ref[...], w1_ref[...], preferred_element_type=jnp.float32)
    acc += jnp.dot(x2_ref[...], w2_ref[...], preferred_element_type=jnp.float32)
    o_ref[...] = (acc + b_ref[...]).astype(o_ref.dtype)


def dense_concat2(x1, x2, w1, w2, b, out_dtype=jnp.float32):
    """Returns the padded (Mp, Np) result; the caller slices once at the end."""
    Kp, Np = w1.shape
    assert Kp <= _K_SINGLE_TILE
    a1 = x1.reshape(-1, Kp).astype(jnp.bfloat16)
    a2 = x2.reshape(-1, Kp).astype(jnp.bfloat16)
    M = a1.shape[0]
    Mp = _round_up(M, 8)
    tm = _pick_tile(Mp, 256, 8)
    tn = _pick_tile(Np, 512, 128)
    if Mp != M:
        a1 = jnp.zeros((Mp, Kp), jnp.bfloat16).at[:M].set(a1)
        a2 = jnp.zeros((Mp, Kp), jnp.bfloat16).at[:M].set(a2)
    grid = (Mp // tm, Np // tn)
    out = pl.pallas_call(
        _dense2_k1_kernel,
        out_shape=jax.ShapeDtypeStruct((Mp, Np), out_dtype),
        grid=grid,
        in_specs=[
            pl.BlockSpec((tm, Kp), lambda i, j: (i, 0)),
            pl.BlockSpec((Kp, tn), lambda i, j: (0, j)),
            pl.BlockSpec((tm, Kp), lambda i, j: (i, 0)),
            pl.BlockSpec((Kp, tn), lambda i, j: (0, j)),
            pl.BlockSpec((1, tn), lambda i, j: (0, j)),
        ],
        out_specs=pl.BlockSpec((tm, tn), lambda i, j: (i, j)),
        compiler_params=pltpu.CompilerParams(
            dimension_semantics=("parallel", "parallel"),
            vmem_limit_bytes=_VMEM_LIMIT),
    )(a1, w1, a2, w2, b)
    return out


# ----------------------------------------------------------------------------
# Fused char-LSTM epilogue + char_fc: contract the (C, B*S, hpad) recurrence
# outputs over chars directly (no slice / concat / transpose HBM passes).
# ----------------------------------------------------------------------------
def _char_fc_kernel(hf_ref, wf_ref, hb_ref, wb_ref, b_ref, o_ref, acc_ref):
    c = pl.program_id(2)

    @pl.when(c == 0)
    def _init():
        acc_ref[...] = jnp.broadcast_to(b_ref[...], acc_ref.shape)

    acc_ref[...] += jnp.dot(hf_ref[0], wf_ref[0],
                            preferred_element_type=jnp.float32)
    acc_ref[...] += jnp.dot(hb_ref[0], wb_ref[0],
                            preferred_element_type=jnp.float32)

    @pl.when(c == pl.num_programs(2) - 1)
    def _store():
        o_ref[...] = acc_ref[...].astype(o_ref.dtype)


def char_fc_fused(out_f, out_b, wf3, wb3, b, out_dtype=jnp.bfloat16):
    """out_f/out_b: (C, M, hpad) bf16 (only the first E/2 lanes carry data);
    wf3/wb3: (C, hpad, Np) bf16 with the matching char_fc weight rows (zero
    elsewhere).  Computes char_fc of the per-word char representation."""
    C, M, hpad = out_f.shape
    Np = wf3.shape[-1]
    tm = _pick_tile(M, 256, 8)
    tn = _pick_tile(Np, 512, 128)
    grid = (M // tm, Np // tn, C)
    return pl.pallas_call(
        _char_fc_kernel,
        out_shape=jax.ShapeDtypeStruct((M, Np), out_dtype),
        grid=grid,
        in_specs=[
            pl.BlockSpec((1, tm, hpad), lambda i, j, c: (c, i, 0)),
            pl.BlockSpec((1, hpad, tn), lambda i, j, c: (c, 0, j)),
            pl.BlockSpec((1, tm, hpad), lambda i, j, c: (c, i, 0)),
            pl.BlockSpec((1, hpad, tn), lambda i, j, c: (c, 0, j)),
            pl.BlockSpec((1, tn), lambda i, j, c: (0, j)),
        ],
        out_specs=pl.BlockSpec((tm, tn), lambda i, j, c: (i, j)),
        scratch_shapes=[pltpu.VMEM((tm, tn), jnp.float32)],
        compiler_params=pltpu.CompilerParams(
            dimension_semantics=("parallel", "parallel", "arbitrary"),
            vmem_limit_bytes=_VMEM_LIMIT),
    )(out_f, wf3, out_b, wb3, b)


# ----------------------------------------------------------------------------
# Paired LSTM recurrence: two independent recurrences (fwd + bwd) share one
# in-kernel time loop.  Grid = (batch tiles [parallel], time chunks
# [arbitrary]); h/c live in VMEM scratch and carry across time chunks.
# Gates are laid out (i, f, o, g) at hpad-aligned lane offsets.
# ----------------------------------------------------------------------------
def _sigmoid(x):
    # tanh-based sigmoid -> EUP tanh (single contiguous transcendental pass).
    return 0.5 * (jnp.tanh(0.5 * x) + 1.0)


def _bilstm_kernel(xp0_ref, xp1_ref, whh0_ref, whh1_ref,
                   out0_ref, out1_ref, h_ref, c_ref,
                   *, tt, hpad, reverse):
    t_chunk = pl.program_id(1)

    @pl.when(t_chunk == 0)
    def _init():
        h_ref[...] = jnp.zeros_like(h_ref)
        c_ref[...] = jnp.zeros_like(c_ref)

    xps = (xp0_ref, xp1_ref)
    whhs = (whh0_ref, whh1_ref)
    outs = (out0_ref, out1_ref)

    def step(i, carry):
        for d in range(2):
            li = (tt - 1 - i) if reverse[d] else i
            x_t = xps[d][li].astype(jnp.float32)                 # (tb, 4*hpad)
            gates = x_t + jnp.dot(h_ref[d].astype(jnp.bfloat16), whhs[d][...],
                                  preferred_element_type=jnp.float32)
            sig = _sigmoid(gates[:, :3 * hpad])
            i_g = sig[:, 0 * hpad:1 * hpad]
            f_g = sig[:, 1 * hpad:2 * hpad]
            o_g = sig[:, 2 * hpad:3 * hpad]
            g_g = jnp.tanh(gates[:, 3 * hpad:])
            c_new = f_g * c_ref[d] + i_g * g_g
            h_new = o_g * jnp.tanh(c_new)
            c_ref[d] = c_new
            h_ref[d] = h_new
            outs[d][pl.ds(li, 1), :, :] = h_new[None].astype(jnp.bfloat16)
        return carry

    lax.fori_loop(0, tt, step, 0, unroll=(True if tt <= 8 else 2))


def _recurrence_block_bytes(tb, tt, G, hpad):
    io = 2 * (tt * tb * G * 2 + tt * tb * hpad * 2)       # xp + out, bf16, per dir
    return 2 * io + 2 * hpad * G * 2 + 2 * 2 * tb * hpad * 4


def bilstm_pair(xp0, xp1, whh0, whh1, reverse):
    """xp*: (T, Bp, 4*hpad) bf16 precomputed x @ W_ih^T + (b_ih + b_hh);
    whh*: (hpad, 4*hpad) bf16.  Returns two (T, Bp, hpad) bf16 hidden
    sequences (padded lanes stay exactly zero through the recurrence)."""
    T, Bp, G = xp0.shape
    hpad = whh0.shape[0]

    budget = max(4 * 1024 * 1024, _VMEM_LIMIT // 4)
    tb, tt, best_area = min(Bp, 8), 1, 0
    for cand_tb in _divisors(Bp, 8):
        if cand_tb > 512:
            continue
        for cand_tt in _divisors(T, 1):
            if (_recurrence_block_bytes(cand_tb, cand_tt, G, hpad) <= budget
                    and cand_tb * cand_tt > best_area):
                tb, tt, best_area = cand_tb, cand_tt, cand_tb * cand_tt
    nb, nt = Bp // tb, T // tt

    def tmap(rev):
        if rev:
            return lambda b, t: (nt - 1 - t, b, 0)
        return lambda b, t: (t, b, 0)

    kernel = functools.partial(_bilstm_kernel, tt=tt, hpad=hpad, reverse=reverse)
    # TODO(synk): put the two directions on their own parallel grid axis
    # (requires stacking the xp slabs); currently megacore parallelism comes
    # from the batch-tile axis only.
    out0, out1 = pl.pallas_call(
        kernel,
        out_shape=(jax.ShapeDtypeStruct((T, Bp, hpad), jnp.bfloat16),
                   jax.ShapeDtypeStruct((T, Bp, hpad), jnp.bfloat16)),
        grid=(nb, nt),
        in_specs=[
            pl.BlockSpec((tt, tb, G), tmap(reverse[0])),
            pl.BlockSpec((tt, tb, G), tmap(reverse[1])),
            pl.BlockSpec((hpad, G), lambda b, t: (0, 0)),
            pl.BlockSpec((hpad, G), lambda b, t: (0, 0)),
        ],
        out_specs=(
            pl.BlockSpec((tt, tb, hpad), tmap(reverse[0])),
            pl.BlockSpec((tt, tb, hpad), tmap(reverse[1])),
        ),
        scratch_shapes=[
            pltpu.VMEM((2, tb, hpad), jnp.float32),   # h per direction
            pltpu.VMEM((2, tb, hpad), jnp.float32),   # c per direction
        ],
        compiler_params=pltpu.CompilerParams(
            dimension_semantics=("parallel", "arbitrary"),
            vmem_limit_bytes=_VMEM_LIMIT),
    )(xp0, xp1, whh0, whh1)
    return out0, out1


def lm_pair(x_f, x_b, stack_f, stack_b):
    """Run the fwd and bwd LM stacks layer-by-layer; both directions share one
    recurrence kernel per layer (the bwd LM stream is already time-flipped)."""
    h_f, h_b = x_f, x_b
    for pf, pb in zip(stack_f, stack_b):
        xpf = dense(h_f, pf["ih_w"], pf["ih_b"])
        xpb = dense(h_b, pb["ih_w"], pb["ih_b"])
        h_f, h_b = bilstm_pair(xpf, xpb, pf["whh"], pb["whh"],
                               reverse=(False, False))
    return h_f, h_b


def char_bilstm(x_tm, p_f, p_b):
    """Bidirectional single-layer char LSTM; x_tm: (C, B*S, Ep) time-major."""
    xpf = dense(x_tm, p_f["ih_w"], p_f["ih_b"])
    xpb = dense(x_tm, p_b["ih_w"], p_b["ih_b"])
    return bilstm_pair(xpf, xpb, p_f["whh"], p_b["whh"], reverse=(False, True))


# ----------------------------------------------------------------------------
# Parameter initialization (PyTorch-shaped, deterministic) and one-time prep
# into kernel-ready layouts (arrays ONLY -> safe as a jit argument pytree).
# ----------------------------------------------------------------------------
def init_params(key, opts, vocab_sizes):
    word_vocab_size, char_size = vocab_sizes
    E = opts.char_embedding_dim
    P = opts.projection_dim
    H = opts.hidden_dim

    keys = iter(jax.random.split(key, 128))

    def unif(shape, scale):
        return jax.random.uniform(next(keys), shape, jnp.float32,
                                  minval=-scale, maxval=scale)

    def lstm_params(input_size, hidden):
        k = 1.0 / math.sqrt(hidden)
        return (unif((4 * hidden, input_size), k),   # w_ih
                unif((4 * hidden, hidden), k),       # w_hh
                unif((4 * hidden,), k),              # b_ih
                unif((4 * hidden,), k))              # b_hh

    def stacked(input_size, hidden, num_layers):
        return [lstm_params(input_size if l == 0 else hidden, hidden)
                for l in range(num_layers)]

    def linear_params(in_f, out_f):
        k = 1.0 / math.sqrt(in_f)
        return unif((out_f, in_f), k), unif((out_f,), k)

    xav = math.sqrt(6.0 / (char_size + E))
    char_emb = unif((char_size, E), xav).at[0].set(0.0)   # padding_idx = 0

    params = {
        "char_emb": char_emb,
        "char_lstm_f": lstm_params(E, E // 2),
        "char_lstm_b": lstm_params(E, E // 2),
        "fwd_lstm1": stacked(P, H, opts.num_layers),
        "fwd_lstm2": stacked(P, H, opts.num_layers),
        "bwd_lstm1": stacked(P, H, opts.num_layers),
        "bwd_lstm2": stacked(P, H, opts.num_layers),
    }
    params["fwd_proj1_w"], params["fwd_proj1_b"] = linear_params(H, P)
    params["bwd_proj1_w"], params["bwd_proj1_b"] = linear_params(H, P)
    params["fwd_proj2_w"], params["fwd_proj2_b"] = linear_params(H, P)
    params["bwd_proj2_w"], params["bwd_proj2_b"] = linear_params(H, P)
    params["char_fc_w"], params["char_fc_b"] = linear_params(opts.char_fc_dim, P)
    params["softmax_w"], params["softmax_b"] = linear_params(2 * P, word_vocab_size)
    return params


def prep_linear(weight, bias):
    """(N, K) PyTorch layout -> transposed, bf16, 128-padded (Kp, Np)."""
    N, K = weight.shape
    Kp, Np = _round_up(K, 128), _round_up(N, 128)
    w = jnp.zeros((Kp, Np), jnp.bfloat16).at[:K, :N].set(weight.T.astype(jnp.bfloat16))
    b = jnp.zeros((1, Np), jnp.float32).at[0, :N].set(bias.astype(jnp.float32))
    return w, b


def prep_linear_split2(weight, bias):
    """Softmax weight (V, 2P): split K into the two concat halves."""
    V, K2 = weight.shape
    P = K2 // 2
    Pp, Vp = _round_up(P, 128), _round_up(V, 128)
    w1 = jnp.zeros((Pp, Vp), jnp.bfloat16).at[:P, :V].set(weight[:, :P].T.astype(jnp.bfloat16))
    w2 = jnp.zeros((Pp, Vp), jnp.bfloat16).at[:P, :V].set(weight[:, P:].T.astype(jnp.bfloat16))
    b = jnp.zeros((1, Vp), jnp.float32).at[0, :V].set(bias.astype(jnp.float32))
    return w1, w2, b


def prep_lstm(w_ih, w_hh, b_ih, b_hh):
    """Gates re-packed (i, f, o, g) at hpad-aligned lane offsets; b_ih+b_hh folded."""
    H = w_hh.shape[1]
    I = w_ih.shape[1]
    hpad = _round_up(H, 128)
    ipad = _round_up(I, 128)
    G = 4 * hpad
    w_ih_t = jnp.zeros((ipad, G), jnp.bfloat16)
    w_hh_t = jnp.zeros((hpad, G), jnp.bfloat16)
    bias = jnp.zeros((1, G), jnp.float32)
    # PyTorch packs gates (i, f, g, o); re-order so sigmoid covers one slab.
    for slot, g in enumerate((0, 1, 3, 2)):
        w_ih_t = w_ih_t.at[:I, slot * hpad:slot * hpad + H].set(
            w_ih[g * H:(g + 1) * H, :].T.astype(jnp.bfloat16))
        w_hh_t = w_hh_t.at[:H, slot * hpad:slot * hpad + H].set(
            w_hh[g * H:(g + 1) * H, :].T.astype(jnp.bfloat16))
        bias = bias.at[0, slot * hpad:slot * hpad + H].set(
            (b_ih[g * H:(g + 1) * H] + b_hh[g * H:(g + 1) * H]).astype(jnp.float32))
    return {"ih_w": w_ih_t, "ih_b": bias, "whh": w_hh_t}


def prep_char_fc(weight, bias, C, E, hpad):
    """char_fc weight (P, C*E) -> per-char (C, hpad, Pp) blocks for the fused
    epilogue kernel (rows beyond E/2 are zero, matching the padded hidden)."""
    P = weight.shape[0]
    half_e = E // 2
    Pp = _round_up(P, 128)
    wt = weight.T.astype(jnp.bfloat16)                 # (C*E, P)
    wf3 = jnp.zeros((C, hpad, Pp), jnp.bfloat16)
    wb3 = jnp.zeros((C, hpad, Pp), jnp.bfloat16)
    for c in range(C):
        wf3 = wf3.at[c, :half_e, :P].set(wt[c * E:c * E + half_e, :])
        wb3 = wb3.at[c, :half_e, :P].set(wt[c * E + half_e:(c + 1) * E, :])
    b = jnp.zeros((1, Pp), jnp.float32).at[0, :P].set(bias.astype(jnp.float32))
    return wf3, wb3, b


def prep_params(raw, opts):
    E = opts.char_embedding_dim
    Ep = _round_up(E, 128)
    char_size = raw["char_emb"].shape[0]
    # Lane-padded bf16 embedding table: the gather output needs no re-pad/cast.
    char_emb = jnp.zeros((char_size, Ep), jnp.bfloat16).at[:, :E].set(
        raw["char_emb"].astype(jnp.bfloat16))

    prepped = {"char_emb": char_emb}
    prepped["char_lstm_f"] = prep_lstm(*raw["char_lstm_f"])
    prepped["char_lstm_b"] = prep_lstm(*raw["char_lstm_b"])
    for name in ("fwd_lstm1", "fwd_lstm2", "bwd_lstm1", "bwd_lstm2"):
        prepped[name] = [prep_lstm(*layer) for layer in raw[name]]
    for name in ("fwd_proj1", "bwd_proj1", "fwd_proj2", "bwd_proj2"):
        w, b = prep_linear(raw[name + "_w"], raw[name + "_b"])
        prepped[name] = {"w": w, "b": b}

    hpad_char = prepped["char_lstm_f"]["whh"].shape[0]
    C = opts.char_fc_dim // E
    wf3, wb3, cb = prep_char_fc(raw["char_fc_w"], raw["char_fc_b"],
                                C=C, E=E, hpad=hpad_char)
    prepped["char_fc"] = {"wf3": wf3, "wb3": wb3, "b": cb}
    w1, w2, sb = prep_linear_split2(raw["softmax_w"], raw["softmax_b"])
    prepped["softmax"] = {"w1": w1, "w2": w2, "b": sb}
    return prepped


# ----------------------------------------------------------------------------
# ELMo forward
# ----------------------------------------------------------------------------
def elmo_forward(prepped, word_ids, char_ids, opts, word_vocab_size):
    del word_ids, opts  # the reference forward never uses word_ids
    B, S, C = char_ids.shape

    # Pad batch to a sublane multiple (all-padding-char rows; dropped at the end).
    Bp = _round_up(B, 8)
    char_ids_p = jnp.zeros((Bp, S, C), char_ids.dtype).at[:B].set(char_ids)

    # Char embedding gather from the padded bf16 table (dropout = identity).
    emb = prepped["char_emb"][char_ids_p]                            # (Bp, S, C, Ep)
    Ep = emb.shape[-1]
    emb_tm = jnp.transpose(emb.reshape(Bp * S, C, Ep), (1, 0, 2))    # (C, Bp*S, Ep)

    # Char-level bidirectional LSTM (backward direction reversed in-kernel).
    hf, hb = char_bilstm(emb_tm, prepped["char_lstm_f"], prepped["char_lstm_b"])
    # Fused slice/concat/transpose + char_fc (no char_repr HBM round trip).
    # TODO(synk): pack the useful E/2 lanes inside the recurrence store instead
    # of carrying hpad-wide hidden outputs when E/2 << 128.
    cf = prepped["char_fc"]
    char_repr = char_fc_fused(hf, hb, cf["wf3"], cf["wb3"], cf["b"])  # (Bp*S, Pp)
    Pp = char_repr.shape[-1]
    char_repr_tm = jnp.transpose(char_repr.reshape(Bp, S, Pp), (1, 0, 2))  # (S, Bp, Pp)

    # Language-model stacks, time-major (T = S-1, Bp, Pp), bf16 activations.
    fwd_in = char_repr_tm[:-1]
    bwd_in = jnp.flip(char_repr_tm, axis=0)[:-1]

    fo1_f, fo1_b = lm_pair(fwd_in, bwd_in,
                           prepped["fwd_lstm1"], prepped["bwd_lstm1"])
    p_fo1 = dense(fo1_f, prepped["fwd_proj1"]["w"], prepped["fwd_proj1"]["b"],
                  residual=fwd_in)
    p_bo1 = dense(fo1_b, prepped["bwd_proj1"]["w"], prepped["bwd_proj1"]["b"],
                  residual=bwd_in)

    fo2_f, fo2_b = lm_pair(p_fo1, p_bo1,
                           prepped["fwd_lstm2"], prepped["bwd_lstm2"])
    p_fo2 = dense(fo2_f, prepped["fwd_proj2"]["w"], prepped["fwd_proj2"]["b"],
                  residual=p_fo1)
    p_bo2 = dense(fo2_b, prepped["bwd_proj2"]["w"], prepped["bwd_proj2"]["b"],
                  residual=p_bo1)

    # Transpose the narrow P-wide streams to batch-major BEFORE the vocab-wide
    # fused concat-softmax (never transposes the logits); drop padded rows.
    # Note: like the PyTorch reference, the backward stream stays in flipped
    # time order through the concat.
    T = S - 1
    f_bm = jnp.transpose(p_fo2, (1, 0, 2))[:B].reshape(B * T, Pp)
    b_bm = jnp.transpose(p_bo2, (1, 0, 2))[:B].reshape(B * T, Pp)
    sm = prepped["softmax"]
    logits = dense_concat2(f_bm, b_bm, sm["w1"], sm["w2"], sm["b"],
                           out_dtype=jnp.float32)                    # (Mp, Vp)
    return logits[:B * T, :word_vocab_size]


# ----------------------------------------------------------------------------
# Demo
# ----------------------------------------------------------------------------
if __name__ == "__main__":
    B, S, C = 2, 8, 4  # batch, words per sentence, chars per word
    opts = types.SimpleNamespace(
        char_embedding_dim=16,
        projection_dim=16,
        hidden_dim=32,
        num_layers=1,
        dropout=0.1,          # identity at inference
        char_fc_dim=C * 16,   # = chars_per_word * char_embedding_dim
    )
    word_vocab_size, char_size = 64, 32
    vocab_sizes = (word_vocab_size, char_size)

    key = jax.random.PRNGKey(0)
    pkey, wkey, ckey = jax.random.split(key, 3)
    raw_params = init_params(pkey, opts, vocab_sizes)
    prepped = prep_params(raw_params, opts)

    word_ids = jax.random.randint(wkey, (B, S), 0, word_vocab_size, dtype=jnp.int32)
    char_ids = jax.random.randint(ckey, (B, S, C), 0, char_size, dtype=jnp.int32)

    forward = jax.jit(functools.partial(
        elmo_forward, opts=opts, word_vocab_size=word_vocab_size))
    out = jax.block_until_ready(forward(prepped, word_ids, char_ids))

    assert out.shape == (B * (S - 1), word_vocab_size), out.shape
    assert out.dtype == jnp.float32
    assert bool(jnp.all(jnp.isfinite(out)))
    print("KERNEL_OK")
</pallas_src>

<mosaic_0001>
module attributes {stable_mosaic.version = 11 : i64} {
  func.func @_dense_k1_kernel(%arg0: i32, %arg1: i32, %arg2: memref<256x128xbf16, #tpu.memory_space<vmem>>, %arg3: memref<128x512xbf16, #tpu.memory_space<vmem>>, %arg4: memref<1x512xf32, #tpu.memory_space<vmem>>, %arg5: memref<256x512xbf16, #tpu.memory_space<vmem>>) attributes {dimension_semantics = [#tpu.dimension_semantics<parallel>, #tpu.dimension_semantics<parallel>], iteration_bounds = array<i64: 1, 1>, scalar_prefetch = 0 : i64, scratch_operands = 0 : i64, tpu.core_type = #tpu.core_type<tc>, window_params = [{transform_indices = @transform_0, window_bounds = array<i64: 256, 128>}, {transform_indices = @transform_1, window_bounds = array<i64: 128, 512>}, {transform_indices = @transform_2, window_bounds = array<i64: 1, 512>}, {transform_indices = @transform_3, window_bounds = array<i64: 256, 512>}]} {
    %c0 = arith.constant 0 : index
    %c0_0 = arith.constant 0 : index
    %0 = vector.load %arg2[%c0, %c0_0] : memref<256x128xbf16, #tpu.memory_space<vmem>>, vector<256x128xbf16>
    %c0_1 = arith.constant 0 : index
    %c0_2 = arith.constant 0 : index
    %1 = vector.load %arg3[%c0_1, %c0_2] : memref<128x512xbf16, #tpu.memory_space<vmem>>, vector<128x512xbf16>
    %cst = arith.constant dense<0.000000e+00> : vector<256x512xf32>
    %2 = tpu.matmul %0, %1, %cst {dimension_numbers = #tpu.dot_dimension_numbers<[1], [0], [0], [1], [0, 0, 1, 1], [], []>} : vector<256x128xbf16>, vector<128x512xbf16>, vector<256x512xf32> -> vector<256x512xf32>
    %c0_3 = arith.constant 0 : index
    %c0_4 = arith.constant 0 : index
    %3 = vector.load %arg4[%c0_3, %c0_4] : memref<1x512xf32, #tpu.memory_space<vmem>>, vector<1x512xf32>
    %4 = vector.broadcast %3 : vector<1x512xf32> to vector<256x512xf32>
    %5 = arith.addf %2, %4 : vector<256x512xf32>
    %6 = arith.truncf %5 : vector<256x512xf32> to vector<256x512xbf16>
    %c0_5 = arith.constant 0 : index
    %c0_6 = arith.constant 0 : index
    %7 = vector.load %arg5[%c0_5, %c0_6] : memref<256x512xbf16, #tpu.memory_space<vmem>>, vector<256x512xbf16>
    tpu.vector_store %arg5[%c0_5, %c0_6], %6 {strides = array<i32>} : memref<256x512xbf16, #tpu.memory_space<vmem>>, vector<256x512xbf16>,
    return
  }
  func.func @transform_0(%arg0: i32, %arg1: i32) -> (i32, i32) {
    %c0_i32 = arith.constant 0 : i32
    %c0_i32_0 = arith.constant 0 : i32
    return %arg0, %c0_i32 : i32, i32
  }
  func.func @transform_1(%arg0: i32, %arg1: i32) -> (i32, i32) {
    %c0_i32 = arith.constant 0 : i32
    %c0_i32_0 = arith.constant 0 : i32
    return %c0_i32, %arg1 : i32, i32
  }
  func.func @transform_2(%arg0: i32, %arg1: i32) -> (i32, i32) {
    %c0_i32 = arith.constant 0 : i32
    %c0_i32_0 = arith.constant 0 : i32
    return %c0_i32, %arg1 : i32, i32
  }
  func.func @transform_3(%arg0: i32, %arg1: i32) -> (i32, i32) {
    %c0_i32 = arith.constant 0 : i32
    return %arg0, %arg1 : i32, i32
  }
}

module attributes {stable_mosaic.version = 11 : i64} {
  func.func @_bilstm_kernel(%arg0: i32, %arg1: i32, %arg2: memref<4x64x512xbf16, #tpu.memory_space<vmem>>, %arg3: memref<4x64x512xbf16, #tpu.memory_space<vmem>>, %arg4: memref<128x512xbf16, #tpu.memory_space<vmem>>, %arg5: memref<128x512xbf16, #tpu.memory_space<vmem>>, %arg6: memref<4x64x128xbf16, #tpu.memory_space<vmem>>, %arg7: memref<4x64x128xbf16, #tpu.memory_space<vmem>>, %arg8: memref<2x64x128xf32, #tpu.memory_space<vmem>>, %arg9: memref<2x64x128xf32, #tpu.memory_space<vmem>>) attributes {dimension_semantics = [#tpu.dimension_semantics<parallel>, #tpu.dimension_semantics<arbitrary>], iteration_bounds = array<i64: 1, 1>, scalar_prefetch = 0 : i64, scratch_operands = 2 : i64, tpu.core_type = #tpu.core_type<tc>, window_params = [{transform_indices = @transform_0, window_bounds = array<i64: 4, 64, 512>}, {transform_indices = @transform_1, window_bounds = array<i64: 4, 64, 512>}, {pipeline_mode = #tpu.pipeline_mode<synchronous>, transform_indices = @transform_2, window_bounds = array<i64: 128, 512>}, {pipeline_mode = #tpu.pipeline_mode<synchronous>, transform_indices = @transform_3, window_bounds = array<i64: 128, 512>}, {transform_indices = @transform_4, window_bounds = array<i64: 4, 64, 128>}, {transform_indices = @transform_5, window_bounds = array<i64: 4, 64, 128>}]} {
    %c0_i32 = arith.constant 0 : i32
    %0 = arith.cmpi eq, %arg1, %c0_i32 : i32
    %1 = arith.extui %0 : i1 to i32
    %c0_i32_0 = arith.constant 0 : i32
    %2 = arith.cmpi ne, %1, %c0_i32_0 : i32
    scf.if %2 {
      %cst_179 = arith.constant 0.000000e+00 : f32
      %327 = vector.broadcast %cst_179 : f32 to vector<2x64x128xf32>
      %c0_180 = arith.constant 0 : index
      %c0_181 = arith.constant 0 : index
      %c0_182 = arith.constant 0 : index
      %328 = vector.load %arg8[%c0_180, %c0_181, %c0_182] : memref<2x64x128xf32, #tpu.memory_space<vmem>>, vector<2x64x128xf32>
      tpu.vector_store %arg8[%c0_180, %c0_181, %c0_182], %327 {strides = array<i32>} : memref<2x64x128xf32, #tpu.memory_space<vmem>>, vector<2x64x128xf32>,
      %cst_183 = arith.constant 0.000000e+00 : f32
      %329 = vector.broadcast %cst_183 : f32 to vector<2x64x128xf32>
      %c0_184 = arith.constant 0 : index
      %c0_185 = arith.constant 0 : index
      %c0_186 = arith.constant 0 : index
      %330 = vector.load %arg9[%c0_184, %c0_185, %c0_186] : memref<2x64x128xf32, #tpu.memory_space<vmem>>, vector<2x64x128xf32>
      tpu.vector_store %arg9[%c0_184, %c0_185, %c0_186], %329 {strides = array<i32>} : memref<2x64x128xf32, #tpu.memory_space<vmem>>, vector<2x64x128xf32>,
    } else {
    }
    %c0_i32_1 = arith.constant 0 : i32
    %3 = arith.index_cast %c0_i32_1 : i32 to index
    %c0 = arith.constant 0 : index
    %c0_2 = arith.constant 0 : index
    %4 = vector.load %arg2[%3, %c0, %c0_2] : memref<4x64x512xbf16, #tpu.memory_space<vmem>>, vector<1x64x512xbf16>
    %5 = vector.shape_cast %4 : vector<1x64x512xbf16> to vector<64x512xbf16>
    %6 = arith.extf %5 : vector<64x512xbf16> to vector<64x512xf32>
    %c0_3 = arith.constant 0 : index
    %c0_4 = arith.constant 0 : index
    %c0_5 = arith.constant 0 : index
    %7 = vector.load %arg8[%c0_3, %c0_4, %c0_5] : memref<2x64x128xf32, #tpu.memory_space<vmem>>, vector<1x64x128xf32>
    %8 = vector.shape_cast %7 : vector<1x64x128xf32> to vector<64x128xf32>
    %9 = arith.truncf %8 : vector<64x128xf32> to vector<64x128xbf16>
    %c0_6 = arith.constant 0 : index
    %c0_7 = arith.constant 0 : index
    %10 = vector.load %arg4[%c0_6, %c0_7] : memref<128x512xbf16, #tpu.memory_space<vmem>>, vector<128x512xbf16>
    %cst = arith.constant dense<0.000000e+00> : vector<64x512xf32>
    %11 = tpu.matmul %9, %10, %cst {dimension_numbers = #tpu.dot_dimension_numbers<[1], [0], [0], [1], [0, 0, 1, 1], [], []>} : vector<64x128xbf16>, vector<128x512xbf16>, vector<64x512xf32> -> vector<64x512xf32>
    %12 = arith.addf %6, %11 : vector<64x512xf32>
    %13 = vector.extract_strided_slice %12 {offsets = [0, 0], sizes = [64, 384], strides = [1, 1]} : vector<64x512xf32> to vector<64x384xf32>
    %cst_8 = arith.constant 5.000000e-01 : f32
    %14 = vector.broadcast %cst_8 : f32 to vector<64x384xf32>
    %15 = arith.mulf %14, %13 : vector<64x384xf32>
    %16 = math.tanh %15 : vector<64x384xf32>
    %cst_9 = arith.constant 1.000000e+00 : f32
    %17 = vector.broadcast %cst_9 : f32 to vector<64x384xf32>
    %18 = arith.addf %16, %17 : vector<64x384xf32>
    %cst_10 = arith.constant 5.000000e-01 : f32
    %19 = vector.broadcast %cst_10 : f32 to vector<64x384xf32>
    %20 = arith.mulf %19, %18 : vector<64x384xf32>
    %21 = vector.extract_strided_slice %20 {offsets = [0, 0], sizes = [64, 128], strides = [1, 1]} : vector<64x384xf32> to vector<64x128xf32>
    %22 = vector.extract_strided_slice %20 {offsets = [0, 128], sizes = [64, 128], strides = [1, 1]} : vector<64x384xf32> to vector<64x128xf32>
    %23 = vector.extract_strided_slice %20 {offsets = [0, 256], sizes = [64, 128], strides = [1, 1]} : vector<64x384xf32> to vector<64x128xf32>
    %24 = vector.extract_strided_slice %12 {offsets = [0, 384], sizes = [64, 128], strides = [1, 1]} : vector<64x512xf32> to vector<64x128xf32>
    %25 = math.tanh %24 : vector<64x128xf32>
    %c0_11 = arith.constant 0 : index
    %c0_12 = arith.constant 0 : index
    %c0_13 = arith.constant 0 : index
    %26 = vector.load %arg9[%c0_11, %c0_12, %c0_13] : memref<2x64x128xf32, #tpu.memory_space<vmem>>, vector<1x64x128xf32>
    %27 = vector.shape_cast %26 : vector<1x64x128xf32> to vector<64x128xf32>
    %28 = arith.mulf %22, %27 : vector<64x128xf32>
    %29 = arith.mulf %21, %25 : vector<64x128xf32>
    %30 = arith.addf %28, %29 : vector<64x128xf32>
    %31 = math.tanh %30 : vector<64x128xf32>
    %32 = arith.mulf %23, %31 : vector<64x128xf32>
    %c0_14 = arith.constant 0 : index
    %c0_15 = arith.constant 0 : index
    %c0_16 = arith.constant 0 : index
    %33 = vector.load %arg9[%c0_14, %c0_15, %c0_16] : memref<2x64x128xf32, #tpu.memory_space<vmem>>, vector<1x64x128xf32>
    %34 = vector.shape_cast %33 : vector<1x64x128xf32> to vector<64x128xf32>
    %35 = vector.shape_cast %30 : vector<64x128xf32> to vector<1x64x128xf32>
    tpu.vector_store %arg9[%c0_14, %c0_15, %c0_16], %35 {strides = array<i32>} : memref<2x64x128xf32, #tpu.memory_space<vmem>>, vector<1x64x128xf32>,
    %c0_17 = arith.constant 0 : index
    %c0_18 = arith.constant 0 : index
    %c0_19 = arith.constant 0 : index
    %36 = vector.load %arg8[%c0_17, %c0_18, %c0_19] : memref<2x64x128xf32, #tpu.memory_space<vmem>>, vector<1x64x128xf32>
    %37 = vector.shape_cast %36 : vector<1x64x128xf32> to vector<64x128xf32>
    %38 = vector.shape_cast %32 : vector<64x128xf32> to vector<1x64x128xf32>
    tpu.vector_store %arg8[%c0_17, %c0_18, %c0_19], %38 {strides = array<i32>} : memref<2x64x128xf32, #tpu.memory_space<vmem>>, vector<1x64x128xf32>,
    %39 = vector.shape_cast %32 : vector<64x128xf32> to vector<1x64x128xf32>
    %40 = arith.truncf %39 : vector<1x64x128xf32> to vector<1x64x128xbf16>
    %41 = arith.index_cast %c0_i32_1 : i32 to index
    %c0_20 = arith.constant 0 : index
    %c0_21 = arith.constant 0 : index
    %42 = vector.load %arg6[%41, %c0_20, %c0_21] : memref<4x64x128xbf16, #tpu.memory_space<vmem>>, vector<1x64x128xbf16>
    tpu.vector_store %arg6[%41, %c0_20, %c0_21], %40 {strides = array<i32>} : memref<4x64x128xbf16, #tpu.memory_space<vmem>>, vector<1x64x128xbf16>,
    %c3_i32 = arith.constant 3 : i32
    %43 = arith.subi %c3_i32, %c0_i32_1 : i32
    %44 = arith.index_cast %43 : i32 to index
    %c0_22 = arith.constant 0 : index
    %c0_23 = arith.constant 0 : index
    %45 = vector.load %arg3[%44, %c0_22, %c0_23] : memref<4x64x512xbf16, #tpu.memory_space<vmem>>, vector<1x64x512xbf16>
    %46 = vector.shape_cast %45 : vector<1x64x512xbf16> to vector<64x512xbf16>
    %47 = arith.extf %46 : vector<64x512xbf16> to vector<64x512xf32>
    %c1 = arith.constant 1 : index
    %c0_24 = arith.constant 0 : index
    %c0_25 = arith.constant 0 : index
    %48 = vector.load %arg8[%c1, %c0_24, %c0_25] : memref<2x64x128xf32, #tpu.memory_space<vmem>>, vector<1x64x128xf32>
    %49 = vector.shape_cast %48 : vector<1x64x128xf32> to vector<64x128xf32>
    %50 = arith.truncf %49 : vector<64x128xf32> to vector<64x128xbf16>
    %c0_26 = arith.constant 0 : index
    %c0_27 = arith.constant 0 : index
    %51 = vector.load %arg5[%c0_26, %c0_27] : memref<128x512xbf16, #tpu.memory_space<vmem>>, vector<128x512xbf16>
    %cst_28 = arith.constant dense<0.000000e+00> : vector<64x512xf32>
    %52 = tpu.matmul %50, %51, %cst_28 {dimension_numbers = #tpu.dot_dimension_numbers<[1], [0], [0], [1], [0, 0, 1, 1], [], []>} : vector<64x128xbf16>, vector<128x512xbf16>, vector<64x512xf32> -> vector<64x512xf32>
    %53 = arith.addf %47, %52 : vector<64x512xf32>
    %54 = vector.extract_strided_slice %53 {offsets = [0, 0], sizes = [64, 384], strides = [1, 1]} : vector<64x512xf32> to vector<64x384xf32>
    %cst_29 = arith.constant 5.000000e-01 : f32
    %55 = vector.broadcast %cst_29 : f32 to vector<64x384xf32>
    %56 = arith.mulf %55, %54 : vector<64x384xf32>
    %57 = math.tanh %56 : vector<64x384xf32>
    %cst_30 = arith.constant 1.000000e+00 : f32
    %58 = vector.broadcast %cst_30 : f32 to vector<64x384xf32>
    %59 = arith.addf %57, %58 : vector<64x384xf32>
    %cst_31 = arith.constant 5.000000e-01 : f32
    %60 = vector.broadcast %cst_31 : f32 to vector<64x384xf32>
    %61 = arith.mulf %60, %59 : vector<64x384xf32>
    %62 = vector.extract_strided_slice %61 {offsets = [0, 0], sizes = [64, 128], strides = [1, 1]} : vector<64x384xf32> to vector<64x128xf32>
    %63 = vector.extract_strided_slice %61 {offsets = [0, 128], sizes = [64, 128], strides = [1, 1]} : vector<64x384xf32> to vector<64x128xf32>
    %64 = vector.extract_strided_slice %61 {offsets = [0, 256], sizes = [64, 128], strides = [1, 1]} : vector<64x384xf32> to vector<64x128xf32>
    %65 = vector.extract_strided_slice %53 {offsets = [0, 384], sizes = [64, 128], strides = [1, 1]} : vector<64x512xf32> to vector<64x128xf32>
    %66 = math.tanh %65 : vector<64x128xf32>
    %c1_32 = arith.constant 1 : index
    %c0_33 = arith.constant 0 : index
    %c0_34 = arith.constant 0 : index
    %67 = vector.load %arg9[%c1_32, %c0_33, %c0_34] : memref<2x64x128xf32, #tpu.memory_space<vmem>>, vector<1x64x128xf32>
    %68 = vector.shape_cast %67 : vector<1x64x128xf32> to vector<64x128xf32>
    %69 = arith.mulf %63, %68 : vector<64x128xf32>
    %70 = arith.mulf %62, %66 : vector<64x128xf32>
    %71 = arith.addf %69, %70 : vector<64x128xf32>
    %72 = math.tanh %71 : vector<64x128xf32>
    %73 = arith.mulf %64, %72 : vector<64x128xf32>
    %c1_35 = arith.constant 1 : index
    %c0_36 = arith.constant 0 : index
    %c0_37 = arith.constant 0 : index
    %74 = vector.load %arg9[%c1_35, %c0_36, %c0_37] : memref<2x64x128xf32, #tpu.memory_space<vmem>>, vector<1x64x128xf32>
    %75 = vector.shape_cast %74 : vector<1x64x128xf32> to vector<64x128xf32>
    %76 = vector.shape_cast %71 : vector<64x128xf32> to vector<1x64x128xf32>
    tpu.vector_store %arg9[%c1_35, %c0_36, %c0_37], %76 {strides = array<i32>} : memref<2x64x128xf32, #tpu.memory_space<vmem>>, vector<1x64x128xf32>,
    %c1_38 = arith.constant 1 : index
    %c0_39 = arith.constant 0 : index
    %c0_40 = arith.constant 0 : index
    %77 = vector.load %arg8[%c1_38, %c0_39, %c0_40] : memref<2x64x128xf32, #tpu.memory_space<vmem>>, vector<1x64x128xf32>
    %78 = vector.shape_cast %77 : vector<1x64x128xf32> to vector<64x128xf32>
    %79 = vector.shape_cast %73 : vector<64x128xf32> to vector<1x64x128xf32>
    tpu.vector_store %arg8[%c1_38, %c0_39, %c0_40], %79 {strides = array<i32>} : memref<2x64x128xf32, #tpu.memory_space<vmem>>, vector<1x64x128xf32>,
    %80 = vector.shape_cast %73 : vector<64x128xf32> to vector<1x64x128xf32>
    %81 = arith.truncf %80 : vector<1x64x128xf32> to vector<1x64x128xbf16>
    %82 = arith.index_cast %43 : i32 to index
    %c0_41 = arith.constant 0 : index
    %c0_42 = arith.constant 0 : index
    %83 = vector.load %arg7[%82, %c0_41, %c0_42] : memref<4x64x128xbf16, #tpu.memory_space<vmem>>, vector<1x64x128xbf16>
    tpu.vector_store %arg7[%82, %c0_41, %c0_42], %81 {strides = array<i32>} : memref<4x64x128xbf16, #tpu.memory_space<vmem>>, vector<1x64x128xbf16>,
    %c1_i32 = arith.constant 1 : i32
    %84 = arith.index_cast %c1_i32 : i32 to index
    %c0_43 = arith.constant 0 : index
    %c0_44 = arith.constant 0 : index
    %85 = vector.load %arg2[%84, %c0_43, %c0_44] : memref<4x64x512xbf16, #tpu.memory_space<vmem>>, vector<1x64x512xbf16>
    %86 = vector.shape_cast %85 : vector<1x64x512xbf16> to vector<64x512xbf16>
    %87 = arith.extf %86 : vector<64x512xbf16> to vector<64x512xf32>
    %c0_45 = arith.constant 0 : index
    %c0_46 = arith.constant 0 : index
    %c0_47 = arith.constant 0 : index
    %88 = vector.load %arg8[%c0_45, %c0_46, %c0_47] : memref<2x64x128xf32, #tpu.memory_space<vmem>>, vector<1x64x128xf32>
    %89 = vector.shape_cast %88 : vector<1x64x128xf32> to vector<64x128xf32>
    %90 = arith.truncf %89 : vector<64x128xf32> to vector<64x128xbf16>
    %c0_48 = arith.constant 0 : index
    %c0_49 = arith.constant 0 : index
    %91 = vector.load %arg4[%c0_48, %c0_49] : memref<128x512xbf16, #tpu.memory_space<vmem>>, vector<128x512xbf16>
    %cst_50 = arith.constant dense<0.000000e+00> : vector<64x512xf32>
    %92 = tpu.matmul %90, %91, %cst_50 {dimension_numbers = #tpu.dot_dimension_numbers<[1], [0], [0], [1], [0, 0, 1, 1], [], []>} : vector<64x128xbf16>, vector<128x512xbf16>, vector<64x512xf32> -> vector<64x512xf32>
    %93 = arith.addf %87, %92 : vector<64x512xf32>
    %94 = vector.extract_strided_slice %93 {offsets = [0, 0], sizes = [64, 384], strides = [1, 1]} : vector<64x512xf32> to vector<64x384xf32>
    %cst_51 = arith.constant 5.000000e-01 : f32
    %95 = vector.broadcast %cst_51 : f32 to vector<64x384xf32>
    %96 = arith.mulf %95, %94 : vector<64x384xf32>
    %97 = math.tanh %96 : vector<64x384xf32>
    %cst_52 = arith.constant 1.000000e+00 : f32
    %98 = vector.broadcast %cst_52 : f32 to vector<64x384xf32>
    %99 = arith.addf %97, %98 : vector<64x384xf32>
    %cst_53 = arith.constant 5.000000e-01 : f32
    %100 = vector.broadcast %cst_53 : f32 to vector<64x384xf32>
    %101 = arith.mulf %100, %99 : vector<64x384xf32>
    %102 = vector.extract_strided_slice %101 {offsets = [0, 0], sizes = [64, 128], strides = [1, 1]} : vector<64x384xf32> to vector<64x128xf32>
    %103 = vector.extract_strided_slice %101 {offsets = [0, 128], sizes = [64, 128], strides = [1, 1]} : vector<64x384xf32> to vector<64x128xf32>
    %104 = vector.extract_strided_slice %101 {offsets = [0, 256], sizes = [64, 128], strides = [1, 1]} : vector<64x384xf32> to vector<64x128xf32>
    %105 = vector.extract_strided_slice %93 {offsets = [0, 384], sizes = [64, 128], strides = [1, 1]} : vector<64x512xf32> to vector<64x128xf32>
    %106 = math.tanh %105 : vector<64x128xf32>
    %c0_54 = arith.constant 0 : index
    %c0_55 = arith.constant 0 : index
    %c0_56 = arith.constant 0 : index
    %107 = vector.load %arg9[%c0_54, %c0_55, %c0_56] : memref<2x64x128xf32, #tpu.memory_space<vmem>>, vector<1x64x128xf32>
    %108 = vector.shape_cast %107 : vector<1x64x128xf32> to vector<64x128xf32>
    %109 = arith.mulf %103, %108 : vector<64x128xf32>
    %110 = arith.mulf %102, %106 : vector<64x128xf32>
    %111 = arith.addf %109, %110 : vector<64x128xf32>
    %112 = math.tanh %111 : vector<64x128xf32>
    %113 = arith.mulf %104, %112 : vector<64x128xf32>
    %c0_57 = arith.constant 0 : index
    %c0_58 = arith.constant 0 : index
    %c0_59 = arith.constant 0 : index
    %114 = vector.load %arg9[%c0_57, %c0_58, %c0_59] : memref<2x64x128xf32, #tpu.memory_space<vmem>>, vector<1x64x128xf32>
    %115 = vector.shape_cast %114 : vector<1x64x128xf32> to vector<64x128xf32>
    %116 = vector.shape_cast %111 : vector<64x128xf32> to vector<1x64x128xf32>
    tpu.vector_store %arg9[%c0_57, %c0_58, %c0_59], %116 {strides = array<i32>} : memref<2x64x128xf32, #tpu.memory_space<vmem>>, vector<1x64x128xf32>,
    %c0_60 = arith.constant 0 : index
    %c0_61 = arith.constant 0 : index
    %c0_62 = arith.constant 0 : index
    %117 = vector.load %arg8[%c0_60, %c0_61, %c0_62] : memref<2x64x128xf32, #tpu.memory_space<vmem>>, vector<1x64x128xf32>
    %118 = vector.shape_cast %117 : vector<1x64x128xf32> to vector<64x128xf32>
    %119 = vector.shape_cast %113 : vector<64x128xf32> to vector<1x64x128xf32>
    tpu.vector_store %arg8[%c0_60, %c0_61, %c0_62], %119 {strides = array<i32>} : memref<2x64x128xf32, #tpu.memory_space<vmem>>, vector<1x64x128xf32>,
    %120 = vector.shape_cast %113 : vector<64x128xf32> to vector<1x64x128xf32>
    %121 = arith.truncf %120 : vector<1x64x128xf32> to vector<1x64x128xbf16>
    %122 = arith.index_cast %c1_i32 : i32 to index
    %c0_63 = arith.constant 0 : index
    %c0_64 = arith.constant 0 : index
    %123 = vector.load %arg6[%122, %c0_63, %c0_64] : memref<4x64x128xbf16, #tpu.memory_space<vmem>>, vector<1x64x128xbf16>
    tpu.vector_store %arg6[%122, %c0_63, %c0_64], %121 {strides = array<i32>} : memref<4x64x128xbf16, #tpu.memory_space<vmem>>, vector<1x64x128xbf16>,
    %c3_i32_65 = arith.constant 3 : i32
    %124 = arith.subi %c3_i32_65, %c1_i32 : i32
    %125 = arith.index_cast %124 : i32 to index
    %c0_66 = arith.constant 0 : index
    %c0_67 = arith.constant 0 : index
    %126 = vector.load %arg3[%125, %c0_66, %c0_67] : memref<4x64x512xbf16, #tpu.memory_space<vmem>>, vector<1x64x512xbf16>
    %127 = vector.shape_cast %126 : vector<1x64x512xbf16> to vector<64x512xbf16>
    %128 = arith.extf %127 : vector<64x512xbf16> to vector<64x512xf32>
    %c1_68 = arith.constant 1 : index
    %c0_69 = arith.constant 0 : index
    %c0_70 = arith.constant 0 : index
    %129 = vector.load %arg8[%c1_68, %c0_69, %c0_70] : memref<2x64x128xf32, #tpu.memory_space<vmem>>, vector<1x64x128xf32>
    %130 = vector.shape_cast %129 : vector<1x64x128xf32> to vector<64x128xf32>
    %131 = arith.truncf %130 : vector<64x128xf32> to vector<64x128xbf16>
    %c0_71 = arith.constant 0 : index
    %c0_72 = arith.constant 0 : index
    %132 = vector.load %arg5[%c0_71, %c0_72] : memref<128x512xbf16, #tpu.memory_space<vmem>>, vector<128x512xbf16>
    %cst_73 = arith.constant dense<0.000000e+00> : vector<64x512xf32>
    %133 = tpu.matmul %131, %132, %cst_73 {dimension_numbers = #tpu.dot_dimension_numbers<[1], [0], [0], [1], [0, 0, 1, 1], [], []>} : vector<64x128xbf16>, vector<128x512xbf16>, vector<64x512xf32> -> vector<64x512xf32>
    %134 = arith.addf %128, %133 : vector<64x512xf32>
    %135 = vector.extract_strided_slice %134 {offsets = [0, 0], sizes = [64, 384], strides = [1, 1]} : vector<64x512xf32> to vector<64x384xf32>
    %cst_74 = arith.constant 5.000000e-01 : f32
    %136 = vector.broadcast %cst_74 : f32 to vector<64x384xf32>
    %137 = arith.mulf %136, %135 : vector<64x384xf32>
    %138 = math.tanh %137 : vector<64x384xf32>
    %cst_75 = arith.constant 1.000000e+00 : f32
    %139 = vector.broadcast %cst_75 : f32 to vector<64x384xf32>
    %140 = arith.addf %138, %139 : vector<64x384xf32>
    %cst_76 = arith.constant 5.000000e-01 : f32
    %141 = vector.broadcast %cst_76 : f32 to vector<64x384xf32>
    %142 = arith.mulf %141, %140 : vector<64x384xf32>
    %143 = vector.extract_strided_slice %142 {offsets = [0, 0], sizes = [64, 128], strides = [1, 1]} : vector<64x384xf32> to vector<64x128xf32>
    %144 = vector.extract_strided_slice %142 {offsets = [0, 128], sizes = [64, 128], strides = [1, 1]} : vector<64x384xf32> to vector<64x128xf32>
    %145 = vector.extract_strided_slice %142 {offsets = [0, 256], sizes = [64, 128], strides = [1, 1]} : vector<64x384xf32> to vector<64x128xf32>
    %146 = vector.extract_strided_slice %134 {offsets = [0, 384], sizes = [64, 128], strides = [1, 1]} : vector<64x512xf32> to vector<64x128xf32>
    %147 = math.tanh %146 : vector<64x128xf32>
    %c1_77 = arith.constant 1 : index
    %c0_78 = arith.constant 0 : index
    %c0_79 = arith.constant 0 : index
    %148 = vector.load %arg9[%c1_77, %c0_78, %c0_79] : memref<2x64x128xf32, #tpu.memory_space<vmem>>, vector<1x64x128xf32>
    %149 = vector.shape_cast %148 : vector<1x64x128xf32> to vector<64x128xf32>
    %150 = arith.mulf %144, %149 : vector<64x128xf32>
    %151 = arith.mulf %143, %147 : vector<64x128xf32>
    %152 = arith.addf %150, %151 : vector<64x128xf32>
    %153 = math.tanh %152 : vector<64x128xf32>
    %154 = arith.mulf %145, %153 : vector<64x128xf32>
    %c1_80 = arith.constant 1 : index
    %c0_81 = arith.constant 0 : index
    %c0_82 = arith.constant 0 : index
    %155 = vector.load %arg9[%c1_80, %c0_81, %c0_82] : memref<2x64x128xf32, #tpu.memory_space<vmem>>, vector<1x64x128xf32>
    %156 = vector.shape_cast %155 : vector<1x64x128xf32> to vector<64x128xf32>
    %157 = vector.shape_cast %152 : vector<64x128xf32> to vector<1x64x128xf32>
    tpu.vector_store %arg9[%c1_80, %c0_81, %c0_82], %157 {strides = array<i32>} : memref<2x64x128xf32, #tpu.memory_space<vmem>>, vector<1x64x128xf32>,
    %c1_83 = arith.constant 1 : index
    %c0_84 = arith.constant 0 : index
    %c0_85 = arith.constant 0 : index
    %158 = vector.load %arg8[%c1_83, %c0_84, %c0_85] : memref<2x64x128xf32, #tpu.memory_space<vmem>>, vector<1x64x128xf32>
    %159 = vector.shape_cast %158 : vector<1x64x128xf32> to vector<64x128xf32>
    %160 = vector.shape_cast %154 : vector<64x128xf32> to vector<1x64x128xf32>
    tpu.vector_store %arg8[%c1_83, %c0_84, %c0_85], %160 {strides = array<i32>} : memref<2x64x128xf32, #tpu.memory_space<vmem>>, vector<1x64x128xf32>,
    %161 = vector.shape_cast %154 : vector<64x128xf32> to vector<1x64x128xf32>
    %162 = arith.truncf %161 : vector<1x64x128xf32> to vector<1x64x128xbf16>
    %163 = arith.index_cast %124 : i32 to index
    %c0_86 = arith.constant 0 : index
    %c0_87 = arith.constant 0 : index
    %164 = vector.load %arg7[%163, %c0_86, %c0_87] : memref<4x64x128xbf16, #tpu.memory_space<vmem>>, vector<1x64x128xbf16>
    tpu.vector_store %arg7[%163, %c0_86, %c0_87], %162 {strides = array<i32>} : memref<4x64x128xbf16, #tpu.memory_space<vmem>>, vector<1x64x128xbf16>,
    %c2_i32 = arith.constant 2 : i32
    %165 = arith.index_cast %c2_i32 : i32 to index
    %c0_88 = arith.constant 0 : index
    %c0_89 = arith.constant 0 : index
    %166 = vector.load %arg2[%165, %c0_88, %c0_89] : memref<4x64x512xbf16, #tpu.memory_space<vmem>>, vector<1x64x512xbf16>
    %167 = vector.shape_cast %166 : vector<1x64x512xbf16> to vector<64x512xbf16>
    %168 = arith.extf %167 : vector<64x512xbf16> to vector<64x512xf32>
    %c0_90 = arith.constant 0 : index
    %c0_91 = arith.constant 0 : index
    %c0_92 = arith.constant 0 : index
    %169 = vector.load %arg8[%c0_90, %c0_91, %c0_92] : memref<2x64x128xf32, #tpu.memory_space<vmem>>, vector<1x64x128xf32>
    %170 = vector.shape_cast %169 : vector<1x64x128xf32> to vector<64x128xf32>
    %171 = arith.truncf %170 : vector<64x128xf32> to vector<64x128xbf16>
    %c0_93 = arith.constant 0 : index
    %c0_94 = arith.constant 0 : index
    %172 = vector.load %arg4[%c0_93, %c0_94] : memref<128x512xbf16, #tpu.memory_space<vmem>>, vector<128x512xbf16>
    %cst_95 = arith.constant dense<0.000000e+00> : vector<64x512xf32>
    %173 = tpu.matmul %171, %172, %cst_95 {dimension_numbers = #tpu.dot_dimension_numbers<[1], [0], [0], [1], [0, 0, 1, 1], [], []>} : vector<64x128xbf16>, vector<128x512xbf16>, vector<64x512xf32> -> vector<64x512xf32>
    %174 = arith.addf %168, %173 : vector<64x512xf32>
    %175 = vector.extract_strided_slice %174 {offsets = [0, 0], sizes = [64, 384], strides = [1, 1]} : vector<64x512xf32> to vector<64x384xf32>
    %cst_96 = arith.constant 5.000000e-01 : f32
    %176 = vector.broadcast %cst_96 : f32 to vector<64x384xf32>
    %177 = arith.mulf %176, %175 : vector<64x384xf32>
    %178 = math.tanh %177 : vector<64x384xf32>
    %cst_97 = arith.constant 1.000000e+00 : f32
    %179 = vector.broadcast %cst_97 : f32 to vector<64x384xf32>
    %180 = arith.addf %178, %179 : vector<64x384xf32>
    %cst_98 = arith.constant 5.000000e-01 : f32
    %181 = vector.broadcast %cst_98 : f32 to vector<64x384xf32>
    %182 = arith.mulf %181, %180 : vector<64x384xf32>
    %183 = vector.extract_strided_slice %182 {offsets = [0, 0], sizes = [64, 128], strides = [1, 1]} : vector<64x384xf32> to vector<64x128xf32>
    %184 = vector.extract_strided_slice %182 {offsets = [0, 128], sizes = [64, 128], strides = [1, 1]} : vector<64x384xf32> to vector<64x128xf32>
    %185 = vector.extract_strided_slice %182 {offsets = [0, 256], sizes = [64, 128], strides = [1, 1]} : vector<64x384xf32> to vector<64x128xf32>
    %186 = vector.extract_strided_slice %174 {offsets = [0, 384], sizes = [64, 128], strides = [1, 1]} : vector<64x512xf32> to vector<64x128xf32>
    %187 = math.tanh %186 : vector<64x128xf32>
    %c0_99 = arith.constant 0 : index
    %c0_100 = arith.constant 0 : index
    %c0_101 = arith.constant 0 : index
    %188 = vector.load %arg9[%c0_99, %c0_100, %c0_101] : memref<2x64x128xf32, #tpu.memory_space<vmem>>, vector<1x64x128xf32>
    %189 = vector.shape_cast %188 : vector<1x64x128xf32> to vector<64x128xf32>
    %190 = arith.mulf %184, %189 : vector<64x128xf32>
    %191 = arith.mulf %183, %187 : vector<64x128xf32>
    %192 = arith.addf %190, %191 : vector<64x128xf32>
    %193 = math.tanh %192 : vector<64x128xf32>
    %194 = arith.mulf %185, %193 : vector<64x128xf32>
    %c0_102 = arith.constant 0 : index
    %c0_103 = arith.constant 0 : index
    %c0_104 = arith.constant 0 : index
    %195 = vector.load %arg9[%c0_102, %c0_103, %c0_104] : memref<2x64x128xf32, #tpu.memory_space<vmem>>, vector<1x64x128xf32>
    %196 = vector.shape_cast %195 : vector<1x64x128xf32> to vector<64x128xf32>
    %197 = vector.shape_cast %192 : vector<64x128xf32> to vector<1x64x128xf32>
    tpu.vector_store %arg9[%c0_102, %c0_103, %c0_104], %197 {strides = array<i32>} : memref<2x64x128xf32, #tpu.memory_space<vmem>>, vector<1x64x128xf32>,
    %c0_105 = arith.constant 0 : index
    %c0_106 = arith.constant 0 : index
    %c0_107 = arith.constant 0 : index
    %198 = vector.load %arg8[%c0_105, %c0_106, %c0_107] : memref<2x64x128xf32, #tpu.memory_space<vmem>>, vector<1x64x128xf32>
    %199 = vector.shape_cast %198 : vector<1x64x128xf32> to vector<64x128xf32>
    %200 = vector.shape_cast %194 : vector<64x128xf32> to vector<1x64x128xf32>
    tpu.vector_store %arg8[%c0_105, %c0_106, %c0_107], %200 {strides = array<i32>} : memref<2x64x128xf32, #tpu.memory_space<vmem>>, vector<1x64x128xf32>,
    %201 = vector.shape_cast %194 : vector<64x128xf32> to vector<1x64x128xf32>
    %202 = arith.truncf %201 : vector<1x64x128xf32> to vector<1x64x128xbf16>
    %203 = arith.index_cast %c2_i32 : i32 to index
    %c0_108 = arith.constant 0 : index
    %c0_109 = arith.constant 0 : index
    %204 = vector.load %arg6[%203, %c0_108, %c0_109] : memref<4x64x128xbf16, #tpu.memory_space<vmem>>, vector<1x64x128xbf16>
    tpu.vector_store %arg6[%203, %c0_108, %c0_109], %202 {strides = array<i32>} : memref<4x64x128xbf16, #tpu.memory_space<vmem>>, vector<1x64x128xbf16>,
    %c3_i32_110 = arith.constant 3 : i32
    %205 = arith.subi %c3_i32_110, %c2_i32 : i32
    %206 = arith.index_cast %205 : i32 to index
    %c0_111 = arith.constant 0 : index
    %c0_112 = arith.constant 0 : index
    %207 = vector.load %arg3[%206, %c0_111, %c0_112] : memref<4x64x512xbf16, #tpu.memory_space<vmem>>, vector<1x64x512xbf16>
    %208 = vector.shape_cast %207 : vector<1x64x512xbf16> to vector<64x512xbf16>
    %209 = arith.extf %208 : vector<64x512xbf16> to vector<64x512xf32>
    %c1_113 = arith.constant 1 : index
    %c0_114 = arith.constant 0 : index
    %c0_115 = arith.constant 0 : index
    %210 = vector.load %arg8[%c1_113, %c0_114, %c0_115] : memref<2x64x128xf32, #tpu.memory_space<vmem>>, vector<1x64x128xf32>
    %211 = vector.shape_cast %210 : vector<1x64x128xf32> to vector<64x128xf32>
    %212 = arith.truncf %211 : vector<64x128xf32> to vector<64x128xbf16>
    %c0_116 = arith.constant 0 : index
    %c0_117 = arith.constant 0 : index
    %213 = vector.load %arg5[%c0_116, %c0_117] : memref<128x512xbf16, #tpu.memory_space<vmem>>, vector<128x512xbf16>
    %cst_118 = arith.constant dense<0.000000e+00> : vector<64x512xf32>
    %214 = tpu.matmul %212, %213, %cst_118 {dimension_numbers = #tpu.dot_dimension_numbers<[1], [0], [0], [1], [0, 0, 1, 1], [], []>} : vector<64x128xbf16>, vector<128x512xbf16>, vector<64x512xf32> -> vector<64x512xf32>
    %215 = arith.addf %209, %214 : vector<64x512xf32>
    %216 = vector.extract_strided_slice %215 {offsets = [0, 0], sizes = [64, 384], strides = [1, 1]} : vector<64x512xf32> to vector<64x384xf32>
    %cst_119 = arith.constant 5.000000e-01 : f32
    %217 = vector.broadcast %cst_119 : f32 to vector<64x384xf32>
    %218 = arith.mulf %217, %216 : vector<64x384xf32>
    %219 = math.tanh %218 : vector<64x384xf32>
    %cst_120 = arith.constant 1.000000e+00 : f32
    %220 = vector.broadcast %cst_120 : f32 to vector<64x384xf32>
    %221 = arith.addf %219, %220 : vector<64x384xf32>
    %cst_121 = arith.constant 5.000000e-01 : f32
    %222 = vector.broadcast %cst_121 : f32 to vector<64x384xf32>
    %223 = arith.mulf %222, %221 : vector<64x384xf32>
    %224 = vector.extract_strided_slice %223 {offsets = [0, 0], sizes = [64, 128], strides = [1, 1]} : vector<64x384xf32> to vector<64x128xf32>
    %225 = vector.extract_strided_slice %223 {offsets = [0, 128], sizes = [64, 128], strides = [1, 1]} : vector<64x384xf32> to vector<64x128xf32>
    %226 = vector.extract_strided_slice %223 {offsets = [0, 256], sizes = [64, 128], strides = [1, 1]} : vector<64x384xf32> to vector<64x128xf32>
    %227 = vector.extract_strided_slice %215 {offsets = [0, 384], sizes = [64, 128], strides = [1, 1]} : vector<64x512xf32> to vector<64x128xf32>
    %228 = math.tanh %227 : vector<64x128xf32>
    %c1_122 = arith.constant 1 : index
    %c0_123 = arith.constant 0 : index
    %c0_124 = arith.constant 0 : index
    %229 = vector.load %arg9[%c1_122, %c0_123, %c0_124] : memref<2x64x128xf32, #tpu.memory_space<vmem>>, vector<1x64x128xf32>
    %230 = vector.shape_cast %229 : vector<1x64x128xf32> to vector<64x128xf32>
    %231 = arith.mulf %225, %230 : vector<64x128xf32>
    %232 = arith.mulf %224, %228 : vector<64x128xf32>
    %233 = arith.addf %231, %232 : vector<64x128xf32>
    %234 = math.tanh %233 : vector<64x128xf32>
    %235 = arith.mulf %226, %234 : vector<64x128xf32>
    %c1_125 = arith.constant 1 : index
    %c0_126 = arith.constant 0 : index
    %c0_127 = arith.constant 0 : index
    %236 = vector.load %arg9[%c1_125, %c0_126, %c0_127] : memref<2x64x128xf32, #tpu.memory_space<vmem>>, vector<1x64x128xf32>
    %237 = vector.shape_cast %236 : vector<1x64x128xf32> to vector<64x128xf32>
    %238 = vector.shape_cast %233 : vector<64x128xf32> to vector<1x64x128xf32>
    tpu.vector_store %arg9[%c1_125, %c0_126, %c0_127], %238 {strides = array<i32>} : memref<2x64x128xf32, #tpu.memory_space<vmem>>, vector<1x64x128xf32>,
    %c1_128 = arith.constant 1 : index
    %c0_129 = arith.constant 0 : index
    %c0_130 = arith.constant 0 : index
    %239 = vector.load %arg8[%c1_128, %c0_129, %c0_130] : memref<2x64x128xf32, #tpu.memory_space<vmem>>, vector<1x64x128xf32>
    %240 = vector.shape_cast %239 : vector<1x64x128xf32> to vector<64x128xf32>
    %241 = vector.shape_cast %235 : vector<64x128xf32> to vector<1x64x128xf32>
    tpu.vector_store %arg8[%c1_128, %c0_129, %c0_130], %241 {strides = array<i32>} : memref<2x64x128xf32, #tpu.memory_space<vmem>>, vector<1x64x128xf32>,
    %242 = vector.shape_cast %235 : vector<64x128xf32> to vector<1x64x128xf32>
    %243 = arith.truncf %242 : vector<1x64x128xf32> to vector<1x64x128xbf16>
    %244 = arith.index_cast %205 : i32 to index
    %c0_131 = arith.constant 0 : index
    %c0_132 = arith.constant 0 : index
    %245 = vector.load %arg7[%244, %c0_131, %c0_132] : memref<4x64x128xbf16, #tpu.memory_space<vmem>>, vector<1x64x128xbf16>
    tpu.vector_store %arg7[%244, %c0_131, %c0_132], %243 {strides = array<i32>} : memref<4x64x128xbf16, #tpu.memory_space<vmem>>, vector<1x64x128xbf16>,
    %c3_i32_133 = arith.constant 3 : i32
    %246 = arith.index_cast %c3_i32_133 : i32 to index
    %c0_134 = arith.constant 0 : index
    %c0_135 = arith.constant 0 : index
    %247 = vector.load %arg2[%246, %c0_134, %c0_135] : memref<4x64x512xbf16, #tpu.memory_space<vmem>>, vector<1x64x512xbf16>
    %248 = vector.shape_cast %247 : vector<1x64x512xbf16> to vector<64x512xbf16>
    %249 = arith.extf %248 : vector<64x512xbf16> to vector<64x512xf32>
    %c0_136 = arith.constant 0 : index
    %c0_137 = arith.constant 0 : index
    %c0_138 = arith.constant 0 : index
    %250 = vector.load %arg8[%c0_136, %c0_137, %c0_138] : memref<2x64x128xf32, #tpu.memory_space<vmem>>, vector<1x64x128xf32>
    %251 = vector.shape_cast %250 : vector<1x64x128xf32> to vector<64x128xf32>
    %252 = arith.truncf %251 : vector<64x128xf32> to vector<64x128xbf16>
    %c0_139 = arith.constant 0 : index
    %c0_140 = arith.constant 0 : index
    %253 = vector.load %arg4[%c0_139, %c0_140] : memref<128x512xbf16, #tpu.memory_space<vmem>>, vector<128x512xbf16>
    %cst_141 = arith.constant dense<0.000000e+00> : vector<64x512xf32>
    %254 = tpu.matmul %252, %253, %cst_141 {dimension_numbers = #tpu.dot_dimension_numbers<[1], [0], [0], [1], [0, 0, 1, 1], [], []>} : vector<64x128xbf16>, vector<128x512xbf16>, vector<64x512xf32> -> vector<64x512xf32>
    %255 = arith.addf %249, %254 : vector<64x512xf32>
    %256 = vector.extract_strided_slice %255 {offsets = [0, 0], sizes = [64, 384], strides = [1, 1]} : vector<64x512xf32> to vector<64x384xf32>
    %cst_142 = arith.constant 5.000000e-01 : f32
    %257 = vector.broadcast %cst_142 : f32 to vector<64x384xf32>
    %258 = arith.mulf %257, %256 : vector<64x384xf32>
    %259 = math.tanh %258 : vector<64x384xf32>
    %cst_143 = arith.constant 1.000000e+00 : f32
    %260 = vector.broadcast %cst_143 : f32 to vector<64x384xf32>
    %261 = arith.addf %259, %260 : vector<64x384xf32>
    %cst_144 = arith.constant 5.000000e-01 : f32
    %262 = vector.broadcast %cst_144 : f32 to vector<64x384xf32>
    %263 = arith.mulf %262, %261 : vector<64x384xf32>
    %264 = vector.extract_strided_slice %263 {offsets = [0, 0], sizes = [64, 128], strides = [1, 1]} : vector<64x384xf32> to vector<64x128xf32>
    %265 = vector.extract_strided_slice %263 {offsets = [0, 128], sizes = [64, 128], strides = [1, 1]} : vector<64x384xf32> to vector<64x128xf32>
    %266 = vector.extract_strided_slice %263 {offsets = [0, 256], sizes = [64, 128], strides = [1, 1]} : vector<64x384xf32> to vector<64x128xf32>
    %267 = vector.extract_strided_slice %255 {offsets = [0, 384], sizes = [64, 128], strides = [1, 1]} : vector<64x512xf32> to vector<64x128xf32>
    %268 = math.tanh %267 : vector<64x128xf32>
    %c0_145 = arith.constant 0 : index
    %c0_146 = arith.constant 0 : index
    %c0_147 = arith.constant 0 : index
    %269 = vector.load %arg9[%c0_145, %c0_146, %c0_147] : memref<2x64x128xf32, #tpu.memory_space<vmem>>, vector<1x64x128xf32>
    %270 = vector.shape_cast %269 : vector<1x64x128xf32> to vector<64x128xf32>
    %271 = arith.mulf %265, %270 : vector<64x128xf32>
    %272 = arith.mulf %264, %268 : vector<64x128xf32>
    %273 = arith.addf %271, %272 : vector<64x128xf32>
    %274 = math.tanh %273 : vector<64x128xf32>
    %275 = arith.mulf %266, %274 : vector<64x128xf32>
    %c0_148 = arith.constant 0 : index
    %c0_149 = arith.constant 0 : index
    %c0_150 = arith.constant 0 : index
    %276 = vector.load %arg9[%c0_148, %c0_149, %c0_150] : memref<2x64x128xf32, #tpu.memory_space<vmem>>, vector<1x64x128xf32>
    %277 = vector.shape_cast %276 : vector<1x64x128xf32> to vector<64x128xf32>
    %278 = vector.shape_cast %273 : vector<64x128xf32> to vector<1x64x128xf32>
    tpu.vector_store %arg9[%c0_148, %c0_149, %c0_150], %278 {strides = array<i32>} : memref<2x64x128xf32, #tpu.memory_space<vmem>>, vector<1x64x128xf32>,
    %c0_151 = arith.constant 0 : index
    %c0_152 = arith.constant 0 : index
    %c0_153 = arith.constant 0 : index
    %279 = vector.load %arg8[%c0_151, %c0_152, %c0_153] : memref<2x64x128xf32, #tpu.memory_space<vmem>>, vector<1x64x128xf32>
    %280 = vector.shape_cast %279 : vector<1x64x128xf32> to vector<64x128xf32>
    %281 = vector.shape_cast %275 : vector<64x128xf32> to vector<1x64x128xf32>
    tpu.vector_store %arg8[%c0_151, %c0_152, %c0_153], %281 {strides = array<i32>} : memref<2x64x128xf32, #tpu.memory_space<vmem>>, vector<1x64x128xf32>,
    %282 = vector.shape_cast %275 : vector<64x128xf32> to vector<1x64x128xf32>
    %283 = arith.truncf %282 : vector<1x64x128xf32> to vector<1x64x128xbf16>
    %284 = arith.index_cast %c3_i32_133 : i32 to index
    %c0_154 = arith.constant 0 : index
    %c0_155 = arith.constant 0 : index
    %285 = vector.load %arg6[%284, %c0_154, %c0_155] : memref<4x64x128xbf16, #tpu.memory_space<vmem>>, vector<1x64x128xbf16>
    tpu.vector_store %arg6[%284, %c0_154, %c0_155], %283 {strides = array<i32>} : memref<4x64x128xbf16, #tpu.memory_space<vmem>>, vector<1x64x128xbf16>,
    %c3_i32_156 = arith.constant 3 : i32
    %286 = arith.subi %c3_i32_156, %c3_i32_133 : i32
    %287 = arith.index_cast %286 : i32 to index
    %c0_157 = arith.constant 0 : index
    %c0_158 = arith.constant 0 : index
    %288 = vector.load %arg3[%287, %c0_157, %c0_158] : memref<4x64x512xbf16, #tpu.memory_space<vmem>>, vector<1x64x512xbf16>
    %289 = vector.shape_cast %288 : vector<1x64x512xbf16> to vector<64x512xbf16>
    %290 = arith.extf %289 : vector<64x512xbf16> to vector<64x512xf32>
    %c1_159 = arith.constant 1 : index
    %c0_160 = arith.constant 0 : index
    %c0_161 = arith.constant 0 : index
    %291 = vector.load %arg8[%c1_159, %c0_160, %c0_161] : memref<2x64x128xf32, #tpu.memory_space<vmem>>, vector<1x64x128xf32>
    %292 = vector.shape_cast %291 : vector<1x64x128xf32> to vector<64x128xf32>
    %293 = arith.truncf %292 : vector<64x128xf32> to vector<64x128xbf16>
    %c0_162 = arith.constant 0 : index
    %c0_163 = arith.constant 0 : index
    %294 = vector.load %arg5[%c0_162, %c0_163] : memref<128x512xbf16, #tpu.memory_space<vmem>>, vector<128x512xbf16>
    %cst_164 = arith.constant dense<0.000000e+00> : vector<64x512xf32>
    %295 = tpu.matmul %293, %294, %cst_164 {dimension_numbers = #tpu.dot_dimension_numbers<[1], [0], [0], [1], [0, 0, 1, 1], [], []>} : vector<64x128xbf16>, vector<128x512xbf16>, vector<64x512xf32> -> vector<64x512xf32>
    %296 = arith.addf %290, %295 : vector<64x512xf32>
    %297 = vector.extract_strided_slice %296 {offsets = [0, 0], sizes = [64, 384], strides = [1, 1]} : vector<64x512xf32> to vector<64x384xf32>
    %cst_165 = arith.constant 5.000000e-01 : f32
    %298 = vector.broadcast %cst_165 : f32 to vector<64x384xf32>
    %299 = arith.mulf %298, %297 : vector<64x384xf32>
    %300 = math.tanh %299 : vector<64x384xf32>
    %cst_166 = arith.constant 1.000000e+00 : f32
    %301 = vector.broadcast %cst_166 : f32 to vector<64x384xf32>
    %302 = arith.addf %300, %301 : vector<64x384xf32>
    %cst_167 = arith.constant 5.000000e-01 : f32
    %303 = vector.broadcast %cst_167 : f32 to vector<64x384xf32>
    %304 = arith.mulf %303, %302 : vector<64x384xf32>
    %305 = vector.extract_strided_slice %304 {offsets = [0, 0], sizes = [64, 128], strides = [1, 1]} : vector<64x384xf32> to vector<64x128xf32>
    %306 = vector.extract_strided_slice %304 {offsets = [0, 128], sizes = [64, 128], strides = [1, 1]} : vector<64x384xf32> to vector<64x128xf32>
    %307 = vector.extract_strided_slice %304 {offsets = [0, 256], sizes = [64, 128], strides = [1, 1]} : vector<64x384xf32> to vector<64x128xf32>
    %308 = vector.extract_strided_slice %296 {offsets = [0, 384], sizes = [64, 128], strides = [1, 1]} : vector<64x512xf32> to vector<64x128xf32>
    %309 = math.tanh %308 : vector<64x128xf32>
    %c1_168 = arith.constant 1 : index
    %c0_169 = arith.constant 0 : index
    %c0_170 = arith.constant 0 : index
    %310 = vector.load %arg9[%c1_168, %c0_169, %c0_170] : memref<2x64x128xf32, #tpu.memory_space<vmem>>, vector<1x64x128xf32>
    %311 = vector.shape_cast %310 : vector<1x64x128xf32> to vector<64x128xf32>
    %312 = arith.mulf %306, %311 : vector<64x128xf32>
    %313 = arith.mulf %305, %309 : vector<64x128xf32>
    %314 = arith.addf %312, %313 : vector<64x128xf32>
    %315 = math.tanh %314 : vector<64x128xf32>
    %316 = arith.mulf %307, %315 : vector<64x128xf32>
    %c1_171 = arith.constant 1 : index
    %c0_172 = arith.constant 0 : index
    %c0_173 = arith.constant 0 : index
    %317 = vector.load %arg9[%c1_171, %c0_172, %c0_173] : memref<2x64x128xf32, #tpu.memory_space<vmem>>, vector<1x64x128xf32>
    %318 = vector.shape_cast %317 : vector<1x64x128xf32> to vector<64x128xf32>
    %319 = vector.shape_cast %314 : vector<64x128xf32> to vector<1x64x128xf32>
    tpu.vector_store %arg9[%c1_171, %c0_172, %c0_173], %319 {strides = array<i32>} : memref<2x64x128xf32, #tpu.memory_space<vmem>>, vector<1x64x128xf32>,
    %c1_174 = arith.constant 1 : index
    %c0_175 = arith.constant 0 : index
    %c0_176 = arith.constant 0 : index
    %320 = vector.load %arg8[%c1_174, %c0_175, %c0_176] : memref<2x64x128xf32, #tpu.memory_space<vmem>>, vector<1x64x128xf32>
    %321 = vector.shape_cast %320 : vector<1x64x128xf32> to vector<64x128xf32>
    %322 = vector.shape_cast %316 : vector<64x128xf32> to vector<1x64x128xf32>
    tpu.vector_store %arg8[%c1_174, %c0_175, %c0_176], %322 {strides = array<i32>} : memref<2x64x128xf32, #tpu.memory_space<vmem>>, vector<1x64x128xf32>,
    %323 = vector.shape_cast %316 : vector<64x128xf32> to vector<1x64x128xf32>
    %324 = arith.truncf %323 : vector<1x64x128xf32> to vector<1x64x128xbf16>
    %325 = arith.index_cast %286 : i32 to index
    %c0_177 = arith.constant 0 : index
    %c0_178 = arith.constant 0 : index
    %326 = vector.load %arg7[%325, %c0_177, %c0_178] : memref<4x64x128xbf16, #tpu.memory_space<vmem>>, vector<1x64x128xbf16>
    tpu.vector_store %arg7[%325, %c0_177, %c0_178], %324 {strides = array<i32>} : memref<4x64x128xbf16, #tpu.memory_space<vmem>>, vector<1x64x128xbf16>,
    %c4_i32 = arith.constant 4 : i32
    return
  }
  func.func @transform_0(%arg0: i32, %arg1: i32) -> (i32, i32, i32) {
    %c0_i32 = arith.constant 0 : i32
    %c0_i32_0 = arith.constant 0 : i32
    return %arg1, %arg0, %c0_i32 : i32, i32, i32
  }
  func.func @transform_1(%arg0: i32, %arg1: i32) -> (i32, i32, i32) {
    %c0_i32 = arith.constant 0 : i32
    %0 = arith.subi %c0_i32, %arg1 : i32
    %c0_i32_0 = arith.constant 0 : i32
    %c0_i32_1 = arith.constant 0 : i32
    return %0, %arg0, %c0_i32_0 : i32, i32, i32
  }
  func.func @transform_2(%arg0: i32, %arg1: i32) -> (i32, i32) {
    %c0_i32 = arith.constant 0 : i32
    %c0_i32_0 = arith.constant 0 : i32
    %c0_i32_1 = arith.constant 0 : i32
    return %c0_i32, %c0_i32_0 : i32, i32
  }
  func.func @transform_3(%arg0: i32, %arg1: i32) -> (i32, i32) {
    %c0_i32 = arith.constant 0 : i32
    %c0_i32_0 = arith.constant 0 : i32
    %c0_i32_1 = arith.constant 0 : i32
    return %c0_i32, %c0_i32_0 : i32, i32
  }
  func.func @transform_4(%arg0: i32, %arg1: i32) -> (i32, i32, i32) {
    %c0_i32 = arith.constant 0 : i32
    %c0_i32_0 = arith.constant 0 : i32
    return %arg1, %arg0, %c0_i32 : i32, i32, i32
  }
  func.func @transform_5(%arg0: i32, %arg1: i32) -> (i32, i32, i32) {
    %c0_i32 = arith.constant 0 : i32
    %0 = arith.subi %c0_i32, %arg1 : i32
    %c0_i32_0 = arith.constant 0 : i32
    %c0_i32_1 = arith.constant 0 : i32
    return %0, %arg0, %c0_i32_0 : i32, i32, i32
  }
}

module attributes {stable_mosaic.version = 11 : i64} {
  func.func @_char_fc_kernel(%arg0: i32, %arg1: i32, %arg2: i32, %arg3: memref<1x64x128xbf16, #tpu.memory_space<vmem>>, %arg4: memref<1x128x128xbf16, #tpu.memory_space<vmem>>, %arg5: memref<1x64x128xbf16, #tpu.memory_space<vmem>>, %arg6: memref<1x128x128xbf16, #tpu.memory_space<vmem>>, %arg7: memref<1x128xf32, #tpu.memory_space<vmem>>, %arg8: memref<64x128xbf16, #tpu.memory_space<vmem>>, %arg9: memref<64x128xf32, #tpu.memory_space<vmem>>) attributes {dimension_semantics = [#tpu.dimension_semantics<parallel>, #tpu.dimension_semantics<parallel>, #tpu.dimension_semantics<arbitrary>], iteration_bounds = array<i64: 1, 1, 4>, scalar_prefetch = 0 : i64, scratch_operands = 1 : i64, tpu.core_type = #tpu.core_type<tc>, window_params = [{transform_indices = @transform_0, window_bounds = array<i64: 1, 64, 128>}, {transform_indices = @transform_1, window_bounds = array<i64: 1, 128, 128>}, {transform_indices = @transform_2, window_bounds = array<i64: 1, 64, 128>}, {transform_indices = @transform_3, window_bounds = array<i64: 1, 128, 128>}, {transform_indices = @transform_4, window_bounds = array<i64: 1, 128>}, {transform_indices = @transform_5, window_bounds = array<i64: 64, 128>}]} {
    %c0_i32 = arith.constant 0 : i32
    %0 = arith.cmpi eq, %arg2, %c0_i32 : i32
    %1 = arith.extui %0 : i1 to i32
    %c0_i32_0 = arith.constant 0 : i32
    %2 = arith.cmpi ne, %1, %c0_i32_0 : i32
    scf.if %2 {
      %c0_22 = arith.constant 0 : index
      %c0_23 = arith.constant 0 : index
      %22 = vector.load %arg7[%c0_22, %c0_23] : memref<1x128xf32, #tpu.memory_space<vmem>>, vector<1x128xf32>
      %23 = vector.shape_cast %22 : vector<1x128xf32> to vector<1x128xf32>
      %24 = vector.broadcast %23 : vector<1x128xf32> to vector<64x128xf32>
      %c0_24 = arith.constant 0 : index
      %c0_25 = arith.constant 0 : index
      %25 = vector.load %arg9[%c0_24, %c0_25] : memref<64x128xf32, #tpu.memory_space<vmem>>, vector<64x128xf32>
      tpu.vector_store %arg9[%c0_24, %c0_25], %24 {strides = array<i32>} : memref<64x128xf32, #tpu.memory_space<vmem>>, vector<64x128xf32>,
    } else {
    }
    %c0 = arith.constant 0 : index
    %c0_1 = arith.constant 0 : index
    %3 = vector.load %arg9[%c0, %c0_1] : memref<64x128xf32, #tpu.memory_space<vmem>>, vector<64x128xf32>
    %c0_2 = arith.constant 0 : index
    %c0_3 = arith.constant 0 : index
    %c0_4 = arith.constant 0 : index
    %4 = vector.load %arg3[%c0_2, %c0_3, %c0_4] : memref<1x64x128xbf16, #tpu.memory_space<vmem>>, vector<1x64x128xbf16>
    %5 = vector.shape_cast %4 : vector<1x64x128xbf16> to vector<64x128xbf16>
    %c0_5 = arith.constant 0 : index
    %c0_6 = arith.constant 0 : index
    %c0_7 = arith.constant 0 : index
    %6 = vector.load %arg4[%c0_5, %c0_6, %c0_7] : memref<1x128x128xbf16, #tpu.memory_space<vmem>>, vector<1x128x128xbf16>
    %7 = vector.shape_cast %6 : vector<1x128x128xbf16> to vector<128x128xbf16>
    %cst = arith.constant dense<0.000000e+00> : vector<64x128xf32>
    %8 = tpu.matmul %5, %7, %cst {dimension_numbers = #tpu.dot_dimension_numbers<[1], [0], [0], [1], [0, 0, 1, 1], [], []>} : vector<64x128xbf16>, vector<128x128xbf16>, vector<64x128xf32> -> vector<64x128xf32>
    %9 = arith.addf %3, %8 : vector<64x128xf32>
    %c0_8 = arith.constant 0 : index
    %c0_9 = arith.constant 0 : index
    %10 = vector.load %arg9[%c0_8, %c0_9] : memref<64x128xf32, #tpu.memory_space<vmem>>, vector<64x128xf32>
    tpu.vector_store %arg9[%c0_8, %c0_9], %9 {strides = array<i32>} : memref<64x128xf32, #tpu.memory_space<vmem>>, vector<64x128xf32>,
    %c0_10 = arith.constant 0 : index
    %c0_11 = arith.constant 0 : index
    %11 = vector.load %arg9[%c0_10, %c0_11] : memref<64x128xf32, #tpu.memory_space<vmem>>, vector<64x128xf32>
    %c0_12 = arith.constant 0 : index
    %c0_13 = arith.constant 0 : index
    %c0_14 = arith.constant 0 : index
    %12 = vector.load %arg5[%c0_12, %c0_13, %c0_14] : memref<1x64x128xbf16, #tpu.memory_space<vmem>>, vector<1x64x128xbf16>
    %13 = vector.shape_cast %12 : vector<1x64x128xbf16> to vector<64x128xbf16>
    %c0_15 = arith.constant 0 : index
    %c0_16 = arith.constant 0 : index
    %c0_17 = arith.constant 0 : index
    %14 = vector.load %arg6[%c0_15, %c0_16, %c0_17] : memref<1x128x128xbf16, #tpu.memory_space<vmem>>, vector<1x128x128xbf16>
    %15 = vector.shape_cast %14 : vector<1x128x128xbf16> to vector<128x128xbf16>
    %cst_18 = arith.constant dense<0.000000e+00> : vector<64x128xf32>
    %16 = tpu.matmul %13, %15, %cst_18 {dimension_numbers = #tpu.dot_dimension_numbers<[1], [0], [0], [1], [0, 0, 1, 1], [], []>} : vector<64x128xbf16>, vector<128x128xbf16>, vector<64x128xf32> -> vector<64x128xf32>
    %17 = arith.addf %11, %16 : vector<64x128xf32>
    %c0_19 = arith.constant 0 : index
    %c0_20 = arith.constant 0 : index
    %18 = vector.load %arg9[%c0_19, %c0_20] : memref<64x128xf32, #tpu.memory_space<vmem>>, vector<64x128xf32>
    tpu.vector_store %arg9[%c0_19, %c0_20], %17 {strides = array<i32>} : memref<64x128xf32, #tpu.memory_space<vmem>>, vector<64x128xf32>,
    %c3_i32 = arith.constant 3 : i32
    %19 = arith.cmpi eq, %arg2, %c3_i32 : i32
    %20 = arith.extui %19 : i1 to i32
    %c0_i32_21 = arith.constant 0 : i32
    %21 = arith.cmpi ne, %20, %c0_i32_21 : i32
    scf.if %21 {
      %c0_22 = arith.constant 0 : index
      %c0_23 = arith.constant 0 : index
      %22 = vector.load %arg9[%c0_22, %c0_23] : memref<64x128xf32, #tpu.memory_space<vmem>>, vector<64x128xf32>
      %23 = arith.truncf %22 : vector<64x128xf32> to vector<64x128xbf16>
      %c0_24 = arith.constant 0 : index
      %c0_25 = arith.constant 0 : index
      %24 = vector.load %arg8[%c0_24, %c0_25] : memref<64x128xbf16, #tpu.memory_space<vmem>>, vector<64x128xbf16>
      tpu.vector_store %arg8[%c0_24, %c0_25], %23 {strides = array<i32>} : memref<64x128xbf16, #tpu.memory_space<vmem>>, vector<64x128xbf16>,
    } else {
    }
    return
  }
  func.func @transform_0(%arg0: i32, %arg1: i32, %arg2: i32) -> (i32, i32, i32) {
    %c0_i32 = arith.constant 0 : i32
    %c0_i32_0 = arith.constant 0 : i32
    return %arg2, %arg0, %c0_i32 : i32, i32, i32
  }
  func.func @transform_1(%arg0: i32, %arg1: i32, %arg2: i32) -> (i32, i32, i32) {
    %c0_i32 = arith.constant 0 : i32
    %c0_i32_0 = arith.constant 0 : i32
    return %arg2, %c0_i32, %arg1 : i32, i32, i32
  }
  func.func @transform_2(%arg0: i32, %arg1: i32, %arg2: i32) -> (i32, i32, i32) {
    %c0_i32 = arith.constant 0 : i32
    %c0_i32_0 = arith.constant 0 : i32
    return %arg2, %arg0, %c0_i32 : i32, i32, i32
  }
  func.func @transform_3(%arg0: i32, %arg1: i32, %arg2: i32) -> (i32, i32, i32) {
    %c0_i32 = arith.constant 0 : i32
    %c0_i32_0 = arith.constant 0 : i32
    return %arg2, %c0_i32, %arg1 : i32, i32, i32
  }
  func.func @transform_4(%arg0: i32, %arg1: i32, %arg2: i32) -> (i32, i32) {
    %c0_i32 = arith.constant 0 : i32
    %c0_i32_0 = arith.constant 0 : i32
    return %c0_i32, %arg1 : i32, i32
  }
  func.func @transform_5(%arg0: i32, %arg1: i32, %arg2: i32) -> (i32, i32) {
    %c0_i32 = arith.constant 0 : i32
    return %arg0, %arg1 : i32, i32
  }
}

module attributes {stable_mosaic.version = 11 : i64} {
  func.func @_dense_k1_kernel(%arg0: i32, %arg1: i32, %arg2: memref<56x128xbf16, #tpu.memory_space<vmem>>, %arg3: memref<128x512xbf16, #tpu.memory_space<vmem>>, %arg4: memref<1x512xf32, #tpu.memory_space<vmem>>, %arg5: memref<56x512xbf16, #tpu.memory_space<vmem>>) attributes {dimension_semantics = [#tpu.dimension_semantics<parallel>, #tpu.dimension_semantics<parallel>], iteration_bounds = array<i64: 1, 1>, scalar_prefetch = 0 : i64, scratch_operands = 0 : i64, tpu.core_type = #tpu.core_type<tc>, window_params = [{transform_indices = @transform_0, window_bounds = array<i64: 56, 128>}, {transform_indices = @transform_1, window_bounds = array<i64: 128, 512>}, {transform_indices = @transform_2, window_bounds = array<i64: 1, 512>}, {transform_indices = @transform_3, window_bounds = array<i64: 56, 512>}]} {
    %c0 = arith.constant 0 : index
    %c0_0 = arith.constant 0 : index
    %0 = vector.load %arg2[%c0, %c0_0] : memref<56x128xbf16, #tpu.memory_space<vmem>>, vector<56x128xbf16>
    %c0_1 = arith.constant 0 : index
    %c0_2 = arith.constant 0 : index
    %1 = vector.load %arg3[%c0_1, %c0_2] : memref<128x512xbf16, #tpu.memory_space<vmem>>, vector<128x512xbf16>
    %cst = arith.constant dense<0.000000e+00> : vector<56x512xf32>
    %2 = tpu.matmul %0, %1, %cst {dimension_numbers = #tpu.dot_dimension_numbers<[1], [0], [0], [1], [0, 0, 1, 1], [], []>} : vector<56x128xbf16>, vector<128x512xbf16>, vector<56x512xf32> -> vector<56x512xf32>
    %c0_3 = arith.constant 0 : index
    %c0_4 = arith.constant 0 : index
    %3 = vector.load %arg4[%c0_3, %c0_4] : memref<1x512xf32, #tpu.memory_space<vmem>>, vector<1x512xf32>
    %4 = vector.broadcast %3 : vector<1x512xf32> to vector<56x512xf32>
    %5 = arith.addf %2, %4 : vector<56x512xf32>
    %6 = arith.truncf %5 : vector<56x512xf32> to vector<56x512xbf16>
    %c0_5 = arith.constant 0 : index
    %c0_6 = arith.constant 0 : index
    %7 = vector.load %arg5[%c0_5, %c0_6] : memref<56x512xbf16, #tpu.memory_space<vmem>>, vector<56x512xbf16>
    tpu.vector_store %arg5[%c0_5, %c0_6], %6 {strides = array<i32>} : memref<56x512xbf16, #tpu.memory_space<vmem>>, vector<56x512xbf16>,
    return
  }
  func.func @transform_0(%arg0: i32, %arg1: i32) -> (i32, i32) {
    %c0_i32 = arith.constant 0 : i32
    %c0_i32_0 = arith.constant 0 : i32
    return %arg0, %c0_i32 : i32, i32
  }
  func.func @transform_1(%arg0: i32, %arg1: i32) -> (i32, i32) {
    %c0_i32 = arith.constant 0 : i32
    %c0_i32_0 = arith.constant 0 : i32
    return %c0_i32, %arg1 : i32, i32
  }
  func.func @transform_2(%arg0: i32, %arg1: i32) -> (i32, i32) {
    %c0_i32 = arith.constant 0 : i32
    %c0_i32_0 = arith.constant 0 : i32
    return %c0_i32, %arg1 : i32, i32
  }
  func.func @transform_3(%arg0: i32, %arg1: i32) -> (i32, i32) {
    %c0_i32 = arith.constant 0 : i32
    return %arg0, %arg1 : i32, i32
  }
}

module attributes {stable_mosaic.version = 11 : i64} {
  func.func @_dense_k1_res_kernel(%arg0: i32, %arg1: i32, %arg2: memref<56x128xbf16, #tpu.memory_space<vmem>>, %arg3: memref<128x128xbf16, #tpu.memory_space<vmem>>, %arg4: memref<1x128xf32, #tpu.memory_space<vmem>>, %arg5: memref<56x128xbf16, #tpu.memory_space<vmem>>, %arg6: memref<56x128xbf16, #tpu.memory_space<vmem>>) attributes {dimension_semantics = [#tpu.dimension_semantics<parallel>, #tpu.dimension_semantics<parallel>], iteration_bounds = array<i64: 1, 1>, scalar_prefetch = 0 : i64, scratch_operands = 0 : i64, tpu.core_type = #tpu.core_type<tc>, window_params = [{transform_indices = @transform_0, window_bounds = array<i64: 56, 128>}, {transform_indices = @transform_1, window_bounds = array<i64: 128, 128>}, {transform_indices = @transform_2, window_bounds = array<i64: 1, 128>}, {transform_indices = @transform_3, window_bounds = array<i64: 56, 128>}, {transform_indices = @transform_4, window_bounds = array<i64: 56, 128>}]} {
    %c0 = arith.constant 0 : index
    %c0_0 = arith.constant 0 : index
    %0 = vector.load %arg2[%c0, %c0_0] : memref<56x128xbf16, #tpu.memory_space<vmem>>, vector<56x128xbf16>
    %c0_1 = arith.constant 0 : index
    %c0_2 = arith.constant 0 : index
    %1 = vector.load %arg3[%c0_1, %c0_2] : memref<128x128xbf16, #tpu.memory_space<vmem>>, vector<128x128xbf16>
    %cst = arith.constant dense<0.000000e+00> : vector<56x128xf32>
    %2 = tpu.matmul %0, %1, %cst {dimension_numbers = #tpu.dot_dimension_numbers<[1], [0], [0], [1], [0, 0, 1, 1], [], []>} : vector<56x128xbf16>, vector<128x128xbf16>, vector<56x128xf32> -> vector<56x128xf32>
    %c0_3 = arith.constant 0 : index
    %c0_4 = arith.constant 0 : index
    %3 = vector.load %arg4[%c0_3, %c0_4] : memref<1x128xf32, #tpu.memory_space<vmem>>, vector<1x128xf32>
    %4 = vector.broadcast %3 : vector<1x128xf32> to vector<56x128xf32>
    %5 = arith.addf %2, %4 : vector<56x128xf32>
    %c0_5 = arith.constant 0 : index
    %c0_6 = arith.constant 0 : index
    %6 = vector.load %arg5[%c0_5, %c0_6] : memref<56x128xbf16, #tpu.memory_space<vmem>>, vector<56x128xbf16>
    %7 = arith.extf %6 : vector<56x128xbf16> to vector<56x128xf32>
    %8 = arith.addf %5, %7 : vector<56x128xf32>
    %9 = arith.truncf %8 : vector<56x128xf32> to vector<56x128xbf16>
    %c0_7 = arith.constant 0 : index
    %c0_8 = arith.constant 0 : index
    %10 = vector.load %arg6[%c0_7, %c0_8] : memref<56x128xbf16, #tpu.memory_space<vmem>>, vector<56x128xbf16>
    tpu.vector_store %arg6[%c0_7, %c0_8], %9 {strides = array<i32>} : memref<56x128xbf16, #tpu.memory_space<vmem>>, vector<56x128xbf16>,
    return
  }
  func.func @transform_0(%arg0: i32, %arg1: i32) -> (i32, i32) {
    %c0_i32 = arith.constant 0 : i32
    %c0_i32_0 = arith.constant 0 : i32
    return %arg0, %c0_i32 : i32, i32
  }
  func.func @transform_1(%arg0: i32, %arg1: i32) -> (i32, i32) {
    %c0_i32 = arith.constant 0 : i32
    %c0_i32_0 = arith.constant 0 : i32
    return %c0_i32, %arg1 : i32, i32
  }
  func.func @transform_2(%arg0: i32, %arg1: i32) -> (i32, i32) {
    %c0_i32 = arith.constant 0 : i32
    %c0_i32_0 = arith.constant 0 : i32
    return %c0_i32, %arg1 : i32, i32
  }
  func.func @transform_3(%arg0: i32, %arg1: i32) -> (i32, i32) {
    %c0_i32 = arith.constant 0 : i32
    return %arg0, %arg1 : i32, i32
  }
  func.func @transform_4(%arg0: i32, %arg1: i32) -> (i32, i32) {
    %c0_i32 = arith.constant 0 : i32
    return %arg0, %arg1 : i32, i32
  }
}

module attributes {stable_mosaic.version = 11 : i64} {
  func.func @_bilstm_kernel(%arg0: i32, %arg1: i32, %arg2: memref<7x8x512xbf16, #tpu.memory_space<vmem>>, %arg3: memref<7x8x512xbf16, #tpu.memory_space<vmem>>, %arg4: memref<128x512xbf16, #tpu.memory_space<vmem>>, %arg5: memref<128x512xbf16, #tpu.memory_space<vmem>>, %arg6: memref<7x8x128xbf16, #tpu.memory_space<vmem>>, %arg7: memref<7x8x128xbf16, #tpu.memory_space<vmem>>, %arg8: memref<2x8x128xf32, #tpu.memory_space<vmem>>, %arg9: memref<2x8x128xf32, #tpu.memory_space<vmem>>) attributes {dimension_semantics = [#tpu.dimension_semantics<parallel>, #tpu.dimension_semantics<arbitrary>], iteration_bounds = array<i64: 1, 1>, scalar_prefetch = 0 : i64, scratch_operands = 2 : i64, tpu.core_type = #tpu.core_type<tc>, window_params = [{transform_indices = @transform_0, window_bounds = array<i64: 7, 8, 512>}, {transform_indices = @transform_1, window_bounds = array<i64: 7, 8, 512>}, {pipeline_mode = #tpu.pipeline_mode<synchronous>, transform_indices = @transform_2, window_bounds = array<i64: 128, 512>}, {pipeline_mode = #tpu.pipeline_mode<synchronous>, transform_indices = @transform_3, window_bounds = array<i64: 128, 512>}, {transform_indices = @transform_4, window_bounds = array<i64: 7, 8, 128>}, {transform_indices = @transform_5, window_bounds = array<i64: 7, 8, 128>}]} {
    %c0_i32 = arith.constant 0 : i32
    %0 = arith.cmpi eq, %arg1, %c0_i32 : i32
    %1 = arith.extui %0 : i1 to i32
    %c0_i32_0 = arith.constant 0 : i32
    %2 = arith.cmpi ne, %1, %c0_i32_0 : i32
    scf.if %2 {
      %cst_307 = arith.constant 0.000000e+00 : f32
      %563 = vector.broadcast %cst_307 : f32 to vector<2x8x128xf32>
      %c0_308 = arith.constant 0 : index
      %c0_309 = arith.constant 0 : index
      %c0_310 = arith.constant 0 : index
      %564 = vector.load %arg8[%c0_308, %c0_309, %c0_310] : memref<2x8x128xf32, #tpu.memory_space<vmem>>, vector<2x8x128xf32>
      tpu.vector_store %arg8[%c0_308, %c0_309, %c0_310], %563 {strides = array<i32>} : memref<2x8x128xf32, #tpu.memory_space<vmem>>, vector<2x8x128xf32>,
      %cst_311 = arith.constant 0.000000e+00 : f32
      %565 = vector.broadcast %cst_311 : f32 to vector<2x8x128xf32>
      %c0_312 = arith.constant 0 : index
      %c0_313 = arith.constant 0 : index
      %c0_314 = arith.constant 0 : index
      %566 = vector.load %arg9[%c0_312, %c0_313, %c0_314] : memref<2x8x128xf32, #tpu.memory_space<vmem>>, vector<2x8x128xf32>
      tpu.vector_store %arg9[%c0_312, %c0_313, %c0_314], %565 {strides = array<i32>} : memref<2x8x128xf32, #tpu.memory_space<vmem>>, vector<2x8x128xf32>,
    } else {
    }
    %c0_i32_1 = arith.constant 0 : i32
    %3 = arith.index_cast %c0_i32_1 : i32 to index
    %c0 = arith.constant 0 : index
    %c0_2 = arith.constant 0 : index
    %4 = vector.load %arg2[%3, %c0, %c0_2] : memref<7x8x512xbf16, #tpu.memory_space<vmem>>, vector<1x8x512xbf16>
    %5 = vector.shape_cast %4 : vector<1x8x512xbf16> to vector<8x512xbf16>
    %6 = arith.extf %5 : vector<8x512xbf16> to vector<8x512xf32>
    %c0_3 = arith.constant 0 : index
    %c0_4 = arith.constant 0 : index
    %c0_5 = arith.constant 0 : index
    %7 = vector.load %arg8[%c0_3, %c0_4, %c0_5] : memref<2x8x128xf32, #tpu.memory_space<vmem>>, vector<1x8x128xf32>
    %8 = vector.shape_cast %7 : vector<1x8x128xf32> to vector<8x128xf32>
    %9 = arith.truncf %8 : vector<8x128xf32> to vector<8x128xbf16>
    %c0_6 = arith.constant 0 : index
    %c0_7 = arith.constant 0 : index
    %10 = vector.load %arg4[%c0_6, %c0_7] : memref<128x512xbf16, #tpu.memory_space<vmem>>, vector<128x512xbf16>
    %cst = arith.constant dense<0.000000e+00> : vector<8x512xf32>
    %11 = tpu.matmul %9, %10, %cst {dimension_numbers = #tpu.dot_dimension_numbers<[1], [0], [0], [1], [0, 0, 1, 1], [], []>} : vector<8x128xbf16>, vector<128x512xbf16>, vector<8x512xf32> -> vector<8x512xf32>
    %12 = arith.addf %6, %11 : vector<8x512xf32>
    %13 = vector.extract_strided_slice %12 {offsets = [0, 0], sizes = [8, 384], strides = [1, 1]} : vector<8x512xf32> to vector<8x384xf32>
    %cst_8 = arith.constant 5.000000e-01 : f32
    %14 = vector.broadcast %cst_8 : f32 to vector<8x384xf32>
    %15 = arith.mulf %14, %13 : vector<8x384xf32>
    %16 = math.tanh %15 : vector<8x384xf32>
    %cst_9 = arith.constant 1.000000e+00 : f32
    %17 = vector.broadcast %cst_9 : f32 to vector<8x384xf32>
    %18 = arith.addf %16, %17 : vector<8x384xf32>
    %cst_10 = arith.constant 5.000000e-01 : f32
    %19 = vector.broadcast %cst_10 : f32 to vector<8x384xf32>
    %20 = arith.mulf %19, %18 : vector<8x384xf32>
    %21 = vector.extract_strided_slice %20 {offsets = [0, 0], sizes = [8, 128], strides = [1, 1]} : vector<8x384xf32> to vector<8x128xf32>
    %22 = vector.extract_strided_slice %20 {offsets = [0, 128], sizes = [8, 128], strides = [1, 1]} : vector<8x384xf32> to vector<8x128xf32>
    %23 = vector.extract_strided_slice %20 {offsets = [0, 256], sizes = [8, 128], strides = [1, 1]} : vector<8x384xf32> to vector<8x128xf32>
    %24 = vector.extract_strided_slice %12 {offsets = [0, 384], sizes = [8, 128], strides = [1, 1]} : vector<8x512xf32> to vector<8x128xf32>
    %25 = math.tanh %24 : vector<8x128xf32>
    %c0_11 = arith.constant 0 : index
    %c0_12 = arith.constant 0 : index
    %c0_13 = arith.constant 0 : index
    %26 = vector.load %arg9[%c0_11, %c0_12, %c0_13] : memref<2x8x128xf32, #tpu.memory_space<vmem>>, vector<1x8x128xf32>
    %27 = vector.shape_cast %26 : vector<1x8x128xf32> to vector<8x128xf32>
    %28 = arith.mulf %22, %27 : vector<8x128xf32>
    %29 = arith.mulf %21, %25 : vector<8x128xf32>
    %30 = arith.addf %28, %29 : vector<8x128xf32>
    %31 = math.tanh %30 : vector<8x128xf32>
    %32 = arith.mulf %23, %31 : vector<8x128xf32>
    %c0_14 = arith.constant 0 : index
    %c0_15 = arith.constant 0 : index
    %c0_16 = arith.constant 0 : index
    %33 = vector.load %arg9[%c0_14, %c0_15, %c0_16] : memref<2x8x128xf32, #tpu.memory_space<vmem>>, vector<1x8x128xf32>
    %34 = vector.shape_cast %33 : vector<1x8x128xf32> to vector<8x128xf32>
    %35 = vector.shape_cast %30 : vector<8x128xf32> to vector<1x8x128xf32>
    tpu.vector_store %arg9[%c0_14, %c0_15, %c0_16], %35 {strides = array<i32>} : memref<2x8x128xf32, #tpu.memory_space<vmem>>, vector<1x8x128xf32>,
    %c0_17 = arith.constant 0 : index
    %c0_18 = arith.constant 0 : index
    %c0_19 = arith.constant 0 : index
    %36 = vector.load %arg8[%c0_17, %c0_18, %c0_19] : memref<2x8x128xf32, #tpu.memory_space<vmem>>, vector<1x8x128xf32>
    %37 = vector.shape_cast %36 : vector<1x8x128xf32> to vector<8x128xf32>
    %38 = vector.shape_cast %32 : vector<8x128xf32> to vector<1x8x128xf32>
    tpu.vector_store %arg8[%c0_17, %c0_18, %c0_19], %38 {strides = array<i32>} : memref<2x8x128xf32, #tpu.memory_space<vmem>>, vector<1x8x128xf32>,
    %39 = vector.shape_cast %32 : vector<8x128xf32> to vector<1x8x128xf32>
    %40 = arith.truncf %39 : vector<1x8x128xf32> to vector<1x8x128xbf16>
    %41 = arith.index_cast %c0_i32_1 : i32 to index
    %c0_20 = arith.constant 0 : index
    %c0_21 = arith.constant 0 : index
    %42 = vector.load %arg6[%41, %c0_20, %c0_21] : memref<7x8x128xbf16, #tpu.memory_space<vmem>>, vector<1x8x128xbf16>
    tpu.vector_store %arg6[%41, %c0_20, %c0_21], %40 {strides = array<i32>} : memref<7x8x128xbf16, #tpu.memory_space<vmem>>, vector<1x8x128xbf16>,
    %43 = arith.index_cast %c0_i32_1 : i32 to index
    %c0_22 = arith.constant 0 : index
    %c0_23 = arith.constant 0 : index
    %44 = vector.load %arg3[%43, %c0_22, %c0_23] : memref<7x8x512xbf16, #tpu.memory_space<vmem>>, vector<1x8x512xbf16>
    %45 = vector.shape_cast %44 : vector<1x8x512xbf16> to vector<8x512xbf16>
    %46 = arith.extf %45 : vector<8x512xbf16> to vector<8x512xf32>
    %c1 = arith.constant 1 : index
    %c0_24 = arith.constant 0 : index
    %c0_25 = arith.constant 0 : index
    %47 = vector.load %arg8[%c1, %c0_24, %c0_25] : memref<2x8x128xf32, #tpu.memory_space<vmem>>, vector<1x8x128xf32>
    %48 = vector.shape_cast %47 : vector<1x8x128xf32> to vector<8x128xf32>
    %49 = arith.truncf %48 : vector<8x128xf32> to vector<8x128xbf16>
    %c0_26 = arith.constant 0 : index
    %c0_27 = arith.constant 0 : index
    %50 = vector.load %arg5[%c0_26, %c0_27] : memref<128x512xbf16, #tpu.memory_space<vmem>>, vector<128x512xbf16>
    %cst_28 = arith.constant dense<0.000000e+00> : vector<8x512xf32>
    %51 = tpu.matmul %49, %50, %cst_28 {dimension_numbers = #tpu.dot_dimension_numbers<[1], [0], [0], [1], [0, 0, 1, 1], [], []>} : vector<8x128xbf16>, vector<128x512xbf16>, vector<8x512xf32> -> vector<8x512xf32>
    %52 = arith.addf %46, %51 : vector<8x512xf32>
    %53 = vector.extract_strided_slice %52 {offsets = [0, 0], sizes = [8, 384], strides = [1, 1]} : vector<8x512xf32> to vector<8x384xf32>
    %cst_29 = arith.constant 5.000000e-01 : f32
    %54 = vector.broadcast %cst_29 : f32 to vector<8x384xf32>
    %55 = arith.mulf %54, %53 : vector<8x384xf32>
    %56 = math.tanh %55 : vector<8x384xf32>
    %cst_30 = arith.constant 1.000000e+00 : f32
    %57 = vector.broadcast %cst_30 : f32 to vector<8x384xf32>
    %58 = arith.addf %56, %57 : vector<8x384xf32>
    %cst_31 = arith.constant 5.000000e-01 : f32
    %59 = vector.broadcast %cst_31 : f32 to vector<8x384xf32>
    %60 = arith.mulf %59, %58 : vector<8x384xf32>
    %61 = vector.extract_strided_slice %60 {offsets = [0, 0], sizes = [8, 128], strides = [1, 1]} : vector<8x384xf32> to vector<8x128xf32>
    %62 = vector.extract_strided_slice %60 {offsets = [0, 128], sizes = [8, 128], strides = [1, 1]} : vector<8x384xf32> to vector<8x128xf32>
    %63 = vector.extract_strided_slice %60 {offsets = [0, 256], sizes = [8, 128], strides = [1, 1]} : vector<8x384xf32> to vector<8x128xf32>
    %64 = vector.extract_strided_slice %52 {offsets = [0, 384], sizes = [8, 128], strides = [1, 1]} : vector<8x512xf32> to vector<8x128xf32>
    %65 = math.tanh %64 : vector<8x128xf32>
    %c1_32 = arith.constant 1 : index
    %c0_33 = arith.constant 0 : index
    %c0_34 = arith.constant 0 : index
    %66 = vector.load %arg9[%c1_32, %c0_33, %c0_34] : memref<2x8x128xf32, #tpu.memory_space<vmem>>, vector<1x8x128xf32>
    %67 = vector.shape_cast %66 : vector<1x8x128xf32> to vector<8x128xf32>
    %68 = arith.mulf %62, %67 : vector<8x128xf32>
    %69 = arith.mulf %61, %65 : vector<8x128xf32>
    %70 = arith.addf %68, %69 : vector<8x128xf32>
    %71 = math.tanh %70 : vector<8x128xf32>
    %72 = arith.mulf %63, %71 : vector<8x128xf32>
    %c1_35 = arith.constant 1 : index
    %c0_36 = arith.constant 0 : index
    %c0_37 = arith.constant 0 : index
    %73 = vector.load %arg9[%c1_35, %c0_36, %c0_37] : memref<2x8x128xf32, #tpu.memory_space<vmem>>, vector<1x8x128xf32>
    %74 = vector.shape_cast %73 : vector<1x8x128xf32> to vector<8x128xf32>
    %75 = vector.shape_cast %70 : vector<8x128xf32> to vector<1x8x128xf32>
    tpu.vector_store %arg9[%c1_35, %c0_36, %c0_37], %75 {strides = array<i32>} : memref<2x8x128xf32, #tpu.memory_space<vmem>>, vector<1x8x128xf32>,
    %c1_38 = arith.constant 1 : index
    %c0_39 = arith.constant 0 : index
    %c0_40 = arith.constant 0 : index
    %76 = vector.load %arg8[%c1_38, %c0_39, %c0_40] : memref<2x8x128xf32, #tpu.memory_space<vmem>>, vector<1x8x128xf32>
    %77 = vector.shape_cast %76 : vector<1x8x128xf32> to vector<8x128xf32>
    %78 = vector.shape_cast %72 : vector<8x128xf32> to vector<1x8x128xf32>
    tpu.vector_store %arg8[%c1_38, %c0_39, %c0_40], %78 {strides = array<i32>} : memref<2x8x128xf32, #tpu.memory_space<vmem>>, vector<1x8x128xf32>,
    %79 = vector.shape_cast %72 : vector<8x128xf32> to vector<1x8x128xf32>
    %80 = arith.truncf %79 : vector<1x8x128xf32> to vector<1x8x128xbf16>
    %81 = arith.index_cast %c0_i32_1 : i32 to index
    %c0_41 = arith.constant 0 : index
    %c0_42 = arith.constant 0 : index
    %82 = vector.load %arg7[%81, %c0_41, %c0_42] : memref<7x8x128xbf16, #tpu.memory_space<vmem>>, vector<1x8x128xbf16>
    tpu.vector_store %arg7[%81, %c0_41, %c0_42], %80 {strides = array<i32>} : memref<7x8x128xbf16, #tpu.memory_space<vmem>>, vector<1x8x128xbf16>,
    %c1_i32 = arith.constant 1 : i32
    %83 = arith.index_cast %c1_i32 : i32 to index
    %c0_43 = arith.constant 0 : index
    %c0_44 = arith.constant 0 : index
    %84 = vector.load %arg2[%83, %c0_43, %c0_44] : memref<7x8x512xbf16, #tpu.memory_space<vmem>>, vector<1x8x512xbf16>
    %85 = vector.shape_cast %84 : vector<1x8x512xbf16> to vector<8x512xbf16>
    %86 = arith.extf %85 : vector<8x512xbf16> to vector<8x512xf32>
    %c0_45 = arith.constant 0 : index
    %c0_46 = arith.constant 0 : index
    %c0_47 = arith.constant 0 : index
    %87 = vector.load %arg8[%c0_45, %c0_46, %c0_47] : memref<2x8x128xf32, #tpu.memory_space<vmem>>, vector<1x8x128xf32>
    %88 = vector.shape_cast %87 : vector<1x8x128xf32> to vector<8x128xf32>
    %89 = arith.truncf %88 : vector<8x128xf32> to vector<8x128xbf16>
    %c0_48 = arith.constant 0 : index
    %c0_49 = arith.constant 0 : index
    %90 = vector.load %arg4[%c0_48, %c0_49] : memref<128x512xbf16, #tpu.memory_space<vmem>>, vector<128x512xbf16>
    %cst_50 = arith.constant dense<0.000000e+00> : vector<8x512xf32>
    %91 = tpu.matmul %89, %90, %cst_50 {dimension_numbers = #tpu.dot_dimension_numbers<[1], [0], [0], [1], [0, 0, 1, 1], [], []>} : vector<8x128xbf16>, vector<128x512xbf16>, vector<8x512xf32> -> vector<8x512xf32>
    %92 = arith.addf %86, %91 : vector<8x512xf32>
    %93 = vector.extract_strided_slice %92 {offsets = [0, 0], sizes = [8, 384], strides = [1, 1]} : vector<8x512xf32> to vector<8x384xf32>
    %cst_51 = arith.constant 5.000000e-01 : f32
    %94 = vector.broadcast %cst_51 : f32 to vector<8x384xf32>
    %95 = arith.mulf %94, %93 : vector<8x384xf32>
    %96 = math.tanh %95 : vector<8x384xf32>
    %cst_52 = arith.constant 1.000000e+00 : f32
    %97 = vector.broadcast %cst_52 : f32 to vector<8x384xf32>
    %98 = arith.addf %96, %97 : vector<8x384xf32>
    %cst_53 = arith.constant 5.000000e-01 : f32
    %99 = vector.broadcast %cst_53 : f32 to vector<8x384xf32>
    %100 = arith.mulf %99, %98 : vector<8x384xf32>
    %101 = vector.extract_strided_slice %100 {offsets = [0, 0], sizes = [8, 128], strides = [1, 1]} : vector<8x384xf32> to vector<8x128xf32>
    %102 = vector.extract_strided_slice %100 {offsets = [0, 128], sizes = [8, 128], strides = [1, 1]} : vector<8x384xf32> to vector<8x128xf32>
    %103 = vector.extract_strided_slice %100 {offsets = [0, 256], sizes = [8, 128], strides = [1, 1]} : vector<8x384xf32> to vector<8x128xf32>
    %104 = vector.extract_strided_slice %92 {offsets = [0, 384], sizes = [8, 128], strides = [1, 1]} : vector<8x512xf32> to vector<8x128xf32>
    %105 = math.tanh %104 : vector<8x128xf32>
    %c0_54 = arith.constant 0 : index
    %c0_55 = arith.constant 0 : index
    %c0_56 = arith.constant 0 : index
    %106 = vector.load %arg9[%c0_54, %c0_55, %c0_56] : memref<2x8x128xf32, #tpu.memory_space<vmem>>, vector<1x8x128xf32>
    %107 = vector.shape_cast %106 : vector<1x8x128xf32> to vector<8x128xf32>
    %108 = arith.mulf %102, %107 : vector<8x128xf32>
    %109 = arith.mulf %101, %105 : vector<8x128xf32>
    %110 = arith.addf %108, %109 : vector<8x128xf32>
    %111 = math.tanh %110 : vector<8x128xf32>
    %112 = arith.mulf %103, %111 : vector<8x128xf32>
    %c0_57 = arith.constant 0 : index
    %c0_58 = arith.constant 0 : index
    %c0_59 = arith.constant 0 : index
    %113 = vector.load %arg9[%c0_57, %c0_58, %c0_59] : memref<2x8x128xf32, #tpu.memory_space<vmem>>, vector<1x8x128xf32>
    %114 = vector.shape_cast %113 : vector<1x8x128xf32> to vector<8x128xf32>
    %115 = vector.shape_cast %110 : vector<8x128xf32> to vector<1x8x128xf32>
    tpu.vector_store %arg9[%c0_57, %c0_58, %c0_59], %115 {strides = array<i32>} : memref<2x8x128xf32, #tpu.memory_space<vmem>>, vector<1x8x128xf32>,
    %c0_60 = arith.constant 0 : index
    %c0_61 = arith.constant 0 : index
    %c0_62 = arith.constant 0 : index
    %116 = vector.load %arg8[%c0_60, %c0_61, %c0_62] : memref<2x8x128xf32, #tpu.memory_space<vmem>>, vector<1x8x128xf32>
    %117 = vector.shape_cast %116 : vector<1x8x128xf32> to vector<8x128xf32>
    %118 = vector.shape_cast %112 : vector<8x128xf32> to vector<1x8x128xf32>
    tpu.vector_store %arg8[%c0_60, %c0_61, %c0_62], %118 {strides = array<i32>} : memref<2x8x128xf32, #tpu.memory_space<vmem>>, vector<1x8x128xf32>,
    %119 = vector.shape_cast %112 : vector<8x128xf32> to vector<1x8x128xf32>
    %120 = arith.truncf %119 : vector<1x8x128xf32> to vector<1x8x128xbf16>
    %121 = arith.index_cast %c1_i32 : i32 to index
    %c0_63 = arith.constant 0 : index
    %c0_64 = arith.constant 0 : index
    %122 = vector.load %arg6[%121, %c0_63, %c0_64] : memref<7x8x128xbf16, #tpu.memory_space<vmem>>, vector<1x8x128xbf16>
    tpu.vector_store %arg6[%121, %c0_63, %c0_64], %120 {strides = array<i32>} : memref<7x8x128xbf16, #tpu.memory_space<vmem>>, vector<1x8x128xbf16>,
    %123 = arith.index_cast %c1_i32 : i32 to index
    %c0_65 = arith.constant 0 : index
    %c0_66 = arith.constant 0 : index
    %124 = vector.load %arg3[%123, %c0_65, %c0_66] : memref<7x8x512xbf16, #tpu.memory_space<vmem>>, vector<1x8x512xbf16>
    %125 = vector.shape_cast %124 : vector<1x8x512xbf16> to vector<8x512xbf16>
    %126 = arith.extf %125 : vector<8x512xbf16> to vector<8x512xf32>
    %c1_67 = arith.constant 1 : index
    %c0_68 = arith.constant 0 : index
    %c0_69 = arith.constant 0 : index
    %127 = vector.load %arg8[%c1_67, %c0_68, %c0_69] : memref<2x8x128xf32, #tpu.memory_space<vmem>>, vector<1x8x128xf32>
    %128 = vector.shape_cast %127 : vector<1x8x128xf32> to vector<8x128xf32>
    %129 = arith.truncf %128 : vector<8x128xf32> to vector<8x128xbf16>
    %c0_70 = arith.constant 0 : index
    %c0_71 = arith.constant 0 : index
    %130 = vector.load %arg5[%c0_70, %c0_71] : memref<128x512xbf16, #tpu.memory_space<vmem>>, vector<128x512xbf16>
    %cst_72 = arith.constant dense<0.000000e+00> : vector<8x512xf32>
    %131 = tpu.matmul %129, %130, %cst_72 {dimension_numbers = #tpu.dot_dimension_numbers<[1], [0], [0], [1], [0, 0, 1, 1], [], []>} : vector<8x128xbf16>, vector<128x512xbf16>, vector<8x512xf32> -> vector<8x512xf32>
    %132 = arith.addf %126, %131 : vector<8x512xf32>
    %133 = vector.extract_strided_slice %132 {offsets = [0, 0], sizes = [8, 384], strides = [1, 1]} : vector<8x512xf32> to vector<8x384xf32>
    %cst_73 = arith.constant 5.000000e-01 : f32
    %134 = vector.broadcast %cst_73 : f32 to vector<8x384xf32>
    %135 = arith.mulf %134, %133 : vector<8x384xf32>
    %136 = math.tanh %135 : vector<8x384xf32>
    %cst_74 = arith.constant 1.000000e+00 : f32
    %137 = vector.broadcast %cst_74 : f32 to vector<8x384xf32>
    %138 = arith.addf %136, %137 : vector<8x384xf32>
    %cst_75 = arith.constant 5.000000e-01 : f32
    %139 = vector.broadcast %cst_75 : f32 to vector<8x384xf32>
    %140 = arith.mulf %139, %138 : vector<8x384xf32>
    %141 = vector.extract_strided_slice %140 {offsets = [0, 0], sizes = [8, 128], strides = [1, 1]} : vector<8x384xf32> to vector<8x128xf32>
    %142 = vector.extract_strided_slice %140 {offsets = [0, 128], sizes = [8, 128], strides = [1, 1]} : vector<8x384xf32> to vector<8x128xf32>
    %143 = vector.extract_strided_slice %140 {offsets = [0, 256], sizes = [8, 128], strides = [1, 1]} : vector<8x384xf32> to vector<8x128xf32>
    %144 = vector.extract_strided_slice %132 {offsets = [0, 384], sizes = [8, 128], strides = [1, 1]} : vector<8x512xf32> to vector<8x128xf32>
    %145 = math.tanh %144 : vector<8x128xf32>
    %c1_76 = arith.constant 1 : index
    %c0_77 = arith.constant 0 : index
    %c0_78 = arith.constant 0 : index
    %146 = vector.load %arg9[%c1_76, %c0_77, %c0_78] : memref<2x8x128xf32, #tpu.memory_space<vmem>>, vector<1x8x128xf32>
    %147 = vector.shape_cast %146 : vector<1x8x128xf32> to vector<8x128xf32>
    %148 = arith.mulf %142, %147 : vector<8x128xf32>
    %149 = arith.mulf %141, %145 : vector<8x128xf32>
    %150 = arith.addf %148, %149 : vector<8x128xf32>
    %151 = math.tanh %150 : vector<8x128xf32>
    %152 = arith.mulf %143, %151 : vector<8x128xf32>
    %c1_79 = arith.constant 1 : index
    %c0_80 = arith.constant 0 : index
    %c0_81 = arith.constant 0 : index
    %153 = vector.load %arg9[%c1_79, %c0_80, %c0_81] : memref<2x8x128xf32, #tpu.memory_space<vmem>>, vector<1x8x128xf32>
    %154 = vector.shape_cast %153 : vector<1x8x128xf32> to vector<8x128xf32>
    %155 = vector.shape_cast %150 : vector<8x128xf32> to vector<1x8x128xf32>
    tpu.vector_store %arg9[%c1_79, %c0_80, %c0_81], %155 {strides = array<i32>} : memref<2x8x128xf32, #tpu.memory_space<vmem>>, vector<1x8x128xf32>,
    %c1_82 = arith.constant 1 : index
    %c0_83 = arith.constant 0 : index
    %c0_84 = arith.constant 0 : index
    %156 = vector.load %arg8[%c1_82, %c0_83, %c0_84] : memref<2x8x128xf32, #tpu.memory_space<vmem>>, vector<1x8x128xf32>
    %157 = vector.shape_cast %156 : vector<1x8x128xf32> to vector<8x128xf32>
    %158 = vector.shape_cast %152 : vector<8x128xf32> to vector<1x8x128xf32>
    tpu.vector_store %arg8[%c1_82, %c0_83, %c0_84], %158 {strides = array<i32>} : memref<2x8x128xf32, #tpu.memory_space<vmem>>, vector<1x8x128xf32>,
    %159 = vector.shape_cast %152 : vector<8x128xf32> to vector<1x8x128xf32>
    %160 = arith.truncf %159 : vector<1x8x128xf32> to vector<1x8x128xbf16>
    %161 = arith.index_cast %c1_i32 : i32 to index
    %c0_85 = arith.constant 0 : index
    %c0_86 = arith.constant 0 : index
    %162 = vector.load %arg7[%161, %c0_85, %c0_86] : memref<7x8x128xbf16, #tpu.memory_space<vmem>>, vector<1x8x128xbf16>
    tpu.vector_store %arg7[%161, %c0_85, %c0_86], %160 {strides = array<i32>} : memref<7x8x128xbf16, #tpu.memory_space<vmem>>, vector<1x8x128xbf16>,
    %c2_i32 = arith.constant 2 : i32
    %163 = arith.index_cast %c2_i32 : i32 to index
    %c0_87 = arith.constant 0 : index
    %c0_88 = arith.constant 0 : index
    %164 = vector.load %arg2[%163, %c0_87, %c0_88] : memref<7x8x512xbf16, #tpu.memory_space<vmem>>, vector<1x8x512xbf16>
    %165 = vector.shape_cast %164 : vector<1x8x512xbf16> to vector<8x512xbf16>
    %166 = arith.extf %165 : vector<8x512xbf16> to vector<8x512xf32>
    %c0_89 = arith.constant 0 : index
    %c0_90 = arith.constant 0 : index
    %c0_91 = arith.constant 0 : index
    %167 = vector.load %arg8[%c0_89, %c0_90, %c0_91] : memref<2x8x128xf32, #tpu.memory_space<vmem>>, vector<1x8x128xf32>
    %168 = vector.shape_cast %167 : vector<1x8x128xf32> to vector<8x128xf32>
    %169 = arith.truncf %168 : vector<8x128xf32> to vector<8x128xbf16>
    %c0_92 = arith.constant 0 : index
    %c0_93 = arith.constant 0 : index
    %170 = vector.load %arg4[%c0_92, %c0_93] : memref<128x512xbf16, #tpu.memory_space<vmem>>, vector<128x512xbf16>
    %cst_94 = arith.constant dense<0.000000e+00> : vector<8x512xf32>
    %171 = tpu.matmul %169, %170, %cst_94 {dimension_numbers = #tpu.dot_dimension_numbers<[1], [0], [0], [1], [0, 0, 1, 1], [], []>} : vector<8x128xbf16>, vector<128x512xbf16>, vector<8x512xf32> -> vector<8x512xf32>
    %172 = arith.addf %166, %171 : vector<8x512xf32>
    %173 = vector.extract_strided_slice %172 {offsets = [0, 0], sizes = [8, 384], strides = [1, 1]} : vector<8x512xf32> to vector<8x384xf32>
    %cst_95 = arith.constant 5.000000e-01 : f32
    %174 = vector.broadcast %cst_95 : f32 to vector<8x384xf32>
    %175 = arith.mulf %174, %173 : vector<8x384xf32>
    %176 = math.tanh %175 : vector<8x384xf32>
    %cst_96 = arith.constant 1.000000e+00 : f32
    %177 = vector.broadcast %cst_96 : f32 to vector<8x384xf32>
    %178 = arith.addf %176, %177 : vector<8x384xf32>
    %cst_97 = arith.constant 5.000000e-01 : f32
    %179 = vector.broadcast %cst_97 : f32 to vector<8x384xf32>
    %180 = arith.mulf %179, %178 : vector<8x384xf32>
    %181 = vector.extract_strided_slice %180 {offsets = [0, 0], sizes = [8, 128], strides = [1, 1]} : vector<8x384xf32> to vector<8x128xf32>
    %182 = vector.extract_strided_slice %180 {offsets = [0, 128], sizes = [8, 128], strides = [1, 1]} : vector<8x384xf32> to vector<8x128xf32>
    %183 = vector.extract_strided_slice %180 {offsets = [0, 256], sizes = [8, 128], strides = [1, 1]} : vector<8x384xf32> to vector<8x128xf32>
    %184 = vector.extract_strided_slice %172 {offsets = [0, 384], sizes = [8, 128], strides = [1, 1]} : vector<8x512xf32> to vector<8x128xf32>
    %185 = math.tanh %184 : vector<8x128xf32>
    %c0_98 = arith.constant 0 : index
    %c0_99 = arith.constant 0 : index
    %c0_100 = arith.constant 0 : index
    %186 = vector.load %arg9[%c0_98, %c0_99, %c0_100] : memref<2x8x128xf32, #tpu.memory_space<vmem>>, vector<1x8x128xf32>
    %187 = vector.shape_cast %186 : vector<1x8x128xf32> to vector<8x128xf32>
    %188 = arith.mulf %182, %187 : vector<8x128xf32>
    %189 = arith.mulf %181, %185 : vector<8x128xf32>
    %190 = arith.addf %188, %189 : vector<8x128xf32>
    %191 = math.tanh %190 : vector<8x128xf32>
    %192 = arith.mulf %183, %191 : vector<8x128xf32>
    %c0_101 = arith.constant 0 : index
    %c0_102 = arith.constant 0 : index
    %c0_103 = arith.constant 0 : index
    %193 = vector.load %arg9[%c0_101, %c0_102, %c0_103] : memref<2x8x128xf32, #tpu.memory_space<vmem>>, vector<1x8x128xf32>
    %194 = vector.shape_cast %193 : vector<1x8x128xf32> to vector<8x128xf32>
    %195 = vector.shape_cast %190 : vector<8x128xf32> to vector<1x8x128xf32>
    tpu.vector_store %arg9[%c0_101, %c0_102, %c0_103], %195 {strides = array<i32>} : memref<2x8x128xf32, #tpu.memory_space<vmem>>, vector<1x8x128xf32>,
    %c0_104 = arith.constant 0 : index
    %c0_105 = arith.constant 0 : index
    %c0_106 = arith.constant 0 : index
    %196 = vector.load %arg8[%c0_104, %c0_105, %c0_106] : memref<2x8x128xf32, #tpu.memory_space<vmem>>, vector<1x8x128xf32>
    %197 = vector.shape_cast %196 : vector<1x8x128xf32> to vector<8x128xf32>
    %198 = vector.shape_cast %192 : vector<8x128xf32> to vector<1x8x128xf32>
    tpu.vector_store %arg8[%c0_104, %c0_105, %c0_106], %198 {strides = array<i32>} : memref<2x8x128xf32, #tpu.memory_space<vmem>>, vector<1x8x128xf32>,
    %199 = vector.shape_cast %192 : vector<8x128xf32> to vector<1x8x128xf32>
    %200 = arith.truncf %199 : vector<1x8x128xf32> to vector<1x8x128xbf16>
    %201 = arith.index_cast %c2_i32 : i32 to index
    %c0_107 = arith.constant 0 : index
    %c0_108 = arith.constant 0 : index
    %202 = vector.load %arg6[%201, %c0_107, %c0_108] : memref<7x8x128xbf16, #tpu.memory_space<vmem>>, vector<1x8x128xbf16>
    tpu.vector_store %arg6[%201, %c0_107, %c0_108], %200 {strides = array<i32>} : memref<7x8x128xbf16, #tpu.memory_space<vmem>>, vector<1x8x128xbf16>,
    %203 = arith.index_cast %c2_i32 : i32 to index
    %c0_109 = arith.constant 0 : index
    %c0_110 = arith.constant 0 : index
    %204 = vector.load %arg3[%203, %c0_109, %c0_110] : memref<7x8x512xbf16, #tpu.memory_space<vmem>>, vector<1x8x512xbf16>
    %205 = vector.shape_cast %204 : vector<1x8x512xbf16> to vector<8x512xbf16>
    %206 = arith.extf %205 : vector<8x512xbf16> to vector<8x512xf32>
    %c1_111 = arith.constant 1 : index
    %c0_112 = arith.constant 0 : index
    %c0_113 = arith.constant 0 : index
    %207 = vector.load %arg8[%c1_111, %c0_112, %c0_113] : memref<2x8x128xf32, #tpu.memory_space<vmem>>, vector<1x8x128xf32>
    %208 = vector.shape_cast %207 : vector<1x8x128xf32> to vector<8x128xf32>
    %209 = arith.truncf %208 : vector<8x128xf32> to vector<8x128xbf16>
    %c0_114 = arith.constant 0 : index
    %c0_115 = arith.constant 0 : index
    %210 = vector.load %arg5[%c0_114, %c0_115] : memref<128x512xbf16, #tpu.memory_space<vmem>>, vector<128x512xbf16>
    %cst_116 = arith.constant dense<0.000000e+00> : vector<8x512xf32>
    %211 = tpu.matmul %209, %210, %cst_116 {dimension_numbers = #tpu.dot_dimension_numbers<[1], [0], [0], [1], [0, 0, 1, 1], [], []>} : vector<8x128xbf16>, vector<128x512xbf16>, vector<8x512xf32> -> vector<8x512xf32>
    %212 = arith.addf %206, %211 : vector<8x512xf32>
    %213 = vector.extract_strided_slice %212 {offsets = [0, 0], sizes = [8, 384], strides = [1, 1]} : vector<8x512xf32> to vector<8x384xf32>
    %cst_117 = arith.constant 5.000000e-01 : f32
    %214 = vector.broadcast %cst_117 : f32 to vector<8x384xf32>
    %215 = arith.mulf %214, %213 : vector<8x384xf32>
    %216 = math.tanh %215 : vector<8x384xf32>
    %cst_118 = arith.constant 1.000000e+00 : f32
    %217 = vector.broadcast %cst_118 : f32 to vector<8x384xf32>
    %218 = arith.addf %216, %217 : vector<8x384xf32>
    %cst_119 = arith.constant 5.000000e-01 : f32
    %219 = vector.broadcast %cst_119 : f32 to vector<8x384xf32>
    %220 = arith.mulf %219, %218 : vector<8x384xf32>
    %221 = vector.extract_strided_slice %220 {offsets = [0, 0], sizes = [8, 128], strides = [1, 1]} : vector<8x384xf32> to vector<8x128xf32>
    %222 = vector.extract_strided_slice %220 {offsets = [0, 128], sizes = [8, 128], strides = [1, 1]} : vector<8x384xf32> to vector<8x128xf32>
    %223 = vector.extract_strided_slice %220 {offsets = [0, 256], sizes = [8, 128], strides = [1, 1]} : vector<8x384xf32> to vector<8x128xf32>
    %224 = vector.extract_strided_slice %212 {offsets = [0, 384], sizes = [8, 128], strides = [1, 1]} : vector<8x512xf32> to vector<8x128xf32>
    %225 = math.tanh %224 : vector<8x128xf32>
    %c1_120 = arith.constant 1 : index
    %c0_121 = arith.constant 0 : index
    %c0_122 = arith.constant 0 : index
    %226 = vector.load %arg9[%c1_120, %c0_121, %c0_122] : memref<2x8x128xf32, #tpu.memory_space<vmem>>, vector<1x8x128xf32>
    %227 = vector.shape_cast %226 : vector<1x8x128xf32> to vector<8x128xf32>
    %228 = arith.mulf %222, %227 : vector<8x128xf32>
    %229 = arith.mulf %221, %225 : vector<8x128xf32>
    %230 = arith.addf %228, %229 : vector<8x128xf32>
    %231 = math.tanh %230 : vector<8x128xf32>
    %232 = arith.mulf %223, %231 : vector<8x128xf32>
    %c1_123 = arith.constant 1 : index
    %c0_124 = arith.constant 0 : index
    %c0_125 = arith.constant 0 : index
    %233 = vector.load %arg9[%c1_123, %c0_124, %c0_125] : memref<2x8x128xf32, #tpu.memory_space<vmem>>, vector<1x8x128xf32>
    %234 = vector.shape_cast %233 : vector<1x8x128xf32> to vector<8x128xf32>
    %235 = vector.shape_cast %230 : vector<8x128xf32> to vector<1x8x128xf32>
    tpu.vector_store %arg9[%c1_123, %c0_124, %c0_125], %235 {strides = array<i32>} : memref<2x8x128xf32, #tpu.memory_space<vmem>>, vector<1x8x128xf32>,
    %c1_126 = arith.constant 1 : index
    %c0_127 = arith.constant 0 : index
    %c0_128 = arith.constant 0 : index
    %236 = vector.load %arg8[%c1_126, %c0_127, %c0_128] : memref<2x8x128xf32, #tpu.memory_space<vmem>>, vector<1x8x128xf32>
    %237 = vector.shape_cast %236 : vector<1x8x128xf32> to vector<8x128xf32>
    %238 = vector.shape_cast %232 : vector<8x128xf32> to vector<1x8x128xf32>
    tpu.vector_store %arg8[%c1_126, %c0_127, %c0_128], %238 {strides = array<i32>} : memref<2x8x128xf32, #tpu.memory_space<vmem>>, vector<1x8x128xf32>,
    %239 = vector.shape_cast %232 : vector<8x128xf32> to vector<1x8x128xf32>
    %240 = arith.truncf %239 : vector<1x8x128xf32> to vector<1x8x128xbf16>
    %241 = arith.index_cast %c2_i32 : i32 to index
    %c0_129 = arith.constant 0 : index
    %c0_130 = arith.constant 0 : index
    %242 = vector.load %arg7[%241, %c0_129, %c0_130] : memref<7x8x128xbf16, #tpu.memory_space<vmem>>, vector<1x8x128xbf16>
    tpu.vector_store %arg7[%241, %c0_129, %c0_130], %240 {strides = array<i32>} : memref<7x8x128xbf16, #tpu.memory_space<vmem>>, vector<1x8x128xbf16>,
    %c3_i32 = arith.constant 3 : i32
    %243 = arith.index_cast %c3_i32 : i32 to index
    %c0_131 = arith.constant 0 : index
    %c0_132 = arith.constant 0 : index
    %244 = vector.load %arg2[%243, %c0_131, %c0_132] : memref<7x8x512xbf16, #tpu.memory_space<vmem>>, vector<1x8x512xbf16>
    %245 = vector.shape_cast %244 : vector<1x8x512xbf16> to vector<8x512xbf16>
    %246 = arith.extf %245 : vector<8x512xbf16> to vector<8x512xf32>
    %c0_133 = arith.constant 0 : index
    %c0_134 = arith.constant 0 : index
    %c0_135 = arith.constant 0 : index
    %247 = vector.load %arg8[%c0_133, %c0_134, %c0_135] : memref<2x8x128xf32, #tpu.memory_space<vmem>>, vector<1x8x128xf32>
    %248 = vector.shape_cast %247 : vector<1x8x128xf32> to vector<8x128xf32>
    %249 = arith.truncf %248 : vector<8x128xf32> to vector<8x128xbf16>
    %c0_136 = arith.constant 0 : index
    %c0_137 = arith.constant 0 : index
    %250 = vector.load %arg4[%c0_136, %c0_137] : memref<128x512xbf16, #tpu.memory_space<vmem>>, vector<128x512xbf16>
    %cst_138 = arith.constant dense<0.000000e+00> : vector<8x512xf32>
    %251 = tpu.matmul %249, %250, %cst_138 {dimension_numbers = #tpu.dot_dimension_numbers<[1], [0], [0], [1], [0, 0, 1, 1], [], []>} : vector<8x128xbf16>, vector<128x512xbf16>, vector<8x512xf32> -> vector<8x512xf32>
    %252 = arith.addf %246, %251 : vector<8x512xf32>
    %253 = vector.extract_strided_slice %252 {offsets = [0, 0], sizes = [8, 384], strides = [1, 1]} : vector<8x512xf32> to vector<8x384xf32>
    %cst_139 = arith.constant 5.000000e-01 : f32
    %254 = vector.broadcast %cst_139 : f32 to vector<8x384xf32>
    %255 = arith.mulf %254, %253 : vector<8x384xf32>
    %256 = math.tanh %255 : vector<8x384xf32>
    %cst_140 = arith.constant 1.000000e+00 : f32
    %257 = vector.broadcast %cst_140 : f32 to vector<8x384xf32>
    %258 = arith.addf %256, %257 : vector<8x384xf32>
    %cst_141 = arith.constant 5.000000e-01 : f32
    %259 = vector.broadcast %cst_141 : f32 to vector<8x384xf32>
    %260 = arith.mulf %259, %258 : vector<8x384xf32>
    %261 = vector.extract_strided_slice %260 {offsets = [0, 0], sizes = [8, 128], strides = [1, 1]} : vector<8x384xf32> to vector<8x128xf32>
    %262 = vector.extract_strided_slice %260 {offsets = [0, 128], sizes = [8, 128], strides = [1, 1]} : vector<8x384xf32> to vector<8x128xf32>
    %263 = vector.extract_strided_slice %260 {offsets = [0, 256], sizes = [8, 128], strides = [1, 1]} : vector<8x384xf32> to vector<8x128xf32>
    %264 = vector.extract_strided_slice %252 {offsets = [0, 384], sizes = [8, 128], strides = [1, 1]} : vector<8x512xf32> to vector<8x128xf32>
    %265 = math.tanh %264 : vector<8x128xf32>
    %c0_142 = arith.constant 0 : index
    %c0_143 = arith.constant 0 : index
    %c0_144 = arith.constant 0 : index
    %266 = vector.load %arg9[%c0_142, %c0_143, %c0_144] : memref<2x8x128xf32, #tpu.memory_space<vmem>>, vector<1x8x128xf32>
    %267 = vector.shape_cast %266 : vector<1x8x128xf32> to vector<8x128xf32>
    %268 = arith.mulf %262, %267 : vector<8x128xf32>
    %269 = arith.mulf %261, %265 : vector<8x128xf32>
    %270 = arith.addf %268, %269 : vector<8x128xf32>
    %271 = math.tanh %270 : vector<8x128xf32>
    %272 = arith.mulf %263, %271 : vector<8x128xf32>
    %c0_145 = arith.constant 0 : index
    %c0_146 = arith.constant 0 : index
    %c0_147 = arith.constant 0 : index
    %273 = vector.load %arg9[%c0_145, %c0_146, %c0_147] : memref<2x8x128xf32, #tpu.memory_space<vmem>>, vector<1x8x128xf32>
    %274 = vector.shape_cast %273 : vector<1x8x128xf32> to vector<8x128xf32>
    %275 = vector.shape_cast %270 : vector<8x128xf32> to vector<1x8x128xf32>
    tpu.vector_store %arg9[%c0_145, %c0_146, %c0_147], %275 {strides = array<i32>} : memref<2x8x128xf32, #tpu.memory_space<vmem>>, vector<1x8x128xf32>,
    %c0_148 = arith.constant 0 : index
    %c0_149 = arith.constant 0 : index
    %c0_150 = arith.constant 0 : index
    %276 = vector.load %arg8[%c0_148, %c0_149, %c0_150] : memref<2x8x128xf32, #tpu.memory_space<vmem>>, vector<1x8x128xf32>
    %277 = vector.shape_cast %276 : vector<1x8x128xf32> to vector<8x128xf32>
    %278 = vector.shape_cast %272 : vector<8x128xf32> to vector<1x8x128xf32>
    tpu.vector_store %arg8[%c0_148, %c0_149, %c0_150], %278 {strides = array<i32>} : memref<2x8x128xf32, #tpu.memory_space<vmem>>, vector<1x8x128xf32>,
    %279 = vector.shape_cast %272 : vector<8x128xf32> to vector<1x8x128xf32>
    %280 = arith.truncf %279 : vector<1x8x128xf32> to vector<1x8x128xbf16>
    %281 = arith.index_cast %c3_i32 : i32 to index
    %c0_151 = arith.constant 0 : index
    %c0_152 = arith.constant 0 : index
    %282 = vector.load %arg6[%281, %c0_151, %c0_152] : memref<7x8x128xbf16, #tpu.memory_space<vmem>>, vector<1x8x128xbf16>
    tpu.vector_store %arg6[%281, %c0_151, %c0_152], %280 {strides = array<i32>} : memref<7x8x128xbf16, #tpu.memory_space<vmem>>, vector<1x8x128xbf16>,
    %283 = arith.index_cast %c3_i32 : i32 to index
    %c0_153 = arith.constant 0 : index
    %c0_154 = arith.constant 0 : index
    %284 = vector.load %arg3[%283, %c0_153, %c0_154] : memref<7x8x512xbf16, #tpu.memory_space<vmem>>, vector<1x8x512xbf16>
    %285 = vector.shape_cast %284 : vector<1x8x512xbf16> to vector<8x512xbf16>
    %286 = arith.extf %285 : vector<8x512xbf16> to vector<8x512xf32>
    %c1_155 = arith.constant 1 : index
    %c0_156 = arith.constant 0 : index
    %c0_157 = arith.constant 0 : index
    %287 = vector.load %arg8[%c1_155, %c0_156, %c0_157] : memref<2x8x128xf32, #tpu.memory_space<vmem>>, vector<1x8x128xf32>
    %288 = vector.shape_cast %287 : vector<1x8x128xf32> to vector<8x128xf32>
    %289 = arith.truncf %288 : vector<8x128xf32> to vector<8x128xbf16>
    %c0_158 = arith.constant 0 : index
    %c0_159 = arith.constant 0 : index
    %290 = vector.load %arg5[%c0_158, %c0_159] : memref<128x512xbf16, #tpu.memory_space<vmem>>, vector<128x512xbf16>
    %cst_160 = arith.constant dense<0.000000e+00> : vector<8x512xf32>
    %291 = tpu.matmul %289, %290, %cst_160 {dimension_numbers = #tpu.dot_dimension_numbers<[1], [0], [0], [1], [0, 0, 1, 1], [], []>} : vector<8x128xbf16>, vector<128x512xbf16>, vector<8x512xf32> -> vector<8x512xf32>
    %292 = arith.addf %286, %291 : vector<8x512xf32>
    %293 = vector.extract_strided_slice %292 {offsets = [0, 0], sizes = [8, 384], strides = [1, 1]} : vector<8x512xf32> to vector<8x384xf32>
    %cst_161 = arith.constant 5.000000e-01 : f32
    %294 = vector.broadcast %cst_161 : f32 to vector<8x384xf32>
    %295 = arith.mulf %294, %293 : vector<8x384xf32>
    %296 = math.tanh %295 : vector<8x384xf32>
    %cst_162 = arith.constant 1.000000e+00 : f32
    %297 = vector.broadcast %cst_162 : f32 to vector<8x384xf32>
    %298 = arith.addf %296, %297 : vector<8x384xf32>
    %cst_163 = arith.constant 5.000000e-01 : f32
    %299 = vector.broadcast %cst_163 : f32 to vector<8x384xf32>
    %300 = arith.mulf %299, %298 : vector<8x384xf32>
    %301 = vector.extract_strided_slice %300 {offsets = [0, 0], sizes = [8, 128], strides = [1, 1]} : vector<8x384xf32> to vector<8x128xf32>
    %302 = vector.extract_strided_slice %300 {offsets = [0, 128], sizes = [8, 128], strides = [1, 1]} : vector<8x384xf32> to vector<8x128xf32>
    %303 = vector.extract_strided_slice %300 {offsets = [0, 256], sizes = [8, 128], strides = [1, 1]} : vector<8x384xf32> to vector<8x128xf32>
    %304 = vector.extract_strided_slice %292 {offsets = [0, 384], sizes = [8, 128], strides = [1, 1]} : vector<8x512xf32> to vector<8x128xf32>
    %305 = math.tanh %304 : vector<8x128xf32>
    %c1_164 = arith.constant 1 : index
    %c0_165 = arith.constant 0 : index
    %c0_166 = arith.constant 0 : index
    %306 = vector.load %arg9[%c1_164, %c0_165, %c0_166] : memref<2x8x128xf32, #tpu.memory_space<vmem>>, vector<1x8x128xf32>
    %307 = vector.shape_cast %306 : vector<1x8x128xf32> to vector<8x128xf32>
    %308 = arith.mulf %302, %307 : vector<8x128xf32>
    %309 = arith.mulf %301, %305 : vector<8x128xf32>
    %310 = arith.addf %308, %309 : vector<8x128xf32>
    %311 = math.tanh %310 : vector<8x128xf32>
    %312 = arith.mulf %303, %311 : vector<8x128xf32>
    %c1_167 = arith.constant 1 : index
    %c0_168 = arith.constant 0 : index
    %c0_169 = arith.constant 0 : index
    %313 = vector.load %arg9[%c1_167, %c0_168, %c0_169] : memref<2x8x128xf32, #tpu.memory_space<vmem>>, vector<1x8x128xf32>
    %314 = vector.shape_cast %313 : vector<1x8x128xf32> to vector<8x128xf32>
    %315 = vector.shape_cast %310 : vector<8x128xf32> to vector<1x8x128xf32>
    tpu.vector_store %arg9[%c1_167, %c0_168, %c0_169], %315 {strides = array<i32>} : memref<2x8x128xf32, #tpu.memory_space<vmem>>, vector<1x8x128xf32>,
    %c1_170 = arith.constant 1 : index
    %c0_171 = arith.constant 0 : index
    %c0_172 = arith.constant 0 : index
    %316 = vector.load %arg8[%c1_170, %c0_171, %c0_172] : memref<2x8x128xf32, #tpu.memory_space<vmem>>, vector<1x8x128xf32>
    %317 = vector.shape_cast %316 : vector<1x8x128xf32> to vector<8x128xf32>
    %318 = vector.shape_cast %312 : vector<8x128xf32> to vector<1x8x128xf32>
    tpu.vector_store %arg8[%c1_170, %c0_171, %c0_172], %318 {strides = array<i32>} : memref<2x8x128xf32, #tpu.memory_space<vmem>>, vector<1x8x128xf32>,
    %319 = vector.shape_cast %312 : vector<8x128xf32> to vector<1x8x128xf32>
    %320 = arith.truncf %319 : vector<1x8x128xf32> to vector<1x8x128xbf16>
    %321 = arith.index_cast %c3_i32 : i32 to index
    %c0_173 = arith.constant 0 : index
    %c0_174 = arith.constant 0 : index
    %322 = vector.load %arg7[%321, %c0_173, %c0_174] : memref<7x8x128xbf16, #tpu.memory_space<vmem>>, vector<1x8x128xbf16>
    tpu.vector_store %arg7[%321, %c0_173, %c0_174], %320 {strides = array<i32>} : memref<7x8x128xbf16, #tpu.memory_space<vmem>>, vector<1x8x128xbf16>,
    %c4_i32 = arith.constant 4 : i32
    %323 = arith.index_cast %c4_i32 : i32 to index
    %c0_175 = arith.constant 0 : index
    %c0_176 = arith.constant 0 : index
    %324 = vector.load %arg2[%323, %c0_175, %c0_176] : memref<7x8x512xbf16, #tpu.memory_space<vmem>>, vector<1x8x512xbf16>
    %325 = vector.shape_cast %324 : vector<1x8x512xbf16> to vector<8x512xbf16>
    %326 = arith.extf %325 : vector<8x512xbf16> to vector<8x512xf32>
    %c0_177 = arith.constant 0 : index
    %c0_178 = arith.constant 0 : index
    %c0_179 = arith.constant 0 : index
    %327 = vector.load %arg8[%c0_177, %c0_178, %c0_179] : memref<2x8x128xf32, #tpu.memory_space<vmem>>, vector<1x8x128xf32>
    %328 = vector.shape_cast %327 : vector<1x8x128xf32> to vector<8x128xf32>
    %329 = arith.truncf %328 : vector<8x128xf32> to vector<8x128xbf16>
    %c0_180 = arith.constant 0 : index
    %c0_181 = arith.constant 0 : index
    %330 = vector.load %arg4[%c0_180, %c0_181] : memref<128x512xbf16, #tpu.memory_space<vmem>>, vector<128x512xbf16>
    %cst_182 = arith.constant dense<0.000000e+00> : vector<8x512xf32>
    %331 = tpu.matmul %329, %330, %cst_182 {dimension_numbers = #tpu.dot_dimension_numbers<[1], [0], [0], [1], [0, 0, 1, 1], [], []>} : vector<8x128xbf16>, vector<128x512xbf16>, vector<8x512xf32> -> vector<8x512xf32>
    %332 = arith.addf %326, %331 : vector<8x512xf32>
    %333 = vector.extract_strided_slice %332 {offsets = [0, 0], sizes = [8, 384], strides = [1, 1]} : vector<8x512xf32> to vector<8x384xf32>
    %cst_183 = arith.constant 5.000000e-01 : f32
    %334 = vector.broadcast %cst_183 : f32 to vector<8x384xf32>
    %335 = arith.mulf %334, %333 : vector<8x384xf32>
    %336 = math.tanh %335 : vector<8x384xf32>
    %cst_184 = arith.constant 1.000000e+00 : f32
    %337 = vector.broadcast %cst_184 : f32 to vector<8x384xf32>
    %338 = arith.addf %336, %337 : vector<8x384xf32>
    %cst_185 = arith.constant 5.000000e-01 : f32
    %339 = vector.broadcast %cst_185 : f32 to vector<8x384xf32>
    %340 = arith.mulf %339, %338 : vector<8x384xf32>
    %341 = vector.extract_strided_slice %340 {offsets = [0, 0], sizes = [8, 128], strides = [1, 1]} : vector<8x384xf32> to vector<8x128xf32>
    %342 = vector.extract_strided_slice %340 {offsets = [0, 128], sizes = [8, 128], strides = [1, 1]} : vector<8x384xf32> to vector<8x128xf32>
    %343 = vector.extract_strided_slice %340 {offsets = [0, 256], sizes = [8, 128], strides = [1, 1]} : vector<8x384xf32> to vector<8x128xf32>
    %344 = vector.extract_strided_slice %332 {offsets = [0, 384], sizes = [8, 128], strides = [1, 1]} : vector<8x512xf32> to vector<8x128xf32>
    %345 = math.tanh %344 : vector<8x128xf32>
    %c0_186 = arith.constant 0 : index
    %c0_187 = arith.constant 0 : index
    %c0_188 = arith.constant 0 : index
    %346 = vector.load %arg9[%c0_186, %c0_187, %c0_188] : memref<2x8x128xf32, #tpu.memory_space<vmem>>, vector<1x8x128xf32>
    %347 = vector.shape_cast %346 : vector<1x8x128xf32> to vector<8x128xf32>
    %348 = arith.mulf %342, %347 : vector<8x128xf32>
    %349 = arith.mulf %341, %345 : vector<8x128xf32>
    %350 = arith.addf %348, %349 : vector<8x128xf32>
    %351 = math.tanh %350 : vector<8x128xf32>
    %352 = arith.mulf %343, %351 : vector<8x128xf32>
    %c0_189 = arith.constant 0 : index
    %c0_190 = arith.constant 0 : index
    %c0_191 = arith.constant 0 : index
    %353 = vector.load %arg9[%c0_189, %c0_190, %c0_191] : memref<2x8x128xf32, #tpu.memory_space<vmem>>, vector<1x8x128xf32>
    %354 = vector.shape_cast %353 : vector<1x8x128xf32> to vector<8x128xf32>
    %355 = vector.shape_cast %350 : vector<8x128xf32> to vector<1x8x128xf32>
    tpu.vector_store %arg9[%c0_189, %c0_190, %c0_191], %355 {strides = array<i32>} : memref<2x8x128xf32, #tpu.memory_space<vmem>>, vector<1x8x128xf32>,
    %c0_192 = arith.constant 0 : index
    %c0_193 = arith.constant 0 : index
    %c0_194 = arith.constant 0 : index
    %356 = vector.load %arg8[%c0_192, %c0_193, %c0_194] : memref<2x8x128xf32, #tpu.memory_space<vmem>>, vector<1x8x128xf32>
    %357 = vector.shape_cast %356 : vector<1x8x128xf32> to vector<8x128xf32>
    %358 = vector.shape_cast %352 : vector<8x128xf32> to vector<1x8x128xf32>
    tpu.vector_store %arg8[%c0_192, %c0_193, %c0_194], %358 {strides = array<i32>} : memref<2x8x128xf32, #tpu.memory_space<vmem>>, vector<1x8x128xf32>,
    %359 = vector.shape_cast %352 : vector<8x128xf32> to vector<1x8x128xf32>
    %360 = arith.truncf %359 : vector<1x8x128xf32> to vector<1x8x128xbf16>
    %361 = arith.index_cast %c4_i32 : i32 to index
    %c0_195 = arith.constant 0 : index
    %c0_196 = arith.constant 0 : index
    %362 = vector.load %arg6[%361, %c0_195, %c0_196] : memref<7x8x128xbf16, #tpu.memory_space<vmem>>, vector<1x8x128xbf16>
    tpu.vector_store %arg6[%361, %c0_195, %c0_196], %360 {strides = array<i32>} : memref<7x8x128xbf16, #tpu.memory_space<vmem>>, vector<1x8x128xbf16>,
    %363 = arith.index_cast %c4_i32 : i32 to index
    %c0_197 = arith.constant 0 : index
    %c0_198 = arith.constant 0 : index
    %364 = vector.load %arg3[%363, %c0_197, %c0_198] : memref<7x8x512xbf16, #tpu.memory_space<vmem>>, vector<1x8x512xbf16>
    %365 = vector.shape_cast %364 : vector<1x8x512xbf16> to vector<8x512xbf16>
    %366 = arith.extf %365 : vector<8x512xbf16> to vector<8x512xf32>
    %c1_199 = arith.constant 1 : index
    %c0_200 = arith.constant 0 : index
    %c0_201 = arith.constant 0 : index
    %367 = vector.load %arg8[%c1_199, %c0_200, %c0_201] : memref<2x8x128xf32, #tpu.memory_space<vmem>>, vector<1x8x128xf32>
    %368 = vector.shape_cast %367 : vector<1x8x128xf32> to vector<8x128xf32>
    %369 = arith.truncf %368 : vector<8x128xf32> to vector<8x128xbf16>
    %c0_202 = arith.constant 0 : index
    %c0_203 = arith.constant 0 : index
    %370 = vector.load %arg5[%c0_202, %c0_203] : memref<128x512xbf16, #tpu.memory_space<vmem>>, vector<128x512xbf16>
    %cst_204 = arith.constant dense<0.000000e+00> : vector<8x512xf32>
    %371 = tpu.matmul %369, %370, %cst_204 {dimension_numbers = #tpu.dot_dimension_numbers<[1], [0], [0], [1], [0, 0, 1, 1], [], []>} : vector<8x128xbf16>, vector<128x512xbf16>, vector<8x512xf32> -> vector<8x512xf32>
    %372 = arith.addf %366, %371 : vector<8x512xf32>
    %373 = vector.extract_strided_slice %372 {offsets = [0, 0], sizes = [8, 384], strides = [1, 1]} : vector<8x512xf32> to vector<8x384xf32>
    %cst_205 = arith.constant 5.000000e-01 : f32
    %374 = vector.broadcast %cst_205 : f32 to vector<8x384xf32>
    %375 = arith.mulf %374, %373 : vector<8x384xf32>
    %376 = math.tanh %375 : vector<8x384xf32>
    %cst_206 = arith.constant 1.000000e+00 : f32
    %377 = vector.broadcast %cst_206 : f32 to vector<8x384xf32>
    %378 = arith.addf %376, %377 : vector<8x384xf32>
    %cst_207 = arith.constant 5.000000e-01 : f32
    %379 = vector.broadcast %cst_207 : f32 to vector<8x384xf32>
    %380 = arith.mulf %379, %378 : vector<8x384xf32>
    %381 = vector.extract_strided_slice %380 {offsets = [0, 0], sizes = [8, 128], strides = [1, 1]} : vector<8x384xf32> to vector<8x128xf32>
    %382 = vector.extract_strided_slice %380 {offsets = [0, 128], sizes = [8, 128], strides = [1, 1]} : vector<8x384xf32> to vector<8x128xf32>
    %383 = vector.extract_strided_slice %380 {offsets = [0, 256], sizes = [8, 128], strides = [1, 1]} : vector<8x384xf32> to vector<8x128xf32>
    %384 = vector.extract_strided_slice %372 {offsets = [0, 384], sizes = [8, 128], strides = [1, 1]} : vector<8x512xf32> to vector<8x128xf32>
    %385 = math.tanh %384 : vector<8x128xf32>
    %c1_208 = arith.constant 1 : index
    %c0_209 = arith.constant 0 : index
    %c0_210 = arith.constant 0 : index
    %386 = vector.load %arg9[%c1_208, %c0_209, %c0_210] : memref<2x8x128xf32, #tpu.memory_space<vmem>>, vector<1x8x128xf32>
    %387 = vector.shape_cast %386 : vector<1x8x128xf32> to vector<8x128xf32>
    %388 = arith.mulf %382, %387 : vector<8x128xf32>
    %389 = arith.mulf %381, %385 : vector<8x128xf32>
    %390 = arith.addf %388, %389 : vector<8x128xf32>
    %391 = math.tanh %390 : vector<8x128xf32>
    %392 = arith.mulf %383, %391 : vector<8x128xf32>
    %c1_211 = arith.constant 1 : index
    %c0_212 = arith.constant 0 : index
    %c0_213 = arith.constant 0 : index
    %393 = vector.load %arg9[%c1_211, %c0_212, %c0_213] : memref<2x8x128xf32, #tpu.memory_space<vmem>>, vector<1x8x128xf32>
    %394 = vector.shape_cast %393 : vector<1x8x128xf32> to vector<8x128xf32>
    %395 = vector.shape_cast %390 : vector<8x128xf32> to vector<1x8x128xf32>
    tpu.vector_store %arg9[%c1_211, %c0_212, %c0_213], %395 {strides = array<i32>} : memref<2x8x128xf32, #tpu.memory_space<vmem>>, vector<1x8x128xf32>,
    %c1_214 = arith.constant 1 : index
    %c0_215 = arith.constant 0 : index
    %c0_216 = arith.constant 0 : index
    %396 = vector.load %arg8[%c1_214, %c0_215, %c0_216] : memref<2x8x128xf32, #tpu.memory_space<vmem>>, vector<1x8x128xf32>
    %397 = vector.shape_cast %396 : vector<1x8x128xf32> to vector<8x128xf32>
    %398 = vector.shape_cast %392 : vector<8x128xf32> to vector<1x8x128xf32>
    tpu.vector_store %arg8[%c1_214, %c0_215, %c0_216], %398 {strides = array<i32>} : memref<2x8x128xf32, #tpu.memory_space<vmem>>, vector<1x8x128xf32>,
    %399 = vector.shape_cast %392 : vector<8x128xf32> to vector<1x8x128xf32>
    %400 = arith.truncf %399 : vector<1x8x128xf32> to vector<1x8x128xbf16>
    %401 = arith.index_cast %c4_i32 : i32 to index
    %c0_217 = arith.constant 0 : index
    %c0_218 = arith.constant 0 : index
    %402 = vector.load %arg7[%401, %c0_217, %c0_218] : memref<7x8x128xbf16, #tpu.memory_space<vmem>>, vector<1x8x128xbf16>
    tpu.vector_store %arg7[%401, %c0_217, %c0_218], %400 {strides = array<i32>} : memref<7x8x128xbf16, #tpu.memory_space<vmem>>, vector<1x8x128xbf16>,
    %c5_i32 = arith.constant 5 : i32
    %403 = arith.index_cast %c5_i32 : i32 to index
    %c0_219 = arith.constant 0 : index
    %c0_220 = arith.constant 0 : index
    %404 = vector.load %arg2[%403, %c0_219, %c0_220] : memref<7x8x512xbf16, #tpu.memory_space<vmem>>, vector<1x8x512xbf16>
    %405 = vector.shape_cast %404 : vector<1x8x512xbf16> to vector<8x512xbf16>
    %406 = arith.extf %405 : vector<8x512xbf16> to vector<8x512xf32>
    %c0_221 = arith.constant 0 : index
    %c0_222 = arith.constant 0 : index
    %c0_223 = arith.constant 0 : index
    %407 = vector.load %arg8[%c0_221, %c0_222, %c0_223] : memref<2x8x128xf32, #tpu.memory_space<vmem>>, vector<1x8x128xf32>
    %408 = vector.shape_cast %407 : vector<1x8x128xf32> to vector<8x128xf32>
    %409 = arith.truncf %408 : vector<8x128xf32> to vector<8x128xbf16>
    %c0_224 = arith.constant 0 : index
    %c0_225 = arith.constant 0 : index
    %410 = vector.load %arg4[%c0_224, %c0_225] : memref<128x512xbf16, #tpu.memory_space<vmem>>, vector<128x512xbf16>
    %cst_226 = arith.constant dense<0.000000e+00> : vector<8x512xf32>
    %411 = tpu.matmul %409, %410, %cst_226 {dimension_numbers = #tpu.dot_dimension_numbers<[1], [0], [0], [1], [0, 0, 1, 1], [], []>} : vector<8x128xbf16>, vector<128x512xbf16>, vector<8x512xf32> -> vector<8x512xf32>
    %412 = arith.addf %406, %411 : vector<8x512xf32>
    %413 = vector.extract_strided_slice %412 {offsets = [0, 0], sizes = [8, 384], strides = [1, 1]} : vector<8x512xf32> to vector<8x384xf32>
    %cst_227 = arith.constant 5.000000e-01 : f32
    %414 = vector.broadcast %cst_227 : f32 to vector<8x384xf32>
    %415 = arith.mulf %414, %413 : vector<8x384xf32>
    %416 = math.tanh %415 : vector<8x384xf32>
    %cst_228 = arith.constant 1.000000e+00 : f32
    %417 = vector.broadcast %cst_228 : f32 to vector<8x384xf32>
    %418 = arith.addf %416, %417 : vector<8x384xf32>
    %cst_229 = arith.constant 5.000000e-01 : f32
    %419 = vector.broadcast %cst_229 : f32 to vector<8x384xf32>
    %420 = arith.mulf %419, %418 : vector<8x384xf32>
    %421 = vector.extract_strided_slice %420 {offsets = [0, 0], sizes = [8, 128], strides = [1, 1]} : vector<8x384xf32> to vector<8x128xf32>
    %422 = vector.extract_strided_slice %420 {offsets = [0, 128], sizes = [8, 128], strides = [1, 1]} : vector<8x384xf32> to vector<8x128xf32>
    %423 = vector.extract_strided_slice %420 {offsets = [0, 256], sizes = [8, 128], strides = [1, 1]} : vector<8x384xf32> to vector<8x128xf32>
    %424 = vector.extract_strided_slice %412 {offsets = [0, 384], sizes = [8, 128], strides = [1, 1]} : vector<8x512xf32> to vector<8x128xf32>
    %425 = math.tanh %424 : vector<8x128xf32>
    %c0_230 = arith.constant 0 : index
    %c0_231 = arith.constant 0 : index
    %c0_232 = arith.constant 0 : index
    %426 = vector.load %arg9[%c0_230, %c0_231, %c0_232] : memref<2x8x128xf32, #tpu.memory_space<vmem>>, vector<1x8x128xf32>
    %427 = vector.shape_cast %426 : vector<1x8x128xf32> to vector<8x128xf32>
    %428 = arith.mulf %422, %427 : vector<8x128xf32>
    %429 = arith.mulf %421, %425 : vector<8x128xf32>
    %430 = arith.addf %428, %429 : vector<8x128xf32>
    %431 = math.tanh %430 : vector<8x128xf32>
    %432 = arith.mulf %423, %431 : vector<8x128xf32>
    %c0_233 = arith.constant 0 : index
    %c0_234 = arith.constant 0 : index
    %c0_235 = arith.constant 0 : index
    %433 = vector.load %arg9[%c0_233, %c0_234, %c0_235] : memref<2x8x128xf32, #tpu.memory_space<vmem>>, vector<1x8x128xf32>
    %434 = vector.shape_cast %433 : vector<1x8x128xf32> to vector<8x128xf32>
    %435 = vector.shape_cast %430 : vector<8x128xf32> to vector<1x8x128xf32>
    tpu.vector_store %arg9[%c0_233, %c0_234, %c0_235], %435 {strides = array<i32>} : memref<2x8x128xf32, #tpu.memory_space<vmem>>, vector<1x8x128xf32>,
    %c0_236 = arith.constant 0 : index
    %c0_237 = arith.constant 0 : index
    %c0_238 = arith.constant 0 : index
    %436 = vector.load %arg8[%c0_236, %c0_237, %c0_238] : memref<2x8x128xf32, #tpu.memory_space<vmem>>, vector<1x8x128xf32>
    %437 = vector.shape_cast %436 : vector<1x8x128xf32> to vector<8x128xf32>
    %438 = vector.shape_cast %432 : vector<8x128xf32> to vector<1x8x128xf32>
    tpu.vector_store %arg8[%c0_236, %c0_237, %c0_238], %438 {strides = array<i32>} : memref<2x8x128xf32, #tpu.memory_space<vmem>>, vector<1x8x128xf32>,
    %439 = vector.shape_cast %432 : vector<8x128xf32> to vector<1x8x128xf32>
    %440 = arith.truncf %439 : vector<1x8x128xf32> to vector<1x8x128xbf16>
    %441 = arith.index_cast %c5_i32 : i32 to index
    %c0_239 = arith.constant 0 : index
    %c0_240 = arith.constant 0 : index
    %442 = vector.load %arg6[%441, %c0_239, %c0_240] : memref<7x8x128xbf16, #tpu.memory_space<vmem>>, vector<1x8x128xbf16>
    tpu.vector_store %arg6[%441, %c0_239, %c0_240], %440 {strides = array<i32>} : memref<7x8x128xbf16, #tpu.memory_space<vmem>>, vector<1x8x128xbf16>,
    %443 = arith.index_cast %c5_i32 : i32 to index
    %c0_241 = arith.constant 0 : index
    %c0_242 = arith.constant 0 : index
    %444 = vector.load %arg3[%443, %c0_241, %c0_242] : memref<7x8x512xbf16, #tpu.memory_space<vmem>>, vector<1x8x512xbf16>
    %445 = vector.shape_cast %444 : vector<1x8x512xbf16> to vector<8x512xbf16>
    %446 = arith.extf %445 : vector<8x512xbf16> to vector<8x512xf32>
    %c1_243 = arith.constant 1 : index
    %c0_244 = arith.constant 0 : index
    %c0_245 = arith.constant 0 : index
    %447 = vector.load %arg8[%c1_243, %c0_244, %c0_245] : memref<2x8x128xf32, #tpu.memory_space<vmem>>, vector<1x8x128xf32>
    %448 = vector.shape_cast %447 : vector<1x8x128xf32> to vector<8x128xf32>
    %449 = arith.truncf %448 : vector<8x128xf32> to vector<8x128xbf16>
    %c0_246 = arith.constant 0 : index
    %c0_247 = arith.constant 0 : index
    %450 = vector.load %arg5[%c0_246, %c0_247] : memref<128x512xbf16, #tpu.memory_space<vmem>>, vector<128x512xbf16>
    %cst_248 = arith.constant dense<0.000000e+00> : vector<8x512xf32>
    %451 = tpu.matmul %449, %450, %cst_248 {dimension_numbers = #tpu.dot_dimension_numbers<[1], [0], [0], [1], [0, 0, 1, 1], [], []>} : vector<8x128xbf16>, vector<128x512xbf16>, vector<8x512xf32> -> vector<8x512xf32>
    %452 = arith.addf %446, %451 : vector<8x512xf32>
    %453 = vector.extract_strided_slice %452 {offsets = [0, 0], sizes = [8, 384], strides = [1, 1]} : vector<8x512xf32> to vector<8x384xf32>
    %cst_249 = arith.constant 5.000000e-01 : f32
    %454 = vector.broadcast %cst_249 : f32 to vector<8x384xf32>
    %455 = arith.mulf %454, %453 : vector<8x384xf32>
    %456 = math.tanh %455 : vector<8x384xf32>
    %cst_250 = arith.constant 1.000000e+00 : f32
    %457 = vector.broadcast %cst_250 : f32 to vector<8x384xf32>
    %458 = arith.addf %456, %457 : vector<8x384xf32>
    %cst_251 = arith.constant 5.000000e-01 : f32
    %459 = vector.broadcast %cst_251 : f32 to vector<8x384xf32>
    %460 = arith.mulf %459, %458 : vector<8x384xf32>
    %461 = vector.extract_strided_slice %460 {offsets = [0, 0], sizes = [8, 128], strides = [1, 1]} : vector<8x384xf32> to vector<8x128xf32>
    %462 = vector.extract_strided_slice %460 {offsets = [0, 128], sizes = [8, 128], strides = [1, 1]} : vector<8x384xf32> to vector<8x128xf32>
    %463 = vector.extract_strided_slice %460 {offsets = [0, 256], sizes = [8, 128], strides = [1, 1]} : vector<8x384xf32> to vector<8x128xf32>
    %464 = vector.extract_strided_slice %452 {offsets = [0, 384], sizes = [8, 128], strides = [1, 1]} : vector<8x512xf32> to vector<8x128xf32>
    %465 = math.tanh %464 : vector<8x128xf32>
    %c1_252 = arith.constant 1 : index
    %c0_253 = arith.constant 0 : index
    %c0_254 = arith.constant 0 : index
    %466 = vector.load %arg9[%c1_252, %c0_253, %c0_254] : memref<2x8x128xf32, #tpu.memory_space<vmem>>, vector<1x8x128xf32>
    %467 = vector.shape_cast %466 : vector<1x8x128xf32> to vector<8x128xf32>
    %468 = arith.mulf %462, %467 : vector<8x128xf32>
    %469 = arith.mulf %461, %465 : vector<8x128xf32>
    %470 = arith.addf %468, %469 : vector<8x128xf32>
    %471 = math.tanh %470 : vector<8x128xf32>
    %472 = arith.mulf %463, %471 : vector<8x128xf32>
    %c1_255 = arith.constant 1 : index
    %c0_256 = arith.constant 0 : index
    %c0_257 = arith.constant 0 : index
    %473 = vector.load %arg9[%c1_255, %c0_256, %c0_257] : memref<2x8x128xf32, #tpu.memory_space<vmem>>, vector<1x8x128xf32>
    %474 = vector.shape_cast %473 : vector<1x8x128xf32> to vector<8x128xf32>
    %475 = vector.shape_cast %470 : vector<8x128xf32> to vector<1x8x128xf32>
    tpu.vector_store %arg9[%c1_255, %c0_256, %c0_257], %475 {strides = array<i32>} : memref<2x8x128xf32, #tpu.memory_space<vmem>>, vector<1x8x128xf32>,
    %c1_258 = arith.constant 1 : index
    %c0_259 = arith.constant 0 : index
    %c0_260 = arith.constant 0 : index
    %476 = vector.load %arg8[%c1_258, %c0_259, %c0_260] : memref<2x8x128xf32, #tpu.memory_space<vmem>>, vector<1x8x128xf32>
    %477 = vector.shape_cast %476 : vector<1x8x128xf32> to vector<8x128xf32>
    %478 = vector.shape_cast %472 : vector<8x128xf32> to vector<1x8x128xf32>
    tpu.vector_store %arg8[%c1_258, %c0_259, %c0_260], %478 {strides = array<i32>} : memref<2x8x128xf32, #tpu.memory_space<vmem>>, vector<1x8x128xf32>,
    %479 = vector.shape_cast %472 : vector<8x128xf32> to vector<1x8x128xf32>
    %480 = arith.truncf %479 : vector<1x8x128xf32> to vector<1x8x128xbf16>
    %481 = arith.index_cast %c5_i32 : i32 to index
    %c0_261 = arith.constant 0 : index
    %c0_262 = arith.constant 0 : index
    %482 = vector.load %arg7[%481, %c0_261, %c0_262] : memref<7x8x128xbf16, #tpu.memory_space<vmem>>, vector<1x8x128xbf16>
    tpu.vector_store %arg7[%481, %c0_261, %c0_262], %480 {strides = array<i32>} : memref<7x8x128xbf16, #tpu.memory_space<vmem>>, vector<1x8x128xbf16>,
    %c6_i32 = arith.constant 6 : i32
    %483 = arith.index_cast %c6_i32 : i32 to index
    %c0_263 = arith.constant 0 : index
    %c0_264 = arith.constant 0 : index
    %484 = vector.load %arg2[%483, %c0_263, %c0_264] : memref<7x8x512xbf16, #tpu.memory_space<vmem>>, vector<1x8x512xbf16>
    %485 = vector.shape_cast %484 : vector<1x8x512xbf16> to vector<8x512xbf16>
    %486 = arith.extf %485 : vector<8x512xbf16> to vector<8x512xf32>
    %c0_265 = arith.constant 0 : index
    %c0_266 = arith.constant 0 : index
    %c0_267 = arith.constant 0 : index
    %487 = vector.load %arg8[%c0_265, %c0_266, %c0_267] : memref<2x8x128xf32, #tpu.memory_space<vmem>>, vector<1x8x128xf32>
    %488 = vector.shape_cast %487 : vector<1x8x128xf32> to vector<8x128xf32>
    %489 = arith.truncf %488 : vector<8x128xf32> to vector<8x128xbf16>
    %c0_268 = arith.constant 0 : index
    %c0_269 = arith.constant 0 : index
    %490 = vector.load %arg4[%c0_268, %c0_269] : memref<128x512xbf16, #tpu.memory_space<vmem>>, vector<128x512xbf16>
    %cst_270 = arith.constant dense<0.000000e+00> : vector<8x512xf32>
    %491 = tpu.matmul %489, %490, %cst_270 {dimension_numbers = #tpu.dot_dimension_numbers<[1], [0], [0], [1], [0, 0, 1, 1], [], []>} : vector<8x128xbf16>, vector<128x512xbf16>, vector<8x512xf32> -> vector<8x512xf32>
    %492 = arith.addf %486, %491 : vector<8x512xf32>
    %493 = vector.extract_strided_slice %492 {offsets = [0, 0], sizes = [8, 384], strides = [1, 1]} : vector<8x512xf32> to vector<8x384xf32>
    %cst_271 = arith.constant 5.000000e-01 : f32
    %494 = vector.broadcast %cst_271 : f32 to vector<8x384xf32>
    %495 = arith.mulf %494, %493 : vector<8x384xf32>
    %496 = math.tanh %495 : vector<8x384xf32>
    %cst_272 = arith.constant 1.000000e+00 : f32
    %497 = vector.broadcast %cst_272 : f32 to vector<8x384xf32>
    %498 = arith.addf %496, %497 : vector<8x384xf32>
    %cst_273 = arith.constant 5.000000e-01 : f32
    %499 = vector.broadcast %cst_273 : f32 to vector<8x384xf32>
    %500 = arith.mulf %499, %498 : vector<8x384xf32>
    %501 = vector.extract_strided_slice %500 {offsets = [0, 0], sizes = [8, 128], strides = [1, 1]} : vector<8x384xf32> to vector<8x128xf32>
    %502 = vector.extract_strided_slice %500 {offsets = [0, 128], sizes = [8, 128], strides = [1, 1]} : vector<8x384xf32> to vector<8x128xf32>
    %503 = vector.extract_strided_slice %500 {offsets = [0, 256], sizes = [8, 128], strides = [1, 1]} : vector<8x384xf32> to vector<8x128xf32>
    %504 = vector.extract_strided_slice %492 {offsets = [0, 384], sizes = [8, 128], strides = [1, 1]} : vector<8x512xf32> to vector<8x128xf32>
    %505 = math.tanh %504 : vector<8x128xf32>
    %c0_274 = arith.constant 0 : index
    %c0_275 = arith.constant 0 : index
    %c0_276 = arith.constant 0 : index
    %506 = vector.load %arg9[%c0_274, %c0_275, %c0_276] : memref<2x8x128xf32, #tpu.memory_space<vmem>>, vector<1x8x128xf32>
    %507 = vector.shape_cast %506 : vector<1x8x128xf32> to vector<8x128xf32>
    %508 = arith.mulf %502, %507 : vector<8x128xf32>
    %509 = arith.mulf %501, %505 : vector<8x128xf32>
    %510 = arith.addf %508, %509 : vector<8x128xf32>
    %511 = math.tanh %510 : vector<8x128xf32>
    %512 = arith.mulf %503, %511 : vector<8x128xf32>
    %c0_277 = arith.constant 0 : index
    %c0_278 = arith.constant 0 : index
    %c0_279 = arith.constant 0 : index
    %513 = vector.load %arg9[%c0_277, %c0_278, %c0_279] : memref<2x8x128xf32, #tpu.memory_space<vmem>>, vector<1x8x128xf32>
    %514 = vector.shape_cast %513 : vector<1x8x128xf32> to vector<8x128xf32>
    %515 = vector.shape_cast %510 : vector<8x128xf32> to vector<1x8x128xf32>
    tpu.vector_store %arg9[%c0_277, %c0_278, %c0_279], %515 {strides = array<i32>} : memref<2x8x128xf32, #tpu.memory_space<vmem>>, vector<1x8x128xf32>,
    %c0_280 = arith.constant 0 : index
    %c0_281 = arith.constant 0 : index
    %c0_282 = arith.constant 0 : index
    %516 = vector.load %arg8[%c0_280, %c0_281, %c0_282] : memref<2x8x128xf32, #tpu.memory_space<vmem>>, vector<1x8x128xf32>
    %517 = vector.shape_cast %516 : vector<1x8x128xf32> to vector<8x128xf32>
    %518 = vector.shape_cast %512 : vector<8x128xf32> to vector<1x8x128xf32>
    tpu.vector_store %arg8[%c0_280, %c0_281, %c0_282], %518 {strides = array<i32>} : memref<2x8x128xf32, #tpu.memory_space<vmem>>, vector<1x8x128xf32>,
    %519 = vector.shape_cast %512 : vector<8x128xf32> to vector<1x8x128xf32>
    %520 = arith.truncf %519 : vector<1x8x128xf32> to vector<1x8x128xbf16>
    %521 = arith.index_cast %c6_i32 : i32 to index
    %c0_283 = arith.constant 0 : index
    %c0_284 = arith.constant 0 : index
    %522 = vector.load %arg6[%521, %c0_283, %c0_284] : memref<7x8x128xbf16, #tpu.memory_space<vmem>>, vector<1x8x128xbf16>
    tpu.vector_store %arg6[%521, %c0_283, %c0_284], %520 {strides = array<i32>} : memref<7x8x128xbf16, #tpu.memory_space<vmem>>, vector<1x8x128xbf16>,
    %523 = arith.index_cast %c6_i32 : i32 to index
    %c0_285 = arith.constant 0 : index
    %c0_286 = arith.constant 0 : index
    %524 = vector.load %arg3[%523, %c0_285, %c0_286] : memref<7x8x512xbf16, #tpu.memory_space<vmem>>, vector<1x8x512xbf16>
    %525 = vector.shape_cast %524 : vector<1x8x512xbf16> to vector<8x512xbf16>
    %526 = arith.extf %525 : vector<8x512xbf16> to vector<8x512xf32>
    %c1_287 = arith.constant 1 : index
    %c0_288 = arith.constant 0 : index
    %c0_289 = arith.constant 0 : index
    %527 = vector.load %arg8[%c1_287, %c0_288, %c0_289] : memref<2x8x128xf32, #tpu.memory_space<vmem>>, vector<1x8x128xf32>
    %528 = vector.shape_cast %527 : vector<1x8x128xf32> to vector<8x128xf32>
    %529 = arith.truncf %528 : vector<8x128xf32> to vector<8x128xbf16>
    %c0_290 = arith.constant 0 : index
    %c0_291 = arith.constant 0 : index
    %530 = vector.load %arg5[%c0_290, %c0_291] : memref<128x512xbf16, #tpu.memory_space<vmem>>, vector<128x512xbf16>
    %cst_292 = arith.constant dense<0.000000e+00> : vector<8x512xf32>
    %531 = tpu.matmul %529, %530, %cst_292 {dimension_numbers = #tpu.dot_dimension_numbers<[1], [0], [0], [1], [0, 0, 1, 1], [], []>} : vector<8x128xbf16>, vector<128x512xbf16>, vector<8x512xf32> -> vector<8x512xf32>
    %532 = arith.addf %526, %531 : vector<8x512xf32>
    %533 = vector.extract_strided_slice %532 {offsets = [0, 0], sizes = [8, 384], strides = [1, 1]} : vector<8x512xf32> to vector<8x384xf32>
    %cst_293 = arith.constant 5.000000e-01 : f32
    %534 = vector.broadcast %cst_293 : f32 to vector<8x384xf32>
    %535 = arith.mulf %534, %533 : vector<8x384xf32>
    %536 = math.tanh %535 : vector<8x384xf32>
    %cst_294 = arith.constant 1.000000e+00 : f32
    %537 = vector.broadcast %cst_294 : f32 to vector<8x384xf32>
    %538 = arith.addf %536, %537 : vector<8x384xf32>
    %cst_295 = arith.constant 5.000000e-01 : f32
    %539 = vector.broadcast %cst_295 : f32 to vector<8x384xf32>
    %540 = arith.mulf %539, %538 : vector<8x384xf32>
    %541 = vector.extract_strided_slice %540 {offsets = [0, 0], sizes = [8, 128], strides = [1, 1]} : vector<8x384xf32> to vector<8x128xf32>
    %542 = vector.extract_strided_slice %540 {offsets = [0, 128], sizes = [8, 128], strides = [1, 1]} : vector<8x384xf32> to vector<8x128xf32>
    %543 = vector.extract_strided_slice %540 {offsets = [0, 256], sizes = [8, 128], strides = [1, 1]} : vector<8x384xf32> to vector<8x128xf32>
    %544 = vector.extract_strided_slice %532 {offsets = [0, 384], sizes = [8, 128], strides = [1, 1]} : vector<8x512xf32> to vector<8x128xf32>
    %545 = math.tanh %544 : vector<8x128xf32>
    %c1_296 = arith.constant 1 : index
    %c0_297 = arith.constant 0 : index
    %c0_298 = arith.constant 0 : index
    %546 = vector.load %arg9[%c1_296, %c0_297, %c0_298] : memref<2x8x128xf32, #tpu.memory_space<vmem>>, vector<1x8x128xf32>
    %547 = vector.shape_cast %546 : vector<1x8x128xf32> to vector<8x128xf32>
    %548 = arith.mulf %542, %547 : vector<8x128xf32>
    %549 = arith.mulf %541, %545 : vector<8x128xf32>
    %550 = arith.addf %548, %549 : vector<8x128xf32>
    %551 = math.tanh %550 : vector<8x128xf32>
    %552 = arith.mulf %543, %551 : vector<8x128xf32>
    %c1_299 = arith.constant 1 : index
    %c0_300 = arith.constant 0 : index
    %c0_301 = arith.constant 0 : index
    %553 = vector.load %arg9[%c1_299, %c0_300, %c0_301] : memref<2x8x128xf32, #tpu.memory_space<vmem>>, vector<1x8x128xf32>
    %554 = vector.shape_cast %553 : vector<1x8x128xf32> to vector<8x128xf32>
    %555 = vector.shape_cast %550 : vector<8x128xf32> to vector<1x8x128xf32>
    tpu.vector_store %arg9[%c1_299, %c0_300, %c0_301], %555 {strides = array<i32>} : memref<2x8x128xf32, #tpu.memory_space<vmem>>, vector<1x8x128xf32>,
    %c1_302 = arith.constant 1 : index
    %c0_303 = arith.constant 0 : index
    %c0_304 = arith.constant 0 : index
    %556 = vector.load %arg8[%c1_302, %c0_303, %c0_304] : memref<2x8x128xf32, #tpu.memory_space<vmem>>, vector<1x8x128xf32>
    %557 = vector.shape_cast %556 : vector<1x8x128xf32> to vector<8x128xf32>
    %558 = vector.shape_cast %552 : vector<8x128xf32> to vector<1x8x128xf32>
    tpu.vector_store %arg8[%c1_302, %c0_303, %c0_304], %558 {strides = array<i32>} : memref<2x8x128xf32, #tpu.memory_space<vmem>>, vector<1x8x128xf32>,
    %559 = vector.shape_cast %552 : vector<8x128xf32> to vector<1x8x128xf32>
    %560 = arith.truncf %559 : vector<1x8x128xf32> to vector<1x8x128xbf16>
    %561 = arith.index_cast %c6_i32 : i32 to index
    %c0_305 = arith.constant 0 : index
    %c0_306 = arith.constant 0 : index
    %562 = vector.load %arg7[%561, %c0_305, %c0_306] : memref<7x8x128xbf16, #tpu.memory_space<vmem>>, vector<1x8x128xbf16>
    tpu.vector_store %arg7[%561, %c0_305, %c0_306], %560 {strides = array<i32>} : memref<7x8x128xbf16, #tpu.memory_space<vmem>>, vector<1x8x128xbf16>,
    %c7_i32 = arith.constant 7 : i32
    return
  }
  func.func @transform_0(%arg0: i32, %arg1: i32) -> (i32, i32, i32) {
    %c0_i32 = arith.constant 0 : i32
    %c0_i32_0 = arith.constant 0 : i32
    return %arg1, %arg0, %c0_i32 : i32, i32, i32
  }
  func.func @transform_1(%arg0: i32, %arg1: i32) -> (i32, i32, i32) {
    %c0_i32 = arith.constant 0 : i32
    %c0_i32_0 = arith.constant 0 : i32
    return %arg1, %arg0, %c0_i32 : i32, i32, i32
  }
  func.func @transform_2(%arg0: i32, %arg1: i32) -> (i32, i32) {
    %c0_i32 = arith.constant 0 : i32
    %c0_i32_0 = arith.constant 0 : i32
    %c0_i32_1 = arith.constant 0 : i32
    return %c0_i32, %c0_i32_0 : i32, i32
  }
  func.func @transform_3(%arg0: i32, %arg1: i32) -> (i32, i32) {
    %c0_i32 = arith.constant 0 : i32
    %c0_i32_0 = arith.constant 0 : i32
    %c0_i32_1 = arith.constant 0 : i32
    return %c0_i32, %c0_i32_0 : i32, i32
  }
  func.func @transform_4(%arg0: i32, %arg1: i32) -> (i32, i32, i32) {
    %c0_i32 = arith.constant 0 : i32
    %c0_i32_0 = arith.constant 0 : i32
    return %arg1, %arg0, %c0_i32 : i32, i32, i32
  }
  func.func @transform_5(%arg0: i32, %arg1: i32) -> (i32, i32, i32) {
    %c0_i32 = arith.constant 0 : i32
    %c0_i32_0 = arith.constant 0 : i32
    return %arg1, %arg0, %c0_i32 : i32, i32, i32
  }
}

module attributes {stable_mosaic.version = 11 : i64} {
  func.func @_dense2_k1_kernel(%arg0: i32, %arg1: i32, %arg2: memref<16x128xbf16, #tpu.memory_space<vmem>>, %arg3: memref<128x128xbf16, #tpu.memory_space<vmem>>, %arg4: memref<16x128xbf16, #tpu.memory_space<vmem>>, %arg5: memref<128x128xbf16, #tpu.memory_space<vmem>>, %arg6: memref<1x128xf32, #tpu.memory_space<vmem>>, %arg7: memref<16x128xf32, #tpu.memory_space<vmem>>) attributes {dimension_semantics = [#tpu.dimension_semantics<parallel>, #tpu.dimension_semantics<parallel>], iteration_bounds = array<i64: 1, 1>, scalar_prefetch = 0 : i64, scratch_operands = 0 : i64, tpu.core_type = #tpu.core_type<tc>, window_params = [{transform_indices = @transform_0, window_bounds = array<i64: 16, 128>}, {transform_indices = @transform_1, window_bounds = array<i64: 128, 128>}, {transform_indices = @transform_2, window_bounds = array<i64: 16, 128>}, {transform_indices = @transform_3, window_bounds = array<i64: 128, 128>}, {transform_indices = @transform_4, window_bounds = array<i64: 1, 128>}, {transform_indices = @transform_5, window_bounds = array<i64: 16, 128>}]} {
    %c0 = arith.constant 0 : index
    %c0_0 = arith.constant 0 : index
    %0 = vector.load %arg2[%c0, %c0_0] : memref<16x128xbf16, #tpu.memory_space<vmem>>, vector<16x128xbf16>
    %c0_1 = arith.constant 0 : index
    %c0_2 = arith.constant 0 : index
    %1 = vector.load %arg3[%c0_1, %c0_2] : memref<128x128xbf16, #tpu.memory_space<vmem>>, vector<128x128xbf16>
    %cst = arith.constant dense<0.000000e+00> : vector<16x128xf32>
    %2 = tpu.matmul %0, %1, %cst {dimension_numbers = #tpu.dot_dimension_numbers<[1], [0], [0], [1], [0, 0, 1, 1], [], []>} : vector<16x128xbf16>, vector<128x128xbf16>, vector<16x128xf32> -> vector<16x128xf32>
    %c0_3 = arith.constant 0 : index
    %c0_4 = arith.constant 0 : index
    %3 = vector.load %arg4[%c0_3, %c0_4] : memref<16x128xbf16, #tpu.memory_space<vmem>>, vector<16x128xbf16>
    %c0_5 = arith.constant 0 : index
    %c0_6 = arith.constant 0 : index
    %4 = vector.load %arg5[%c0_5, %c0_6] : memref<128x128xbf16, #tpu.memory_space<vmem>>, vector<128x128xbf16>
    %cst_7 = arith.constant dense<0.000000e+00> : vector<16x128xf32>
    %5 = tpu.matmul %3, %4, %cst_7 {dimension_numbers = #tpu.dot_dimension_numbers<[1], [0], [0], [1], [0, 0, 1, 1], [], []>} : vector<16x128xbf16>, vector<128x128xbf16>, vector<16x128xf32> -> vector<16x128xf32>
    %6 = arith.addf %2, %5 : vector<16x128xf32>
    %c0_8 = arith.constant 0 : index
    %c0_9 = arith.constant 0 : index
    %7 = vector.load %arg6[%c0_8, %c0_9] : memref<1x128xf32, #tpu.memory_space<vmem>>, vector<1x128xf32>
    %8 = vector.broadcast %7 : vector<1x128xf32> to vector<16x128xf32>
    %9 = arith.addf %6, %8 : vector<16x128xf32>
    %c0_10 = arith.constant 0 : index
    %c0_11 = arith.constant 0 : index
    %10 = vector.load %arg7[%c0_10, %c0_11] : memref<16x128xf32, #tpu.memory_space<vmem>>, vector<16x128xf32>
    tpu.vector_store %arg7[%c0_10, %c0_11], %9 {strides = array<i32>} : memref<16x128xf32, #tpu.memory_space<vmem>>, vector<16x128xf32>,
    return
  }
  func.func @transform_0(%arg0: i32, %arg1: i32) -> (i32, i32) {
    %c0_i32 = arith.constant 0 : i32
    %c0_i32_0 = arith.constant 0 : i32
    return %arg0, %c0_i32 : i32, i32
  }
  func.func @transform_1(%arg0: i32, %arg1: i32) -> (i32, i32) {
    %c0_i32 = arith.constant 0 : i32
    %c0_i32_0 = arith.constant 0 : i32
    return %c0_i32, %arg1 : i32, i32
  }
  func.func @transform_2(%arg0: i32, %arg1: i32) -> (i32, i32) {
    %c0_i32 = arith.constant 0 : i32
    %c0_i32_0 = arith.constant 0 : i32
    return %arg0, %c0_i32 : i32, i32
  }
  func.func @transform_3(%arg0: i32, %arg1: i32) -> (i32, i32) {
    %c0_i32 = arith.constant 0 : i32
    %c0_i32_0 = arith.constant 0 : i32
    return %c0_i32, %arg1 : i32, i32
  }
  func.func @transform_4(%arg0: i32, %arg1: i32) -> (i32, i32) {
    %c0_i32 = arith.constant 0 : i32
    %c0_i32_0 = arith.constant 0 : i32
    return %c0_i32, %arg1 : i32, i32
  }
  func.func @transform_5(%arg0: i32, %arg1: i32) -> (i32, i32) {
    %c0_i32 = arith.constant 0 : i32
    return %arg0, %arg1 : i32, i32
  }
}

</mosaic_0001>

<bundles_post_ra>
// kernel: elmo_forward.18
= control target key start
LH: loop header
LB: loop body
LE: loop exit
PB: predicated region body
PF: predicated region fallthrough
CT: control target
= control target key end

     0   :  { %s1263_s18 = smov 0   ;;  %s1265_s19 = smov 0   ;;  %s1355_s0 = inlined_call_operand.vmem [shape: bf16[4,64,128], index: 0, kind: input, shape index: {}]   ;;  %s1356_s1 = inlined_call_operand.vmem [shape: bf16[4,128,128], index: 1, kind: input, shape index: {}]   ;;  %s1357_s2 = inlined_call_operand.vmem [shape: bf16[4,64,128], index: 2, kind: input, shape index: {}]   ;;  %s1358_s3 = inlined_call_operand.vmem [shape: bf16[4,128,128], index: 3, kind: input, shape index: {}]   ;;  %s1359_s4 = inlined_call_operand.vmem [shape: f32[1,128], index: 4, kind: input, shape index: {}]   ;;  %s1360_s5 = inlined_call_operand.vmem [shape: bf16[64,128], index: 5, kind: output, shape index: {}]  }
   0x1   :  { %s1267_s20 = smov 0  }
   0x2 LB: > { %s27_s21 = sadd.s32 1, %s1227_s19  ;;  %p974_p0 = scmp.ge.s32.totalorder %s1231_s20, 1  ;;  %s1231_s20 = sphi %s1267_s20, %s15_s20   ;;  %s1227_s19 = sphi %s1265_s19, %s1362_s19   ;;  %s1223_s18 = sphi %s1263_s18, %s1361_s18  }
   0x3   : > { %p28_p1 = scmp.ge.s32.totalorder %s27_s21, 4  ;;  %p270_p2 = scmp.lt.s32.totalorder %s1231_s20, 5 }
   0x5   : > { %s1364_s21 = smov (%p28_p1, %s27_s21), 0  ;;  %p271_p3 = pnand %p974_p0, %p270_p2 }
   0x6   : > { %p334_p4 = scmp.lt.s32.totalorder (!%p271_p3), %s1223_s18, 3  ;;  %p983_p5 = scmp.ne.s32.totalorder (!%p271_p3), %s1223_s18, 0 }
   0x7   : > { %274 = sbr.rel (%p271_p3) target bundleno = 293 (0x125), region = 40 }
   0xe   : > { %s335_s22 = scalar_select %p334_p4, %s1223_s18, 3 }
   0xf   : > { %385 = sbr.rel (%p983_p5) target bundleno = 22 (0x16), region = 44  ;;  %v984_v0 = vld [vmem:[%s1359_s4] ss:$0 sm:$0xff] (!%p983_p5) }
  0x10   : > { %s1022_s23 = sshll.u32 %s335_s22, 5  ;;  %s1023_s24 = sshll.u32 %s335_s22, 6  ;;  %393 = vst [vmem:[#allocation2] sm:$0xff] (!%p983_p5), %v984_v0  ;;  %394 = vst [vmem:[#allocation2 + $0x8] sm:$0xff] (!%p983_p5), %v984_v0 }
  0x11   : > { %s1288_s27 = scalar_lea.vmem %s1355_s0, %s1022_s23  ;;  %s1293_s30 = scalar_lea.vmem %s1356_s1, %s1023_s24  ;;  %395 = vst [vmem:[#allocation2 + $0x10] sm:$0xff] (!%p983_p5), %v984_v0  ;;  %396 = vst [vmem:[#allocation2 + $0x18] sm:$0xff] (!%p983_p5), %v984_v0 }
  0x12   : > { %s1298_s8 = scalar_lea.vmem %s1357_s2, %s1022_s23  ;;  %s1303_s11 = scalar_lea.vmem %s1358_s3, %s1023_s24  ;;  %397 = vst [vmem:[#allocation2 + $0x20] sm:$0xff] (!%p983_p5), %v984_v0  ;;  %398 = vst [vmem:[#allocation2 + $0x28] sm:$0xff] (!%p983_p5), %v984_v0 }
  0x13   : > { %399 = vst [vmem:[#allocation2 + $0x30] sm:$0xff] (!%p983_p5), %v984_v0  ;;  %400 = vst [vmem:[#allocation2 + $0x38] sm:$0xff] (!%p983_p5), %v984_v0 }
  0x16 PF: > { %v1185_v1 = vld [vmem:[%s1293_s30] sm:$0xff]   ;;  %v1186_v2 = vld [vmem:[%s1293_s30 + $0x8] sm:$0xff]   ;;  %v1188_v4 = vld [vmem:[%s1293_s30 + $0x10] sm:$0xff]   ;;  %p1009_p6 = scmp.ne.s32.totalorder %s1223_s18, 3 }
  0x17   : > { %1081 = vmatprep.subr.bf16.mxu1 %v1185_v1  ;;  %v1187_v3 = vld [vmem:[%s1303_s11] sm:$0xff]   ;;  %v1189_v5 = vld [vmem:[%s1303_s11 + $0x8] sm:$0xff]   ;;  %v1191_v6 = vld [vmem:[%s1303_s11 + $0x10] sm:$0xff]  }
  0x18   : > { %1082 = vmatpush3.bf16.msra.mxu1 %v1185_v1  ;;  %1105 = vmatprep.subr.bf16.mxu0 %v1187_v3  ;;  %v1190_v7 = vld [vmem:[%s1293_s30 + $0x18] sm:$0xff]   ;;  %v1192_v9 = vld [vmem:[%s1293_s30 + $0x20] sm:$0xff]   ;;  %v1194_v12 = vld [vmem:[%s1293_s30 + $0x28] sm:$0xff]  }
  0x19   : > { %1083 = vmatprep.subr.bf16.mxu1 %v1186_v2  ;;  %1106 = vmatpush3.bf16.msra.mxu0 %v1187_v3  ;;  %v1193_v8 = vld [vmem:[%s1303_s11 + $0x18] sm:$0xff]   ;;  %v1195_v10 = vld [vmem:[%s1303_s11 + $0x20] sm:$0xff]   ;;  %v1197_v13 = vld [vmem:[%s1303_s11 + $0x28] sm:$0xff]  }
  0x1a   : > { %1107 = vmatprep.subr.bf16.mxu0 %v1189_v5  ;;  %v1199_v11 = vld [vmem:[%s1288_s27] sm:$0xff]   ;;  %v1196_v15 = vld [vmem:[%s1293_s30 + $0x30] sm:$0xff]   ;;  %v1198_v17 = vld [vmem:[%s1293_s30 + $0x38] sm:$0xff]  }
  0x1b   : > { %1097 = vmatprep.mubr.bf16.mxu1 %v1199_v11  ;;  %v1203_v14 = vld [vmem:[%s1298_s8] sm:$0xff]   ;;  %v1200_v16 = vld [vmem:[%s1303_s11 + $0x30] sm:$0xff]   ;;  %v1202_v18 = vld [vmem:[%s1303_s11 + $0x38] sm:$0xff]  }
  0x1c   : > { %1084 = vmatpush3.bf16.msra.mxu1 %v1186_v2  ;;  %1121 = vmatprep.mubr.bf16.mxu0 %v1203_v14  ;;  %v1201_v19 = vld [vmem:[%s1288_s27 + $0x8] sm:$0xff]   ;;  %v1204_v20 = vld [vmem:[%s1288_s27 + $0x10] sm:$0xff]   ;;  %v1206_v23 = vld [vmem:[%s1288_s27 + $0x18] sm:$0xff]  }
  0x1d   : > { %1085 = vmatprep.subr.bf16.mxu1 %v1188_v4  ;;  %1108 = vmatpush3.bf16.msra.mxu0 %v1189_v5  ;;  %v1205_v21 = vld [vmem:[%s1298_s8 + $0x8] sm:$0xff]   ;;  %v1207_v22 = vld [vmem:[%s1298_s8 + $0x10] sm:$0xff]   ;;  %v1208_v24 = vld [vmem:[%s1298_s8 + $0x18] sm:$0xff]  }
  0x1e   : > { %1109 = vmatprep.subr.bf16.mxu0 %v1191_v6  ;;  %v403_v25 = vld [vmem:[#allocation2 + $0x10] sm:$0xff]  ;;  %v401_v26 = vld [vmem:[#allocation2] sm:$0xff]  ;;  %v404_v28 = vld [vmem:[#allocation2 + $0x18] sm:$0xff] }
  0x1f   : > { %v402_v31 = vld [vmem:[#allocation2 + $0x8] sm:$0xff]  ;;  %v407_v44 = vld [vmem:[#allocation2 + $0x30] sm:$0xff]  ;;  %v405_v46 = vld [vmem:[#allocation2 + $0x20] sm:$0xff] }
  0x20   : > { %1086 = vmatpush3.bf16.msra.mxu1 %v1188_v4  ;;  %v408_v48 = vld [vmem:[#allocation2 + $0x38] sm:$0xff]  ;;  %v406_v51 = vld [vmem:[#allocation2 + $0x28] sm:$0xff] }
  0x21   : > { %1087 = vmatprep.subr.bf16.mxu1 %v1190_v7  ;;  %1110 = vmatpush3.bf16.msra.mxu0 %v1191_v6 }
  0x22   : > { %1111 = vmatprep.subr.bf16.mxu0 %v1193_v8 }
  0x24   : > { %1088 = vmatpush3.bf16.msra.mxu1 %v1190_v7 }
  0x25   : > { %1089 = vmatprep.subr.bf16.mxu1 %v1192_v9  ;;  %1112 = vmatpush3.bf16.msra.mxu0 %v1193_v8 }
  0x26   : > { %1113 = vmatprep.subr.bf16.mxu0 %v1195_v10 }
  0x28   : > { %1090 = vmatpush3.bf16.msra.mxu1 %v1192_v9 }
  0x29   : > { %1091 = vmatprep.subr.bf16.mxu1 %v1194_v12  ;;  %1114 = vmatpush3.bf16.msra.mxu0 %v1195_v10 }
  0x2a   : > { %1115 = vmatprep.subr.bf16.mxu0 %v1197_v13 }
  0x2c   : > { %1092 = vmatpush3.bf16.msra.mxu1 %v1194_v12 }
  0x2d   : > { %1093 = vmatprep.subr.bf16.mxu1 %v1196_v15  ;;  %1116 = vmatpush3.bf16.msra.mxu0 %v1197_v13 }
  0x2e   : > { %1117 = vmatprep.subr.bf16.mxu0 %v1200_v16 }
  0x30   : > { %1094 = vmatpush3.bf16.msra.mxu1 %v1196_v15 }
  0x31   : > { %1095 = vmatprep.subr.bf16.mxu1 %v1198_v17  ;;  %1118 = vmatpush3.bf16.msra.mxu0 %v1200_v16 }
  0x32   : > { %1119 = vmatprep.subr.bf16.mxu0 %v1202_v18 }
  0x34   : > { %1096 = vmatpush3.bf16.msra.mxu1 %v1198_v17 }
  0x35   : > { %1120 = vmatpush3.bf16.msra.mxu0 %v1202_v18 }
  0x37   : > { %1098 = vmatmul.mubr.bf16.vlgmr.msra.gmra.mrb[0].mxu1 %v1201_v19 }
  0x38   : > { %1101 = vmatprep.mubr.bf16.mxu1 %v1204_v20  ;;  %1122 = vmatmul.mubr.bf16.vlgmr.msra.gmra.mrb[0].mxu0 %v1205_v21 }
  0x39   : > { %1125 = vmatprep.mubr.bf16.mxu0 %v1207_v22 }
  0x3f   : > { %1102 = vmatmul.mubr.bf16.gmra.mrb[4].mxu1 %v1206_v23 }
  0x40   : > { %1126 = vmatmul.mubr.bf16.gmra.mrb[4].mxu0 %v1208_v24 }
 0x10a   : > { %v1099_v27 = vpop.f32.mrb[0].mxu1 }
 0x10b   : > { %v572_v29 = vadd.f32 %v1099_v27, %v403_v25  ;;  %v539_v30 = vpop.f32.mrb[1].mxu1  ;;  %v1123_v34 = vpop.f32.mrb[0].mxu0 }
 0x10c   : > { %v570_v32 = vadd.f32 %v539_v30, %v401_v26  ;;  %v1100_v33 = vpop.f32.mrb[2].mxu1  ;;  %v724_v38 = vpop.f32.mrb[1].mxu0 }
 0x10d   : > { %v573_v35 = vadd.f32 %v1100_v33, %v404_v28  ;;  %v542_v36 = vpop.f32.mrb[3].mxu1  ;;  %v1132_v37 = vadd.f32 %v1123_v34, %v572_v29  ;;  %v1124_v41 = vpop.f32.mrb[2].mxu0 }
 0x10e   : > { %v571_v39 = vadd.f32 %v542_v36, %v402_v31  ;;  %v1136_v40 = vadd.f32 %v724_v38, %v570_v32  ;;  %v727_v43 = vpop.f32.mrb[3].mxu0 }
 0x10f   : > { %765 = vst [vmem:[#allocation2 + $0x10] sm:$0xff] %v1132_v37  ;;  %v1140_v42 = vadd.f32 %v1124_v41, %v573_v35 }
 0x110   : > { %763 = vst [vmem:[#allocation2] sm:$0xff] %v1136_v40  ;;  %v1144_v45 = vadd.f32 %v727_v43, %v571_v39 }
 0x111   : > { %766 = vst [vmem:[#allocation2 + $0x18] sm:$0xff] %v1140_v42 }
 0x112   : > { %v1103_v47 = vpop.f32.mrb[4].mxu1  ;;  %764 = vst [vmem:[#allocation2 + $0x8] sm:$0xff] %v1144_v45 }
 0x113   : > { %v576_v49 = vadd.f32 %v1103_v47, %v407_v44  ;;  %v555_v50 = vpop.f32.mrb[5].mxu1  ;;  %v1127_v54 = vpop.f32.mrb[4].mxu0 }
 0x114   : > { %v574_v52 = vadd.f32 %v555_v50, %v405_v46  ;;  %v1104_v53 = vpop.f32.mrb[6].mxu1  ;;  %v740_v58 = vpop.f32.mrb[5].mxu0  ;;  %774 = sbr.rel (%p1009_p6) target bundleno = 293 (0x125), region = 48 }
 0x115   : > { %v577_v55 = vadd.f32 %v1104_v53, %v408_v48  ;;  %v558_v56 = vpop.f32.mrb[7].mxu1  ;;  %v1148_v57 = vadd.f32 %v1127_v54, %v576_v49  ;;  %v1128_v61 = vpop.f32.mrb[6].mxu0 }
 0x116   : > { %v575_v59 = vadd.f32 %v558_v56, %v406_v51  ;;  %v1152_v60 = vadd.f32 %v740_v58, %v574_v52  ;;  %v743_v63 = vpop.f32.mrb[7].mxu0  ;;  %v777_v3 = vld [vmem:[#allocation2 + $0x10] sm:$0xff] (!%p1009_p6) }
 0x117   : > { %769 = vst [vmem:[#allocation2 + $0x30] sm:$0xff] %v1148_v57  ;;  %v1156_v62 = vadd.f32 %v1128_v61, %v577_v55  ;;  %v775_v1 = vld [vmem:[#allocation2] sm:$0xff] (!%p1009_p6) }
 0x118   : > { %767 = vst [vmem:[#allocation2 + $0x20] sm:$0xff] %v1152_v60  ;;  %v1160_v0 = vadd.f32 %v743_v63, %v575_v59  ;;  %v778_v5 = vld [vmem:[#allocation2 + $0x18] sm:$0xff] (!%p1009_p6) }
 0x119   : > { %770 = vst [vmem:[#allocation2 + $0x38] sm:$0xff] %v1156_v62  ;;  %v776_v2 = vld [vmem:[#allocation2 + $0x8] sm:$0xff] (!%p1009_p6)  ;;  %v1042_v8 = vpack.c.bf16 (!%p1009_p6), %v778_v5, %v777_v3 }
 0x11a   : > { %768 = vst [vmem:[#allocation2 + $0x28] sm:$0xff] %v1160_v0  ;;  %v1037_v4 = vpack.c.bf16 (!%p1009_p6), %v776_v2, %v775_v1 }
 0x11b   : > { %1054 = vst [vmem:[%s1360_s5 + $0x8] sm:$0xff] %v1042_v8  }
 0x11c   : > { %1038 = vst [vmem:[%s1360_s5] sm:$0xff] %v1037_v4  }
 0x11e   : > { %v781_v10 = vld [vmem:[#allocation2 + $0x30] sm:$0xff] }
 0x11f   : > { %v779_v6 = vld [vmem:[#allocation2 + $0x20] sm:$0xff] }
 0x120   : > { %v782_v11 = vld [vmem:[#allocation2 + $0x38] sm:$0xff] }
 0x121   : > { %v780_v7 = vld [vmem:[#allocation2 + $0x28] sm:$0xff]  ;;  %v1052_v12 = vpack.c.bf16 %v782_v11, %v781_v10 }
 0x122   : > { %v1047_v9 = vpack.c.bf16 %v780_v7, %v779_v6 }
 0x123   : > { %1056 = vst [vmem:[%s1360_s5 + $0x18] sm:$0xff] %v1052_v12  }
 0x124   : > { %1055 = vst [vmem:[%s1360_s5 + $0x10] sm:$0xff] %v1047_v9  }
 0x125 PF: > { %s15_s20 = sadd.s32 1, %s1231_s20   ;;  %s1361_s18 = smov %s1227_s19 }
 0x126   : > { %p12_p7 = scmp.ge.s32.totalorder %s15_s20, 6   ;;  %s1362_s19 = smov %s1364_s21 }
 0x128   :  { %14 = sbr.rel (!%p12_p7) target bundleno = 2 (0x2), region = 90 }

// kernel: elmo_forward.16
= control target key start
LH: loop header
LB: loop body
LE: loop exit
PB: predicated region body
PF: predicated region fallthrough
CT: control target
= control target key end

     0   :  { %v1436_v1 = vmov 0   ;;  %v81_v49 = vlaneseq  ;;  %s1964_s1 = inlined_call_operand.vmem [shape: bf16[128,512], index: 1, kind: input, shape index: {}]   ;;  %s1965_s0 = inlined_call_operand.vmem [shape: bf16[256,128], index: 0, kind: input, shape index: {}]   ;;  %s1966_s2 = inlined_call_operand.vmem [shape: f32[1,512], index: 2, kind: input, shape index: {}]   ;;  %s1967_s3 = inlined_call_operand.vmem [shape: bf16[256,512], index: 3, kind: output, shape index: {}]  }
   0x1   :  { %v1372_v0 = vld [vmem:[%s1964_s1 + $0x4] ss:$16 sps:$4 sm:$0xff]   ;;  %389 = vmatprep.mubr.bf16.mxu0 %v1436_v1  ;;  %582 = vmatprep.mubr.bf16.mxu1 %v1436_v1  ;;  %v1374_v2 = vld [vmem:[%s1964_s1 + $0xc] ss:$16 sps:$4 sm:$0xff]   ;;  %v1376_v3 = vld [vmem:[%s1964_s1] ss:$16 sps:$4 sm:$0xff]  }
   0x2   :  { %357 = vmatprep.subr.bf16.mxu0 %v1372_v0  ;;  %v1377_v4 = vld [vmem:[%s1964_s1 + $0x8] ss:$16 sps:$4 sm:$0xff]   ;;  %550 = vmatprep.subr.bf16.mxu1 %v1374_v2  ;;  %v1378_v5 = vld [vmem:[%s1964_s1 + $0x24] ss:$16 sps:$4 sm:$0xff]   ;;  %v1380_v6 = vld [vmem:[%s1964_s1 + $0x2c] ss:$16 sps:$4 sm:$0xff]  }
   0x3   :  { %358 = vmatpush1.bf16.msra.mxu0 %v1376_v3  ;;  %551 = vmatpush1.bf16.msra.mxu1 %v1377_v4  ;;  %v1382_v7 = vld [vmem:[%s1964_s1 + $0x20] ss:$16 sps:$4 sm:$0xff]   ;;  %v1383_v8 = vld [vmem:[%s1964_s1 + $0x28] ss:$16 sps:$4 sm:$0xff]   ;;  %v1384_v9 = vld [vmem:[%s1964_s1 + $0x44] ss:$16 sps:$4 sm:$0xff]  }
   0x4   :  { %359 = vmatprep.subr.bf16.mxu0 %v1378_v5  ;;  %552 = vmatprep.subr.bf16.mxu1 %v1380_v6  ;;  %v1386_v10 = vld [vmem:[%s1964_s1 + $0x4c] ss:$16 sps:$4 sm:$0xff]   ;;  %v1388_v11 = vld [vmem:[%s1964_s1 + $0x40] ss:$16 sps:$4 sm:$0xff]   ;;  %v1389_v12 = vld [vmem:[%s1964_s1 + $0x48] ss:$16 sps:$4 sm:$0xff]  }
   0x5   :  { %v1390_v13 = vld [vmem:[%s1964_s1 + $0x64] ss:$16 sps:$4 sm:$0xff]   ;;  %v1392_v14 = vld [vmem:[%s1964_s1 + $0x6c] ss:$16 sps:$4 sm:$0xff]   ;;  %v1394_v15 = vld [vmem:[%s1964_s1 + $0x60] ss:$16 sps:$4 sm:$0xff]  }
   0x6   :  { %v1395_v16 = vld [vmem:[%s1964_s1 + $0x68] ss:$16 sps:$4 sm:$0xff]   ;;  %v1396_v17 = vld [vmem:[%s1964_s1 + $0x84] ss:$16 sps:$4 sm:$0xff]   ;;  %v1398_v18 = vld [vmem:[%s1964_s1 + $0x8c] ss:$16 sps:$4 sm:$0xff]  }
   0x7   :  { %360 = vmatpush1.bf16.msra.mxu0 %v1382_v7  ;;  %553 = vmatpush1.bf16.msra.mxu1 %v1383_v8  ;;  %v1400_v19 = vld [vmem:[%s1964_s1 + $0x80] ss:$16 sps:$4 sm:$0xff]   ;;  %v1401_v20 = vld [vmem:[%s1964_s1 + $0x88] ss:$16 sps:$4 sm:$0xff]   ;;  %v1402_v21 = vld [vmem:[%s1964_s1 + $0xa4] ss:$16 sps:$4 sm:$0xff]  }
   0x8   :  { %361 = vmatprep.subr.bf16.mxu0 %v1384_v9  ;;  %554 = vmatprep.subr.bf16.mxu1 %v1386_v10  ;;  %v1404_v22 = vld [vmem:[%s1964_s1 + $0xac] ss:$16 sps:$4 sm:$0xff]   ;;  %v1406_v23 = vld [vmem:[%s1964_s1 + $0xa0] ss:$16 sps:$4 sm:$0xff]   ;;  %v1407_v24 = vld [vmem:[%s1964_s1 + $0xa8] ss:$16 sps:$4 sm:$0xff]  }
   0x9   :  { %v1408_v25 = vld [vmem:[%s1964_s1 + $0xc4] ss:$16 sps:$4 sm:$0xff]   ;;  %v1410_v26 = vld [vmem:[%s1964_s1 + $0xcc] ss:$16 sps:$4 sm:$0xff]   ;;  %v1412_v27 = vld [vmem:[%s1964_s1 + $0xc0] ss:$16 sps:$4 sm:$0xff]  }
   0xa   :  { %v1413_v28 = vld [vmem:[%s1964_s1 + $0xc8] ss:$16 sps:$4 sm:$0xff]   ;;  %v1414_v29 = vld [vmem:[%s1964_s1 + $0xe4] ss:$16 sps:$4 sm:$0xff]   ;;  %v1416_v30 = vld [vmem:[%s1964_s1 + $0xec] ss:$16 sps:$4 sm:$0xff]  }
   0xb   :  { %362 = vmatpush1.bf16.msra.mxu0 %v1388_v11  ;;  %555 = vmatpush1.bf16.msra.mxu1 %v1389_v12  ;;  %v1418_v31 = vld [vmem:[%s1964_s1 + $0xe0] ss:$16 sps:$4 sm:$0xff]   ;;  %v1419_v32 = vld [vmem:[%s1964_s1 + $0xe8] ss:$16 sps:$4 sm:$0xff]   ;;  %v82_v50 = vshrl.u32 %v81_v49, 7 }
   0xc   :  { %363 = vmatprep.subr.bf16.mxu0 %v1390_v13  ;;  %556 = vmatprep.subr.bf16.mxu1 %v1392_v14  ;;  %v1420_v33 = vld [vmem:[%s1965_s0] sm:$0xff]   ;;  %v1421_v34 = vld [vmem:[%s1965_s0 + $0x8] sm:$0xff]   ;;  %v1422_v35 = vld [vmem:[%s1965_s0 + $0x10] sm:$0xff]  }
   0xd   :  { %v1423_v36 = vld [vmem:[%s1965_s0 + $0x18] sm:$0xff]   ;;  %v1424_v37 = vld [vmem:[%s1965_s0 + $0x20] sm:$0xff]   ;;  %v1425_v38 = vld [vmem:[%s1965_s0 + $0x28] sm:$0xff]   ;;  %v83_v51 = vsub.s32 0, %v82_v50  ;;  %v91_v52 = vsub.s32 2, %v82_v50  ;;  %v87_v54 = vsub.s32 1, %v82_v50 }
   0xe   :  { %v1426_v39 = vld [vmem:[%s1965_s0 + $0x30] sm:$0xff]   ;;  %v1427_v40 = vld [vmem:[%s1965_s0 + $0x38] sm:$0xff]   ;;  %v1428_v41 = vld [vmem:[%s1965_s0 + $0x40] sm:$0xff]   ;;  %v95_v55 = vsub.s32 3, %v82_v50 }
   0xf   :  { %364 = vmatpush1.bf16.msra.mxu0 %v1394_v15  ;;  %557 = vmatpush1.bf16.msra.mxu1 %v1395_v16  ;;  %v1429_v42 = vld [vmem:[%s1965_s0 + $0x48] sm:$0xff]   ;;  %v1430_v43 = vld [vmem:[%s1965_s0 + $0x50] sm:$0xff]   ;;  %v1431_v44 = vld [vmem:[%s1965_s0 + $0x58] sm:$0xff]  }
  0x10   :  { %365 = vmatprep.subr.bf16.mxu0 %v1396_v17  ;;  %558 = vmatprep.subr.bf16.mxu1 %v1398_v18  ;;  %v1432_v45 = vld [vmem:[%s1965_s0 + $0x60] sm:$0xff]   ;;  %v1433_v46 = vld [vmem:[%s1965_s0 + $0x68] sm:$0xff]   ;;  %v1434_v47 = vld [vmem:[%s1965_s0 + $0x70] sm:$0xff]  }
  0x11   :  { %v1435_v48 = vld [vmem:[%s1965_s0 + $0x78] sm:$0xff]   ;;  %v79_v53 = vld [vmem:[%s1966_s2] sm:$0xf] }
  0x12   :  { %v1636_v56 = vrot.slane %v79_v53, %v83_v51  ;;  %v1638_v57 = vrot.slane %v79_v53, %v91_v52  ;;  %v1640_v58 = vrot.slane %v79_v53, %v87_v54  ;;  %v1642_v59 = vrot.slane %v79_v53, %v95_v55 }
  0x13   :  { %366 = vmatpush1.bf16.msra.mxu0 %v1400_v19  ;;  %559 = vmatpush1.bf16.msra.mxu1 %v1401_v20 }
  0x14   :  { %367 = vmatprep.subr.bf16.mxu0 %v1402_v21  ;;  %560 = vmatprep.subr.bf16.mxu1 %v1404_v22 }
  0x17   :  { %368 = vmatpush1.bf16.msra.mxu0 %v1406_v23  ;;  %561 = vmatpush1.bf16.msra.mxu1 %v1407_v24 }
  0x18   :  { %369 = vmatprep.subr.bf16.mxu0 %v1408_v25  ;;  %562 = vmatprep.subr.bf16.mxu1 %v1410_v26 }
  0x1b   :  { %370 = vmatpush1.bf16.msra.mxu0 %v1412_v27  ;;  %563 = vmatpush1.bf16.msra.mxu1 %v1413_v28 }
  0x1c   :  { %371 = vmatprep.subr.bf16.mxu0 %v1414_v29  ;;  %564 = vmatprep.subr.bf16.mxu1 %v1416_v30 }
  0x1f   :  { %372 = vmatpush1.bf16.msra.mxu0 %v1418_v31  ;;  %565 = vmatpush1.bf16.msra.mxu1 %v1419_v32 }
  0x22   :  { %390 = vmatmul.mubr.bf16.vlgmr.msra.gmra.mrb[0].mxu0 %v1420_v33  ;;  %583 = vmatmul.mubr.bf16.vlgmr.msra.gmra.mrb[0].mxu1 %v1420_v33 }
  0x23   :  { %399 = vmatprep.mubr.bf16.mxu0 %v1436_v1  ;;  %592 = vmatprep.mubr.bf16.mxu1 %v1436_v1 }
  0x2a   :  { %400 = vmatmul.mubr.bf16.gmra.mrb[4].mxu0 %v1421_v34  ;;  %593 = vmatmul.mubr.bf16.gmra.mrb[4].mxu1 %v1421_v34 }
  0x2b   :  { %409 = vmatprep.mubr.bf16.mxu0 %v1436_v1  ;;  %602 = vmatprep.mubr.bf16.mxu1 %v1436_v1 }
  0x32   :  { %410 = vmatmul.mubr.bf16.gmra.mrb[8].mxu0 %v1422_v35  ;;  %603 = vmatmul.mubr.bf16.gmra.mrb[8].mxu1 %v1422_v35 }
  0x33   :  { %419 = vmatprep.mubr.bf16.mxu0 %v1436_v1  ;;  %612 = vmatprep.mubr.bf16.mxu1 %v1436_v1 }
  0x3a   :  { %420 = vmatmul.mubr.bf16.gmra.mrb[12].mxu0 %v1423_v36  ;;  %613 = vmatmul.mubr.bf16.gmra.mrb[12].mxu1 %v1423_v36 }
  0x3b   :  { %429 = vmatprep.mubr.bf16.mxu0 %v1436_v1  ;;  %622 = vmatprep.mubr.bf16.mxu1 %v1436_v1 }
  0x42   :  { %430 = vmatmul.mubr.bf16.gmra.mrb[16].mxu0 %v1424_v37  ;;  %623 = vmatmul.mubr.bf16.gmra.mrb[16].mxu1 %v1424_v37 }
  0x43   :  { %439 = vmatprep.mubr.bf16.mxu0 %v1436_v1  ;;  %632 = vmatprep.mubr.bf16.mxu1 %v1436_v1 }
  0x4a   :  { %440 = vmatmul.mubr.bf16.gmra.mrb[20].mxu0 %v1425_v38  ;;  %633 = vmatmul.mubr.bf16.gmra.mrb[20].mxu1 %v1425_v38 }
  0x4b   :  { %449 = vmatprep.mubr.bf16.mxu0 %v1436_v1  ;;  %642 = vmatprep.mubr.bf16.mxu1 %v1436_v1 }
  0x52   :  { %450 = vmatmul.mubr.bf16.gmra.mrb[24].mxu0 %v1426_v39  ;;  %643 = vmatmul.mubr.bf16.gmra.mrb[24].mxu1 %v1426_v39 }
  0x53   :  { %459 = vmatprep.mubr.bf16.mxu0 %v1436_v1  ;;  %652 = vmatprep.mubr.bf16.mxu1 %v1436_v1 }
  0x5a   :  { %460 = vmatmul.mubr.bf16.gmra.mrb[28].mxu0 %v1427_v40  ;;  %653 = vmatmul.mubr.bf16.gmra.mrb[28].mxu1 %v1427_v40 }
  0x5b   :  { %469 = vmatprep.mubr.bf16.mxu0 %v1436_v1  ;;  %662 = vmatprep.mubr.bf16.mxu1 %v1436_v1 }
  0x62   :  { %470 = vmatmul.mubr.bf16.gmra.mrb[32].mxu0 %v1428_v41  ;;  %663 = vmatmul.mubr.bf16.gmra.mrb[32].mxu1 %v1428_v41 }
  0x63   :  { %479 = vmatprep.mubr.bf16.mxu0 %v1436_v1  ;;  %672 = vmatprep.mubr.bf16.mxu1 %v1436_v1 }
  0x6a   :  { %480 = vmatmul.mubr.bf16.gmra.mrb[36].mxu0 %v1429_v42  ;;  %673 = vmatmul.mubr.bf16.gmra.mrb[36].mxu1 %v1429_v42 }
  0x6b   :  { %489 = vmatprep.mubr.bf16.mxu0 %v1436_v1  ;;  %682 = vmatprep.mubr.bf16.mxu1 %v1436_v1 }
  0x72   :  { %490 = vmatmul.mubr.bf16.gmra.mrb[40].mxu0 %v1430_v43  ;;  %683 = vmatmul.mubr.bf16.gmra.mrb[40].mxu1 %v1430_v43 }
  0x73   :  { %499 = vmatprep.mubr.bf16.mxu0 %v1436_v1  ;;  %692 = vmatprep.mubr.bf16.mxu1 %v1436_v1 }
  0x7a   :  { %500 = vmatmul.mubr.bf16.gmra.mrb[44].mxu0 %v1431_v44  ;;  %693 = vmatmul.mubr.bf16.gmra.mrb[44].mxu1 %v1431_v44 }
  0x7b   :  { %509 = vmatprep.mubr.bf16.mxu0 %v1436_v1  ;;  %702 = vmatprep.mubr.bf16.mxu1 %v1436_v1 }
  0x82   :  { %510 = vmatmul.mubr.bf16.gmra.mrb[48].mxu0 %v1432_v45  ;;  %703 = vmatmul.mubr.bf16.gmra.mrb[48].mxu1 %v1432_v45 }
  0x83   :  { %519 = vmatprep.mubr.bf16.mxu0 %v1436_v1  ;;  %712 = vmatprep.mubr.bf16.mxu1 %v1436_v1 }
  0x8a   :  { %520 = vmatmul.mubr.bf16.gmra.mrb[52].mxu0 %v1433_v46  ;;  %713 = vmatmul.mubr.bf16.gmra.mrb[52].mxu1 %v1433_v46 }
  0x8b   :  { %529 = vmatprep.mubr.bf16.mxu0 %v1436_v1  ;;  %722 = vmatprep.mubr.bf16.mxu1 %v1436_v1 }
  0x92   :  { %530 = vmatmul.mubr.bf16.gmra.mrb[56].mxu0 %v1434_v47  ;;  %723 = vmatmul.mubr.bf16.gmra.mrb[56].mxu1 %v1434_v47 }
  0x93   :  { %539 = vmatprep.mubr.bf16.mxu0 %v1436_v1  ;;  %732 = vmatprep.mubr.bf16.mxu1 %v1436_v1 }
  0x9a   :  { %540 = vmatmul.mubr.bf16.gmra.mrb[60].mxu0 %v1435_v48  ;;  %733 = vmatmul.mubr.bf16.gmra.mrb[60].mxu1 %v1435_v48 }
  0xf5   :  { %v391_v60 = vpop.f32.mrb[0].mxu0  ;;  %v584_v61 = vpop.f32.mrb[0].mxu1 }
  0xf6   :  { %v392_v62 = vadd.f32 %v391_v60, %v1636_v56  ;;  %v585_v63 = vadd.f32 %v584_v61, %v1638_v57  ;;  %v393_v0 = vpop.f32.mrb[1].mxu0  ;;  %v586_v1 = vpop.f32.mrb[1].mxu1 }
  0xf7   :  { %v394_v2 = vadd.f32 %v393_v0, %v1640_v58  ;;  %v587_v3 = vadd.f32 %v586_v1, %v1642_v59  ;;  %v395_v4 = vpop.f32.mrb[2].mxu0  ;;  %v588_v5 = vpop.f32.mrb[2].mxu1 }
  0xf8   :  { %v396_v6 = vadd.f32 %v395_v4, %v1636_v56  ;;  %v589_v7 = vadd.f32 %v588_v5, %v1638_v57  ;;  %v397_v8 = vpop.f32.mrb[3].mxu0  ;;  %v590_v9 = vpop.f32.mrb[3].mxu1 }
  0xf9   :  { %v1307_v10 = vpack.c.bf16 %v394_v2, %v392_v62  ;;  %v1308_v11 = vpack.c.bf16 %v587_v3, %v585_v63  ;;  %v398_v12 = vadd.f32 %v397_v8, %v1640_v58  ;;  %v591_v13 = vadd.f32 %v590_v9, %v1642_v59 }
  0xfb   :  { %1127 = vst [vmem:[%s1967_s3] sm:$0xff] %v1307_v10  ;;  %1128 = vst [vmem:[%s1967_s3 + $0x8] sm:$0xff] %v1308_v11  ;;  %v1309_v14 = vpack.c.bf16 %v398_v12, %v396_v6  ;;  %v1310_v15 = vpack.c.bf16 %v591_v13, %v589_v7 }
  0xfd   :  { %1129 = vst [vmem:[%s1967_s3 + $0x10] sm:$0xff] %v1309_v14  ;;  %1130 = vst [vmem:[%s1967_s3 + $0x18] sm:$0xff] %v1310_v15  ;;  %v401_v16 = vpop.f32.mrb[4].mxu0  ;;  %v594_v17 = vpop.f32.mrb[4].mxu1 }
  0xfe   :  { %v402_v18 = vadd.f32 %v401_v16, %v1636_v56  ;;  %v595_v19 = vadd.f32 %v594_v17, %v1638_v57  ;;  %v403_v20 = vpop.f32.mrb[5].mxu0  ;;  %v596_v21 = vpop.f32.mrb[5].mxu1 }
  0xff   :  { %v404_v22 = vadd.f32 %v403_v20, %v1640_v58  ;;  %v597_v23 = vadd.f32 %v596_v21, %v1642_v59  ;;  %v405_v24 = vpop.f32.mrb[6].mxu0  ;;  %v598_v25 = vpop.f32.mrb[6].mxu1 }
 0x100   :  { %v406_v26 = vadd.f32 %v405_v24, %v1636_v56  ;;  %v599_v27 = vadd.f32 %v598_v25, %v1638_v57  ;;  %v407_v28 = vpop.f32.mrb[7].mxu0  ;;  %v600_v29 = vpop.f32.mrb[7].mxu1 }
 0x101   :  { %v1311_v30 = vpack.c.bf16 %v404_v22, %v402_v18  ;;  %v1312_v31 = vpack.c.bf16 %v597_v23, %v595_v19  ;;  %v408_v32 = vadd.f32 %v407_v28, %v1640_v58  ;;  %v601_v33 = vadd.f32 %v600_v29, %v1642_v59 }
 0x103   :  { %1131 = vst [vmem:[%s1967_s3 + $0x20] sm:$0xff] %v1311_v30  ;;  %1132 = vst [vmem:[%s1967_s3 + $0x28] sm:$0xff] %v1312_v31  ;;  %v1313_v34 = vpack.c.bf16 %v408_v32, %v406_v26  ;;  %v1314_v35 = vpack.c.bf16 %v601_v33, %v599_v27 }
 0x105   :  { %1133 = vst [vmem:[%s1967_s3 + $0x30] sm:$0xff] %v1313_v34  ;;  %1134 = vst [vmem:[%s1967_s3 + $0x38] sm:$0xff] %v1314_v35  ;;  %v411_v36 = vpop.f32.mrb[8].mxu0  ;;  %v604_v37 = vpop.f32.mrb[8].mxu1 }
 0x106   :  { %v412_v38 = vadd.f32 %v411_v36, %v1636_v56  ;;  %v605_v39 = vadd.f32 %v604_v37, %v1638_v57  ;;  %v413_v40 = vpop.f32.mrb[9].mxu0  ;;  %v606_v41 = vpop.f32.mrb[9].mxu1 }
 0x107   :  { %v414_v42 = vadd.f32 %v413_v40, %v1640_v58  ;;  %v607_v43 = vadd.f32 %v606_v41, %v1642_v59  ;;  %v415_v44 = vpop.f32.mrb[10].mxu0  ;;  %v608_v45 = vpop.f32.mrb[10].mxu1 }
 0x108   :  { %v416_v46 = vadd.f32 %v415_v44, %v1636_v56  ;;  %v609_v47 = vadd.f32 %v608_v45, %v1638_v57  ;;  %v417_v48 = vpop.f32.mrb[11].mxu0  ;;  %v610_v49 = vpop.f32.mrb[11].mxu1 }
 0x109   :  { %v1315_v50 = vpack.c.bf16 %v414_v42, %v412_v38  ;;  %v1316_v51 = vpack.c.bf16 %v607_v43, %v605_v39  ;;  %v418_v52 = vadd.f32 %v417_v48, %v1640_v58  ;;  %v611_v53 = vadd.f32 %v610_v49, %v1642_v59 }
 0x10b   :  { %1135 = vst [vmem:[%s1967_s3 + $0x40] sm:$0xff] %v1315_v50  ;;  %1136 = vst [vmem:[%s1967_s3 + $0x48] sm:$0xff] %v1316_v51  ;;  %v1317_v54 = vpack.c.bf16 %v418_v52, %v416_v46  ;;  %v1318_v55 = vpack.c.bf16 %v611_v53, %v609_v47 }
 0x10d   :  { %1137 = vst [vmem:[%s1967_s3 + $0x50] sm:$0xff] %v1317_v54  ;;  %1138 = vst [vmem:[%s1967_s3 + $0x58] sm:$0xff] %v1318_v55  ;;  %v421_v60 = vpop.f32.mrb[12].mxu0  ;;  %v614_v61 = vpop.f32.mrb[12].mxu1 }
 0x10e   :  { %v422_v62 = vadd.f32 %v421_v60, %v1636_v56  ;;  %v615_v63 = vadd.f32 %v614_v61, %v1638_v57  ;;  %v423_v0 = vpop.f32.mrb[13].mxu0  ;;  %v616_v1 = vpop.f32.mrb[13].mxu1 }
 0x10f   :  { %v424_v2 = vadd.f32 %v423_v0, %v1640_v58  ;;  %v617_v3 = vadd.f32 %v616_v1, %v1642_v59  ;;  %v425_v4 = vpop.f32.mrb[14].mxu0  ;;  %v618_v5 = vpop.f32.mrb[14].mxu1 }
 0x110   :  { %v426_v6 = vadd.f32 %v425_v4, %v1636_v56  ;;  %v619_v7 = vadd.f32 %v618_v5, %v1638_v57  ;;  %v427_v8 = vpop.f32.mrb[15].mxu0  ;;  %v620_v9 = vpop.f32.mrb[15].mxu1 }
 0x111   :  { %v1319_v10 = vpack.c.bf16 %v424_v2, %v422_v62  ;;  %v1320_v11 = vpack.c.bf16 %v617_v3, %v615_v63  ;;  %v428_v12 = vadd.f32 %v427_v8, %v1640_v58  ;;  %v621_v13 = vadd.f32 %v620_v9, %v1642_v59 }
 0x113   :  { %1139 = vst [vmem:[%s1967_s3 + $0x60] sm:$0xff] %v1319_v10  ;;  %1140 = vst [vmem:[%s1967_s3 + $0x68] sm:$0xff] %v1320_v11  ;;  %v1321_v14 = vpack.c.bf16 %v428_v12, %v426_v6  ;;  %v1322_v15 = vpack.c.bf16 %v621_v13, %v619_v7 }
 0x115   :  { %1141 = vst [vmem:[%s1967_s3 + $0x70] sm:$0xff] %v1321_v14  ;;  %1142 = vst [vmem:[%s1967_s3 + $0x78] sm:$0xff] %v1322_v15  ;;  %v431_v16 = vpop.f32.mrb[16].mxu0  ;;  %v624_v17 = vpop.f32.mrb[16].mxu1 }
 0x116   :  { %v432_v18 = vadd.f32 %v431_v16, %v1636_v56  ;;  %v625_v19 = vadd.f32 %v624_v17, %v1638_v57  ;;  %v433_v20 = vpop.f32.mrb[17].mxu0  ;;  %v626_v21 = vpop.f32.mrb[17].mxu1 }
 0x117   :  { %v434_v22 = vadd.f32 %v433_v20, %v1640_v58  ;;  %v627_v23 = vadd.f32 %v626_v21, %v1642_v59  ;;  %v435_v24 = vpop.f32.mrb[18].mxu0  ;;  %v628_v25 = vpop.f32.mrb[18].mxu1 }
 0x118   :  { %v436_v26 = vadd.f32 %v435_v24, %v1636_v56  ;;  %v629_v27 = vadd.f32 %v628_v25, %v1638_v57  ;;  %v437_v28 = vpop.f32.mrb[19].mxu0  ;;  %v630_v29 = vpop.f32.mrb[19].mxu1 }
 0x119   :  { %v1323_v30 = vpack.c.bf16 %v434_v22, %v432_v18  ;;  %v1324_v31 = vpack.c.bf16 %v627_v23, %v625_v19  ;;  %v438_v32 = vadd.f32 %v437_v28, %v1640_v58  ;;  %v631_v33 = vadd.f32 %v630_v29, %v1642_v59 }
 0x11b   :  { %1143 = vst [vmem:[%s1967_s3 + $0x80] sm:$0xff] %v1323_v30  ;;  %1144 = vst [vmem:[%s1967_s3 + $0x88] sm:$0xff] %v1324_v31  ;;  %v1325_v34 = vpack.c.bf16 %v438_v32, %v436_v26  ;;  %v1326_v35 = vpack.c.bf16 %v631_v33, %v629_v27 }
 0x11d   :  { %1145 = vst [vmem:[%s1967_s3 + $0x90] sm:$0xff] %v1325_v34  ;;  %1146 = vst [vmem:[%s1967_s3 + $0x98] sm:$0xff] %v1326_v35  ;;  %v441_v36 = vpop.f32.mrb[20].mxu0  ;;  %v634_v37 = vpop.f32.mrb[20].mxu1 }
 0x11e   :  { %v442_v38 = vadd.f32 %v441_v36, %v1636_v56  ;;  %v635_v39 = vadd.f32 %v634_v37, %v1638_v57  ;;  %v443_v40 = vpop.f32.mrb[21].mxu0  ;;  %v636_v41 = vpop.f32.mrb[21].mxu1 }
 0x11f   :  { %v444_v42 = vadd.f32 %v443_v40, %v1640_v58  ;;  %v637_v43 = vadd.f32 %v636_v41, %v1642_v59  ;;  %v445_v44 = vpop.f32.mrb[22].mxu0  ;;  %v638_v45 = vpop.f32.mrb[22].mxu1 }
 0x120   :  { %v446_v46 = vadd.f32 %v445_v44, %v1636_v56  ;;  %v639_v47 = vadd.f32 %v638_v45, %v1638_v57  ;;  %v447_v48 = vpop.f32.mrb[23].mxu0  ;;  %v640_v49 = vpop.f32.mrb[23].mxu1 }
 0x121   :  { %v1327_v50 = vpack.c.bf16 %v444_v42, %v442_v38  ;;  %v1328_v51 = vpack.c.bf16 %v637_v43, %v635_v39  ;;  %v448_v52 = vadd.f32 %v447_v48, %v1640_v58  ;;  %v641_v53 = vadd.f32 %v640_v49, %v1642_v59 }
 0x123   :  { %1147 = vst [vmem:[%s1967_s3 + $0xa0] sm:$0xff] %v1327_v50  ;;  %1148 = vst [vmem:[%s1967_s3 + $0xa8] sm:$0xff] %v1328_v51  ;;  %v1329_v54 = vpack.c.bf16 %v448_v52, %v446_v46  ;;  %v1330_v55 = vpack.c.bf16 %v641_v53, %v639_v47 }
 0x125   :  { %1149 = vst [vmem:[%s1967_s3 + $0xb0] sm:$0xff] %v1329_v54  ;;  %1150 = vst [vmem:[%s1967_s3 + $0xb8] sm:$0xff] %v1330_v55  ;;  %v451_v60 = vpop.f32.mrb[24].mxu0  ;;  %v644_v61 = vpop.f32.mrb[24].mxu1 }
 0x126   :  { %v452_v62 = vadd.f32 %v451_v60, %v1636_v56  ;;  %v645_v63 = vadd.f32 %v644_v61, %v1638_v57  ;;  %v453_v0 = vpop.f32.mrb[25].mxu0  ;;  %v646_v1 = vpop.f32.mrb[25].mxu1 }
 0x127   :  { %v454_v2 = vadd.f32 %v453_v0, %v1640_v58  ;;  %v647_v3 = vadd.f32 %v646_v1, %v1642_v59  ;;  %v455_v4 = vpop.f32.mrb[26].mxu0  ;;  %v648_v5 = vpop.f32.mrb[26].mxu1 }
 0x128   :  { %v456_v6 = vadd.f32 %v455_v4, %v1636_v56  ;;  %v649_v7 = vadd.f32 %v648_v5, %v1638_v57  ;;  %v457_v8 = vpop.f32.mrb[27].mxu0  ;;  %v650_v9 = vpop.f32.mrb[27].mxu1 }
 0x129   :  { %v1331_v10 = vpack.c.bf16 %v454_v2, %v452_v62  ;;  %v1332_v11 = vpack.c.bf16 %v647_v3, %v645_v63  ;;  %v458_v12 = vadd.f32 %v457_v8, %v1640_v58  ;;  %v651_v13 = vadd.f32 %v650_v9, %v1642_v59 }
 0x12b   :  { %1151 = vst [vmem:[%s1967_s3 + $0xc0] sm:$0xff] %v1331_v10  ;;  %1152 = vst [vmem:[%s1967_s3 + $0xc8] sm:$0xff] %v1332_v11  ;;  %v1333_v14 = vpack.c.bf16 %v458_v12, %v456_v6  ;;  %v1334_v15 = vpack.c.bf16 %v651_v13, %v649_v7 }
 0x12d   :  { %1153 = vst [vmem:[%s1967_s3 + $0xd0] sm:$0xff] %v1333_v14  ;;  %1154 = vst [vmem:[%s1967_s3 + $0xd8] sm:$0xff] %v1334_v15  ;;  %v461_v16 = vpop.f32.mrb[28].mxu0  ;;  %v654_v17 = vpop.f32.mrb[28].mxu1 }
 0x12e   :  { %v462_v18 = vadd.f32 %v461_v16, %v1636_v56  ;;  %v655_v19 = vadd.f32 %v654_v17, %v1638_v57  ;;  %v463_v20 = vpop.f32.mrb[29].mxu0  ;;  %v656_v21 = vpop.f32.mrb[29].mxu1 }
 0x12f   :  { %v464_v22 = vadd.f32 %v463_v20, %v1640_v58  ;;  %v657_v23 = vadd.f32 %v656_v21, %v1642_v59  ;;  %v465_v24 = vpop.f32.mrb[30].mxu0  ;;  %v658_v25 = vpop.f32.mrb[30].mxu1 }
 0x130   :  { %v466_v26 = vadd.f32 %v465_v24, %v1636_v56  ;;  %v659_v27 = vadd.f32 %v658_v25, %v1638_v57  ;;  %v467_v28 = vpop.f32.mrb[31].mxu0  ;;  %v660_v29 = vpop.f32.mrb[31].mxu1 }
 0x131   :  { %v1335_v30 = vpack.c.bf16 %v464_v22, %v462_v18  ;;  %v1336_v31 = vpack.c.bf16 %v657_v23, %v655_v19  ;;  %v468_v32 = vadd.f32 %v467_v28, %v1640_v58  ;;  %v661_v33 = vadd.f32 %v660_v29, %v1642_v59 }
 0x133   :  { %1155 = vst [vmem:[%s1967_s3 + $0xe0] sm:$0xff] %v1335_v30  ;;  %1156 = vst [vmem:[%s1967_s3 + $0xe8] sm:$0xff] %v1336_v31  ;;  %v1337_v34 = vpack.c.bf16 %v468_v32, %v466_v26  ;;  %v1338_v35 = vpack.c.bf16 %v661_v33, %v659_v27 }
 0x135   :  { %1157 = vst [vmem:[%s1967_s3 + $0xf0] sm:$0xff] %v1337_v34  ;;  %1158 = vst [vmem:[%s1967_s3 + $0xf8] sm:$0xff] %v1338_v35  ;;  %v471_v36 = vpop.f32.mrb[32].mxu0  ;;  %v664_v37 = vpop.f32.mrb[32].mxu1 }
 0x136   :  { %v472_v38 = vadd.f32 %v471_v36, %v1636_v56  ;;  %v665_v39 = vadd.f32 %v664_v37, %v1638_v57  ;;  %v473_v40 = vpop.f32.mrb[33].mxu0  ;;  %v666_v41 = vpop.f32.mrb[33].mxu1 }
 0x137   :  { %v474_v42 = vadd.f32 %v473_v40, %v1640_v58  ;;  %v667_v43 = vadd.f32 %v666_v41, %v1642_v59  ;;  %v475_v44 = vpop.f32.mrb[34].mxu0  ;;  %v668_v45 = vpop.f32.mrb[34].mxu1 }
 0x138   :  { %v476_v46 = vadd.f32 %v475_v44, %v1636_v56  ;;  %v669_v47 = vadd.f32 %v668_v45, %v1638_v57  ;;  %v477_v48 = vpop.f32.mrb[35].mxu0  ;;  %v670_v49 = vpop.f32.mrb[35].mxu1 }
 0x139   :  { %v1339_v50 = vpack.c.bf16 %v474_v42, %v472_v38  ;;  %v1340_v51 = vpack.c.bf16 %v667_v43, %v665_v39  ;;  %v478_v52 = vadd.f32 %v477_v48, %v1640_v58  ;;  %v671_v53 = vadd.f32 %v670_v49, %v1642_v59 }
 0x13b   :  { %1159 = vst [vmem:[%s1967_s3 + $0x100] sm:$0xff] %v1339_v50  ;;  %1160 = vst [vmem:[%s1967_s3 + $0x108] sm:$0xff] %v1340_v51  ;;  %v1341_v54 = vpack.c.bf16 %v478_v52, %v476_v46  ;;  %v1342_v55 = vpack.c.bf16 %v671_v53, %v669_v47 }
 0x13d   :  { %1161 = vst [vmem:[%s1967_s3 + $0x110] sm:$0xff] %v1341_v54  ;;  %1162 = vst [vmem:[%s1967_s3 + $0x118] sm:$0xff] %v1342_v55  ;;  %v481_v60 = vpop.f32.mrb[36].mxu0  ;;  %v674_v61 = vpop.f32.mrb[36].mxu1 }
 0x13e   :  { %v482_v62 = vadd.f32 %v481_v60, %v1636_v56  ;;  %v675_v63 = vadd.f32 %v674_v61, %v1638_v57  ;;  %v483_v0 = vpop.f32.mrb[37].mxu0  ;;  %v676_v1 = vpop.f32.mrb[37].mxu1 }
 0x13f   :  { %v484_v2 = vadd.f32 %v483_v0, %v1640_v58  ;;  %v677_v3 = vadd.f32 %v676_v1, %v1642_v59  ;;  %v485_v4 = vpop.f32.mrb[38].mxu0  ;;  %v678_v5 = vpop.f32.mrb[38].mxu1 }
 0x140   :  { %v486_v6 = vadd.f32 %v485_v4, %v1636_v56  ;;  %v679_v7 = vadd.f32 %v678_v5, %v1638_v57  ;;  %v487_v8 = vpop.f32.mrb[39].mxu0  ;;  %v680_v9 = vpop.f32.mrb[39].mxu1 }
 0x141   :  { %v1343_v10 = vpack.c.bf16 %v484_v2, %v482_v62  ;;  %v1344_v11 = vpack.c.bf16 %v677_v3, %v675_v63  ;;  %v488_v12 = vadd.f32 %v487_v8, %v1640_v58  ;;  %v681_v13 = vadd.f32 %v680_v9, %v1642_v59 }
 0x143   :  { %1163 = vst [vmem:[%s1967_s3 + $0x120] sm:$0xff] %v1343_v10  ;;  %1164 = vst [vmem:[%s1967_s3 + $0x128] sm:$0xff] %v1344_v11  ;;  %v1345_v14 = vpack.c.bf16 %v488_v12, %v486_v6  ;;  %v1346_v15 = vpack.c.bf16 %v681_v13, %v679_v7 }
 0x145   :  { %1165 = vst [vmem:[%s1967_s3 + $0x130] sm:$0xff] %v1345_v14  ;;  %1166 = vst [vmem:[%s1967_s3 + $0x138] sm:$0xff] %v1346_v15  ;;  %v491_v16 = vpop.f32.mrb[40].mxu0  ;;  %v684_v17 = vpop.f32.mrb[40].mxu1 }
 0x146   :  { %v492_v18 = vadd.f32 %v491_v16, %v1636_v56  ;;  %v685_v19 = vadd.f32 %v684_v17, %v1638_v57  ;;  %v493_v20 = vpop.f32.mrb[41].mxu0  ;;  %v686_v21 = vpop.f32.mrb[41].mxu1 }
 0x147   :  { %v494_v22 = vadd.f32 %v493_v20, %v1640_v58  ;;  %v687_v23 = vadd.f32 %v686_v21, %v1642_v59  ;;  %v495_v24 = vpop.f32.mrb[42].mxu0  ;;  %v688_v25 = vpop.f32.mrb[42].mxu1 }
 0x148   :  { %v496_v26 = vadd.f32 %v495_v24, %v1636_v56  ;;  %v689_v27 = vadd.f32 %v688_v25, %v1638_v57  ;;  %v497_v28 = vpop.f32.mrb[43].mxu0  ;;  %v690_v29 = vpop.f32.mrb[43].mxu1 }
 0x149   :  { %v1347_v30 = vpack.c.bf16 %v494_v22, %v492_v18  ;;  %v1348_v31 = vpack.c.bf16 %v687_v23, %v685_v19  ;;  %v498_v32 = vadd.f32 %v497_v28, %v1640_v58  ;;  %v691_v33 = vadd.f32 %v690_v29, %v1642_v59 }
 0x14b   :  { %1167 = vst [vmem:[%s1967_s3 + $0x140] sm:$0xff] %v1347_v30  ;;  %1168 = vst [vmem:[%s1967_s3 + $0x148] sm:$0xff] %v1348_v31  ;;  %v1349_v34 = vpack.c.bf16 %v498_v32, %v496_v26  ;;  %v1350_v35 = vpack.c.bf16 %v691_v33, %v689_v27 }
 0x14d   :  { %1169 = vst [vmem:[%s1967_s3 + $0x150] sm:$0xff] %v1349_v34  ;;  %1170 = vst [vmem:[%s1967_s3 + $0x158] sm:$0xff] %v1350_v35  ;;  %v501_v36 = vpop.f32.mrb[44].mxu0  ;;  %v694_v37 = vpop.f32.mrb[44].mxu1 }
 0x14e   :  { %v502_v38 = vadd.f32 %v501_v36, %v1636_v56  ;;  %v695_v39 = vadd.f32 %v694_v37, %v1638_v57  ;;  %v503_v40 = vpop.f32.mrb[45].mxu0  ;;  %v696_v41 = vpop.f32.mrb[45].mxu1 }
 0x14f   :  { %v504_v42 = vadd.f32 %v503_v40, %v1640_v58  ;;  %v697_v43 = vadd.f32 %v696_v41, %v1642_v59  ;;  %v505_v44 = vpop.f32.mrb[46].mxu0  ;;  %v698_v45 = vpop.f32.mrb[46].mxu1 }
 0x150   :  { %v506_v46 = vadd.f32 %v505_v44, %v1636_v56  ;;  %v699_v47 = vadd.f32 %v698_v45, %v1638_v57  ;;  %v507_v48 = vpop.f32.mrb[47].mxu0  ;;  %v700_v49 = vpop.f32.mrb[47].mxu1 }
 0x151   :  { %v1351_v50 = vpack.c.bf16 %v504_v42, %v502_v38  ;;  %v1352_v51 = vpack.c.bf16 %v697_v43, %v695_v39  ;;  %v508_v52 = vadd.f32 %v507_v48, %v1640_v58  ;;  %v701_v53 = vadd.f32 %v700_v49, %v1642_v59 }
 0x153   :  { %1171 = vst [vmem:[%s1967_s3 + $0x160] sm:$0xff] %v1351_v50  ;;  %1172 = vst [vmem:[%s1967_s3 + $0x168] sm:$0xff] %v1352_v51  ;;  %v1353_v54 = vpack.c.bf16 %v508_v52, %v506_v46  ;;  %v1354_v55 = vpack.c.bf16 %v701_v53, %v699_v47 }
 0x155   :  { %1173 = vst [vmem:[%s1967_s3 + $0x170] sm:$0xff] %v1353_v54  ;;  %1174 = vst [vmem:[%s1967_s3 + $0x178] sm:$0xff] %v1354_v55  ;;  %v511_v60 = vpop.f32.mrb[48].mxu0  ;;  %v704_v61 = vpop.f32.mrb[48].mxu1 }
 0x156   :  { %v512_v62 = vadd.f32 %v511_v60, %v1636_v56  ;;  %v705_v63 = vadd.f32 %v704_v61, %v1638_v57  ;;  %v513_v0 = vpop.f32.mrb[49].mxu0  ;;  %v706_v1 = vpop.f32.mrb[49].mxu1 }
 0x157   :  { %v514_v2 = vadd.f32 %v513_v0, %v1640_v58  ;;  %v707_v3 = vadd.f32 %v706_v1, %v1642_v59  ;;  %v515_v4 = vpop.f32.mrb[50].mxu0  ;;  %v708_v5 = vpop.f32.mrb[50].mxu1 }
 0x158   :  { %v516_v6 = vadd.f32 %v515_v4, %v1636_v56  ;;  %v709_v7 = vadd.f32 %v708_v5, %v1638_v57  ;;  %v517_v8 = vpop.f32.mrb[51].mxu0  ;;  %v710_v9 = vpop.f32.mrb[51].mxu1 }
 0x159   :  { %v1355_v10 = vpack.c.bf16 %v514_v2, %v512_v62  ;;  %v1356_v11 = vpack.c.bf16 %v707_v3, %v705_v63  ;;  %v518_v12 = vadd.f32 %v517_v8, %v1640_v58  ;;  %v711_v13 = vadd.f32 %v710_v9, %v1642_v59 }
 0x15b   :  { %1175 = vst [vmem:[%s1967_s3 + $0x180] sm:$0xff] %v1355_v10  ;;  %1176 = vst [vmem:[%s1967_s3 + $0x188] sm:$0xff] %v1356_v11  ;;  %v1357_v14 = vpack.c.bf16 %v518_v12, %v516_v6  ;;  %v1358_v15 = vpack.c.bf16 %v711_v13, %v709_v7 }
 0x15d   :  { %1177 = vst [vmem:[%s1967_s3 + $0x190] sm:$0xff] %v1357_v14  ;;  %1178 = vst [vmem:[%s1967_s3 + $0x198] sm:$0xff] %v1358_v15  ;;  %v521_v16 = vpop.f32.mrb[52].mxu0  ;;  %v714_v17 = vpop.f32.mrb[52].mxu1 }
 0x15e   :  { %v522_v18 = vadd.f32 %v521_v16, %v1636_v56  ;;  %v715_v19 = vadd.f32 %v714_v17, %v1638_v57  ;;  %v523_v20 = vpop.f32.mrb[53].mxu0  ;;  %v716_v21 = vpop.f32.mrb[53].mxu1 }
 0x15f   :  { %v524_v22 = vadd.f32 %v523_v20, %v1640_v58  ;;  %v717_v23 = vadd.f32 %v716_v21, %v1642_v59  ;;  %v525_v24 = vpop.f32.mrb[54].mxu0  ;;  %v718_v25 = vpop.f32.mrb[54].mxu1 }
 0x160   :  { %v526_v26 = vadd.f32 %v525_v24, %v1636_v56  ;;  %v719_v27 = vadd.f32 %v718_v25, %v1638_v57  ;;  %v527_v28 = vpop.f32.mrb[55].mxu0  ;;  %v720_v29 = vpop.f32.mrb[55].mxu1 }
 0x161   :  { %v1359_v30 = vpack.c.bf16 %v524_v22, %v522_v18  ;;  %v1360_v31 = vpack.c.bf16 %v717_v23, %v715_v19  ;;  %v528_v32 = vadd.f32 %v527_v28, %v1640_v58  ;;  %v721_v33 = vadd.f32 %v720_v29, %v1642_v59 }
 0x163   :  { %1179 = vst [vmem:[%s1967_s3 + $0x1a0] sm:$0xff] %v1359_v30  ;;  %1180 = vst [vmem:[%s1967_s3 + $0x1a8] sm:$0xff] %v1360_v31  ;;  %v1361_v34 = vpack.c.bf16 %v528_v32, %v526_v26  ;;  %v1362_v35 = vpack.c.bf16 %v721_v33, %v719_v27 }
 0x165   :  { %1181 = vst [vmem:[%s1967_s3 + $0x1b0] sm:$0xff] %v1361_v34  ;;  %1182 = vst [vmem:[%s1967_s3 + $0x1b8] sm:$0xff] %v1362_v35  ;;  %v531_v36 = vpop.f32.mrb[56].mxu0  ;;  %v724_v37 = vpop.f32.mrb[56].mxu1 }
 0x166   :  { %v532_v38 = vadd.f32 %v531_v36, %v1636_v56  ;;  %v725_v39 = vadd.f32 %v724_v37, %v1638_v57  ;;  %v533_v40 = vpop.f32.mrb[57].mxu0  ;;  %v726_v41 = vpop.f32.mrb[57].mxu1 }
 0x167   :  { %v534_v42 = vadd.f32 %v533_v40, %v1640_v58  ;;  %v727_v43 = vadd.f32 %v726_v41, %v1642_v59  ;;  %v535_v44 = vpop.f32.mrb[58].mxu0  ;;  %v728_v45 = vpop.f32.mrb[58].mxu1 }
 0x168   :  { %v536_v46 = vadd.f32 %v535_v44, %v1636_v56  ;;  %v729_v47 = vadd.f32 %v728_v45, %v1638_v57  ;;  %v537_v48 = vpop.f32.mrb[59].mxu0  ;;  %v730_v49 = vpop.f32.mrb[59].mxu1 }
 0x169   :  { %v1363_v50 = vpack.c.bf16 %v534_v42, %v532_v38  ;;  %v1364_v51 = vpack.c.bf16 %v727_v43, %v725_v39  ;;  %v538_v52 = vadd.f32 %v537_v48, %v1640_v58  ;;  %v731_v53 = vadd.f32 %v730_v49, %v1642_v59 }
 0x16b   :  { %1183 = vst [vmem:[%s1967_s3 + $0x1c0] sm:$0xff] %v1363_v50  ;;  %1184 = vst [vmem:[%s1967_s3 + $0x1c8] sm:$0xff] %v1364_v51  ;;  %v1365_v54 = vpack.c.bf16 %v538_v52, %v536_v46  ;;  %v1366_v55 = vpack.c.bf16 %v731_v53, %v729_v47 }
 0x16d   :  { %1185 = vst [vmem:[%s1967_s3 + $0x1d0] sm:$0xff] %v1365_v54  ;;  %1186 = vst [vmem:[%s1967_s3 + $0x1d8] sm:$0xff] %v1366_v55  ;;  %v541_v60 = vpop.f32.mrb[60].mxu0  ;;  %v734_v61 = vpop.f32.mrb[60].mxu1 }
 0x16e   :  { %v542_v62 = vadd.f32 %v541_v60, %v1636_v56  ;;  %v735_v63 = vadd.f32 %v734_v61, %v1638_v57  ;;  %v543_v0 = vpop.f32.mrb[61].mxu0  ;;  %v736_v1 = vpop.f32.mrb[61].mxu1 }
 0x16f   :  { %v544_v2 = vadd.f32 %v543_v0, %v1640_v58  ;;  %v737_v3 = vadd.f32 %v736_v1, %v1642_v59  ;;  %v545_v4 = vpop.f32.mrb[62].mxu0  ;;  %v738_v5 = vpop.f32.mrb[62].mxu1 }
 0x170   :  { %v546_v6 = vadd.f32 %v545_v4, %v1636_v56  ;;  %v739_v7 = vadd.f32 %v738_v5, %v1638_v57  ;;  %v547_v8 = vpop.f32.mrb[63].mxu0  ;;  %v740_v9 = vpop.f32.mrb[63].mxu1 }
 0x171   :  { %v1367_v10 = vpack.c.bf16 %v544_v2, %v542_v62  ;;  %v1368_v11 = vpack.c.bf16 %v737_v3, %v735_v63  ;;  %v548_v12 = vadd.f32 %v547_v8, %v1640_v58  ;;  %v741_v13 = vadd.f32 %v740_v9, %v1642_v59 }
 0x173   :  { %1187 = vst [vmem:[%s1967_s3 + $0x1e0] sm:$0xff] %v1367_v10  ;;  %1188 = vst [vmem:[%s1967_s3 + $0x1e8] sm:$0xff] %v1368_v11  ;;  %v1369_v14 = vpack.c.bf16 %v548_v12, %v546_v6  ;;  %v1370_v56 = vpack.c.bf16 %v741_v13, %v739_v7 }
 0x175   :  { %1189 = vst [vmem:[%s1967_s3 + $0x1f0] sm:$0xff] %v1369_v14  ;;  %1190 = vst [vmem:[%s1967_s3 + $0x1f8] sm:$0xff] %v1370_v56 }

// kernel: elmo_forward.20
= control target key start
LH: loop header
LB: loop body
LE: loop exit
PB: predicated region body
PF: predicated region fallthrough
CT: control target
= control target key end

     0   :  { %v623_v1 = vmov 0   ;;  %v56_v37 = vlaneseq  ;;  %s841_s1 = inlined_call_operand.vmem [shape: bf16[128,512], index: 1, kind: input, shape index: {}]   ;;  %s842_s0 = inlined_call_operand.vmem [shape: bf16[56,128], index: 0, kind: input, shape index: {}]   ;;  %s843_s2 = inlined_call_operand.vmem [shape: f32[1,512], index: 2, kind: input, shape index: {}]   ;;  %s844_s3 = inlined_call_operand.vmem [shape: bf16[56,512], index: 3, kind: output, shape index: {}]  }
   0x1   :  { %v571_v0 = vld [vmem:[%s841_s1 + $0x4] ss:$16 sps:$4 sm:$0xff]   ;;  %290 = vmatprep.mubr.bf16.mxu0 %v623_v1  ;;  %361 = vmatprep.mubr.bf16.mxu1 %v623_v1  ;;  %v573_v2 = vld [vmem:[%s841_s1 + $0xc] ss:$16 sps:$4 sm:$0xff]   ;;  %v575_v3 = vld [vmem:[%s841_s1] ss:$16 sps:$4 sm:$0xff]  }
   0x2   :  { %258 = vmatprep.subr.bf16.mxu0 %v571_v0  ;;  %v576_v4 = vld [vmem:[%s841_s1 + $0x8] ss:$16 sps:$4 sm:$0xff]   ;;  %329 = vmatprep.subr.bf16.mxu1 %v573_v2  ;;  %v577_v5 = vld [vmem:[%s841_s1 + $0x24] ss:$16 sps:$4 sm:$0xff]   ;;  %v579_v6 = vld [vmem:[%s841_s1 + $0x2c] ss:$16 sps:$4 sm:$0xff]  }
   0x3   :  { %259 = vmatpush1.bf16.msra.mxu0 %v575_v3  ;;  %330 = vmatpush1.bf16.msra.mxu1 %v576_v4  ;;  %v581_v7 = vld [vmem:[%s841_s1 + $0x20] ss:$16 sps:$4 sm:$0xff]   ;;  %v582_v8 = vld [vmem:[%s841_s1 + $0x28] ss:$16 sps:$4 sm:$0xff]   ;;  %v583_v9 = vld [vmem:[%s841_s1 + $0x44] ss:$16 sps:$4 sm:$0xff]  }
   0x4   :  { %260 = vmatprep.subr.bf16.mxu0 %v577_v5  ;;  %331 = vmatprep.subr.bf16.mxu1 %v579_v6  ;;  %v585_v10 = vld [vmem:[%s841_s1 + $0x4c] ss:$16 sps:$4 sm:$0xff]   ;;  %v587_v11 = vld [vmem:[%s841_s1 + $0x40] ss:$16 sps:$4 sm:$0xff]   ;;  %v588_v12 = vld [vmem:[%s841_s1 + $0x48] ss:$16 sps:$4 sm:$0xff]  }
   0x5   :  { %v589_v13 = vld [vmem:[%s841_s1 + $0x64] ss:$16 sps:$4 sm:$0xff]   ;;  %v591_v14 = vld [vmem:[%s841_s1 + $0x6c] ss:$16 sps:$4 sm:$0xff]   ;;  %v593_v15 = vld [vmem:[%s841_s1 + $0x60] ss:$16 sps:$4 sm:$0xff]  }
   0x6   :  { %v594_v16 = vld [vmem:[%s841_s1 + $0x68] ss:$16 sps:$4 sm:$0xff]   ;;  %v595_v17 = vld [vmem:[%s841_s1 + $0x84] ss:$16 sps:$4 sm:$0xff]   ;;  %v597_v18 = vld [vmem:[%s841_s1 + $0x8c] ss:$16 sps:$4 sm:$0xff]  }
   0x7   :  { %261 = vmatpush1.bf16.msra.mxu0 %v581_v7  ;;  %332 = vmatpush1.bf16.msra.mxu1 %v582_v8  ;;  %v599_v19 = vld [vmem:[%s841_s1 + $0x80] ss:$16 sps:$4 sm:$0xff]   ;;  %v600_v20 = vld [vmem:[%s841_s1 + $0x88] ss:$16 sps:$4 sm:$0xff]   ;;  %v601_v21 = vld [vmem:[%s841_s1 + $0xa4] ss:$16 sps:$4 sm:$0xff]  }
   0x8   :  { %262 = vmatprep.subr.bf16.mxu0 %v583_v9  ;;  %333 = vmatprep.subr.bf16.mxu1 %v585_v10  ;;  %v603_v22 = vld [vmem:[%s841_s1 + $0xac] ss:$16 sps:$4 sm:$0xff]   ;;  %v605_v23 = vld [vmem:[%s841_s1 + $0xa0] ss:$16 sps:$4 sm:$0xff]   ;;  %v606_v24 = vld [vmem:[%s841_s1 + $0xa8] ss:$16 sps:$4 sm:$0xff]  }
   0x9   :  { %v607_v25 = vld [vmem:[%s841_s1 + $0xc4] ss:$16 sps:$4 sm:$0xff]   ;;  %v609_v26 = vld [vmem:[%s841_s1 + $0xcc] ss:$16 sps:$4 sm:$0xff]   ;;  %v611_v27 = vld [vmem:[%s841_s1 + $0xc0] ss:$16 sps:$4 sm:$0xff]  }
   0xa   :  { %v612_v28 = vld [vmem:[%s841_s1 + $0xc8] ss:$16 sps:$4 sm:$0xff]   ;;  %v613_v29 = vld [vmem:[%s841_s1 + $0xe4] ss:$16 sps:$4 sm:$0xff]   ;;  %v615_v30 = vld [vmem:[%s841_s1 + $0xec] ss:$16 sps:$4 sm:$0xff]  }
   0xb   :  { %263 = vmatpush1.bf16.msra.mxu0 %v587_v11  ;;  %334 = vmatpush1.bf16.msra.mxu1 %v588_v12  ;;  %v617_v31 = vld [vmem:[%s841_s1 + $0xe0] ss:$16 sps:$4 sm:$0xff]   ;;  %v618_v32 = vld [vmem:[%s841_s1 + $0xe8] ss:$16 sps:$4 sm:$0xff]   ;;  %v57_v38 = vshrl.u32 %v56_v37, 7 }
   0xc   :  { %264 = vmatprep.subr.bf16.mxu0 %v589_v13  ;;  %335 = vmatprep.subr.bf16.mxu1 %v591_v14  ;;  %v619_v33 = vld [vmem:[%s842_s0] sm:$0xff]   ;;  %v620_v34 = vld [vmem:[%s842_s0 + $0x8] sm:$0xff]   ;;  %v621_v35 = vld [vmem:[%s842_s0 + $0x10] sm:$0xff]  }
   0xd   :  { %v622_v36 = vld [vmem:[%s842_s0 + $0x18] ss:$0 sps:$4 sm:$0xff]   ;;  %v58_v39 = vsub.s32 0, %v57_v38  ;;  %v66_v40 = vsub.s32 2, %v57_v38  ;;  %v54_v41 = vld [vmem:[%s843_s2] sm:$0xf] }
   0xe   :  { %v62_v42 = vsub.s32 1, %v57_v38  ;;  %v70_v43 = vsub.s32 3, %v57_v38 }
   0xf   :  { %265 = vmatpush1.bf16.msra.mxu0 %v593_v15  ;;  %336 = vmatpush1.bf16.msra.mxu1 %v594_v16  ;;  %v763_v44 = vrot.slane %v54_v41, %v58_v39  ;;  %v765_v45 = vrot.slane %v54_v41, %v66_v40 }
  0x10   :  { %266 = vmatprep.subr.bf16.mxu0 %v595_v17  ;;  %337 = vmatprep.subr.bf16.mxu1 %v597_v18  ;;  %v767_v46 = vrot.slane %v54_v41, %v62_v42  ;;  %v769_v47 = vrot.slane %v54_v41, %v70_v43 }
  0x13   :  { %267 = vmatpush1.bf16.msra.mxu0 %v599_v19  ;;  %338 = vmatpush1.bf16.msra.mxu1 %v600_v20 }
  0x14   :  { %268 = vmatprep.subr.bf16.mxu0 %v601_v21  ;;  %339 = vmatprep.subr.bf16.mxu1 %v603_v22 }
  0x17   :  { %269 = vmatpush1.bf16.msra.mxu0 %v605_v23  ;;  %340 = vmatpush1.bf16.msra.mxu1 %v606_v24 }
  0x18   :  { %270 = vmatprep.subr.bf16.mxu0 %v607_v25  ;;  %341 = vmatprep.subr.bf16.mxu1 %v609_v26 }
  0x1b   :  { %271 = vmatpush1.bf16.msra.mxu0 %v611_v27  ;;  %342 = vmatpush1.bf16.msra.mxu1 %v612_v28 }
  0x1c   :  { %272 = vmatprep.subr.bf16.mxu0 %v613_v29  ;;  %343 = vmatprep.subr.bf16.mxu1 %v615_v30 }
  0x1f   :  { %273 = vmatpush1.bf16.msra.mxu0 %v617_v31  ;;  %344 = vmatpush1.bf16.msra.mxu1 %v618_v32 }
  0x22   :  { %291 = vmatmul.mubr.bf16.vlgmr.msra.gmra.mrb[0].mxu0 %v619_v33  ;;  %362 = vmatmul.mubr.bf16.vlgmr.msra.gmra.mrb[0].mxu1 %v619_v33 }
  0x23   :  { %300 = vmatprep.mubr.bf16.mxu0 %v623_v1  ;;  %371 = vmatprep.mubr.bf16.mxu1 %v623_v1 }
  0x2a   :  { %301 = vmatmul.mubr.bf16.gmra.mrb[4].mxu0 %v620_v34  ;;  %372 = vmatmul.mubr.bf16.gmra.mrb[4].mxu1 %v620_v34 }
  0x2b   :  { %310 = vmatprep.mubr.bf16.mxu0 %v623_v1  ;;  %381 = vmatprep.mubr.bf16.mxu1 %v623_v1 }
  0x32   :  { %311 = vmatmul.mubr.bf16.gmra.mrb[8].mxu0 %v621_v35  ;;  %382 = vmatmul.mubr.bf16.gmra.mrb[8].mxu1 %v621_v35 }
  0x33   :  { %320 = vmatprep.mubr.bf16.mxu0 %v623_v1  ;;  %391 = vmatprep.mubr.bf16.mxu1 %v623_v1 }
  0x3a   :  { %321 = vmatmul.mubr.bf16.gmra.mrb[12].mxu0 %v622_v36  ;;  %392 = vmatmul.mubr.bf16.gmra.mrb[12].mxu1 %v622_v36 }
  0xf5   :  { %v292_v48 = vpop.f32.mrb[0].mxu0  ;;  %v363_v49 = vpop.f32.mrb[0].mxu1 }
  0xf6   :  { %v293_v50 = vadd.f32 %v292_v48, %v763_v44  ;;  %v364_v51 = vadd.f32 %v363_v49, %v765_v45  ;;  %v294_v52 = vpop.f32.mrb[1].mxu0  ;;  %v365_v53 = vpop.f32.mrb[1].mxu1 }
  0xf7   :  { %v295_v54 = vadd.f32 %v294_v52, %v767_v46  ;;  %v366_v55 = vadd.f32 %v365_v53, %v769_v47  ;;  %v296_v56 = vpop.f32.mrb[2].mxu0  ;;  %v367_v57 = vpop.f32.mrb[2].mxu1 }
  0xf8   :  { %v297_v58 = vadd.f32 %v296_v56, %v763_v44  ;;  %v368_v59 = vadd.f32 %v367_v57, %v765_v45  ;;  %v298_v60 = vpop.f32.mrb[3].mxu0  ;;  %v369_v61 = vpop.f32.mrb[3].mxu1 }
  0xf9   :  { %v556_v62 = vpack.c.bf16 %v295_v54, %v293_v50  ;;  %v557_v63 = vpack.c.bf16 %v366_v55, %v364_v51  ;;  %v299_v0 = vadd.f32 %v298_v60, %v767_v46  ;;  %v370_v1 = vadd.f32 %v369_v61, %v769_v47 }
  0xfb   :  { %488 = vst [vmem:[%s844_s3] sm:$0xff] %v556_v62  ;;  %489 = vst [vmem:[%s844_s3 + $0x8] sm:$0xff] %v557_v63  ;;  %v558_v2 = vpack.c.bf16 %v299_v0, %v297_v58  ;;  %v559_v3 = vpack.c.bf16 %v370_v1, %v368_v59 }
  0xfd   :  { %490 = vst [vmem:[%s844_s3 + $0x10] sm:$0xff] %v558_v2  ;;  %491 = vst [vmem:[%s844_s3 + $0x18] sm:$0xff] %v559_v3  ;;  %v302_v4 = vpop.f32.mrb[4].mxu0  ;;  %v373_v5 = vpop.f32.mrb[4].mxu1 }
  0xfe   :  { %v303_v6 = vadd.f32 %v302_v4, %v763_v44  ;;  %v374_v7 = vadd.f32 %v373_v5, %v765_v45  ;;  %v304_v8 = vpop.f32.mrb[5].mxu0  ;;  %v375_v9 = vpop.f32.mrb[5].mxu1 }
  0xff   :  { %v305_v10 = vadd.f32 %v304_v8, %v767_v46  ;;  %v376_v11 = vadd.f32 %v375_v9, %v769_v47  ;;  %v306_v12 = vpop.f32.mrb[6].mxu0  ;;  %v377_v13 = vpop.f32.mrb[6].mxu1 }
 0x100   :  { %v307_v14 = vadd.f32 %v306_v12, %v763_v44  ;;  %v378_v15 = vadd.f32 %v377_v13, %v765_v45  ;;  %v308_v16 = vpop.f32.mrb[7].mxu0  ;;  %v379_v17 = vpop.f32.mrb[7].mxu1 }
 0x101   :  { %v560_v18 = vpack.c.bf16 %v305_v10, %v303_v6  ;;  %v561_v19 = vpack.c.bf16 %v376_v11, %v374_v7  ;;  %v309_v20 = vadd.f32 %v308_v16, %v767_v46  ;;  %v380_v21 = vadd.f32 %v379_v17, %v769_v47 }
 0x103   :  { %492 = vst [vmem:[%s844_s3 + $0x20] sm:$0xff] %v560_v18  ;;  %493 = vst [vmem:[%s844_s3 + $0x28] sm:$0xff] %v561_v19  ;;  %v562_v22 = vpack.c.bf16 %v309_v20, %v307_v14  ;;  %v563_v23 = vpack.c.bf16 %v380_v21, %v378_v15 }
 0x105   :  { %494 = vst [vmem:[%s844_s3 + $0x30] sm:$0xff] %v562_v22  ;;  %495 = vst [vmem:[%s844_s3 + $0x38] sm:$0xff] %v563_v23  ;;  %v312_v24 = vpop.f32.mrb[8].mxu0  ;;  %v383_v25 = vpop.f32.mrb[8].mxu1 }
 0x106   :  { %v313_v26 = vadd.f32 %v312_v24, %v763_v44  ;;  %v384_v27 = vadd.f32 %v383_v25, %v765_v45  ;;  %v314_v28 = vpop.f32.mrb[9].mxu0  ;;  %v385_v29 = vpop.f32.mrb[9].mxu1 }
 0x107   :  { %v315_v30 = vadd.f32 %v314_v28, %v767_v46  ;;  %v386_v31 = vadd.f32 %v385_v29, %v769_v47  ;;  %v316_v32 = vpop.f32.mrb[10].mxu0  ;;  %v387_v33 = vpop.f32.mrb[10].mxu1 }
 0x108   :  { %v317_v34 = vadd.f32 %v316_v32, %v763_v44  ;;  %v388_v35 = vadd.f32 %v387_v33, %v765_v45  ;;  %v318_v36 = vpop.f32.mrb[11].mxu0  ;;  %v389_v37 = vpop.f32.mrb[11].mxu1 }
 0x109   :  { %v564_v38 = vpack.c.bf16 %v315_v30, %v313_v26  ;;  %v565_v39 = vpack.c.bf16 %v386_v31, %v384_v27  ;;  %v319_v40 = vadd.f32 %v318_v36, %v767_v46  ;;  %v390_v41 = vadd.f32 %v389_v37, %v769_v47 }
 0x10b   :  { %496 = vst [vmem:[%s844_s3 + $0x40] sm:$0xff] %v564_v38  ;;  %497 = vst [vmem:[%s844_s3 + $0x48] sm:$0xff] %v565_v39  ;;  %v566_v42 = vpack.c.bf16 %v319_v40, %v317_v34  ;;  %v567_v43 = vpack.c.bf16 %v390_v41, %v388_v35 }
 0x10d   :  { %498 = vst [vmem:[%s844_s3 + $0x50] sm:$0xff] %v566_v42  ;;  %499 = vst [vmem:[%s844_s3 + $0x58] sm:$0xff] %v567_v43  ;;  %v322_v48 = vpop.f32.mrb[12].mxu0  ;;  %v393_v49 = vpop.f32.mrb[12].mxu1 }
 0x10e   :  { %v323_v50 = vadd.f32 %v322_v48, %v763_v44  ;;  %v394_v51 = vadd.f32 %v393_v49, %v765_v45  ;;  %v324_v52 = vpop.f32.mrb[13].mxu0  ;;  %v395_v53 = vpop.f32.mrb[13].mxu1 }
 0x10f   :  { %v325_v54 = vadd.f32 %v324_v52, %v767_v46  ;;  %v396_v55 = vadd.f32 %v395_v53, %v769_v47  ;;  %v326_v56 = vpop.f32.mrb[14].mxu0  ;;  %v397_v57 = vpop.f32.mrb[14].mxu1 }
 0x110   :  { %v327_v58 = vpop.f32.mrb[15].mxu0  ;;  %v398_v59 = vpop.f32.mrb[15].mxu1 }
 0x111   :  { %v568_v60 = vpack.c.bf16 %v325_v54, %v323_v50  ;;  %v569_v61 = vpack.c.bf16 %v396_v55, %v394_v51 }
 0x113   :  { %500 = vst [vmem:[%s844_s3 + $0x60] sm:$0xff] %v568_v60  ;;  %501 = vst [vmem:[%s844_s3 + $0x68] sm:$0xff] %v569_v61 }

// kernel: elmo_forward.22
= control target key start
LH: loop header
LB: loop body
LE: loop exit
PB: predicated region body
PF: predicated region fallthrough
CT: control target
= control target key end

     0   :  { %s453_s1 = inlined_call_operand.vmem [shape: bf16[128,128], index: 1, kind: input, shape index: {}]   ;;  %s454_s0 = inlined_call_operand.vmem [shape: bf16[56,128], index: 0, kind: input, shape index: {}]   ;;  %s455_s3 = inlined_call_operand.vmem [shape: bf16[56,128], index: 3, kind: input, shape index: {}]   ;;  %s456_s2 = inlined_call_operand.vmem [shape: f32[1,128], index: 2, kind: input, shape index: {}]   ;;  %s457_s4 = inlined_call_operand.vmem [shape: bf16[56,128], index: 4, kind: output, shape index: {}]  }
   0x1   :  { %v353_v0 = vld [vmem:[%s453_s1] sm:$0xff]   ;;  %v354_v1 = vld [vmem:[%s453_s1 + $0x8] sm:$0xff]   ;;  %v355_v2 = vld [vmem:[%s453_s1 + $0x10] sm:$0xff]  }
   0x2   :  { %313 = vmatprep.subr.bf16.mxu0 %v353_v0  ;;  %337 = vmatprep.subr.bf16.mxu1 %v353_v0  ;;  %v356_v3 = vld [vmem:[%s453_s1 + $0x18] sm:$0xff]   ;;  %v361_v4 = vld [vmem:[%s454_s0] sm:$0xff]   ;;  %v362_v5 = vld [vmem:[%s454_s0 + $0x10] sm:$0xff]  }
   0x3   :  { %314 = vmatpush3.bf16.msra.mxu0 %v353_v0  ;;  %345 = vmatpush3.bf16.msra.mxu1 %v353_v0  ;;  %v357_v6 = vld [vmem:[%s453_s1 + $0x20] sm:$0xff]   ;;  %v358_v7 = vld [vmem:[%s453_s1 + $0x28] sm:$0xff]   ;;  %v359_v8 = vld [vmem:[%s453_s1 + $0x30] sm:$0xff]  }
   0x4   :  { %315 = vmatprep.subr.bf16.mxu0 %v354_v1  ;;  %338 = vmatprep.subr.bf16.mxu1 %v354_v1  ;;  %v360_v9 = vld [vmem:[%s453_s1 + $0x38] sm:$0xff]   ;;  %v363_v10 = vld [vmem:[%s454_s0 + $0x8] sm:$0xff]   ;;  %v271_v14 = vld [vmem:[%s455_s3] sm:$0xff]  }
   0x5   :  { %329 = vmatprep.mubr.bf16.mxu0 %v361_v4  ;;  %333 = vmatprep.mubr.bf16.mxu1 %v362_v5  ;;  %v364_v11 = vld [vmem:[%s454_s0 + $0x18] ss:$0 sps:$4 sm:$0xff]   ;;  %v297_v13 = vld [vmem:[%s455_s3 + $0x8] sm:$0xff]   ;;  %v243_v15 = vld [vmem:[%s456_s2] ss:$0 sm:$0xff]  ;;  %v272_v21 = vunpack.c.l.bf16 %v271_v14  ;;  %v273_v32 = vunpack.c.h.bf16 %v271_v14 }
   0x6   :  { %v188_v12 = vld [vmem:[%s455_s3 + $0x18] sm:$0xf]  ;;  %v298_v16 = vld [vmem:[%s455_s3 + $0x10] sm:$0xff]   ;;  %v276_v19 = vunpack.c.l.bf16 %v297_v13  ;;  %v277_v27 = vunpack.c.h.bf16 %v297_v13 }
   0x7   :  { %316 = vmatpush3.bf16.msra.mxu0 %v354_v1  ;;  %346 = vmatpush3.bf16.msra.mxu1 %v354_v1  ;;  %v195_v17 = vunpack.c.l.bf16 %v188_v12  ;;  %v280_v26 = vunpack.c.l.bf16 %v298_v16  ;;  %v281_v33 = vunpack.c.h.bf16 %v298_v16 }
   0x8   :  { %317 = vmatprep.subr.bf16.mxu0 %v355_v2  ;;  %339 = vmatprep.subr.bf16.mxu1 %v355_v2 }
   0xb   :  { %318 = vmatpush3.bf16.msra.mxu0 %v355_v2  ;;  %347 = vmatpush3.bf16.msra.mxu1 %v355_v2 }
   0xc   :  { %319 = vmatprep.subr.bf16.mxu0 %v356_v3  ;;  %340 = vmatprep.subr.bf16.mxu1 %v356_v3 }
   0xf   :  { %320 = vmatpush3.bf16.msra.mxu0 %v356_v3  ;;  %348 = vmatpush3.bf16.msra.mxu1 %v356_v3 }
  0x10   :  { %321 = vmatprep.subr.bf16.mxu0 %v357_v6  ;;  %341 = vmatprep.subr.bf16.mxu1 %v357_v6 }
  0x13   :  { %322 = vmatpush3.bf16.msra.mxu0 %v357_v6  ;;  %349 = vmatpush3.bf16.msra.mxu1 %v357_v6 }
  0x14   :  { %323 = vmatprep.subr.bf16.mxu0 %v358_v7  ;;  %342 = vmatprep.subr.bf16.mxu1 %v358_v7 }
  0x17   :  { %324 = vmatpush3.bf16.msra.mxu0 %v358_v7  ;;  %350 = vmatpush3.bf16.msra.mxu1 %v358_v7 }
  0x18   :  { %325 = vmatprep.subr.bf16.mxu0 %v359_v8  ;;  %343 = vmatprep.subr.bf16.mxu1 %v359_v8 }
  0x1b   :  { %326 = vmatpush3.bf16.msra.mxu0 %v359_v8  ;;  %351 = vmatpush3.bf16.msra.mxu1 %v359_v8 }
  0x1c   :  { %327 = vmatprep.subr.bf16.mxu0 %v360_v9  ;;  %344 = vmatprep.subr.bf16.mxu1 %v360_v9 }
  0x1f   :  { %328 = vmatpush3.bf16.msra.mxu0 %v360_v9  ;;  %352 = vmatpush3.bf16.msra.mxu1 %v360_v9 }
  0x22   :  { %330 = vmatmul.mubr.bf16.vlgmr.msra.gmra.mrb[0].mxu0 %v363_v10  ;;  %334 = vmatmul.mubr.bf16.vlgmr.msra.gmra.mrb[0].mxu1 %v364_v11 }
  0xf5   :  { %v331_v18 = vpop.f32.mrb[0].mxu0  ;;  %v335_v20 = vpop.f32.mrb[0].mxu1 }
  0xf6   :  { %v161_v22 = vadd.f32 %v331_v18, %v243_v15  ;;  %v177_v23 = vadd.f32 %v335_v20, %v243_v15  ;;  %v152_v24 = vpop.f32.mrb[1].mxu0  ;;  %v168_v25 = vpop.f32.mrb[1].mxu1 }
  0xf7   :  { %v153_v28 = vadd.f32 %v243_v15, %v152_v24  ;;  %v169_v29 = vadd.f32 %v243_v15, %v168_v25  ;;  %v332_v30 = vpop.f32.mrb[2].mxu0  ;;  %v336_v31 = vpop.f32.mrb[2].mxu1 }
  0xf8   :  { %v202_v34 = vadd.f32 %v195_v17, %v177_v23  ;;  %v164_v35 = vadd.f32 %v332_v30, %v243_v15  ;;  %v155_v36 = vpop.f32.mrb[3].mxu0  ;;  %v171_v37 = vpop.f32.mrb[3].mxu1  ;;  %v198_v40 = vadd.f32 %v276_v19, %v161_v22 }
  0xf9   :  { %v156_v38 = vadd.f32 %v243_v15, %v155_v36  ;;  %v172_v39 = vadd.f32 %v243_v15, %v171_v37  ;;  %v196_v43 = vadd.f32 %v272_v21, %v153_v28  ;;  %v200_v44 = vadd.f32 %v280_v26, %v169_v29 }
  0xfa   :  { %v269_v41 = vpack.c.bf16 %v202_v34, %v202_v34  ;;  %v199_v42 = vadd.f32 %v277_v27, %v164_v35 }
  0xfb   :  { %v197_v45 = vadd.f32 %v273_v32, %v156_v38  ;;  %v201_v46 = vadd.f32 %v281_v33, %v172_v39 }
  0xfc   :  { %238 = vst [vmem:[%s457_s4 + $0x18] sm:$0xf] %v269_v41  ;;  %v290_v47 = vpack.c.bf16 %v199_v42, %v198_v40 }
  0xfd   :  { %v285_v48 = vpack.c.bf16 %v197_v45, %v196_v43  ;;  %v295_v49 = vpack.c.bf16 %v201_v46, %v200_v44 }
  0xfe   :  { %299 = vst [vmem:[%s457_s4 + $0x8] sm:$0xff] %v290_v47  }
  0xff   :  { %286 = vst [vmem:[%s457_s4] sm:$0xff] %v285_v48   ;;  %300 = vst [vmem:[%s457_s4 + $0x10] sm:$0xff] %v295_v49  }

// kernel: elmo_forward.29
= control target key start
LH: loop header
LB: loop body
LE: loop exit
PB: predicated region body
PF: predicated region fallthrough
CT: control target
= control target key end

     0   :  { %v399_v1 = vmov 0.0   ;;  %vm400_vm0 = vmmov 0   ;;  %s503_s0 = inlined_call_operand.vmem [shape: bf16[16,128], index: 0, kind: input, shape index: {}]   ;;  %s504_s1 = inlined_call_operand.vmem [shape: bf16[128,128], index: 1, kind: input, shape index: {}]   ;;  %s505_s2 = inlined_call_operand.vmem [shape: bf16[16,128], index: 2, kind: input, shape index: {}]   ;;  %s506_s3 = inlined_call_operand.vmem [shape: bf16[128,128], index: 3, kind: input, shape index: {}]   ;;  %s507_s4 = inlined_call_operand.vmem [shape: f32[1,128], index: 4, kind: input, shape index: {}]   ;;  %s508_s5 = inlined_call_operand.hbm [shape: f32[16,128], index: 5, kind: output, shape index: {}]  }
   0x1   :  { %v357_v0 = vld [vmem:[%s506_s3] sm:$0xff]   ;;  %312 = vmatprep.subr.bf16.mxu0 %v399_v1  ;;  %332 = vmatprep.subr.bf16.mxu1 %v399_v1  ;;  %v359_v3 = vld [vmem:[%s506_s3 + $0x8] sm:$0xff]   ;;  %v361_v5 = vld [vmem:[%s506_s3 + $0x10] sm:$0xff]  }
   0x2   :  { %v358_v2 = vld [vmem:[%s504_s1] sm:$0xff]   ;;  %313 = vmatpush3.bf16.msra.mxu0 %v357_v0  ;;  %328 = vmatprep.mubr.msk.bf16.mxu0 %vm400_vm0, %v399_v1  ;;  %v360_v4 = vld [vmem:[%s504_s1 + $0x8] sm:$0xff]   ;;  %v362_v6 = vld [vmem:[%s504_s1 + $0x10] sm:$0xff]  }
   0x3   :  { %333 = vmatpush3.bf16.msra.mxu1 %v358_v2  ;;  %314 = vmatprep.subr.bf16.mxu0 %v399_v1  ;;  %v363_v7 = vld [vmem:[%s506_s3 + $0x18] sm:$0xff]   ;;  %v365_v9 = vld [vmem:[%s506_s3 + $0x20] sm:$0xff]   ;;  %v367_v11 = vld [vmem:[%s506_s3 + $0x28] sm:$0xff]  }
   0x4   :  { %334 = vmatprep.subr.bf16.mxu1 %v399_v1  ;;  %348 = vmatprep.mubr.msk.bf16.mxu1 %vm400_vm0, %v399_v1  ;;  %v364_v8 = vld [vmem:[%s504_s1 + $0x18] sm:$0xff]   ;;  %v366_v10 = vld [vmem:[%s504_s1 + $0x20] sm:$0xff]  }
   0x6   :  { %315 = vmatpush3.bf16.msra.mxu0 %v359_v3 }
   0x7   :  { %335 = vmatpush3.bf16.msra.mxu1 %v360_v4  ;;  %316 = vmatprep.subr.bf16.mxu0 %v399_v1 }
   0x8   :  { %336 = vmatprep.subr.bf16.mxu1 %v399_v1 }
   0xa   :  { %317 = vmatpush3.bf16.msra.mxu0 %v361_v5 }
   0xb   :  { %337 = vmatpush3.bf16.msra.mxu1 %v362_v6  ;;  %318 = vmatprep.subr.bf16.mxu0 %v399_v1 }
   0xc   :  { %338 = vmatprep.subr.bf16.mxu1 %v399_v1 }
   0xe   :  { %319 = vmatpush3.bf16.msra.mxu0 %v363_v7 }
   0xf   :  { %339 = vmatpush3.bf16.msra.mxu1 %v364_v8  ;;  %320 = vmatprep.subr.bf16.mxu0 %v399_v1 }
  0x10   :  { %340 = vmatprep.subr.bf16.mxu1 %v399_v1 }
  0x12   :  { %321 = vmatpush3.bf16.msra.mxu0 %v365_v9 }
  0x13   :  { %10 = vsyncpa [#allocation3], 0  ;;  %341 = vmatpush3.bf16.msra.mxu1 %v366_v10  ;;  %322 = vmatprep.subr.bf16.mxu0 %v399_v1  ;;  %v368_v12 = vld [vmem:[%s504_s1 + $0x28] sm:$0xff]   ;;  %v369_v13 = vld [vmem:[%s506_s3 + $0x30] sm:$0xff]  }
  0x14   :  { %342 = vmatprep.subr.bf16.mxu1 %v399_v1  ;;  %v370_v14 = vld [vmem:[%s504_s1 + $0x30] sm:$0xff]   ;;  %v371_v15 = vld [vmem:[%s506_s3 + $0x38] sm:$0xff]   ;;  %v373_v17 = vld [vmem:[%s505_s2] sm:$0xff]  }
  0x15   :  { %v372_v16 = vld [vmem:[%s504_s1 + $0x38] sm:$0xff]   ;;  %v374_v18 = vld [vmem:[%s503_s0] sm:$0xff]   ;;  %s401_s1 = smov [#allocation2]  }
  0x16   :  { %323 = vmatpush3.bf16.msra.mxu0 %v367_v11  ;;  %v293_v21 = vld [vmem:[%s507_s4] ss:$0 sm:$0xff]  ;;  %s264_s2 = sshll.u32 %s401_s1, 4  ;;  %s265_s2 = int_to_ptr.vmem [resolvable:$true] %s264_s2 }
  0x17   :  { %343 = vmatpush3.bf16.msra.mxu1 %v368_v12  ;;  %324 = vmatprep.subr.bf16.mxu0 %v399_v1  ;;  %s375_s0 = scalar_lea.vmem %s265_s2, 256  ;;  %p380_p1 = scmp.lt.s32.totalorder %s265_s2, %s265_s2 }
  0x18   :  { %344 = vmatprep.subr.bf16.mxu1 %v399_v1  ;;  %p376_p0 = scmp.ne.s32.totalorder %s265_s2, %s375_s0  ;;  %p381_p2 = scmp.lt.s32.totalorder %s375_s0, %s375_s0 }
  0x1a   :  { %325 = vmatpush3.bf16.msra.mxu0 %v369_v13  ;;  %p382_p3 = por %p381_p2, %p380_p1 }
  0x1b   :  { %345 = vmatpush3.bf16.msra.mxu1 %v370_v14  ;;  %326 = vmatprep.subr.bf16.mxu0 %v399_v1 }
  0x1c   :  { %346 = vmatprep.subr.bf16.mxu1 %v399_v1  ;;  %p383_p4 = pnand %p382_p3, %p376_p0 }
  0x1e   :  { %327 = vmatpush3.bf16.msra.mxu0 %v371_v15 }
  0x1f   :  { %347 = vmatpush3.bf16.msra.mxu1 %v372_v16 }
  0x21   :  { %329 = vmatmul.mubr.bf16.vlgmr.msra.gmra.mrb[0].mxu0 %v373_v17 }
  0x22   :  { %349 = vmatmul.mubr.bf16.vlgmr.msra.gmra.mrb[0].mxu1 %v374_v18 }
  0xf4   :  { %v146_v19 = vpop.f32.mrb[0].mxu0 }
  0xf5   :  { %v241_v20 = vpop.f32.mrb[0].mxu1  ;;  %v330_v22 = vpop.f32.mrb[1].mxu0 }
  0xf6   :  { %v242_v23 = vadd.f32 %v241_v20, %v146_v19  ;;  %v350_v24 = vpop.f32.mrb[1].mxu1  ;;  %v149_v25 = vpop.f32.mrb[2].mxu0 }
  0xf7   :  { %v244_v26 = vpop.f32.mrb[2].mxu1  ;;  %v331_v27 = vpop.f32.mrb[3].mxu0 }
  0xf8   :  { %v255_v28 = vadd.f32 %v293_v21, %v242_v23  ;;  %v245_v29 = vadd.f32 %v244_v26, %v149_v25  ;;  %v351_v30 = vpop.f32.mrb[3].mxu1 }
  0xfa   :  { %257 = vst [vmem:[#allocation2] sm:$0xff] %v255_v28  ;;  %v256_v31 = vadd.f32 %v293_v21, %v245_v29 }
  0xfc   :  { %258 = vst [vmem:[#allocation2 + $0x8] sm:$0xff] %v256_v31 }
  0xfd   :  { %386 = shalt.err (!%p383_p4)
}
  0xfe   :  { %s387_s6 = scalar_lea.hbm %s508_s5, 256 }
  0xff   :  { %p388_p5 = scmp.ne.s32.totalorder %s508_s5, %s387_s6  ;;  %p391_p6 = scmp.lt.u32.totalorder %s387_s6, %s508_s5 }
 0x101   :  { %p393_p7 = pnand %p391_p6, %p388_p5 }
 0x103   :  { %396 = shalt.err (!%p393_p7)
}
 0x104   :  { %s402_s11 = smov 128   ;;  %s403_s12 = smov 8  }
 0x105   :  { %270 = dma.vmem_to_hbm [thread:$0]  %s265_s2, 256, %s508_s5, [#allocation3], %s402_s11, %s402_s11, %s403_s12  }
 0x106   :  { %397 = dma.done.wait [#allocation3], 256  }
 0x107   :  { %398 = vsyncadd [#allocation3], 4294967040 }
 0x108   :  { %274 = vsyncpa [#allocation3], 1 }

// kernel: elmo_forward.17
= control target key start
LH: loop header
LB: loop body
LE: loop exit
PB: predicated region body
PF: predicated region fallthrough
CT: control target
= control target key end

     0   :  { %v9935_v1 = vmov 0   ;;  %v6956_v37 = vmov 0.0|0.0   ;;  %s9929_s2 = inlined_call_operand.vmem [shape: bf16[128,512], index: 2, kind: input, shape index: {}]   ;;  %s9930_s3 = inlined_call_operand.vmem [shape: bf16[128,512], index: 3, kind: input, shape index: {}]   ;;  %s9931_s0 = inlined_call_operand.vmem [shape: bf16[4,64,512], index: 0, kind: input, shape index: {}]   ;;  %s9932_s1 = inlined_call_operand.vmem [shape: bf16[4,64,512], index: 1, kind: input, shape index: {}]   ;;  %s9933_s4 = inlined_call_operand.vmem [shape: bf16[4,64,128], index: 4, kind: output, shape index: {0}]   ;;  %s9934_s5 = inlined_call_operand.vmem [shape: bf16[4,64,128], index: 5, kind: output, shape index: {1}]  }
   0x1   :  { %v6990_v0 = vld [vmem:[%s9929_s2 + $0x4] ss:$16 sps:$4 sm:$0xff]   ;;  %381 = vmatprep.mubr.bf16.mxu0 %v9935_v1  ;;  %454 = vmatprep.mubr.bf16.mxu1 %v9935_v1  ;;  %v6997_v2 = vld [vmem:[%s9929_s2] ss:$16 sps:$4 sm:$0xff]   ;;  %v7009_v4 = vld [vmem:[%s9929_s2 + $0xc] ss:$16 sps:$4 sm:$0xff]  }
   0x2   :  { %349 = vmatprep.subr.bf16.mxu0 %v6990_v0  ;;  %v7003_v3 = vld [vmem:[%s9929_s2 + $0x24] ss:$16 sps:$4 sm:$0xff]   ;;  %v7014_v5 = vld [vmem:[%s9929_s2 + $0x20] ss:$16 sps:$4 sm:$0xff]   ;;  %v7019_v6 = vld [vmem:[%s9929_s2 + $0x8] ss:$16 sps:$4 sm:$0xff]   ;;  %422 = vmatprep.subr.bf16.mxu1 %v7009_v4 }
   0x3   :  { %350 = vmatpush1.bf16.msra.mxu0 %v6997_v2  ;;  %v7025_v7 = vld [vmem:[%s9929_s2 + $0x44] ss:$16 sps:$4 sm:$0xff]   ;;  %v7031_v8 = vld [vmem:[%s9929_s2 + $0x2c] ss:$16 sps:$4 sm:$0xff]   ;;  %423 = vmatpush1.bf16.msra.mxu1 %v7019_v6  ;;  %v7037_v9 = vld [vmem:[%s9929_s2 + $0x28] ss:$16 sps:$4 sm:$0xff]  }
   0x4   :  { %351 = vmatprep.subr.bf16.mxu0 %v7003_v3  ;;  %424 = vmatprep.subr.bf16.mxu1 %v7031_v8  ;;  %v7044_v10 = vld [vmem:[%s9929_s2 + $0x40] ss:$16 sps:$4 sm:$0xff]   ;;  %v7050_v11 = vld [vmem:[%s9929_s2 + $0x64] ss:$16 sps:$4 sm:$0xff]   ;;  %v7055_v12 = vld [vmem:[%s9929_s2 + $0x4c] ss:$16 sps:$4 sm:$0xff]  }
   0x5   :  { %v7061_v13 = vld [vmem:[%s9929_s2 + $0x48] ss:$16 sps:$4 sm:$0xff]   ;;  %v7068_v14 = vld [vmem:[%s9929_s2 + $0x60] ss:$16 sps:$4 sm:$0xff]   ;;  %v7073_v15 = vld [vmem:[%s9929_s2 + $0x6c] ss:$16 sps:$4 sm:$0xff]  }
   0x6   :  { %v7079_v16 = vld [vmem:[%s9929_s2 + $0x84] ss:$16 sps:$4 sm:$0xff]   ;;  %v7085_v17 = vld [vmem:[%s9929_s2 + $0x80] ss:$16 sps:$4 sm:$0xff]   ;;  %v7090_v18 = vld [vmem:[%s9929_s2 + $0x68] ss:$16 sps:$4 sm:$0xff]  }
   0x7   :  { %352 = vmatpush1.bf16.msra.mxu0 %v7014_v5  ;;  %425 = vmatpush1.bf16.msra.mxu1 %v7037_v9  ;;  %v7097_v19 = vld [vmem:[%s9929_s2 + $0x8c] ss:$16 sps:$4 sm:$0xff]   ;;  %v7103_v20 = vld [vmem:[%s9929_s2 + $0xa4] ss:$16 sps:$4 sm:$0xff]   ;;  %v7109_v21 = vld [vmem:[%s9929_s2 + $0x88] ss:$16 sps:$4 sm:$0xff]  }
   0x8   :  { %353 = vmatprep.subr.bf16.mxu0 %v7025_v7  ;;  %426 = vmatprep.subr.bf16.mxu1 %v7055_v12  ;;  %v7116_v22 = vld [vmem:[%s9929_s2 + $0xa0] ss:$16 sps:$4 sm:$0xff]   ;;  %v7121_v23 = vld [vmem:[%s9929_s2 + $0xac] ss:$16 sps:$4 sm:$0xff]   ;;  %v7127_v24 = vld [vmem:[%s9929_s2 + $0xc4] ss:$16 sps:$4 sm:$0xff]  }
   0x9   :  { %v7133_v25 = vld [vmem:[%s9929_s2 + $0xa8] ss:$16 sps:$4 sm:$0xff]   ;;  %v7140_v26 = vld [vmem:[%s9929_s2 + $0xc0] ss:$16 sps:$4 sm:$0xff]   ;;  %v7145_v27 = vld [vmem:[%s9929_s2 + $0xcc] ss:$16 sps:$4 sm:$0xff]  }
   0xa   :  { %v6012_v28 = vld [vmem:[%s9929_s2 + $0xe4] ss:$16 sps:$4 sm:$0xff]   ;;  %v7155_v29 = vld [vmem:[%s9929_s2 + $0xc8] ss:$16 sps:$4 sm:$0xff]   ;;  %v6016_v30 = vld [vmem:[%s9929_s2 + $0xe0] ss:$16 sps:$4 sm:$0xff]  }
   0xb   :  { %354 = vmatpush1.bf16.msra.mxu0 %v7044_v10  ;;  %427 = vmatpush1.bf16.msra.mxu1 %v7061_v13  ;;  %v6018_v31 = vld [vmem:[%s9929_s2 + $0xec] ss:$16 sps:$4 sm:$0xff]   ;;  %v6022_v32 = vld [vmem:[%s9930_s3 + $0x4] ss:$16 sps:$4 sm:$0xff]   ;;  %v6023_v33 = vld [vmem:[%s9929_s2 + $0xe8] ss:$16 sps:$4 sm:$0xff]  }
   0xc   :  { %355 = vmatprep.subr.bf16.mxu0 %v7050_v11  ;;  %428 = vmatprep.subr.bf16.mxu1 %v7073_v15  ;;  %v6020_v34 = vld [vmem:[%s9930_s3] ss:$16 sps:$4 sm:$0xff]   ;;  %v6029_v35 = vld [vmem:[%s9930_s3 + $0xc] ss:$16 sps:$4 sm:$0xff]   ;;  %v6026_v36 = vld [vmem:[%s9930_s3 + $0x24] ss:$16 sps:$4 sm:$0xff]  }
   0xd   :  { %v6027_v38 = vld [vmem:[%s9930_s3 + $0x8] ss:$16 sps:$4 sm:$0xff]   ;;  %v6024_v39 = vld [vmem:[%s9930_s3 + $0x20] ss:$16 sps:$4 sm:$0xff]   ;;  %v6035_v40 = vld [vmem:[%s9930_s3 + $0x2c] ss:$16 sps:$4 sm:$0xff]  }
   0xe   :  { %v6032_v41 = vld [vmem:[%s9930_s3 + $0x44] ss:$16 sps:$4 sm:$0xff]   ;;  %v6033_v42 = vld [vmem:[%s9930_s3 + $0x28] ss:$16 sps:$4 sm:$0xff]   ;;  %v6030_v43 = vld [vmem:[%s9930_s3 + $0x40] ss:$16 sps:$4 sm:$0xff]  }
   0xf   :  { %356 = vmatpush1.bf16.msra.mxu0 %v7068_v14  ;;  %429 = vmatpush1.bf16.msra.mxu1 %v7090_v18  ;;  %v6041_v44 = vld [vmem:[%s9930_s3 + $0x4c] ss:$16 sps:$4 sm:$0xff]   ;;  %v6038_v45 = vld [vmem:[%s9930_s3 + $0x64] ss:$16 sps:$4 sm:$0xff]   ;;  %v6036_v46 = vld [vmem:[%s9930_s3 + $0x60] ss:$16 sps:$4 sm:$0xff]  }
  0x10   :  { %357 = vmatprep.subr.bf16.mxu0 %v7079_v16  ;;  %430 = vmatprep.subr.bf16.mxu1 %v7097_v19  ;;  %v6039_v47 = vld [vmem:[%s9930_s3 + $0x48] ss:$16 sps:$4 sm:$0xff]   ;;  %v6044_v48 = vld [vmem:[%s9930_s3 + $0x84] ss:$16 sps:$4 sm:$0xff]   ;;  %v6047_v49 = vld [vmem:[%s9930_s3 + $0x6c] ss:$16 sps:$4 sm:$0xff]  }
  0x11   :  { %v6045_v50 = vld [vmem:[%s9930_s3 + $0x68] ss:$16 sps:$4 sm:$0xff]   ;;  %v6042_v51 = vld [vmem:[%s9930_s3 + $0x80] ss:$16 sps:$4 sm:$0xff]   ;;  %v6053_v52 = vld [vmem:[%s9930_s3 + $0x8c] ss:$16 sps:$4 sm:$0xff]  }
  0x12   :  { %v6050_v53 = vld [vmem:[%s9930_s3 + $0xa4] ss:$16 sps:$4 sm:$0xff]   ;;  %v6051_v54 = vld [vmem:[%s9930_s3 + $0x88] ss:$16 sps:$4 sm:$0xff]   ;;  %v6048_v55 = vld [vmem:[%s9930_s3 + $0xa0] ss:$16 sps:$4 sm:$0xff]  }
  0x13   :  { %358 = vmatpush1.bf16.msra.mxu0 %v7085_v17  ;;  %431 = vmatpush1.bf16.msra.mxu1 %v7109_v21  ;;  %v6059_v56 = vld [vmem:[%s9930_s3 + $0xac] ss:$16 sps:$4 sm:$0xff]   ;;  %v6056_v57 = vld [vmem:[%s9930_s3 + $0xc4] ss:$16 sps:$4 sm:$0xff]   ;;  %v6057_v58 = vld [vmem:[%s9930_s3 + $0xa8] ss:$16 sps:$4 sm:$0xff]  }
  0x14   :  { %359 = vmatprep.subr.bf16.mxu0 %v7103_v20  ;;  %432 = vmatprep.subr.bf16.mxu1 %v7121_v23  ;;  %v6054_v59 = vld [vmem:[%s9930_s3 + $0xc0] ss:$16 sps:$4 sm:$0xff]   ;;  %v6065_v60 = vld [vmem:[%s9930_s3 + $0xcc] ss:$16 sps:$4 sm:$0xff]   ;;  %v6062_v61 = vld [vmem:[%s9930_s3 + $0xe4] ss:$16 sps:$4 sm:$0xff]  }
  0x15   :  { %v6063_v62 = vld [vmem:[%s9930_s3 + $0xc8] ss:$16 sps:$4 sm:$0xff]   ;;  %v6060_v63 = vld [vmem:[%s9930_s3 + $0xe0] ss:$16 sps:$4 sm:$0xff]  }
  0x17   :  { %360 = vmatpush1.bf16.msra.mxu0 %v7116_v22  ;;  %433 = vmatpush1.bf16.msra.mxu1 %v7133_v25 }
  0x18   :  { %361 = vmatprep.subr.bf16.mxu0 %v7127_v24  ;;  %434 = vmatprep.subr.bf16.mxu1 %v7145_v27 }
  0x1b   :  { %362 = vmatpush1.bf16.msra.mxu0 %v7140_v26  ;;  %435 = vmatpush1.bf16.msra.mxu1 %v7155_v29 }
  0x1c   :  { %363 = vmatprep.subr.bf16.mxu0 %v6012_v28  ;;  %436 = vmatprep.subr.bf16.mxu1 %v6018_v31  ;;  %v6068_v28 = vld [vmem:[%s9930_s3 + $0xec] ss:$16 sps:$4 sm:$0xff]  }
  0x1f   :  { %364 = vmatpush1.bf16.msra.mxu0 %v6016_v30  ;;  %437 = vmatpush1.bf16.msra.mxu1 %v6023_v33  ;;  %v6066_v30 = vld [vmem:[%s9930_s3 + $0xe8] ss:$16 sps:$4 sm:$0xff]  }
  0x20   :  { %989 = vmatprep.subr.bf16.mxu0 %v6022_v32  ;;  %1062 = vmatprep.subr.bf16.mxu1 %v6029_v35  ;;  %v7416_v35 = vld [vmem:[%s9931_s0 + $0x60] sm:$0xff] }
  0x22   :  { %382 = vmatmul.mubr.bf16.vlgmr.msra.gmra.mrb[0].mxu0 %v6956_v37  ;;  %455 = vmatmul.mubr.bf16.vlgmr.msra.gmra.mrb[0].mxu1 %v6956_v37 }
  0x23   :  { %990 = vmatpush1.bf16.msra.mxu0 %v6020_v34  ;;  %391 = vmatprep.mubr.bf16.mxu0 %v9935_v1  ;;  %v7411_v34 = vld [vmem:[%s9931_s0 + $0x58] sm:$0xff] }
  0x24   :  { %991 = vmatprep.subr.bf16.mxu0 %v6026_v36  ;;  %1063 = vmatpush1.bf16.msra.mxu1 %v6027_v38 }
  0x25   :  { %464 = vmatprep.mubr.bf16.mxu1 %v9935_v1  ;;  %1064 = vmatprep.subr.bf16.mxu1 %v6035_v40  ;;  %v7425_v40 = vld [vmem:[%s9931_s0 + $0x70] sm:$0xff] }
  0x27   :  { %992 = vmatpush1.bf16.msra.mxu0 %v6024_v39 }
  0x28   :  { %993 = vmatprep.subr.bf16.mxu0 %v6032_v41  ;;  %1065 = vmatpush1.bf16.msra.mxu1 %v6033_v42  ;;  %v7430_v41 = vld [vmem:[%s9931_s0 + $0x68] sm:$0xff] }
  0x29   :  { %1066 = vmatprep.subr.bf16.mxu1 %v6041_v44 }
  0x2a   :  { %392 = vmatmul.mubr.bf16.gmra.mrb[4].mxu0 %v6956_v37  ;;  %465 = vmatmul.mubr.bf16.gmra.mrb[4].mxu1 %v6956_v37 }
  0x2b   :  { %994 = vmatpush1.bf16.msra.mxu0 %v6030_v43  ;;  %401 = vmatprep.mubr.bf16.mxu0 %v9935_v1 }
  0x2c   :  { %995 = vmatprep.subr.bf16.mxu0 %v6038_v45  ;;  %1067 = vmatpush1.bf16.msra.mxu1 %v6039_v47  ;;  %v7444_v47 = vld [vmem:[%s9932_s1 + $0x180] sm:$0xff] }
  0x2d   :  { %474 = vmatprep.mubr.bf16.mxu1 %v9935_v1  ;;  %1068 = vmatprep.subr.bf16.mxu1 %v6047_v49  ;;  %v136_v49 = vunpack.c.h.bf16 %v7411_v34 }
  0x2f   :  { %996 = vmatpush1.bf16.msra.mxu0 %v6036_v46  ;;  %v7439_v46 = vld [vmem:[%s9931_s0 + $0x78] sm:$0xff] }
  0x30   :  { %997 = vmatprep.subr.bf16.mxu0 %v6044_v48  ;;  %1069 = vmatpush1.bf16.msra.mxu1 %v6045_v50  ;;  %v135_v48 = vunpack.c.l.bf16 %v7411_v34  ;;  %v137_v50 = vunpack.c.l.bf16 %v7416_v35 }
  0x31   :  { %1070 = vmatprep.subr.bf16.mxu1 %v6053_v52  ;;  %v7453_v52 = vld [vmem:[%s9932_s1 + $0x190] sm:$0xff] }
  0x32   :  { %402 = vmatmul.mubr.bf16.gmra.mrb[8].mxu0 %v6956_v37  ;;  %475 = vmatmul.mubr.bf16.gmra.mrb[8].mxu1 %v6956_v37 }
  0x33   :  { %998 = vmatpush1.bf16.msra.mxu0 %v6042_v51  ;;  %411 = vmatprep.mubr.bf16.mxu0 %v9935_v1  ;;  %v138_v51 = vunpack.c.h.bf16 %v7416_v35 }
  0x34   :  { %999 = vmatprep.subr.bf16.mxu0 %v6050_v53  ;;  %1071 = vmatpush1.bf16.msra.mxu1 %v6051_v54  ;;  %v141_v54 = vunpack.c.l.bf16 %v7425_v40 }
  0x35   :  { %484 = vmatprep.mubr.bf16.mxu1 %v9935_v1  ;;  %1072 = vmatprep.subr.bf16.mxu1 %v6059_v56  ;;  %v139_v56 = vunpack.c.l.bf16 %v7430_v41 }
  0x37   :  { %1000 = vmatpush1.bf16.msra.mxu0 %v6048_v55  ;;  %v142_v55 = vunpack.c.h.bf16 %v7425_v40 }
  0x38   :  { %1001 = vmatprep.subr.bf16.mxu0 %v6056_v57  ;;  %1073 = vmatpush1.bf16.msra.mxu1 %v6057_v58  ;;  %v140_v57 = vunpack.c.h.bf16 %v7430_v41  ;;  %v7462_v58 = vld [vmem:[%s9932_s1 + $0x188] sm:$0xff] }
  0x39   :  { %1074 = vmatprep.subr.bf16.mxu1 %v6065_v60 }
  0x3a   :  { %412 = vmatmul.mubr.bf16.gmra.mrb[12].mxu0 %v6956_v37  ;;  %485 = vmatmul.mubr.bf16.gmra.mrb[12].mxu1 %v6956_v37 }
  0x3b   :  { %1002 = vmatpush1.bf16.msra.mxu0 %v6054_v59  ;;  %1021 = vmatprep.mubr.bf16.mxu0 %v9935_v1 }
  0x3c   :  { %1003 = vmatprep.subr.bf16.mxu0 %v6062_v61  ;;  %1075 = vmatpush1.bf16.msra.mxu1 %v6063_v62  ;;  %v143_v61 = vunpack.c.l.bf16 %v7439_v46  ;;  %v144_v62 = vunpack.c.h.bf16 %v7439_v46 }
  0x3d   :  { %1094 = vmatprep.mubr.bf16.mxu1 %v9935_v1  ;;  %1076 = vmatprep.subr.bf16.mxu1 %v6068_v28  ;;  %v7470_v28 = vld [vmem:[%s9932_s1 + $0x198] sm:$0xff] }
  0x3f   :  { %1004 = vmatpush1.bf16.msra.mxu0 %v6060_v63 }
  0x40   :  { %1630 = vmatprep.subr.bf16.mxu0 %v6990_v0  ;;  %1077 = vmatpush1.bf16.msra.mxu1 %v6066_v30  ;;  %v6071_v0 = vld [vmem:[%s9929_s2 + $0xe4] ss:$16 sps:$4 sm:$0xff]  }
  0x41   :  { %1703 = vmatprep.subr.bf16.mxu1 %v7009_v4  ;;  %v6074_v4 = vld [vmem:[%s9929_s2 + $0xec] ss:$16 sps:$4 sm:$0xff]  }
  0x42   :  { %1022 = vmatmul.mubr.bf16.vlgmr.msra.gmra.mrb[16].mxu0 %v6956_v37 }
  0x43   :  { %1031 = vmatprep.mubr.bf16.mxu0 %v9935_v1  ;;  %1631 = vmatpush1.bf16.msra.mxu0 %v6997_v2  ;;  %v6069_v2 = vld [vmem:[%s9929_s2 + $0xe0] ss:$16 sps:$4 sm:$0xff]  }
  0x44   :  { %1095 = vmatmul.mubr.bf16.vlgmr.msra.gmra.mrb[16].mxu1 %v6956_v37  ;;  %1632 = vmatprep.subr.bf16.mxu0 %v7003_v3  ;;  %v6072_v3 = vld [vmem:[%s9929_s2 + $0xe8] ss:$16 sps:$4 sm:$0xff]  }
  0x45   :  { %1104 = vmatprep.mubr.bf16.mxu1 %v9935_v1  ;;  %1704 = vmatpush1.bf16.msra.mxu1 %v7019_v6  ;;  %v6080_v6 = vld [vmem:[%s9930_s3 + $0xc] ss:$16 sps:$4 sm:$0xff]  }
  0x46   :  { %1705 = vmatprep.subr.bf16.mxu1 %v7031_v8  ;;  %v7349_v8 = vld [vmem:[%s9931_s0 + $0x10] sm:$0xff] }
  0x47   :  { %1633 = vmatpush1.bf16.msra.mxu0 %v7014_v5  ;;  %v6077_v5 = vld [vmem:[%s9930_s3 + $0x4] ss:$16 sps:$4 sm:$0xff]  }
  0x48   :  { %1634 = vmatprep.subr.bf16.mxu0 %v7025_v7  ;;  %v97_v7 = vld [vmem:[%s9931_s0] sm:$0xff] }
  0x49   :  { %1706 = vmatpush1.bf16.msra.mxu1 %v7037_v9  ;;  %v7354_v9 = vld [vmem:[%s9931_s0 + $0x8] sm:$0xff] }
  0x4a   :  { %1032 = vmatmul.mubr.bf16.gmra.mrb[20].mxu0 %v6956_v37  ;;  %1707 = vmatprep.subr.bf16.mxu1 %v7055_v12  ;;  %v113_v12 = vunpack.c.l.bf16 %v97_v7 }
  0x4b   :  { %1041 = vmatprep.mubr.bf16.mxu0 %v9935_v1  ;;  %1635 = vmatpush1.bf16.msra.mxu0 %v7044_v10  ;;  %v7359_v10 = vld [vmem:[%s9931_s0 + $0x18] sm:$0xff] }
  0x4c   :  { %1105 = vmatmul.mubr.bf16.gmra.mrb[20].mxu1 %v6956_v37  ;;  %1636 = vmatprep.subr.bf16.mxu0 %v7050_v11  ;;  %v7364_v11 = vld [vmem:[%s9931_s0 + $0x20] sm:$0xff] }
  0x4d   :  { %1114 = vmatprep.mubr.bf16.mxu1 %v9935_v1  ;;  %1708 = vmatpush1.bf16.msra.mxu1 %v7061_v13  ;;  %v114_v13 = vunpack.c.h.bf16 %v97_v7 }
  0x4e   :  { %1709 = vmatprep.subr.bf16.mxu1 %v7073_v15  ;;  %v7374_v15 = vld [vmem:[%s9931_s0 + $0x28] sm:$0xff] }
  0x4f   :  { %1637 = vmatpush1.bf16.msra.mxu0 %v7068_v14  ;;  %v7369_v14 = vld [vmem:[%s9931_s0 + $0x30] sm:$0xff]  ;;  %v123_v32 = vunpack.c.l.bf16 %v7374_v15  ;;  %v124_v33 = vunpack.c.h.bf16 %v7374_v15 }
  0x50   :  { %1638 = vmatprep.subr.bf16.mxu0 %v7079_v16  ;;  %v117_v16 = vunpack.c.l.bf16 %v7349_v8  ;;  %v126_v31 = vunpack.c.h.bf16 %v7369_v14 }
  0x51   :  { %1710 = vmatpush1.bf16.msra.mxu1 %v7090_v18  ;;  %v115_v18 = vunpack.c.l.bf16 %v7354_v9 }
  0x52   :  { %1042 = vmatmul.mubr.bf16.gmra.mrb[24].mxu0 %v6956_v37  ;;  %1711 = vmatprep.subr.bf16.mxu1 %v7097_v19  ;;  %v116_v19 = vunpack.c.h.bf16 %v7354_v9 }
  0x53   :  { %1051 = vmatprep.mubr.bf16.mxu0 %v9935_v1  ;;  %1639 = vmatpush1.bf16.msra.mxu0 %v7085_v17  ;;  %v118_v17 = vunpack.c.h.bf16 %v7349_v8 }
  0x54   :  { %1115 = vmatmul.mubr.bf16.gmra.mrb[24].mxu1 %v6956_v37  ;;  %1640 = vmatprep.subr.bf16.mxu0 %v7103_v20  ;;  %v7383_v20 = vld [vmem:[%s9931_s0 + $0x38] sm:$0xff] }
  0x55   :  { %1124 = vmatprep.mubr.bf16.mxu1 %v9935_v1  ;;  %1712 = vmatpush1.bf16.msra.mxu1 %v7109_v21  ;;  %v7388_v21 = vld [vmem:[%s9931_s0 + $0x40] sm:$0xff]  ;;  %v127_v36 = vunpack.c.l.bf16 %v7383_v20 }
  0x56   :  { %1713 = vmatprep.subr.bf16.mxu1 %v7121_v23  ;;  %v120_v23 = vunpack.c.h.bf16 %v7359_v10  ;;  %v129_v38 = vunpack.c.l.bf16 %v7388_v21  ;;  %v130_v39 = vunpack.c.h.bf16 %v7388_v21 }
  0x57   :  { %1641 = vmatpush1.bf16.msra.mxu0 %v7116_v22  ;;  %v119_v22 = vunpack.c.l.bf16 %v7359_v10 }
  0x58   :  { %1642 = vmatprep.subr.bf16.mxu0 %v7127_v24  ;;  %v121_v24 = vunpack.c.l.bf16 %v7364_v11 }
  0x59   :  { %1714 = vmatpush1.bf16.msra.mxu1 %v7133_v25  ;;  %v122_v25 = vunpack.c.h.bf16 %v7364_v11 }
  0x5a   :  { %1052 = vmatmul.mubr.bf16.gmra.mrb[28].mxu0 %v6956_v37  ;;  %1715 = vmatprep.subr.bf16.mxu1 %v7145_v27  ;;  %v7402_v27 = vld [vmem:[%s9931_s0 + $0x48] sm:$0xff] }
  0x5b   :  { %1662 = vmatprep.mubr.bf16.mxu0 %v9935_v1  ;;  %1643 = vmatpush1.bf16.msra.mxu0 %v7140_v26  ;;  %v7397_v26 = vld [vmem:[%s9931_s0 + $0x50] sm:$0xff]  ;;  %v131_v44 = vunpack.c.l.bf16 %v7402_v27  ;;  %v132_v45 = vunpack.c.h.bf16 %v7402_v27 }
  0x5c   :  { %1125 = vmatmul.mubr.bf16.gmra.mrb[28].mxu1 %v6956_v37  ;;  %1644 = vmatprep.subr.bf16.mxu0 %v6071_v0  ;;  %v128_v37 = vunpack.c.h.bf16 %v7383_v20  ;;  %v133_v42 = vunpack.c.l.bf16 %v7397_v26  ;;  %v134_v43 = vunpack.c.h.bf16 %v7397_v26  ;;  %v7584_v26 = vld [vmem:[%s9932_s1 + $0x1f0] sm:$0xff] }
  0x5d   :  { %1716 = vmatpush1.bf16.msra.mxu1 %v7155_v29  ;;  %1735 = vmatprep.mubr.bf16.mxu1 %v9935_v1  ;;  %v125_v29 = vunpack.c.l.bf16 %v7369_v14 }
  0x5e   :  { %1717 = vmatprep.subr.bf16.mxu1 %v6074_v4  ;;  %v7486_v4 = vld [vmem:[%s9932_s1 + $0x1b0] sm:$0xff] }
  0x5f   :  { %1645 = vmatpush1.bf16.msra.mxu0 %v6069_v2 }
  0x60   :  { %2270 = vmatprep.subr.bf16.mxu0 %v6077_v5  ;;  %v7478_v5 = vld [vmem:[%s9932_s1 + $0x1a0] sm:$0xff] }
  0x61   :  { %1718 = vmatpush1.bf16.msra.mxu1 %v6072_v3  ;;  %v758_v3 = vunpack.c.l.bf16 %v7470_v28 }
  0x62   :  { %2343 = vmatprep.subr.bf16.mxu1 %v6080_v6 }
  0xf5   :  { %v383_v53 = vpop.f32.mrb[0].mxu0 }
  0xf6   :  { %v495_v59 = vadd.f32 %v383_v53, %v113_v12  ;;  %v385_v60 = vpop.f32.mrb[1].mxu0  ;;  %v456_v12 = vpop.f32.mrb[0].mxu1 }
  0xf7   :  { %v496_v30 = vadd.f32 %v385_v60, %v114_v13  ;;  %v387_v0 = vpop.f32.mrb[2].mxu0  ;;  %v755_v13 = vunpack.c.h.bf16 %v7462_v58  ;;  %v497_v2 = vadd.f32 %v456_v12, %v115_v18  ;;  %v458_v63 = vpop.f32.mrb[1].mxu1 }
  0xf8   :  { %v527_v6 = vmul.f32 0.5, %v495_v59  ;;  %v499_v7 = vadd.f32 %v387_v0, %v117_v16  ;;  %v389_v8 = vpop.f32.mrb[3].mxu0  ;;  %v460_v16 = vpop.f32.mrb[2].mxu1 }
  0xf9   :  { %v528_v60 = vmul.f32 0.5, %v496_v30  ;;  %v500_v1 = vadd.f32 %v389_v8, %v118_v17  ;;  %v7493_v17 = vld [vmem:[%s9932_s1 + $0x1a8] sm:$0xff]  ;;  %v498_v30 = vadd.f32 %v458_v63, %v116_v19  ;;  %v462_v8 = vpop.f32.mrb[3].mxu1 }
  0xfa   :  { %6315 = vtanh.f32 %v527_v6  ;;  %v530_v59 = vmul.f32 0.5, %v499_v7  ;;  %v7501_v6 = vld [vmem:[%s9932_s1 + $0x1b8] sm:$0xff]  ;;  %v529_v7 = vmul.f32 0.5, %v497_v2  ;;  %v502_v9 = vadd.f32 %v462_v8, %v120_v23  ;;  %v7517_v2 = vld [vmem:[%s9932_s1 + $0x1d0] sm:$0xff] }
  0xfb   :  { %6317 = vtanh.f32 %v528_v60  ;;  %v531_v18 = vmul.f32 0.5, %v500_v1  ;;  %v7508_v1 = vld [vmem:[%s9932_s1 + $0x1c0] sm:$0xff] }
  0xfc   :  { %6319 = vtanh.f32 %v530_v59  ;;  %v501_v59 = vadd.f32 %v460_v16, %v119_v22 }
  0xfd   :  { %6321 = vtanh.f32 %v531_v18  ;;  %v393_v19 = vpop.f32.mrb[4].mxu0  ;;  %v466_v16 = vpop.f32.mrb[4].mxu1 }
  0xfe   :  { %v503_v0 = vadd.f32 %v393_v19, %v121_v24  ;;  %v395_v18 = vpop.f32.mrb[5].mxu0  ;;  %6323 = vtanh.f32 %v498_v30  ;;  %v7535_v30 = vld [vmem:[%s9932_s1 + $0x1c8] sm:$0xff] }
  0xff   :  { %v504_v8 = vadd.f32 %v395_v18, %v122_v25  ;;  %v397_v60 = vpop.f32.mrb[6].mxu0  ;;  %6325 = vtanh.f32 %v529_v7  ;;  %v468_v7 = vpop.f32.mrb[5].mxu1 }
 0x100   :  { %v533_v10 = vmul.f32 0.5, %v503_v0  ;;  %v507_v22 = vadd.f32 %v397_v60, %v125_v29  ;;  %v399_v24 = vpop.f32.mrb[7].mxu0  ;;  %6327 = vtanh.f32 %v502_v9  ;;  %v505_v0 = vadd.f32 %v466_v16, %v123_v32  ;;  %v7544_v29 = vld [vmem:[%s9932_s1 + $0x1d8] sm:$0xff]  ;;  %v470_v19 = vpop.f32.mrb[6].mxu1 }
 0x101   :  { %v534_v11 = vmul.f32 0.5, %v504_v8  ;;  %v508_v25 = vadd.f32 %v399_v24, %v126_v31  ;;  %v532_v60 = vmul.f32 0.5, %v501_v59  ;;  %v506_v14 = vadd.f32 %v468_v7, %v124_v33  ;;  %v472_v31 = vpop.f32.mrb[7].mxu1 }
 0x102   :  { %6329 = vtanh.f32 %v533_v10  ;;  %v536_v18 = vmul.f32 0.5, %v507_v22  ;;  %v535_v24 = vmul.f32 0.5, %v505_v0  ;;  %v510_v15 = vadd.f32 %v472_v31, %v128_v37 }
 0x103   :  { %6331 = vtanh.f32 %v534_v11  ;;  %v537_v9 = vmul.f32 0.5, %v508_v25  ;;  %v509_v11 = vadd.f32 %v470_v19, %v127_v36 }
 0x104   :  { %v6316_v8 = vpop.eup %6315  ;;  %6333 = vtanh.f32 %v536_v18 }
 0x105   :  { %v6318_v10 = vpop.eup %6317  ;;  %v575_v22 = vadd.f32 1.0, %v6316_v8  ;;  %6335 = vtanh.f32 %v537_v9  ;;  %v403_v33 = vpop.f32.mrb[8].mxu0 }
 0x106   :  { %v6320_v25 = vpop.eup %6319  ;;  %v576_v7 = vadd.f32 1.0, %v6318_v10  ;;  %6337 = vtanh.f32 %v532_v60  ;;  %v511_v0 = vadd.f32 %v403_v33, %v129_v38  ;;  %v405_v18 = vpop.f32.mrb[9].mxu0  ;;  %v7564_v38 = vld [vmem:[%s9932_s1 + $0x1e0] sm:$0xff] }
 0x107   :  { %v6322_v59 = vpop.eup %6321  ;;  %v599_v16 = vmul.f32 0.5, %v575_v22  ;;  %v578_v8 = vadd.f32 1.0, %v6320_v25  ;;  %6339 = vtanh.f32 %v506_v14  ;;  %v512_v36 = vadd.f32 %v405_v18, %v130_v39  ;;  %v407_v19 = vpop.f32.mrb[10].mxu0 }
 0x108   :  { %v600_v20 = vmul.f32 0.5, %v576_v7  ;;  %v579_v37 = vadd.f32 1.0, %v6322_v59  ;;  %6341 = vtanh.f32 %v535_v24  ;;  %v539_v9 = vmul.f32 0.5, %v511_v0  ;;  %v409_v31 = vpop.f32.mrb[11].mxu0  ;;  %v476_v60 = vpop.f32.mrb[8].mxu1 }
 0x109   :  { %v6324_v10 = vpop.eup %6323  ;;  %v602_v33 = vmul.f32 0.5, %v578_v8  ;;  %v538_v22 = vmul.f32 0.5, %v509_v11  ;;  %6343 = vtanh.f32 %v510_v15  ;;  %v540_v14 = vmul.f32 0.5, %v512_v36  ;;  %v478_v25 = vpop.f32.mrb[9].mxu1 }
 0x10a   :  { %v7566_v21 = vpop.eup %6325  ;;  %v639_v39 = vmul.f32 0.0, %v600_v20  ;;  %v603_v7 = vmul.f32 0.5, %v579_v37  ;;  %v647_v59 = vmul.f32 %v6324_v10, %v599_v16  ;;  %6345 = vtanh.f32 %v539_v9  ;;  %v480_v24 = vpop.f32.mrb[10].mxu1 }
 0x10b   :  { %v6328_v0 = vpop.eup %6327  ;;  %6347 = vtanh.f32 %v540_v14  ;;  %v515_v18 = vadd.f32 %v407_v19, %v133_v42  ;;  %v482_v32 = vpop.f32.mrb[11].mxu1  ;;  %v516_v16 = vadd.f32 %v409_v31, %v134_v43  ;;  %v513_v42 = vadd.f32 %v476_v60, %v131_v44 }
 0x10c   :  { %v6330_v15 = vpop.eup %6329  ;;  %v640_v8 = vmul.f32 0.0, %v603_v7  ;;  %v7572_v36 = vadd.f32 %v647_v59, %v639_v39  ;;  %v648_v63 = vmul.f32 %v6328_v0, %v602_v33  ;;  %6349 = vtanh.f32 %v538_v22 }
 0x10d   :  { %v6332_v20 = vpop.eup %6331  ;;  %v581_v37 = vadd.f32 1.0, %v6330_v15  ;;  %v542_v9 = vmul.f32 0.5, %v515_v18  ;;  %v413_v19 = vpop.f32.mrb[12].mxu0  ;;  %v543_v39 = vmul.f32 0.5, %v516_v16  ;;  %v541_v22 = vmul.f32 0.5, %v513_v42  ;;  %v7594_v16 = vld [vmem:[%s9932_s1 + $0x1e8] sm:$0xff] }
 0x10e   :  { %v6334_v10 = vpop.eup %6333  ;;  %6351 = vtanh.f32 %v7572_v36  ;;  %v7579_v14 = vadd.f32 %v648_v63, %v640_v8  ;;  %v582_v7 = vadd.f32 1.0, %v6332_v20  ;;  %v415_v59 = vpop.f32.mrb[13].mxu0  ;;  %v514_v18 = vadd.f32 %v478_v25, %v132_v45 }
 0x10f   :  { %v6336_v43 = vpop.eup %6335  ;;  %v605_v31 = vmul.f32 0.5, %v581_v37  ;;  %v584_v33 = vadd.f32 1.0, %v6334_v10  ;;  %6353 = vtanh.f32 %v542_v9  ;;  %v417_v44 = vpop.f32.mrb[14].mxu0  ;;  %v517_v9 = vadd.f32 %v480_v24, %v135_v48 }
 0x110   :  { %v7586_v60 = vpop.eup %6337  ;;  %6355 = vtanh.f32 %v7579_v14  ;;  %v606_v63 = vmul.f32 0.5, %v582_v7  ;;  %v585_v0 = vadd.f32 1.0, %v6336_v43  ;;  %v419_v15 = vpop.f32.mrb[15].mxu0 }
 0x111   :  { %v486_v8 = vpop.f32.mrb[12].mxu1  ;;  %v6340_v20 = vpop.eup %6339  ;;  %v608_v37 = vmul.f32 0.5, %v584_v33  ;;  %6357 = vtanh.f32 %v543_v39  ;;  %v544_v12 = vmul.f32 0.5, %v517_v9  ;;  %v524_v35 = vadd.f32 %v419_v15, %v142_v55 }
 0x112   :  { %v488_v42 = vpop.f32.mrb[13].mxu1  ;;  %v7599_v7 = vpop.eup %6341  ;;  %v641_v27 = vmul.f32 0.0, %v606_v63  ;;  %v609_v45 = vmul.f32 0.5, %v585_v0  ;;  %v649_v25 = vmul.f32 %v6340_v20, %v605_v31  ;;  %6359 = vtanh.f32 %v541_v22  ;;  %v7610_v31 = vld [vmem:[%s9932_s1 + $0x1f8] sm:$0xff] }
 0x113   :  { %v490_v43 = vpop.f32.mrb[14].mxu1  ;;  %v6344_v11 = vpop.eup %6343  ;;  %6361 = vtanh.f32 %v514_v18  ;;  %v518_v63 = vadd.f32 %v482_v32, %v136_v49  ;;  %v519_v18 = vadd.f32 %v413_v19, %v137_v50  ;;  %v520_v49 = vadd.f32 %v415_v59, %v138_v51 }
 0x114   :  { %v492_v23 = vpop.f32.mrb[15].mxu1  ;;  %v6346_v53 = vpop.eup %6345  ;;  %v642_v48 = vmul.f32 0.0, %v609_v45  ;;  %v7603_v24 = vadd.f32 %v649_v25, %v641_v27  ;;  %v650_v10 = vmul.f32 %v6344_v11, %v608_v37  ;;  %6363 = vtanh.f32 %v544_v12 }
 0x115   :  { %v6348_v22 = vpop.eup %6347  ;;  %v587_v0 = vadd.f32 1.0, %v6346_v53  ;;  %v1023_v20 = vpop.f32.mrb[16].mxu0  ;;  %v545_v53 = vmul.f32 0.5, %v519_v18  ;;  %v523_v12 = vadd.f32 %v417_v44, %v141_v54  ;;  %v546_v45 = vmul.f32 0.5, %v520_v49 }
 0x116   :  { %6365 = vtanh.f32 %v7603_v24  ;;  %v7616_v11 = vadd.f32 %v650_v10, %v642_v48  ;;  %v588_v34 = vadd.f32 1.0, %v6348_v22  ;;  %v1025_v32 = vpop.f32.mrb[17].mxu0  ;;  %v7620_v37 = vpop.eup %6349  ;;  %v521_v54 = vadd.f32 %v486_v8, %v139_v56 }
 0x117   :  { %6367 = vtanh.f32 %v518_v63  ;;  %v1027_v50 = vpop.f32.mrb[18].mxu0  ;;  %v1096_v59 = vpop.f32.mrb[16].mxu1  ;;  %v611_v48 = vmul.f32 0.5, %v587_v0  ;;  %v548_v63 = vmul.f32 0.5, %v523_v12  ;;  %v549_v19 = vmul.f32 0.5, %v524_v35 }
 0x118   :  { %v7625_v27 = vpop.eup %6351  ;;  %6369 = vtanh.f32 %v7616_v11  ;;  %v612_v10 = vmul.f32 0.5, %v588_v34  ;;  %v1029_v51 = vpop.f32.mrb[19].mxu0  ;;  %v522_v34 = vadd.f32 %v488_v42, %v140_v57  ;;  %v547_v49 = vmul.f32 0.5, %v521_v54 }
 0x119   :  { %v6354_v25 = vpop.eup %6353  ;;  %6371 = vtanh.f32 %v545_v53  ;;  %v1098_v44 = vpop.f32.mrb[17].mxu1  ;;  %v525_v0 = vadd.f32 %v490_v43, %v143_v61  ;;  %v526_v8 = vadd.f32 %v492_v23, %v144_v62  ;;  %v9960_v35 = vunpack.c.h.bf16 %v7444_v47 }
 0x11a   :  { %v7632_v22 = vpop.eup %6355  ;;  %v590_v18 = vadd.f32 1.0, %v6354_v25  ;;  %6373 = vtanh.f32 %v546_v45  ;;  %v1100_v40 = vpop.f32.mrb[18].mxu1  ;;  %v643_v15 = vmul.f32 0.0, %v612_v10  ;;  %v9959_v45 = vunpack.c.l.bf16 %v7444_v47 }
 0x11b   :  { %v6358_v55 = vpop.eup %6357  ;;  %6375 = vtanh.f32 %v548_v63  ;;  %v1102_v53 = vpop.f32.mrb[19].mxu1  ;;  %v550_v10 = vmul.f32 0.5, %v525_v0  ;;  %v1136_v25 = vadd.f32 %v1025_v32, %v9960_v35  ;;  %v9961_v62 = vunpack.c.l.bf16 %v7453_v52 }
 0x11c   :  { %v7638_v12 = vpop.eup %6359  ;;  %v591_v56 = vadd.f32 1.0, %v6358_v55  ;;  %6377 = vtanh.f32 %v549_v19  ;;  %v1135_v41 = vadd.f32 %v1023_v20, %v9959_v45  ;;  %v614_v42 = vmul.f32 0.5, %v590_v18 }
 0x11d   :  { %v6362_v57 = vpop.eup %6361  ;;  %6379 = vtanh.f32 %v547_v49  ;;  %v1033_v63 = vpop.f32.mrb[20].mxu0  ;;  %v1168_v46 = vmul.f32 0.5, %v1136_v25  ;;  %v1139_v23 = vadd.f32 %v1027_v50, %v9961_v62  ;;  %v577_v47 = vadd.f32 1.0, %v7566_v21 }
 0x11e   :  { %v615_v61 = vmul.f32 0.5, %v591_v56  ;;  %v651_v43 = vmul.f32 %v6362_v57, %v611_v48  ;;  %6381 = vtanh.f32 %v522_v34  ;;  %v1167_v54 = vmul.f32 0.5, %v1135_v41  ;;  %v1035_v55 = vpop.f32.mrb[21].mxu0  ;;  %v7646_v19 = vpop.eup %6363 }
 0x11f   :  { %6383 = vtanh.f32 %v550_v10  ;;  %v7650_v20 = vpop.f32.mrb[22].mxu0  ;;  %v7660_v0 = vpop.f32.mrb[20].mxu1  ;;  %v1170_v45 = vmul.f32 0.5, %v1139_v23  ;;  %v9963_v50 = vunpack.c.h.bf16 %v7453_v52  ;;  %v9964_v57 = vunpack.c.l.bf16 %v7462_v58 }
 0x120   :  { %v7653_v49 = vpop.eup %6365  ;;  %v644_v32 = vmul.f32 0.0, %v615_v61  ;;  %v7656_v48 = vadd.f32 %v651_v43, %v643_v15  ;;  %6385 = vtanh.f32 %v526_v8  ;;  %v7658_v34 = vpop.f32.mrb[23].mxu0  ;;  %v580_v15 = vadd.f32 1.0, %v7586_v60 }
 0x121   :  { %v6368_v56 = vpop.eup %6367  ;;  %6387 = vtanh.f32 %v1167_v54  ;;  %v1140_v41 = vadd.f32 %v1029_v51, %v9963_v50  ;;  %v1137_v10 = vadd.f32 %v1096_v59, %v9964_v57  ;;  %v7666_v35 = vpop.f32.mrb[21].mxu1  ;;  %v1138_v25 = vadd.f32 %v1098_v44, %v755_v13 }
 0x122   :  { %9962 = vst [vmem:[#allocation4_spill] sm:$0xff] %v7656_v48  ;;  %v7668_v21 = vpop.eup %6369  ;;  %6389 = vtanh.f32 %v7656_v48  ;;  %v652_v8 = vmul.f32 %v6368_v56, %v614_v42  ;;  %v7674_v61 = vpop.f32.mrb[22].mxu1  ;;  %v1141_v59 = vadd.f32 %v1100_v40, %v758_v3  ;;  %v9966_v42 = vunpack.c.h.bf16 %v7470_v28 }
 0x123   :  { %v6372_v43 = vpop.eup %6371  ;;  %6391 = vtanh.f32 %v1168_v46  ;;  %v1171_v52 = vmul.f32 0.5, %v1140_v41  ;;  %v1169_v51 = vmul.f32 0.5, %v1137_v10  ;;  %v7678_v54 = vpop.f32.mrb[23].mxu1  ;;  %v9967_v46 = vunpack.c.l.bf16 %v7478_v5 }
 0x124   :  { %v6374_v62 = vpop.eup %6373  ;;  %v7680_v23 = vadd.f32 %v652_v8, %v644_v32  ;;  %v593_v60 = vadd.f32 1.0, %v6372_v43  ;;  %6393 = vtanh.f32 %v1170_v45  ;;  %v1142_v58 = vadd.f32 %v1102_v53, %v9966_v42 }
 0x125   :  { %v6376_v13 = vpop.eup %6375  ;;  %v594_v44 = vadd.f32 1.0, %v6374_v62  ;;  %6395 = vtanh.f32 %v1171_v52  ;;  %v1172_v56 = vmul.f32 0.5, %v1141_v59  ;;  %v1143_v50 = vadd.f32 %v1033_v63, %v9967_v46  ;;  %v7686_v41 = vpop.f32.mrb[24].mxu0 }
 0x126   :  { %9965 = vst [vmem:[#allocation5_spill] sm:$0xff] %v7680_v23  ;;  %v6378_v3 = vpop.eup %6377  ;;  %6397 = vtanh.f32 %v7680_v23  ;;  %v617_v40 = vmul.f32 0.5, %v593_v60  ;;  %v596_v32 = vadd.f32 1.0, %v6376_v13  ;;  %v9968_v57 = vunpack.c.h.bf16 %v7478_v5  ;;  %v7691_v10 = vpop.f32.mrb[25].mxu0 }
 0x127   :  { %v7693_v28 = vpop.eup %6379  ;;  %v618_v53 = vmul.f32 0.5, %v594_v44  ;;  %v597_v8 = vadd.f32 1.0, %v6378_v3  ;;  %6399 = vtanh.f32 %v1169_v51  ;;  %v1173_v43 = vmul.f32 0.5, %v1143_v50  ;;  %v7695_v52 = vpop.f32.mrb[26].mxu0 }
 0x128   :  { %v1144_v45 = vadd.f32 %v1035_v55, %v9968_v57  ;;  %v6382_v63 = vpop.eup %6381  ;;  %v601_v59 = vmul.f32 0.5, %v577_v47  ;;  %v620_v62 = vmul.f32 0.5, %v596_v32  ;;  %6401 = vtanh.f32 %v1138_v25  ;;  %v7697_v60 = vpop.f32.mrb[27].mxu0 }
 0x129   :  { %v7699_v13 = vpop.f32.mrb[24].mxu1  ;;  %v7701_v5 = vpop.eup %6383  ;;  %v645_v55 = vmul.f32 0.0, %v618_v53  ;;  %v621_v46 = vmul.f32 0.5, %v597_v8  ;;  %v653_v57 = vmul.f32 %v6382_v63, %v617_v40  ;;  %6403 = vtanh.f32 %v1172_v56 }
 0x12a   :  { %v1174_v42 = vmul.f32 0.5, %v1144_v45  ;;  %v7703_v44 = vpop.f32.mrb[25].mxu1  ;;  %v6386_v51 = vpop.eup %6385  ;;  %v604_v50 = vmul.f32 0.5, %v580_v15  ;;  %v7706_v3 = vadd.f32 1.0, %v7599_v7  ;;  %6405 = vtanh.f32 %v1142_v58 }
 0x12b   :  { %v9969_v47 = vunpack.c.l.bf16 %v7486_v4  ;;  %v7711_v32 = vpop.f32.mrb[26].mxu1  ;;  %v6388_v45 = vpop.eup %6387  ;;  %v646_v39 = vmul.f32 0.0, %v621_v46  ;;  %v7713_v53 = vadd.f32 %v653_v57, %v645_v55  ;;  %v654_v40 = vmul.f32 %v6386_v51, %v620_v62 }
 0x12c   :  { %6407 = vtanh.f32 %v1173_v43  ;;  %v7715_v56 = vpop.f32.mrb[27].mxu1  ;;  %v7717_v8 = vpop.eup %6389  ;;  %v7720_v7 = vadd.f32 1.0, %v7620_v37  ;;  %v1215_v15 = vadd.f32 1.0, %v6388_v45  ;;  %v671_v55 = vmul.f32 %v7625_v27, %v601_v59  ;;  %v6075_v43 = vld [vmem:[%s9930_s3] ss:$16 sps:$4 sm:$0xff]  }
 0x12d   :  { %v1147_v25 = vadd.f32 %v7650_v20, %v9969_v47  ;;  %9970 = vst [vmem:[#allocation6_spill] sm:$0xff] %v7713_v53  ;;  %6409 = vtanh.f32 %v1174_v42  ;;  %v6392_v63 = vpop.eup %6391  ;;  %v7723_v20 = vadd.f32 %v654_v40, %v646_v39  ;;  %v672_v62 = vmul.f32 %v7632_v22, %v604_v50  ;;  %v6078_v37 = vld [vmem:[%s9930_s3 + $0x8] ss:$16 sps:$4 sm:$0xff]   ;;  %v7733_v46 = vpop.f32.mrb[28].mxu0  ;;  %v6083_v22 = vld [vmem:[%s9930_s3 + $0x24] ss:$16 sps:$4 sm:$0xff]  }
 0x12e   :  { %6411 = vtanh.f32 %v7713_v53  ;;  %v6394_v42 = vpop.eup %6393  ;;  %v589_v57 = vadd.f32 1.0, %v7638_v12  ;;  %v1216_v51 = vadd.f32 1.0, %v6392_v63  ;;  %v9972_v39 = vunpack.c.h.bf16 %v7486_v4  ;;  %v7742_v59 = vpop.f32.mrb[29].mxu0  ;;  %v6086_v4 = vld [vmem:[%s9930_s3 + $0x2c] ss:$16 sps:$4 sm:$0xff]  }
 0x12f   :  { %v1176_v58 = vmul.f32 0.5, %v1147_v25  ;;  %9971 = vst [vmem:[#allocation7_spill] sm:$0xff] %v7723_v20  ;;  %v6396_v50 = vpop.eup %6395  ;;  %v1239_v47 = vmul.f32 0.5, %v1215_v15  ;;  %v1218_v25 = vadd.f32 1.0, %v6394_v42  ;;  %v5784_v45 = vpack.c.bf16 %v672_v62, %v671_v55  ;;  %v7759_v62 = vpop.f32.mrb[28].mxu1 }
 0x130   :  { %v1148_v27 = vadd.f32 %v7658_v34, %v9972_v39  ;;  %v9973_v40 = vunpack.c.l.bf16 %v7493_v17  ;;  %v7752_v34 = vpop.eup %6397  ;;  %v1240_v63 = vmul.f32 0.5, %v1216_v51  ;;  %v1219_v39 = vadd.f32 1.0, %v6396_v50 }
 0x131   :  { %6413 = vtanh.f32 %v1176_v58  ;;  %v7750_v58 = vpop.f32.mrb[30].mxu0  ;;  %v9974_v9 = vunpack.c.h.bf16 %v7493_v17  ;;  %v1242_v42 = vmul.f32 0.5, %v1218_v25  ;;  %5785 = vst [vmem:[%s9933_s4] sm:$0xff] %v5784_v45   ;;  %1663 = vmatmul.mubr.bf16.vlgmr.msra.gmra.mrb[32].mxu0 %v5784_v45  ;;  %1736 = vmatmul.mubr.bf16.vlgmr.msra.gmra.mrb[32].mxu1 %v5784_v45  ;;  %v9975_v17 = vunpack.c.l.bf16 %v7501_v6  ;;  %v6084_v45 = vld [vmem:[%s9930_s3 + $0x28] ss:$16 sps:$4 sm:$0xff]  }
 0x132   :  { %v1145_v12 = vadd.f32 %v7660_v0, %v9973_v40  ;;  %v1177_v18 = vmul.f32 0.5, %v1148_v27  ;;  %v7757_v55 = vpop.f32.mrb[31].mxu0  ;;  %v7761_v0 = vpop.eup %6399  ;;  %6415 = vtanh.f32 %v7723_v20  ;;  %v1280_v40 = vmul.f32 0.0, %v1240_v63  ;;  %2271 = vmatpush1.bf16.msra.mxu0 %v6075_v43  ;;  %2344 = vmatpush1.bf16.msra.mxu1 %v6078_v37 }
 0x133   :  { %v1146_v15 = vadd.f32 %v7666_v35, %v9974_v9  ;;  %v1149_v9 = vadd.f32 %v7674_v61, %v9975_v17  ;;  %v6081_v35 = vld [vmem:[%s9930_s3 + $0x20] ss:$16 sps:$4 sm:$0xff]   ;;  %v7773_v27 = vpop.f32.mrb[29].mxu1  ;;  %v6402_v50 = vpop.eup %6401  ;;  %v1243_v25 = vmul.f32 0.5, %v1219_v39  ;;  %v607_v20 = vmul.f32 0.5, %v7706_v3  ;;  %2272 = vmatprep.subr.bf16.mxu0 %v6083_v22  ;;  %2345 = vmatprep.subr.bf16.mxu1 %v6086_v4 }
 0x134   :  { %v1175_v51 = vmul.f32 0.5, %v1145_v12  ;;  %6417 = vtanh.f32 %v1177_v18  ;;  %v9976_v12 = vunpack.c.h.bf16 %v7501_v6  ;;  %v7781_v17 = vpop.f32.mrb[30].mxu1  ;;  %v7783_v33 = vpop.eup %6403  ;;  %v1288_v53 = vmul.f32 %v6402_v50, %v1239_v47  ;;  %v6089_v6 = vld [vmem:[%s9930_s3 + $0x44] ss:$16 sps:$4 sm:$0xff]  }
 0x135   :  { %v9977_v18 = vunpack.c.l.bf16 %v7508_v1  ;;  %v7795_v37 = vpop.f32.mrb[31].mxu1  ;;  %v6406_v63 = vpop.eup %6405  ;;  %v610_v3 = vmul.f32 0.5, %v7720_v7  ;;  %v592_v22 = vadd.f32 1.0, %v7646_v19  ;;  %v1281_v47 = vmul.f32 0.0, %v1243_v25 }
 0x136   :  { %v1150_v61 = vadd.f32 %v7678_v54, %v9976_v12  ;;  %6419 = vtanh.f32 %v1175_v51  ;;  %v6092_v54 = vld [vmem:[%s9930_s3 + $0x4c] ss:$16 sps:$4 sm:$0xff]   ;;  %v9978_v4 = vmov 0   ;;  %v7801_v39 = vadd.f32 %v1288_v53, %v1280_v40  ;;  %2273 = vmatpush1.bf16.msra.mxu0 %v6081_v35  ;;  %2346 = vmatpush1.bf16.msra.mxu1 %v6084_v45  ;;  %v6087_v53 = vld [vmem:[%s9930_s3 + $0x40] ss:$16 sps:$4 sm:$0xff]  }
 0x137   :  { %v1151_v43 = vadd.f32 %v7686_v41, %v9977_v18  ;;  %6421 = vtanh.f32 %v1146_v15  ;;  %1672 = vmatprep.mubr.bf16.mxu0 %v9978_v4  ;;  %1745 = vmatprep.mubr.bf16.mxu1 %v9978_v4  ;;  %v6408_v41 = vpop.eup %6407  ;;  %v1289_v51 = vmul.f32 %v6406_v63, %v1242_v42  ;;  %v1178_v50 = vmul.f32 0.5, %v1149_v9  ;;  %v6090_v15 = vld [vmem:[%s9930_s3 + $0x48] ss:$16 sps:$4 sm:$0xff]   ;;  %v6098_v40 = vld [vmem:[%s9930_s3 + $0x6c] ss:$16 sps:$4 sm:$0xff]  }
 0x138   :  { %v6410_v18 = vpop.eup %6409  ;;  %v7803_v23 = vmul.f32 0.5, %v589_v57  ;;  %v595_v48 = vadd.f32 1.0, %v7693_v28  ;;  %6423 = vtanh.f32 %v1150_v61  ;;  %v9979_v19 = vunpack.c.h.bf16 %v7508_v1  ;;  %2274 = vmatprep.subr.bf16.mxu0 %v6089_v6  ;;  %2347 = vmatprep.subr.bf16.mxu1 %v6092_v54 }
 0x139   :  { %v1179_v12 = vmul.f32 0.5, %v1151_v43  ;;  %v7815_v42 = vpop.eup %6411  ;;  %v7817_v57 = vadd.f32 %v1289_v51, %v1281_v47  ;;  %v1221_v28 = vadd.f32 1.0, %v6408_v41  ;;  %v1222_v9 = vadd.f32 1.0, %v6410_v18 }
 0x13a   :  { %v1152_v7 = vadd.f32 %v7691_v10, %v9979_v19  ;;  %v9980_v35 = vunpack.c.l.bf16 %v7517_v2  ;;  %v6095_v10 = vld [vmem:[%s9930_s3 + $0x64] ss:$16 sps:$4 sm:$0xff]   ;;  %v7828_v45 = vmul.f32 0.5, %v592_v22  ;;  %v598_v61 = vadd.f32 1.0, %v7701_v5  ;;  %2275 = vmatpush1.bf16.msra.mxu0 %v6087_v53  ;;  %2348 = vmatpush1.bf16.msra.mxu1 %v6090_v15 }
 0x13b   :  { %v6414_v25 = vpop.eup %6413  ;;  %6425 = vtanh.f32 %v1179_v12  ;;  %v1246_v63 = vmul.f32 0.5, %v1222_v9  ;;  %v673_v6 = vmul.f32 %v7653_v49, %v607_v20  ;;  %v674_v54 = vmul.f32 %v7668_v21, %v610_v3  ;;  %v6093_v49 = vld [vmem:[%s9930_s3 + $0x60] ss:$16 sps:$4 sm:$0xff]   ;;  %2276 = vmatprep.subr.bf16.mxu0 %v6095_v10  ;;  %2349 = vmatprep.subr.bf16.mxu1 %v6098_v40  ;;  %v6101_v9 = vld [vmem:[%s9930_s3 + $0x84] ss:$16 sps:$4 sm:$0xff]  }
 0x13c   :  { %v1155_v1 = vadd.f32 %v7695_v52, %v9980_v35  ;;  %v1180_v43 = vmul.f32 0.5, %v1152_v7  ;;  %v1224_v47 = vadd.f32 1.0, %v6414_v25  ;;  %6427 = vtanh.f32 %v1178_v50  ;;  %v7836_v22 = vpop.eup %6415  ;;  %v6104_v35 = vld [vmem:[%s9930_s3 + $0x8c] ss:$16 sps:$4 sm:$0xff]  }
 0x13d   :  { %v9981_v41 = vunpack.c.h.bf16 %v7517_v2  ;;  %v7838_v5 = vmul.f32 0.5, %v595_v48  ;;  %v1245_v12 = vmul.f32 0.5, %v1221_v28  ;;  %v9982_v50 = vunpack.c.h.bf16 %v7535_v30  ;;  %v6096_v2 = vld [vmem:[%s9930_s3 + $0x68] ss:$16 sps:$4 sm:$0xff]  }
 0x13e   :  { %v1182_v52 = vmul.f32 0.5, %v1155_v1  ;;  %6429 = vtanh.f32 %v1180_v43  ;;  %v6418_v21 = vpop.eup %6417  ;;  %v1248_v48 = vmul.f32 0.5, %v1224_v47  ;;  %v5789_v20 = vpack.c.bf16 %v674_v54, %v673_v6  ;;  %2277 = vmatpush1.bf16.msra.mxu0 %v6093_v49  ;;  %2350 = vmatpush1.bf16.msra.mxu1 %v6096_v2  ;;  %v6099_v47 = vld [vmem:[%s9930_s3 + $0x80] ss:$16 sps:$4 sm:$0xff]   ;;  %v6107_v54 = vld [vmem:[%s9930_s3 + $0xa4] ss:$16 sps:$4 sm:$0xff]  }
 0x13f   :  { %v1156_v51 = vadd.f32 %v7697_v60, %v9981_v41  ;;  %v1154_v18 = vadd.f32 %v7703_v44, %v9982_v50  ;;  %v1282_v60 = vmul.f32 0.0, %v1246_v63  ;;  %v1225_v7 = vadd.f32 1.0, %v6418_v21  ;;  %2278 = vmatprep.subr.bf16.mxu0 %v6101_v9  ;;  %2351 = vmatprep.subr.bf16.mxu1 %v6104_v35  ;;  %v6116_v35 = vld [vmem:[%s9930_s3 + $0xcc] ss:$16 sps:$4 sm:$0xff]  }
 0x140   :  { %6431 = vtanh.f32 %v1182_v52  ;;  %v7849_v19 = vpop.eup %6419  ;;  %v9983_v44 = vunpack.c.h.bf16 %v7544_v29  ;;  %v9984_v15 = vunpack.c.l.bf16 %v7564_v38  ;;  %v7863_v10 = vmul.f32 0.5, %v598_v61  ;;  %5941 = vst [vmem:[%s9933_s4 + $0x8] sm:$0xff] %v5789_v20   ;;  %1673 = vmatmul.mubr.bf16.gmra.mrb[36].mxu0 %v5789_v20  ;;  %1746 = vmatmul.mubr.bf16.gmra.mrb[36].mxu1 %v5789_v20 }
 0x141   :  { %v1183_v3 = vmul.f32 0.5, %v1156_v51  ;;  %6433 = vtanh.f32 %v1154_v18  ;;  %v6422_v1 = vpop.eup %6421  ;;  %v9986_v40 = vunpack.c.h.bf16 %v7564_v38  ;;  %v1249_v43 = vmul.f32 0.5, %v1225_v7  ;;  %1682 = vmatprep.mubr.bf16.mxu0 %v9978_v4  ;;  %1755 = vmatprep.mubr.bf16.mxu1 %v9978_v4 }
 0x142   :  { %v1158_v53 = vadd.f32 %v7715_v56, %v9983_v44  ;;  %v1159_v28 = vadd.f32 %v7733_v46, %v9984_v15  ;;  %v9985_v56 = vunpack.c.l.bf16 %v7535_v30  ;;  %v1290_v61 = vmul.f32 %v6422_v1, %v1245_v12  ;;  %v6102_v30 = vld [vmem:[%s9930_s3 + $0x88] ss:$16 sps:$4 sm:$0xff]   ;;  %2279 = vmatpush1.bf16.msra.mxu0 %v6099_v47 }
 0x143   :  { %6435 = vtanh.f32 %v1183_v3  ;;  %v1160_v25 = vadd.f32 %v7742_v59, %v9986_v40  ;;  %v7882_v38 = vadd.f32 1.0, %v7761_v0  ;;  %v9987_v59 = vunpack.c.l.bf16 %v7544_v29  ;;  %v6110_v0 = vld [vmem:[%s9930_s3 + $0xac] ss:$16 sps:$4 sm:$0xff]   ;;  %2352 = vmatpush1.bf16.msra.mxu1 %v6102_v30  ;;  %2280 = vmatprep.subr.bf16.mxu0 %v6107_v54  ;;  %v6114_v30 = vld [vmem:[%s9930_s3 + $0xc8] ss:$16 sps:$4 sm:$0xff]  }
 0x144   :  { %v1153_v46 = vadd.f32 %v7699_v13, %v9985_v56  ;;  %6437 = vtanh.f32 %v7801_v39  ;;  %v1185_v63 = vmul.f32 0.5, %v1159_v28  ;;  %v6424_v13 = vpop.eup %6423  ;;  %v1283_v41 = vmul.f32 0.0, %v1249_v43  ;;  %2353 = vmatprep.subr.bf16.mxu1 %v6110_v0 }
 0x145   :  { %6439 = vtanh.f32 %v7817_v57  ;;  %v1157_v52 = vadd.f32 %v7711_v32, %v9987_v59  ;;  %v1186_v6 = vmul.f32 0.5, %v1160_v25  ;;  %v7896_v51 = vadd.f32 %v1290_v61, %v1282_v60  ;;  %v6426_v29 = vpop.eup %6425  ;;  %v6111_v25 = vld [vmem:[%s9930_s3 + $0xc0] ss:$16 sps:$4 sm:$0xff]  }
 0x146   :  { %v1291_v12 = vmul.f32 %v6424_v13, %v1248_v48  ;;  %6441 = vtanh.f32 %v1158_v53  ;;  %v1181_v32 = vmul.f32 0.5, %v1153_v46  ;;  %v9988_v50 = vunpack.c.l.bf16 %v7584_v26  ;;  %v6428_v2 = vpop.eup %6427 }
 0x147   :  { %6443 = vtanh.f32 %v1185_v63  ;;  %v675_v49 = vmul.f32 %v7717_v8, %v7803_v23  ;;  %v1227_v60 = vadd.f32 1.0, %v6426_v29  ;;  %v676_v48 = vmul.f32 %v7752_v34, %v7828_v45  ;;  %v6105_v23 = vld [vmem:[%s9930_s3 + $0xa0] ss:$16 sps:$4 sm:$0xff]   ;;  %v6108_v8 = vld [vmem:[%s9930_s3 + $0xa8] ss:$16 sps:$4 sm:$0xff]  }
 0x148   :  { %v1163_v18 = vadd.f32 %v7750_v58, %v9988_v50  ;;  %6445 = vtanh.f32 %v7896_v51  ;;  %v7904_v21 = vadd.f32 %v1291_v12, %v1283_v41  ;;  %v6430_v20 = vpop.eup %6429  ;;  %v1184_v3 = vmul.f32 0.5, %v1157_v52  ;;  %2281 = vmatpush1.bf16.msra.mxu0 %v6105_v23  ;;  %2354 = vmatpush1.bf16.msra.mxu1 %v6108_v8 }
 0x149   :  { %6447 = vtanh.f32 %v1186_v6  ;;  %v9989_v58 = vunpack.c.h.bf16 %v7584_v26  ;;  %v1251_v45 = vmul.f32 0.5, %v1227_v60  ;;  %v1228_v53 = vadd.f32 1.0, %v6430_v20  ;;  %v6113_v26 = vld [vmem:[%s9930_s3 + $0xc4] ss:$16 sps:$4 sm:$0xff]   ;;  %2355 = vmatprep.subr.bf16.mxu1 %v6116_v35 }
 0x14a   :  { %v1188_v7 = vmul.f32 0.5, %v1163_v18  ;;  %v6432_v34 = vpop.eup %6431  ;;  %6449 = vtanh.f32 %v7904_v21  ;;  %v5794_v15 = vpack.c.bf16 %v676_v48, %v675_v49  ;;  %v1223_v56 = vadd.f32 1.0, %v7849_v19  ;;  %2282 = vmatprep.subr.bf16.mxu0 %v6113_v26 }
 0x14b   :  { %v1164_v44 = vadd.f32 %v7757_v55, %v9989_v58  ;;  %v1220_v55 = vadd.f32 1.0, %v7783_v33  ;;  %v1230_v28 = vadd.f32 1.0, %v6432_v34  ;;  %v6434_v1 = vpop.eup %6433  ;;  %v1252_v46 = vmul.f32 0.5, %v1228_v53 }
 0x14c   :  { %6451 = vtanh.f32 %v1188_v7  ;;  %5942 = vst [vmem:[%s9933_s4 + $0x10] sm:$0xff] %v5794_v15   ;;  %1683 = vmatmul.mubr.bf16.gmra.mrb[40].mxu0 %v5794_v15  ;;  %1756 = vmatmul.mubr.bf16.gmra.mrb[40].mxu1 %v5794_v15  ;;  %v9990_v33 = vunpack.c.h.bf16 %v7594_v16  ;;  %v1292_v63 = vmul.f32 %v6434_v1, %v1251_v45  ;;  %v9991_v19 = vunpack.c.h.bf16 %v7610_v31 }
 0x14d   :  { %v1189_v9 = vmul.f32 0.5, %v1164_v44  ;;  %6453 = vtanh.f32 %v1181_v32  ;;  %v6436_v43 = vpop.eup %6435  ;;  %v1254_v61 = vmul.f32 0.5, %v1230_v28  ;;  %v1226_v59 = vadd.f32 1.0, %v6428_v2  ;;  %1692 = vmatprep.mubr.bf16.mxu0 %v9978_v4  ;;  %1765 = vmatprep.mubr.bf16.mxu1 %v9978_v4 }
 0x14e   :  { %v1162_v40 = vadd.f32 %v7773_v27, %v9990_v33  ;;  %v1166_v47 = vadd.f32 %v7795_v37, %v9991_v19  ;;  %v6119_v27 = vld [vmem:[%s9930_s3 + $0xe4] ss:$16 sps:$4 sm:$0xff]   ;;  %v6438_v13 = vpop.eup %6437  ;;  %v1284_v52 = vmul.f32 0.0, %v1252_v46  ;;  %v1231_v6 = vadd.f32 1.0, %v6436_v43  ;;  %v6122_v37 = vld [vmem:[%s9930_s3 + $0xec] ss:$16 sps:$4 sm:$0xff]   ;;  %2283 = vmatpush1.bf16.msra.mxu0 %v6111_v25  ;;  %2356 = vmatpush1.bf16.msra.mxu1 %v6114_v30 }
 0x14f   :  { %6455 = vtanh.f32 %v1189_v9  ;;  %v6440_v54 = vpop.eup %6439  ;;  %v9992_v0 = vunpack.c.l.bf16 %v7594_v16  ;;  %v677_v12 = vmul.f32 %v7815_v42, %v7838_v5  ;;  %v678_v29 = vmul.f32 %v7836_v22, %v7863_v10  ;;  %v6117_v22 = vld [vmem:[%s9930_s3 + $0xe0] ss:$16 sps:$4 sm:$0xff]   ;;  %v6120_v5 = vld [vmem:[%s9930_s3 + $0xe8] ss:$16 sps:$4 sm:$0xff]   ;;  %2284 = vmatprep.subr.bf16.mxu0 %v6119_v27  ;;  %2357 = vmatprep.subr.bf16.mxu1 %v6122_v37 }
 0x150   :  { %6457 = vtanh.f32 %v1184_v3  ;;  %v6442_v32 = vpop.eup %6441  ;;  %v1241_v50 = vmul.f32 0.5, %v7882_v38  ;;  %v1255_v18 = vmul.f32 0.5, %v1231_v6  ;;  %v7957_v49 = vadd.f32 %v1292_v63, %v1284_v52 }
 0x151   :  { %v1161_v41 = vadd.f32 %v7759_v62, %v9992_v0  ;;  %6459 = vtanh.f32 %v1162_v40  ;;  %v9993_v2 = vunpack.c.l.bf16 %v7610_v31  ;;  %v6444_v62 = vpop.eup %6443  ;;  %v1244_v60 = vmul.f32 0.5, %v1220_v55 }
 0x152   :  { %v1293_v48 = vmul.f32 %v6442_v32, %v1254_v61  ;;  %6461 = vtanh.f32 %v1166_v47  ;;  %v5799_v42 = vpack.c.bf16 %v678_v29, %v677_v12  ;;  %v6446_v10 = vpop.eup %6445  ;;  %v1247_v38 = vmul.f32 0.5, %v1223_v56  ;;  %2285 = vmatpush1.bf16.msra.mxu0 %v6117_v22  ;;  %2358 = vmatpush1.bf16.msra.mxu1 %v6120_v5 }
 0x153   :  { %v1165_v16 = vadd.f32 %v7781_v17, %v9993_v2  ;;  %v1285_v31 = vmul.f32 0.0, %v1255_v18  ;;  %v1233_v20 = vadd.f32 1.0, %v6444_v62  ;;  %v6448_v17 = vpop.eup %6447  ;;  %v1250_v3 = vmul.f32 0.5, %v1226_v59 }
 0x154   :  { %v1187_v7 = vmul.f32 0.5, %v1161_v41  ;;  %5943 = vst [vmem:[%s9933_s4 + $0x18] sm:$0xff] %v5799_v42   ;;  %v1312_v58 = vmul.f32 %v6438_v13, %v1241_v50  ;;  %v1313_v44 = vmul.f32 %v6440_v54, %v1244_v60  ;;  %v6450_v23 = vpop.eup %6449  ;;  %6463 = vtanh.f32 %v7957_v49  ;;  %1693 = vmatmul.mubr.bf16.gmra.mrb[44].mxu0 %v5799_v42  ;;  %1766 = vmatmul.mubr.bf16.gmra.mrb[44].mxu1 %v5799_v42 }
 0x155   :  { %v7972_v8 = vadd.f32 %v1293_v48, %v1285_v31  ;;  %v1234_v34 = vadd.f32 1.0, %v6448_v17  ;;  %v1190_v45 = vmul.f32 0.5, %v1165_v16  ;;  %v1314_v26 = vmul.f32 %v6446_v10, %v1247_v38  ;;  %2302 = vmatprep.mubr.bf16.mxu0 %v9978_v4  ;;  %2375 = vmatprep.mubr.bf16.mxu1 %v9978_v4  ;;  %v6125_v38 = vld [vmem:[%s9929_s2 + $0x4] ss:$16 sps:$4 sm:$0xff]   ;;  %v6123_v31 = vld [vmem:[%s9929_s2] ss:$16 sps:$4 sm:$0xff]  }
 0x156   :  { %v6452_v53 = vpop.eup %6451  ;;  %v5804_v15 = vpack.c.bf16 %v1313_v44, %v1312_v58  ;;  %v1315_v55 = vmul.f32 %v6450_v23, %v1250_v3  ;;  %v1257_v9 = vmul.f32 0.5, %v1233_v20  ;;  %v6126_v20 = vld [vmem:[%s9929_s2 + $0x8] ss:$16 sps:$4 sm:$0xff]   ;;  %v6128_v17 = vld [vmem:[%s9929_s2 + $0xc] ss:$16 sps:$4 sm:$0xff]   ;;  %2910 = vmatprep.subr.bf16.mxu0 %v6125_v38  ;;  %v8149_v38 = vld [vmem:[%s9931_s0 + $0xc0] sm:$0xff] }
 0x157   :  { %9994 = vst [vmem:[#allocation8_spill] sm:$0xff] %v7972_v8  ;;  %v6454_v28 = vpop.eup %6453  ;;  %6465 = vtanh.f32 %v7972_v8  ;;  %v1258_v35 = vmul.f32 0.5, %v1234_v34  ;;  %v1236_v1 = vadd.f32 1.0, %v6452_v53  ;;  %2983 = vmatprep.subr.bf16.mxu1 %v6128_v17  ;;  %v6131_v3 = vld [vmem:[%s9929_s2 + $0x24] ss:$16 sps:$4 sm:$0xff]  }
 0x158   :  { %6467 = vtanh.f32 %v1187_v7  ;;  %5944 = vst [vmem:[%s9934_s5 + $0x60] sm:$0xff] %v5804_v15   ;;  %v5809_v46 = vpack.c.bf16 %v1315_v55, %v1314_v26  ;;  %v1229_v30 = vadd.f32 1.0, %v6454_v28  ;;  %v6134_v7 = vld [vmem:[%s9929_s2 + $0x2c] ss:$16 sps:$4 sm:$0xff]   ;;  %v6129_v58 = vld [vmem:[%s9929_s2 + $0x20] ss:$16 sps:$4 sm:$0xff]  }
 0x159   :  { %v6456_v56 = vpop.eup %6455  ;;  %v1286_v40 = vmul.f32 0.0, %v1258_v35  ;;  %v1260_v25 = vmul.f32 0.5, %v1236_v1  ;;  %6469 = vtanh.f32 %v1190_v45  ;;  %v6132_v44 = vld [vmem:[%s9929_s2 + $0x28] ss:$16 sps:$4 sm:$0xff]   ;;  %v6137_v23 = vld [vmem:[%s9929_s2 + $0x44] ss:$16 sps:$4 sm:$0xff]  }
 0x15a   :  { %v6458_v33 = vpop.eup %6457  ;;  %v1237_v43 = vadd.f32 1.0, %v6456_v56  ;;  %5945 = vst [vmem:[%s9934_s5 + $0x68] sm:$0xff] %v5809_v46   ;;  %v1253_v54 = vmul.f32 0.5, %v1229_v30  ;;  %v6135_v34 = vld [vmem:[%s9929_s2 + $0x40] ss:$16 sps:$4 sm:$0xff]  }
 0x15b   :  { %v6460_v61 = vpop.eup %6459  ;;  %v1232_v27 = vadd.f32 1.0, %v6458_v33  ;;  %v6138_v45 = vld [vmem:[%s9929_s2 + $0x48] ss:$16 sps:$4 sm:$0xff]   ;;  %v6140_v53 = vld [vmem:[%s9929_s2 + $0x4c] ss:$16 sps:$4 sm:$0xff]  }
 0x15c   :  { %v1261_v63 = vmul.f32 0.5, %v1237_v43  ;;  %v1294_v19 = vmul.f32 %v6460_v61, %v1257_v9  ;;  %v6462_v47 = vpop.eup %6461  ;;  %2303 = vmatmul.mubr.bf16.vlgmr.msra.gmra.mrb[48].mxu0 %v5804_v15  ;;  %2376 = vmatmul.mubr.bf16.vlgmr.msra.gmra.mrb[48].mxu1 %v5804_v15  ;;  %v6143_v15 = vld [vmem:[%s9929_s2 + $0x64] ss:$16 sps:$4 sm:$0xff]   ;;  %v6146_v26 = vld [vmem:[%s9929_s2 + $0x6c] ss:$16 sps:$4 sm:$0xff]  }
 0x15d   :  { %v1295_v52 = vmul.f32 %v6462_v47, %v1260_v25  ;;  %2312 = vmatprep.mubr.bf16.mxu0 %v9978_v4  ;;  %2385 = vmatprep.mubr.bf16.mxu1 %v9978_v4  ;;  %v1256_v0 = vmul.f32 0.5, %v1232_v27  ;;  %v6141_v55 = vld [vmem:[%s9929_s2 + $0x60] ss:$16 sps:$4 sm:$0xff]   ;;  %v6144_v28 = vld [vmem:[%s9929_s2 + $0x68] ss:$16 sps:$4 sm:$0xff]  }
 0x15e   :  { %v1287_v13 = vmul.f32 0.0, %v1261_v63  ;;  %v7983_v59 = vadd.f32 %v1294_v19, %v1286_v40  ;;  %v6464_v6 = vpop.eup %6463  ;;  %2911 = vmatpush1.bf16.msra.mxu0 %v6123_v31  ;;  %2984 = vmatpush1.bf16.msra.mxu1 %v6126_v20  ;;  %v6149_v9 = vld [vmem:[%s9929_s2 + $0x84] ss:$16 sps:$4 sm:$0xff]   ;;  %v6147_v35 = vld [vmem:[%s9929_s2 + $0x80] ss:$16 sps:$4 sm:$0xff]   ;;  %v8154_v31 = vld [vmem:[%s9931_s0 + $0xc8] sm:$0xff] }
 0x15f   :  { %v1316_v29 = vmul.f32 %v6464_v6, %v1253_v54  ;;  %2912 = vmatprep.subr.bf16.mxu0 %v6131_v3  ;;  %2985 = vmatprep.subr.bf16.mxu1 %v6134_v7  ;;  %v6150_v1 = vld [vmem:[%s9929_s2 + $0x88] ss:$16 sps:$4 sm:$0xff]   ;;  %v6152_v56 = vld [vmem:[%s9929_s2 + $0x8c] ss:$16 sps:$4 sm:$0xff]   ;;  %v6153_v40 = vld [vmem:[%s9929_s2 + $0xa0] ss:$16 sps:$4 sm:$0xff]  }
 0x160   :  { %9995 = vst [vmem:[#allocation9_spill] sm:$0xff] %v7983_v59  ;;  %6471 = vtanh.f32 %v7983_v59  ;;  %v7988_v37 = vadd.f32 %v1295_v52, %v1287_v13  ;;  %v6158_v33 = vld [vmem:[%s9929_s2 + $0xac] ss:$16 sps:$4 sm:$0xff]   ;;  %v6156_v25 = vld [vmem:[%s9929_s2 + $0xa8] ss:$16 sps:$4 sm:$0xff]   ;;  %v5357_v54 = vld [vmem:[%s9931_s0 + $0x80] sm:$0xff] }
 0x161   :  { %v6466_v41 = vpop.eup %6465  ;;  %v6161_v43 = vld [vmem:[%s9929_s2 + $0xc4] ss:$16 sps:$4 sm:$0xff]   ;;  %v6159_v61 = vld [vmem:[%s9929_s2 + $0xc0] ss:$16 sps:$4 sm:$0xff]   ;;  %v6162_v63 = vld [vmem:[%s9929_s2 + $0xc8] ss:$16 sps:$4 sm:$0xff]  }
 0x162   :  { %9996 = vst [vmem:[#allocation10_spill] sm:$0xff] %v7988_v37  ;;  %6473 = vtanh.f32 %v7988_v37  ;;  %v6468_v12 = vpop.eup %6467  ;;  %v1317_v32 = vmul.f32 %v6466_v41, %v1256_v0  ;;  %2913 = vmatpush1.bf16.msra.mxu0 %v6129_v58  ;;  %2986 = vmatpush1.bf16.msra.mxu1 %v6132_v44  ;;  %v6164_v19 = vld [vmem:[%s9929_s2 + $0xcc] ss:$16 sps:$4 sm:$0xff]   ;;  %v6167_v47 = vld [vmem:[%s9929_s2 + $0xe4] ss:$16 sps:$4 sm:$0xff]  }
 0x163   :  { %v6470_v50 = vpop.eup %6469  ;;  %v1235_v2 = vadd.f32 1.0, %v6468_v12  ;;  %2914 = vmatprep.subr.bf16.mxu0 %v6137_v23  ;;  %2987 = vmatprep.subr.bf16.mxu1 %v6140_v53  ;;  %v6170_v30 = vld [vmem:[%s9929_s2 + $0xec] ss:$16 sps:$4 sm:$0xff]   ;;  %v6165_v27 = vld [vmem:[%s9929_s2 + $0xe0] ss:$16 sps:$4 sm:$0xff]  }
 0x164   :  { %v5814_v18 = vpack.c.bf16 %v1317_v32, %v1316_v29  ;;  %2313 = vmatmul.mubr.bf16.gmra.mrb[52].mxu0 %v5809_v46  ;;  %2386 = vmatmul.mubr.bf16.gmra.mrb[52].mxu1 %v5809_v46  ;;  %v1238_v16 = vadd.f32 1.0, %v6470_v50  ;;  %v6155_v46 = vld [vmem:[%s9929_s2 + $0xa4] ss:$16 sps:$4 sm:$0xff]   ;;  %v6168_v13 = vld [vmem:[%s9929_s2 + $0xe8] ss:$16 sps:$4 sm:$0xff]   ;;  %v1394_v32 = vunpack.c.l.bf16 %v5357_v54 }
 0x165   :  { %2322 = vmatprep.mubr.bf16.mxu0 %v9978_v4  ;;  %2395 = vmatprep.mubr.bf16.mxu1 %v9978_v4  ;;  %v1259_v60 = vmul.f32 0.5, %v1235_v2  ;;  %v6173_v52 = vld [vmem:[%s9930_s3 + $0x4] ss:$16 sps:$4 sm:$0xff]   ;;  %v6176_v6 = vld [vmem:[%s9930_s3 + $0xc] ss:$16 sps:$4 sm:$0xff]  }
 0x166   :  { %5946 = vst [vmem:[%s9934_s5 + $0x70] sm:$0xff] %v5814_v18   ;;  %v1262_v48 = vmul.f32 0.5, %v1238_v16  ;;  %2915 = vmatpush1.bf16.msra.mxu0 %v6135_v34  ;;  %2988 = vmatpush1.bf16.msra.mxu1 %v6138_v45  ;;  %v8111_v0 = vld [vmem:[%s9931_s0 + $0x88] sm:$0xff]  ;;  %v5359_v41 = vld [vmem:[%s9931_s0 + $0x90] sm:$0xff]  ;;  %v8119_v12 = vld [vmem:[%s9931_s0 + $0x98] sm:$0xff]  ;;  %v1395_v16 = vunpack.c.h.bf16 %v5357_v54 }
 0x167   :  { %2916 = vmatprep.subr.bf16.mxu0 %v6143_v15  ;;  %2989 = vmatprep.subr.bf16.mxu1 %v6146_v26  ;;  %v8124_v29 = vld [vmem:[%s9931_s0 + $0xa0] sm:$0xff]  ;;  %v8129_v50 = vld [vmem:[%s9931_s0 + $0xa8] sm:$0xff]  ;;  %v1396_v2 = vunpack.c.l.bf16 %v8111_v0  ;;  %v8163_v23 = vld [vmem:[%s9931_s0 + $0xd0] sm:$0xff] }
 0x168   :  { %v1404_v3 = vunpack.c.l.bf16 %v8129_v50  ;;  %v1403_v7 = vunpack.c.h.bf16 %v8124_v29  ;;  %v1405_v58 = vunpack.c.h.bf16 %v8129_v50  ;;  %v8193_v54 = vld [vmem:[%s9931_s0 + $0xf0] sm:$0xff] }
 0x16a   :  { %v6472_v62 = vpop.eup %6471  ;;  %2917 = vmatpush1.bf16.msra.mxu0 %v6141_v55  ;;  %2990 = vmatpush1.bf16.msra.mxu1 %v6144_v28  ;;  %v8171_v28 = vld [vmem:[%s9931_s0 + $0xd8] sm:$0xff] }
 0x16b   :  { %v1318_v22 = vmul.f32 %v6472_v62, %v1259_v60  ;;  %2918 = vmatprep.subr.bf16.mxu0 %v6149_v9  ;;  %2991 = vmatprep.subr.bf16.mxu1 %v6152_v56  ;;  %v1397_v62 = vunpack.c.h.bf16 %v8111_v0  ;;  %v1398_v60 = vunpack.c.l.bf16 %v5359_v41  ;;  %v1410_v56 = vunpack.c.l.bf16 %v8149_v38  ;;  %v8198_v0 = vld [vmem:[%s9931_s0 + $0xf8] sm:$0xff] }
 0x16c   :  { %v6474_v42 = vpop.eup %6473  ;;  %2323 = vmatmul.mubr.bf16.gmra.mrb[56].mxu0 %v5814_v18  ;;  %2396 = vmatmul.mubr.bf16.gmra.mrb[56].mxu1 %v5814_v18  ;;  %v8134_v18 = vld [vmem:[%s9931_s0 + $0xb0] sm:$0xff] }
 0x16d   :  { %v1319_v5 = vmul.f32 %v6474_v42, %v1262_v48  ;;  %2332 = vmatprep.mubr.bf16.mxu0 %v9978_v4  ;;  %2405 = vmatprep.mubr.bf16.mxu1 %v9978_v4  ;;  %v8141_v48 = vld [vmem:[%s9931_s0 + $0xb8] sm:$0xff]  ;;  %v1400_v42 = vunpack.c.l.bf16 %v8119_v12  ;;  %v1406_v44 = vunpack.c.l.bf16 %v8134_v18  ;;  %v1407_v26 = vunpack.c.h.bf16 %v8134_v18 }
 0x16e   :  { %2919 = vmatpush1.bf16.msra.mxu0 %v6147_v35  ;;  %2992 = vmatpush1.bf16.msra.mxu1 %v6150_v1  ;;  %v1408_v15 = vunpack.c.l.bf16 %v8141_v48  ;;  %v1409_v55 = vunpack.c.h.bf16 %v8141_v48 }
 0x16f   :  { %v5819_v10 = vpack.c.bf16 %v1319_v5, %v1318_v22  ;;  %2920 = vmatprep.subr.bf16.mxu0 %v6155_v46  ;;  %2993 = vmatprep.subr.bf16.mxu1 %v6158_v33  ;;  %v1399_v22 = vunpack.c.h.bf16 %v5359_v41  ;;  %v1401_v5 = vunpack.c.h.bf16 %v8119_v12  ;;  %v1412_v46 = vunpack.c.l.bf16 %v8154_v31 }
 0x170   :  { %v1411_v33 = vunpack.c.h.bf16 %v8149_v38 }
 0x171   :  { %5947 = vst [vmem:[%s9934_s5 + $0x78] sm:$0xff] %v5819_v10  }
 0x172   :  { %2921 = vmatpush1.bf16.msra.mxu0 %v6153_v40  ;;  %2994 = vmatpush1.bf16.msra.mxu1 %v6156_v25 }
 0x173   :  { %2922 = vmatprep.subr.bf16.mxu0 %v6161_v43  ;;  %2995 = vmatprep.subr.bf16.mxu1 %v6164_v19  ;;  %v1414_v19 = vunpack.c.l.bf16 %v8163_v23 }
 0x174   :  { %2333 = vmatmul.mubr.bf16.gmra.mrb[60].mxu0 %v5819_v10  ;;  %2406 = vmatmul.mubr.bf16.gmra.mrb[60].mxu1 %v5819_v10  ;;  %v1402_v10 = vunpack.c.l.bf16 %v8124_v29  ;;  %v8284_v29 = vld [vmem:[%s9932_s1 + $0x148] sm:$0xff] }
 0x175   :  { %2942 = vmatprep.mubr.bf16.mxu0 %v9978_v4  ;;  %3015 = vmatprep.mubr.bf16.mxu1 %v9978_v4 }
 0x176   :  { %2923 = vmatpush1.bf16.msra.mxu0 %v6159_v61  ;;  %2996 = vmatpush1.bf16.msra.mxu1 %v6162_v63 }
 0x177   :  { %2924 = vmatprep.subr.bf16.mxu0 %v6167_v47  ;;  %2997 = vmatprep.subr.bf16.mxu1 %v6170_v30  ;;  %v8181_v47 = vld [vmem:[%s9931_s0 + $0xe0] sm:$0xff]  ;;  %v8186_v30 = vld [vmem:[%s9931_s0 + $0xe8] sm:$0xff] }
 0x17a   :  { %2925 = vmatpush1.bf16.msra.mxu0 %v6165_v27  ;;  %2998 = vmatpush1.bf16.msra.mxu1 %v6168_v13 }
 0x17b   :  { %3550 = vmatprep.subr.bf16.mxu0 %v6173_v52  ;;  %3623 = vmatprep.subr.bf16.mxu1 %v6176_v6 }
 0x204   :  { %v1664_v20 = vpop.f32.mrb[32].mxu0  ;;  %v1737_v17 = vpop.f32.mrb[32].mxu1 }
 0x205   :  { %v1776_v34 = vadd.f32 %v1664_v20, %v1394_v32  ;;  %v1666_v45 = vpop.f32.mrb[33].mxu0  ;;  %v1739_v53 = vpop.f32.mrb[33].mxu1 }
 0x206   :  { %v1777_v9 = vadd.f32 %v1666_v45, %v1395_v16  ;;  %v1668_v35 = vpop.f32.mrb[34].mxu0  ;;  %v1741_v1 = vpop.f32.mrb[34].mxu1  ;;  %v1779_v41 = vadd.f32 %v1739_v53, %v1397_v62 }
 0x207   :  { %v1808_v40 = vmul.f32 0.5, %v1776_v34  ;;  %v1780_v25 = vadd.f32 %v1668_v35, %v1398_v60  ;;  %v1670_v43 = vpop.f32.mrb[35].mxu0  ;;  %v1743_v61 = vpop.f32.mrb[35].mxu1  ;;  %v8207_v34 = vld [vmem:[%s9932_s1 + $0x100] sm:$0xff]  ;;  %v1778_v35 = vadd.f32 %v1737_v17, %v1396_v2  ;;  %v8238_v17 = vld [vmem:[%s9932_s1 + $0x128] sm:$0xff] }
 0x208   :  { %v1809_v27 = vmul.f32 0.5, %v1777_v9  ;;  %v1781_v13 = vadd.f32 %v1670_v43, %v1399_v22  ;;  %v8215_v9 = vld [vmem:[%s9932_s1 + $0x108] sm:$0xff]  ;;  %v8221_v43 = vld [vmem:[%s9932_s1 + $0x110] sm:$0xff] }
 0x209   :  { %6475 = vtanh.f32 %v1808_v40  ;;  %v1811_v12 = vmul.f32 0.5, %v1780_v25  ;;  %v1783_v40 = vadd.f32 %v1743_v61, %v1401_v5  ;;  %v8233_v5 = vld [vmem:[%s9932_s1 + $0x120] sm:$0xff]  ;;  %v1810_v61 = vmul.f32 0.5, %v1778_v35 }
 0x20a   :  { %v1812_v16 = vmul.f32 0.5, %v1781_v13  ;;  %6477 = vtanh.f32 %v1809_v27  ;;  %v8226_v27 = vld [vmem:[%s9932_s1 + $0x118] sm:$0xff]  ;;  %v1782_v13 = vadd.f32 %v1741_v1, %v1400_v42  ;;  %v8246_v1 = vld [vmem:[%s9932_s1 + $0x130] sm:$0xff] }
 0x20b   :  { %6479 = vtanh.f32 %v1811_v12  ;;  %v8262_v12 = vld [vmem:[%s9932_s1 + $0x140] sm:$0xff] }
 0x20c   :  { %6481 = vtanh.f32 %v1779_v41  ;;  %v1813_v2 = vmul.f32 0.5, %v1782_v13 }
 0x20d   :  { %6483 = vtanh.f32 %v1812_v16  ;;  %v8255_v16 = vld [vmem:[%s9932_s1 + $0x138] sm:$0xff] }
 0x20e   :  { %6485 = vtanh.f32 %v1783_v40 }
 0x20f   :  { %6487 = vtanh.f32 %v1810_v61 }
 0x210   :  { %6489 = vtanh.f32 %v1813_v2 }
 0x213   :  { %v1674_v53 = vpop.f32.mrb[36].mxu0  ;;  %v1747_v62 = vpop.f32.mrb[36].mxu1 }
 0x214   :  { %v1784_v35 = vadd.f32 %v1674_v53, %v1402_v10  ;;  %v1786_v40 = vadd.f32 %v1747_v62, %v1404_v3  ;;  %v1676_v41 = vpop.f32.mrb[37].mxu0  ;;  %v1749_v42 = vpop.f32.mrb[37].mxu1 }
 0x215   :  { %v6476_v60 = vpop.eup %6475  ;;  %v1785_v25 = vadd.f32 %v1676_v41, %v1403_v7  ;;  %v1787_v45 = vadd.f32 %v1749_v42, %v1405_v58  ;;  %v1678_v20 = vpop.f32.mrb[38].mxu0 }
 0x216   :  { %v1751_v32 = vpop.f32.mrb[38].mxu1  ;;  %v1856_v3 = vadd.f32 1.0, %v6476_v60  ;;  %v1814_v62 = vmul.f32 0.5, %v1784_v35  ;;  %v1788_v22 = vadd.f32 %v1678_v20, %v1406_v44  ;;  %v1680_v13 = vpop.f32.mrb[39].mxu0  ;;  %v1816_v7 = vmul.f32 0.5, %v1786_v40 }
 0x217   :  { %v1753_v52 = vpop.f32.mrb[39].mxu1  ;;  %v6478_v50 = vpop.eup %6477  ;;  %v1815_v58 = vmul.f32 0.5, %v1785_v25  ;;  %v1790_v41 = vadd.f32 %v1751_v32, %v1408_v15  ;;  %v1789_v32 = vadd.f32 %v1680_v13, %v1407_v26 }
 0x218   :  { %v6480_v60 = vpop.eup %6479  ;;  %v1880_v61 = vmul.f32 0.5, %v1856_v3  ;;  %v1857_v42 = vadd.f32 1.0, %v6478_v50  ;;  %6491 = vtanh.f32 %v1814_v62  ;;  %v1817_v35 = vmul.f32 0.5, %v1788_v22 }
 0x219   :  { %v6482_v44 = vpop.eup %6481  ;;  %v1859_v20 = vadd.f32 1.0, %v6480_v60  ;;  %6493 = vtanh.f32 %v1787_v45  ;;  %v1819_v45 = vmul.f32 0.5, %v1790_v41  ;;  %v1791_v62 = vadd.f32 %v1753_v52, %v1409_v55 }
 0x21a   :  { %v6484_v6 = vpop.eup %6483  ;;  %v1881_v63 = vmul.f32 0.5, %v1857_v42  ;;  %v1928_v2 = vmul.f32 %v6482_v44, %v1880_v61  ;;  %6495 = vtanh.f32 %v1815_v58  ;;  %v8299_v58 = vld [vmem:[%s9932_s1 + $0x150] sm:$0xff]  ;;  %v1818_v42 = vmul.f32 0.5, %v1789_v32 }
 0x21b   :  { %v1883_v40 = vmul.f32 0.5, %v1859_v20  ;;  %v1860_v15 = vadd.f32 1.0, %v6484_v6  ;;  %6497 = vtanh.f32 %v1817_v35  ;;  %v6486_v22 = vpop.eup %6485  ;;  %v8314_v20 = vld [vmem:[%s9932_s1 + $0x158] sm:$0xff] }
 0x21c   :  { %v1920_v3 = vmul.f32 %v1881_v63, %v7572_v36  ;;  %6499 = vtanh.f32 %v1816_v7 }
 0x21d   :  { %v1884_v6 = vmul.f32 0.5, %v1860_v15  ;;  %v1929_v61 = vmul.f32 %v6486_v22, %v1883_v40  ;;  %6501 = vtanh.f32 %v1791_v62  ;;  %v9999_v15 = vunpack.c.h.bf16 %v8154_v31 }
 0x21e   :  { %v8303_v63 = vadd.f32 %v1928_v2, %v1920_v3  ;;  %6503 = vtanh.f32 %v1818_v42  ;;  %v8316_v2 = vpop.eup %6487  ;;  %v10000_v22 = vunpack.c.h.bf16 %v8163_v23  ;;  %v10001_v31 = vunpack.c.l.bf16 %v8171_v28 }
 0x21f   :  { %v1684_v50 = vpop.f32.mrb[40].mxu0  ;;  %v1757_v60 = vpop.f32.mrb[40].mxu1  ;;  %v1921_v7 = vmul.f32 %v1884_v6, %v7579_v14  ;;  %6505 = vtanh.f32 %v1819_v45  ;;  %v8331_v45 = vld [vmem:[%s9932_s1 + $0x160] sm:$0xff] }
 0x220   :  { %v1792_v18 = vadd.f32 %v1684_v50, %v1410_v56  ;;  %v1686_v26 = vpop.f32.mrb[41].mxu0  ;;  %v1759_v36 = vpop.f32.mrb[41].mxu1  ;;  %9997 = vst [vmem:[#allocation11_spill] sm:$0xff] %v8303_v63  ;;  %v1794_v48 = vadd.f32 %v1757_v60, %v1412_v46 }
 0x221   :  { %v1793_v55 = vadd.f32 %v1686_v26, %v1411_v33  ;;  %v1688_v52 = vpop.f32.mrb[42].mxu0  ;;  %v1761_v13 = vpop.f32.mrb[42].mxu1  ;;  %v8322_v40 = vadd.f32 %v1929_v61, %v1921_v7  ;;  %v1795_v32 = vadd.f32 %v1759_v36, %v9999_v15 }
 0x222   :  { %v1820_v41 = vmul.f32 0.5, %v1792_v18  ;;  %v1690_v35 = vpop.f32.mrb[43].mxu0  ;;  %v1763_v44 = vpop.f32.mrb[43].mxu1  ;;  %v1822_v38 = vmul.f32 0.5, %v1794_v48  ;;  %v1796_v33 = vadd.f32 %v1688_v52, %v1414_v19  ;;  %v1798_v23 = vadd.f32 %v1761_v13, %v10001_v31  ;;  %v8342_v18 = vld [vmem:[%s9932_s1 + $0x168] sm:$0xff] }
 0x223   :  { %v1821_v46 = vmul.f32 0.5, %v1793_v55  ;;  %v8320_v14 = vpop.eup %6489  ;;  %9998 = vst [vmem:[#allocation12_spill] sm:$0xff] %v8322_v40  ;;  %v1797_v3 = vadd.f32 %v1690_v35, %v10000_v22  ;;  %v10002_v48 = vunpack.c.h.bf16 %v8171_v28  ;;  %v10004_v28 = vunpack.c.l.bf16 %v8186_v30 }
 0x224   :  { %6507 = vtanh.f32 %v1820_v41  ;;  %v6492_v62 = vpop.eup %6491  ;;  %v1823_v19 = vmul.f32 0.5, %v1796_v33  ;;  %v10003_v33 = vunpack.c.l.bf16 %v8181_v47 }
 0x225   :  { %6509 = vtanh.f32 %v8303_v63  ;;  %v6494_v6 = vpop.eup %6493  ;;  %v1862_v61 = vadd.f32 1.0, %v6492_v62  ;;  %v1824_v36 = vmul.f32 0.5, %v1797_v3  ;;  %v1799_v55 = vadd.f32 %v1763_v44, %v10002_v48 }
 0x226   :  { %6511 = vtanh.f32 %v1822_v38  ;;  %v6496_v26 = vpop.eup %6495 }
 0x227   :  { %6513 = vtanh.f32 %v1821_v46  ;;  %v1694_v52 = vpop.f32.mrb[44].mxu0  ;;  %v1767_v7 = vpop.f32.mrb[44].mxu1  ;;  %v1886_v38 = vmul.f32 0.5, %v1862_v61  ;;  %v1863_v13 = vadd.f32 1.0, %v6496_v26  ;;  %v1825_v26 = vmul.f32 0.5, %v1798_v23 }
 0x228   :  { %v6498_v35 = vpop.eup %6497  ;;  %6515 = vtanh.f32 %v1795_v32  ;;  %v1800_v15 = vadd.f32 %v1694_v52, %v10003_v33  ;;  %v1696_v22 = vpop.f32.mrb[45].mxu0  ;;  %v1802_v44 = vadd.f32 %v1767_v7, %v10004_v28  ;;  %v10005_v7 = vunpack.c.h.bf16 %v8181_v47  ;;  %v8370_v47 = vld [vmem:[%s9932_s1 + $0x170] sm:$0xff] }
 0x229   :  { %v1769_v62 = vpop.f32.mrb[45].mxu1  ;;  %v8349_v31 = vpop.eup %6499  ;;  %v1865_v46 = vadd.f32 1.0, %v6498_v35  ;;  %6517 = vtanh.f32 %v1823_v19  ;;  %v1887_v61 = vmul.f32 0.5, %v1863_v13  ;;  %v1930_v32 = vmul.f32 %v6494_v6, %v1886_v38 }
 0x22a   :  { %v1698_v3 = vpop.f32.mrb[46].mxu0  ;;  %v1771_v48 = vpop.f32.mrb[46].mxu1  ;;  %6519 = vtanh.f32 %v8322_v40  ;;  %v1826_v42 = vmul.f32 0.5, %v1800_v15  ;;  %v1828_v35 = vmul.f32 0.5, %v1802_v44  ;;  %v1801_v28 = vadd.f32 %v1696_v22, %v10005_v7 }
 0x22b   :  { %v1700_v53 = vpop.f32.mrb[47].mxu0  ;;  %v1773_v52 = vpop.f32.mrb[47].mxu1  ;;  %v1889_v41 = vmul.f32 0.5, %v1865_v46  ;;  %6521 = vtanh.f32 %v1824_v36  ;;  %v1922_v60 = vmul.f32 %v1887_v61, %v7603_v24  ;;  %v10006_v38 = vunpack.c.h.bf16 %v8186_v30  ;;  %v8379_v61 = vld [vmem:[%s9932_s1 + $0x178] sm:$0xff] }
 0x22c   :  { %v6502_v33 = vpop.eup %6501  ;;  %6523 = vtanh.f32 %v1799_v55  ;;  %v1827_v46 = vmul.f32 0.5, %v1801_v28  ;;  %v10008_v24 = vunpack.c.l.bf16 %v8193_v54  ;;  %v10009_v30 = vunpack.c.l.bf16 %v8198_v0  ;;  %10010 = vst [vmem:[#allocation14_spill] sm:$0xff] %v8379_v61 }
 0x22d   :  { %v6504_v19 = vpop.eup %6503  ;;  %v1931_v23 = vmul.f32 %v6502_v33, %v1889_v41  ;;  %6525 = vtanh.f32 %v1826_v42  ;;  %v1803_v13 = vadd.f32 %v1769_v62, %v10006_v38  ;;  %v8363_v15 = vadd.f32 %v1930_v32, %v1922_v60 }
 0x22e   :  { %v8359_v56 = vpop.eup %6505  ;;  %v1866_v6 = vadd.f32 1.0, %v6504_v19  ;;  %6527 = vtanh.f32 %v1825_v26  ;;  %v1804_v55 = vadd.f32 %v1698_v3, %v10008_v24  ;;  %v1806_v62 = vadd.f32 %v1771_v48, %v10009_v30 }
 0x22f   :  { %v6508_v36 = vpop.eup %6507  ;;  %10007 = vst [vmem:[#allocation13_spill] sm:$0xff] %v8363_v15  ;;  %6529 = vtanh.f32 %v1828_v35  ;;  %v2304_v60 = vpop.f32.mrb[48].mxu0  ;;  %v10011_v26 = vunpack.c.h.bf16 %v8193_v54 }
 0x230   :  { %v8372_v22 = vpop.eup %6509  ;;  %v1890_v41 = vmul.f32 0.5, %v1866_v6  ;;  %v1868_v42 = vadd.f32 1.0, %v6508_v36  ;;  %v2377_v44 = vpop.f32.mrb[48].mxu1  ;;  %6531 = vtanh.f32 %v1803_v13  ;;  %v1829_v32 = vmul.f32 0.5, %v1804_v55 }
 0x231   :  { %v8381_v3 = vpop.eup %6511  ;;  %v1805_v33 = vadd.f32 %v1700_v53, %v10011_v26  ;;  %v2306_v19 = vpop.f32.mrb[49].mxu0  ;;  %6533 = vtanh.f32 %v1827_v46  ;;  %v10013_v46 = vunpack.c.h.bf16 %v8198_v0  ;;  %v10015_v53 = vunpack.c.h.bf16 %v8207_v34 }
 0x232   :  { %v2379_v7 = vpop.f32.mrb[49].mxu1  ;;  %v6514_v28 = vpop.eup %6513  ;;  %v1923_v48 = vmul.f32 %v1890_v41, %v7616_v11  ;;  %v1892_v6 = vmul.f32 0.5, %v1868_v42  ;;  %6535 = vtanh.f32 %v1829_v32  ;;  %v1831_v11 = vmul.f32 0.5, %v1806_v62 }
 0x233   :  { %v2308_v38 = vpop.f32.mrb[50].mxu0  ;;  %v2381_v36 = vpop.f32.mrb[50].mxu1  ;;  %v1869_v50 = vadd.f32 1.0, %v6514_v28  ;;  %v1830_v13 = vmul.f32 0.5, %v1805_v33  ;;  %v1807_v41 = vadd.f32 %v1773_v52, %v10013_v46  ;;  %v10014_v32 = vunpack.c.l.bf16 %v8207_v34  ;;  %v10016_v52 = vld [vmem:[#allocation4_spill] sm:$0xff] }
 0x234   :  { %v6516_v30 = vpop.eup %6515  ;;  %v2310_v55 = vpop.f32.mrb[51].mxu0  ;;  %v8391_v35 = vadd.f32 %v1931_v23, %v1923_v48  ;;  %v2417_v23 = vadd.f32 %v2306_v19, %v10015_v53 }
 0x235   :  { %v8388_v54 = vpop.f32.mrb[51].mxu1  ;;  %v6518_v26 = vpop.eup %6517  ;;  %v1932_v25 = vmul.f32 %v6516_v30, %v1892_v6  ;;  %v1893_v24 = vmul.f32 0.5, %v1869_v50  ;;  %6537 = vtanh.f32 %v1830_v13  ;;  %v2416_v33 = vadd.f32 %v2304_v60, %v10014_v32 }
 0x236   :  { %10012 = vst [vmem:[#allocation15_spill] sm:$0xff] %v8391_v35  ;;  %v8395_v42 = vpop.eup %6519  ;;  %v1871_v10 = vadd.f32 1.0, %v6518_v26  ;;  %6539 = vtanh.f32 %v8363_v15  ;;  %v10017_v60 = vunpack.c.l.bf16 %v8215_v9  ;;  %v2449_v32 = vmul.f32 0.5, %v2417_v23 }
 0x237   :  { %v6522_v28 = vpop.eup %6521  ;;  %v1924_v6 = vmul.f32 %v1893_v24, %v10016_v52  ;;  %6541 = vtanh.f32 %v1807_v41  ;;  %v2448_v26 = vmul.f32 0.5, %v2416_v33  ;;  %v2314_v15 = vpop.f32.mrb[52].mxu0  ;;  %v10019_v23 = vunpack.c.l.bf16 %v8221_v43 }
 0x238   :  { %v6524_v0 = vpop.eup %6523  ;;  %v1895_v30 = vmul.f32 0.5, %v1871_v10  ;;  %v1872_v50 = vadd.f32 1.0, %v6522_v28  ;;  %6543 = vtanh.f32 %v1831_v11  ;;  %v2418_v46 = vadd.f32 %v2377_v44, %v10017_v60  ;;  %v8407_v34 = vpop.f32.mrb[52].mxu1 }
 0x239   :  { %v6526_v13 = vpop.eup %6525  ;;  %v8411_v53 = vadd.f32 %v1932_v25, %v1924_v6  ;;  %v2316_v10 = vpop.f32.mrb[53].mxu0  ;;  %v1858_v11 = vadd.f32 1.0, %v8316_v2  ;;  %6545 = vtanh.f32 %v2448_v26  ;;  %v10018_v44 = vunpack.c.h.bf16 %v8215_v9 }
 0x23a   :  { %v8409_v19 = vpop.eup %6527  ;;  %v1896_v62 = vmul.f32 0.5, %v1872_v50  ;;  %v1933_v48 = vmul.f32 %v6524_v0, %v1895_v30  ;;  %v1874_v24 = vadd.f32 1.0, %v6526_v13  ;;  %v8413_v28 = vpop.f32.mrb[53].mxu1  ;;  %v2420_v52 = vadd.f32 %v2308_v38, %v10019_v23  ;;  %v10020_v30 = vld [vmem:[#allocation5_spill] sm:$0xff] }
 0x23b   :  { %v8415_v41 = vpop.eup %6529  ;;  %v2419_v33 = vadd.f32 %v2379_v7, %v10018_v44  ;;  %v2318_v60 = vpop.f32.mrb[54].mxu0  ;;  %v1861_v0 = vadd.f32 1.0, %v8320_v14  ;;  %6547 = vtanh.f32 %v8391_v35  ;;  %v2450_v7 = vmul.f32 0.5, %v2418_v46 }
 0x23c   :  { %v8422_v25 = vpop.f32.mrb[54].mxu1  ;;  %v6532_v6 = vpop.eup %6531  ;;  %v1925_v50 = vmul.f32 %v1896_v62, %v10020_v30  ;;  %v1898_v13 = vmul.f32 0.5, %v1874_v24  ;;  %v2451_v26 = vmul.f32 0.5, %v2420_v52  ;;  %v10021_v38 = vunpack.c.l.bf16 %v8226_v27 }
 0x23d   :  { %v8427_v40 = vpop.f32.mrb[55].mxu0  ;;  %v8429_v2 = vpop.f32.mrb[55].mxu1  ;;  %v10022_v23 = vunpack.c.h.bf16 %v8221_v43  ;;  %6549 = vtanh.f32 %v2449_v32  ;;  %v1882_v62 = vmul.f32 0.5, %v1858_v11  ;;  %v1885_v61 = vmul.f32 0.5, %v1861_v0 }
 0x23e   :  { %v6534_v9 = vpop.eup %6533  ;;  %v2422_v44 = vadd.f32 %v2381_v36, %v10021_v38  ;;  %v8435_v14 = vadd.f32 %v1933_v48, %v1925_v50  ;;  %v1934_v59 = vmul.f32 %v6532_v6, %v1898_v13  ;;  %6551 = vtanh.f32 %v2419_v33 }
 0x23f   :  { %v2421_v63 = vadd.f32 %v2310_v55, %v10022_v23  ;;  %v6536_v37 = vpop.eup %6535  ;;  %v1875_v35 = vadd.f32 1.0, %v6534_v9  ;;  %6553 = vtanh.f32 %v8411_v53  ;;  %v10024_v36 = vunpack.c.h.bf16 %v8226_v27 }
 0x240   :  { %10023 = vst [vmem:[#allocation4_spill] sm:$0xff] %v8435_v14  ;;  %v1877_v24 = vadd.f32 1.0, %v6536_v37  ;;  %v6538_v8 = vpop.eup %6537  ;;  %6555 = vtanh.f32 %v2451_v26  ;;  %v10025_v32 = vunpack.c.l.bf16 %v8233_v5  ;;  %v8445_v37 = vpop.f32.mrb[56].mxu0  ;;  %v1864_v6 = vadd.f32 1.0, %v8349_v31 }
 0x241   :  { %v2452_v30 = vmul.f32 0.5, %v2421_v63  ;;  %v1899_v46 = vmul.f32 0.5, %v1875_v35  ;;  %v2423_v43 = vadd.f32 %v8388_v54, %v10024_v36  ;;  %v8441_v55 = vpop.eup %6539  ;;  %v1878_v52 = vadd.f32 1.0, %v6538_v8  ;;  %v8447_v63 = vpop.f32.mrb[56].mxu1  ;;  %v10026_v35 = vld [vmem:[#allocation6_spill] sm:$0xff] }
 0x242   :  { %v1901_v48 = vmul.f32 0.5, %v1877_v24  ;;  %v2424_v11 = vadd.f32 %v2314_v15, %v10025_v32  ;;  %v6542_v33 = vpop.eup %6541  ;;  %6557 = vtanh.f32 %v2450_v7  ;;  %v2453_v27 = vmul.f32 0.5, %v2422_v44  ;;  %v8451_v54 = vpop.f32.mrb[57].mxu0 }
 0x243   :  { %v1926_v0 = vmul.f32 %v1899_v46, %v10026_v35  ;;  %v8453_v50 = vpop.f32.mrb[57].mxu1  ;;  %v8455_v8 = vpop.eup %6543  ;;  %v1902_v13 = vmul.f32 0.5, %v1878_v52  ;;  %6559 = vtanh.f32 %v2452_v30  ;;  %v1867_v31 = vadd.f32 1.0, %v8359_v56 }
 0x244   :  { %v1935_v9 = vmul.f32 %v6542_v33, %v1901_v48  ;;  %v2454_v15 = vmul.f32 0.5, %v2424_v11  ;;  %v8457_v26 = vpop.f32.mrb[58].mxu0  ;;  %v8459_v38 = vpop.f32.mrb[58].mxu1  ;;  %6561 = vtanh.f32 %v2423_v43  ;;  %v10028_v7 = vunpack.c.h.bf16 %v8233_v5  ;;  %v10029_v48 = vld [vmem:[#allocation7_spill] sm:$0xff] }
 0x245   :  { %v8462_v23 = vadd.f32 %v1934_v59, %v1926_v0  ;;  %v8466_v24 = vpop.f32.mrb[59].mxu0  ;;  %v8468_v46 = vpop.f32.mrb[59].mxu1  ;;  %v1870_v30 = vadd.f32 1.0, %v8381_v3  ;;  %v1927_v52 = vmul.f32 %v1902_v13, %v10029_v48  ;;  %v10030_v32 = vunpack.c.l.bf16 %v8246_v1 }
 0x246   :  { %v2425_v44 = vadd.f32 %v2316_v10, %v10028_v7  ;;  %v6546_v36 = vpop.eup %6545  ;;  %6563 = vtanh.f32 %v2454_v15  ;;  %v10031_v10 = vunpack.c.h.bf16 %v8238_v17  ;;  %v8480_v33 = vmul.f32 0.5, %v1864_v6 }
 0x247   :  { %10027 = vst [vmem:[#allocation5_spill] sm:$0xff] %v8462_v23  ;;  %v2428_v11 = vadd.f32 %v2318_v60, %v10030_v32  ;;  %v8474_v56 = vpop.eup %6547  ;;  %6565 = vtanh.f32 %v8435_v14  ;;  %v2496_v59 = vadd.f32 1.0, %v6546_v36  ;;  %v8482_v35 = vadd.f32 %v1935_v9, %v1927_v52  ;;  %v8502_v48 = vpop.f32.mrb[60].mxu1 }
 0x248   :  { %v2455_v5 = vmul.f32 0.5, %v2425_v44  ;;  %v2427_v43 = vadd.f32 %v8413_v28, %v10031_v10  ;;  %6567 = vtanh.f32 %v2453_v27  ;;  %v6550_v0 = vpop.eup %6549  ;;  %v8484_v13 = vmul.f32 0.5, %v1867_v31  ;;  %v6171_v44 = vld [vmem:[%s9930_s3] ss:$16 sps:$4 sm:$0xff]   ;;  %v6174_v31 = vld [vmem:[%s9930_s3 + $0x8] ss:$16 sps:$4 sm:$0xff]  }
 0x249   :  { %v2457_v3 = vmul.f32 0.5, %v2428_v11  ;;  %v2520_v60 = vmul.f32 0.5, %v2496_v59  ;;  %v10032_v15 = vunpack.c.l.bf16 %v8238_v17  ;;  %v6552_v28 = vpop.eup %6551  ;;  %v2497_v6 = vadd.f32 1.0, %v6550_v0  ;;  %v6182_v10 = vld [vmem:[%s9930_s3 + $0x2c] ss:$16 sps:$4 sm:$0xff]  }
 0x24a   :  { %6569 = vtanh.f32 %v2455_v5  ;;  %v1952_v9 = vmul.f32 %v8372_v22, %v1882_v62  ;;  %v1953_v27 = vmul.f32 %v8395_v42, %v1885_v61  ;;  %v10033_v36 = vunpack.c.h.bf16 %v8246_v1  ;;  %v8504_v52 = vpop.eup %6553  ;;  %v6179_v1 = vld [vmem:[%s9930_s3 + $0x24] ss:$16 sps:$4 sm:$0xff]  }
 0x24b   :  { %v2426_v7 = vadd.f32 %v8407_v34, %v10032_v15  ;;  %v8500_v34 = vpop.f32.mrb[60].mxu0  ;;  %v8506_v32 = vmul.f32 0.5, %v1870_v30  ;;  %v2568_v11 = vmul.f32 %v6552_v28, %v2520_v60  ;;  %6571 = vtanh.f32 %v2427_v43  ;;  %v6556_v62 = vpop.eup %6555 }
 0x24c   :  { %v2429_v17 = vadd.f32 %v8427_v40, %v10033_v36  ;;  %v10034_v22 = vunpack.c.h.bf16 %v8255_v16  ;;  %v8514_v42 = vpop.f32.mrb[61].mxu0  ;;  %v8516_v40 = vpop.f32.mrb[61].mxu1  ;;  %v2521_v59 = vmul.f32 0.5, %v2497_v6  ;;  %6573 = vtanh.f32 %v2457_v3 }
 0x24d   :  { %v5824_v5 = vpack.c.bf16 %v1953_v27, %v1952_v9  ;;  %v8521_v43 = vpop.f32.mrb[62].mxu0  ;;  %v8525_v0 = vpop.eup %6557  ;;  %v1873_v60 = vadd.f32 1.0, %v8409_v19  ;;  %6575 = vtanh.f32 %v8462_v23  ;;  %v2499_v15 = vadd.f32 1.0, %v6556_v62  ;;  %v6177_v19 = vld [vmem:[%s9930_s3 + $0x20] ss:$16 sps:$4 sm:$0xff]  }
 0x24e   :  { %v2431_v61 = vadd.f32 %v8429_v2, %v10034_v22  ;;  %v2458_v30 = vmul.f32 0.5, %v2429_v17  ;;  %v8523_v2 = vpop.f32.mrb[62].mxu1  ;;  %v10035_v28 = vunpack.c.l.bf16 %v8262_v12  ;;  %v8532_v6 = vpop.f32.mrb[63].mxu0  ;;  %v2560_v36 = vmul.f32 %v2521_v59, %v7801_v39  ;;  %v6180_v59 = vld [vmem:[%s9930_s3 + $0x28] ss:$16 sps:$4 sm:$0xff]  }
 0x24f   :  { %v8534_v9 = vpop.f32.mrb[63].mxu1  ;;  %v6560_v27 = vpop.eup %6559  ;;  %v2456_v17 = vmul.f32 0.5, %v2426_v7  ;;  %5948 = vst [vmem:[%s9933_s4 + $0x20] sm:$0xff] %v5824_v5   ;;  %2943 = vmatmul.mubr.bf16.vlgmr.msra.gmra.mrb[64].mxu0 %v5824_v5  ;;  %3016 = vmatmul.mubr.bf16.vlgmr.msra.gmra.mrb[64].mxu1 %v5824_v5  ;;  %v10037_v39 = vunpack.c.l.bf16 %v8255_v16  ;;  %v1876_v14 = vadd.f32 1.0, %v8415_v41  ;;  %v6185_v16 = vld [vmem:[%s9930_s3 + $0x44] ss:$16 sps:$4 sm:$0xff]  }
 0x250   :  { %v2432_v3 = vadd.f32 %v8445_v37, %v10035_v28  ;;  %6577 = vtanh.f32 %v2458_v30  ;;  %v10036_v37 = vunpack.c.h.bf16 %v8262_v12  ;;  %v6562_v62 = vpop.eup %6561  ;;  %v2523_v28 = vmul.f32 0.5, %v2499_v15  ;;  %3551 = vmatpush1.bf16.msra.mxu0 %v6171_v44  ;;  %3624 = vmatpush1.bf16.msra.mxu1 %v6174_v31 }
 0x251   :  { %v2500_v23 = vadd.f32 1.0, %v6560_v27  ;;  %v2430_v7 = vadd.f32 %v8422_v25, %v10037_v39  ;;  %v6564_v30 = vpop.eup %6563  ;;  %v8553_v12 = vadd.f32 %v2568_v11, %v2560_v36  ;;  %6579 = vtanh.f32 %v2431_v61  ;;  %3552 = vmatprep.subr.bf16.mxu0 %v6179_v1  ;;  %3625 = vmatprep.subr.bf16.mxu1 %v6182_v10  ;;  %v6188_v25 = vld [vmem:[%s9930_s3 + $0x4c] ss:$16 sps:$4 sm:$0xff]   ;;  %v6183_v27 = vld [vmem:[%s9930_s3 + $0x40] ss:$16 sps:$4 sm:$0xff]  }
 0x252   :  { %v2433_v22 = vadd.f32 %v8451_v54, %v10036_v37  ;;  %v2460_v5 = vmul.f32 0.5, %v2432_v3  ;;  %v8561_v44 = vpop.eup %6565  ;;  %v2569_v15 = vmul.f32 %v6562_v62, %v2523_v28  ;;  %v2502_v3 = vadd.f32 1.0, %v6564_v30  ;;  %2952 = vmatprep.mubr.bf16.mxu0 %v9978_v4  ;;  %3025 = vmatprep.mubr.bf16.mxu1 %v9978_v4 }
 0x253   :  { %v2524_v31 = vmul.f32 0.5, %v2500_v23  ;;  %v8565_v41 = vpop.eup %6567  ;;  %v8567_v11 = vmul.f32 0.5, %v1873_v60  ;;  %v10038_v61 = vunpack.c.h.bf16 %v8284_v29  ;;  %v10039_v10 = vunpack.c.l.bf16 %v8299_v58 }
 0x254   :  { %v2461_v54 = vmul.f32 0.5, %v2433_v22  ;;  %6581 = vtanh.f32 %v2460_v5  ;;  %v6570_v36 = vpop.eup %6569  ;;  %v2526_v60 = vmul.f32 0.5, %v2502_v3  ;;  %v2459_v22 = vmul.f32 0.5, %v2430_v7  ;;  %3553 = vmatpush1.bf16.msra.mxu0 %v6177_v19  ;;  %3626 = vmatpush1.bf16.msra.mxu1 %v6180_v59 }
 0x255   :  { %6583 = vtanh.f32 %v2456_v17  ;;  %v2435_v1 = vadd.f32 %v8453_v50, %v10038_v61  ;;  %v2436_v23 = vadd.f32 %v8457_v26, %v10039_v10  ;;  %v2561_v37 = vmul.f32 %v2524_v31, %v7817_v57  ;;  %v6186_v50 = vld [vmem:[%s9930_s3 + $0x48] ss:$16 sps:$4 sm:$0xff]   ;;  %v6191_v26 = vld [vmem:[%s9930_s3 + $0x64] ss:$16 sps:$4 sm:$0xff]   ;;  %3554 = vmatprep.subr.bf16.mxu0 %v6185_v16  ;;  %3627 = vmatprep.subr.bf16.mxu1 %v6188_v25  ;;  %v6194_v57 = vld [vmem:[%s9930_s3 + $0x6c] ss:$16 sps:$4 sm:$0xff]   ;;  %v6572_v19 = vpop.eup %6571 }
 0x256   :  { %6585 = vtanh.f32 %v8482_v35  ;;  %v1879_v17 = vadd.f32 1.0, %v8455_v8  ;;  %v2503_v62 = vadd.f32 1.0, %v6570_v36  ;;  %v8590_v39 = vmul.f32 0.5, %v1876_v14  ;;  %v6574_v5 = vpop.eup %6573 }
 0x257   :  { %6587 = vtanh.f32 %v2461_v54  ;;  %v2463_v28 = vmul.f32 0.5, %v2436_v23  ;;  %v8592_v7 = vadd.f32 %v2569_v15, %v2561_v37  ;;  %v1954_v59 = vmul.f32 %v8441_v55, %v8480_v33  ;;  %v8598_v16 = vpop.eup %6575  ;;  %v6189_v55 = vld [vmem:[%s9930_s3 + $0x60] ss:$16 sps:$4 sm:$0xff]   ;;  %v6200_v23 = vld [vmem:[%s9930_s3 + $0x8c] ss:$16 sps:$4 sm:$0xff]  }
 0x258   :  { %6589 = vtanh.f32 %v2435_v1  ;;  %v2527_v8 = vmul.f32 0.5, %v2503_v62  ;;  %v2570_v30 = vmul.f32 %v6572_v19, %v2526_v60  ;;  %v1955_v54 = vmul.f32 %v8474_v56, %v8484_v13  ;;  %3555 = vmatpush1.bf16.msra.mxu0 %v6183_v27  ;;  %3628 = vmatpush1.bf16.msra.mxu1 %v6186_v50  ;;  %v6192_v56 = vld [vmem:[%s9930_s3 + $0x68] ss:$16 sps:$4 sm:$0xff]  }
 0x259   :  { %6591 = vtanh.f32 %v2463_v28  ;;  %v2505_v25 = vadd.f32 1.0, %v6574_v5  ;;  %v10040_v14 = vunpack.c.h.bf16 %v8299_v58  ;;  %v10041_v15 = vunpack.c.h.bf16 %v8314_v20  ;;  %3556 = vmatprep.subr.bf16.mxu0 %v6191_v26  ;;  %3629 = vmatprep.subr.bf16.mxu1 %v6194_v57  ;;  %v6198_v28 = vld [vmem:[%s9930_s3 + $0x88] ss:$16 sps:$4 sm:$0xff]  }
 0x25a   :  { %6593 = vtanh.f32 %v2459_v22  ;;  %v6578_v33 = vpop.eup %6577  ;;  %v8612_v13 = vmul.f32 0.5, %v1879_v17  ;;  %v2562_v58 = vmul.f32 %v2527_v8, %v7896_v51  ;;  %v2498_v36 = vadd.f32 1.0, %v8525_v0  ;;  %v6195_v22 = vld [vmem:[%s9930_s3 + $0x80] ss:$16 sps:$4 sm:$0xff]  }
 0x25b   :  { %v2437_v31 = vadd.f32 %v8466_v24, %v10040_v14  ;;  %v2439_v3 = vadd.f32 %v8468_v46, %v10041_v15  ;;  %6595 = vtanh.f32 %v8553_v12  ;;  %v5829_v24 = vpack.c.bf16 %v1955_v54, %v1954_v59  ;;  %v6197_v46 = vld [vmem:[%s9930_s3 + $0x84] ss:$16 sps:$4 sm:$0xff]   ;;  %v6580_v27 = vpop.eup %6579 }
 0x25c   :  { %6597 = vtanh.f32 %v8592_v7  ;;  %v2529_v61 = vmul.f32 0.5, %v2505_v25  ;;  %v2506_v1 = vadd.f32 1.0, %v6578_v33  ;;  %v8624_v51 = vadd.f32 %v2570_v30, %v2562_v58  ;;  %3557 = vmatpush1.bf16.msra.mxu0 %v6189_v55  ;;  %3630 = vmatpush1.bf16.msra.mxu1 %v6192_v56  ;;  %v6204_v58 = vld [vmem:[%s9930_s3 + $0xa8] ss:$16 sps:$4 sm:$0xff]  }
 0x25d   :  { %v2464_v10 = vmul.f32 0.5, %v2437_v31  ;;  %5949 = vst [vmem:[%s9933_s4 + $0x28] sm:$0xff] %v5829_v24   ;;  %2953 = vmatmul.mubr.bf16.gmra.mrb[68].mxu0 %v5829_v24  ;;  %3026 = vmatmul.mubr.bf16.gmra.mrb[68].mxu1 %v5829_v24  ;;  %6599 = vtanh.f32 %v2439_v3  ;;  %v10042_v37 = vunpack.c.l.bf16 %v8331_v45  ;;  %v10043_v17 = vunpack.c.h.bf16 %v8331_v45  ;;  %v6206_v45 = vld [vmem:[%s9930_s3 + $0xac] ss:$16 sps:$4 sm:$0xff]  }
 0x25e   :  { %v6582_v50 = vpop.eup %6581  ;;  %v2530_v26 = vmul.f32 0.5, %v2506_v1  ;;  %v2571_v0 = vmul.f32 %v6580_v27, %v2529_v61  ;;  %v2501_v19 = vadd.f32 1.0, %v8565_v41  ;;  %v10044_v5 = vunpack.c.l.bf16 %v8284_v29  ;;  %2962 = vmatprep.mubr.bf16.mxu0 %v9978_v4  ;;  %3035 = vmatprep.mubr.bf16.mxu1 %v9978_v4  ;;  %v6209_v1 = vld [vmem:[%s9930_s3 + $0xc4] ss:$16 sps:$4 sm:$0xff]  }
 0x25f   :  { %v2440_v60 = vadd.f32 %v8500_v34, %v10042_v37  ;;  %6601 = vtanh.f32 %v2464_v10  ;;  %v2441_v62 = vadd.f32 %v8514_v42, %v10043_v17  ;;  %v6203_v34 = vld [vmem:[%s9930_s3 + $0xa4] ss:$16 sps:$4 sm:$0xff]   ;;  %v6584_v57 = vpop.eup %6583  ;;  %v2508_v59 = vadd.f32 1.0, %v6582_v50  ;;  %3558 = vmatprep.subr.bf16.mxu0 %v6197_v46  ;;  %3631 = vmatprep.subr.bf16.mxu1 %v6200_v23  ;;  %v6212_v10 = vld [vmem:[%s9930_s3 + $0xcc] ss:$16 sps:$4 sm:$0xff]  }
 0x260   :  { %v2434_v8 = vadd.f32 %v8447_v63, %v10044_v5  ;;  %v8653_v42 = vpop.eup %6585  ;;  %v2563_v54 = vmul.f32 %v2530_v26, %v7904_v21  ;;  %v10045_v41 = vunpack.c.l.bf16 %v8314_v20  ;;  %v10046_v63 = vunpack.c.l.bf16 %v8370_v47  ;;  %3559 = vmatpush1.bf16.msra.mxu0 %v6195_v22  ;;  %3632 = vmatpush1.bf16.msra.mxu1 %v6198_v28 }
 0x261   :  { %v2466_v30 = vmul.f32 0.5, %v2440_v60  ;;  %v2467_v29 = vmul.f32 0.5, %v2441_v62  ;;  %v6588_v31 = vpop.eup %6587  ;;  %v8662_v15 = vmul.f32 0.5, %v2498_v36  ;;  %v2532_v3 = vmul.f32 0.5, %v2508_v59  ;;  %3560 = vmatprep.subr.bf16.mxu0 %v6203_v34  ;;  %3633 = vmatprep.subr.bf16.mxu1 %v6206_v45  ;;  %v10049_v34 = vld [vmem:[#allocation14_spill] sm:$0xff] }
 0x262   :  { %v2438_v25 = vadd.f32 %v8459_v38, %v10045_v41  ;;  %v2444_v14 = vadd.f32 %v8521_v43, %v10046_v63  ;;  %v10047_v55 = vunpack.c.h.bf16 %v8342_v18  ;;  %v6590_v56 = vpop.eup %6589  ;;  %v8668_v20 = vadd.f32 %v2571_v0, %v2563_v54  ;;  %v6201_v43 = vld [vmem:[%s9930_s3 + $0xa0] ss:$16 sps:$4 sm:$0xff]  }
 0x263   :  { %6603 = vtanh.f32 %v2466_v30  ;;  %v2509_v38 = vadd.f32 1.0, %v6588_v31  ;;  %v6592_v24 = vpop.eup %6591  ;;  %v2525_v46 = vmul.f32 0.5, %v2501_v19  ;;  %v2572_v61 = vmul.f32 %v6590_v56, %v2532_v3  ;;  %v6218_v30 = vld [vmem:[%s9930_s3 + $0xec] ss:$16 sps:$4 sm:$0xff]  }
 0x264   :  { %v2443_v21 = vadd.f32 %v8516_v40, %v10047_v55  ;;  %6605 = vtanh.f32 %v8624_v51  ;;  %v2469_v33 = vmul.f32 0.5, %v2444_v14  ;;  %v2462_v40 = vmul.f32 0.5, %v2434_v8  ;;  %v6594_v23 = vpop.eup %6593  ;;  %3561 = vmatpush1.bf16.msra.mxu0 %v6201_v43  ;;  %3634 = vmatpush1.bf16.msra.mxu1 %v6204_v58 }
 0x265   :  { %6607 = vtanh.f32 %v2467_v29  ;;  %v2533_v27 = vmul.f32 0.5, %v2509_v38  ;;  %v2511_v36 = vadd.f32 1.0, %v6592_v24  ;;  %v2465_v37 = vmul.f32 0.5, %v2438_v25  ;;  %v6596_v60 = vpop.eup %6595  ;;  %3562 = vmatprep.subr.bf16.mxu0 %v6209_v1  ;;  %3635 = vmatprep.subr.bf16.mxu1 %v6212_v10 }
 0x266   :  { %6609 = vtanh.f32 %v8668_v20  ;;  %v1956_v22 = vmul.f32 %v8504_v52, %v8506_v32  ;;  %v1957_v50 = vmul.f32 %v8561_v44, %v8567_v11  ;;  %v10048_v26 = vunpack.c.h.bf16 %v8370_v47  ;;  %v6598_v17 = vpop.eup %6597  ;;  %v6207_v47 = vld [vmem:[%s9930_s3 + $0xc0] ss:$16 sps:$4 sm:$0xff]  }
 0x267   :  { %6611 = vtanh.f32 %v2443_v21  ;;  %v2564_v62 = vmul.f32 %v2533_v27, %v7957_v49  ;;  %v2535_v28 = vmul.f32 0.5, %v2511_v36  ;;  %v10050_v19 = vunpack.c.h.bf16 %v10049_v34  ;;  %v6600_v5 = vpop.eup %6599  ;;  %v6210_v49 = vld [vmem:[%s9930_s3 + $0xc8] ss:$16 sps:$4 sm:$0xff]  }
 0x268   :  { %v2445_v0 = vadd.f32 %v8532_v6, %v10048_v26  ;;  %6613 = vtanh.f32 %v2469_v33  ;;  %v2504_v52 = vadd.f32 1.0, %v6584_v57  ;;  %v5834_v32 = vpack.c.bf16 %v1957_v50, %v1956_v22  ;;  %v6215_v57 = vld [vmem:[%s9930_s3 + $0xe4] ss:$16 sps:$4 sm:$0xff]   ;;  %3563 = vmatpush1.bf16.msra.mxu0 %v6207_v47  ;;  %3636 = vmatpush1.bf16.msra.mxu1 %v6210_v49 }
 0x269   :  { %v2447_v59 = vadd.f32 %v8534_v9, %v10050_v19  ;;  %6615 = vtanh.f32 %v2462_v40  ;;  %v6602_v6 = vpop.eup %6601  ;;  %v2507_v11 = vadd.f32 1.0, %v6594_v23  ;;  %v8700_v9 = vadd.f32 %v2572_v61, %v2564_v62  ;;  %3564 = vmatprep.subr.bf16.mxu0 %v6215_v57  ;;  %3637 = vmatprep.subr.bf16.mxu1 %v6218_v30  ;;  %v10053_v33 = vld [vmem:[#allocation8_spill] sm:$0xff]  ;;  %v10055_v47 = vld [vmem:[#allocation10_spill] sm:$0xff] }
 0x26a   :  { %v2470_v44 = vmul.f32 0.5, %v2445_v0  ;;  %6617 = vtanh.f32 %v2465_v37  ;;  %v2573_v8 = vmul.f32 %v6600_v5, %v2535_v28  ;;  %v2512_v45 = vadd.f32 1.0, %v6602_v6  ;;  %5950 = vst [vmem:[%s9933_s4 + $0x30] sm:$0xff] %v5834_v32   ;;  %2963 = vmatmul.mubr.bf16.gmra.mrb[72].mxu0 %v5834_v32  ;;  %3036 = vmatmul.mubr.bf16.gmra.mrb[72].mxu1 %v5834_v32  ;;  %v10054_v0 = vld [vmem:[#allocation9_spill] sm:$0xff] }
 0x26b   :  { %v1958_v54 = vmul.f32 %v8598_v16, %v8590_v39  ;;  %v1959_v41 = vmul.f32 %v8653_v42, %v8612_v13  ;;  %v10051_v25 = vunpack.c.l.bf16 %v8342_v18  ;;  %2972 = vmatprep.mubr.bf16.mxu0 %v9978_v4  ;;  %3045 = vmatprep.mubr.bf16.mxu1 %v9978_v4  ;;  %v2592_v63 = vmul.f32 %v6596_v60, %v8662_v15  ;;  %v6213_v39 = vld [vmem:[%s9930_s3 + $0xe0] ss:$16 sps:$4 sm:$0xff]   ;;  %v6216_v18 = vld [vmem:[%s9930_s3 + $0xe8] ss:$16 sps:$4 sm:$0xff]  }
 0x26c   :  { %6619 = vtanh.f32 %v2470_v44  ;;  %v2593_v14 = vmul.f32 %v6598_v17, %v2525_v46  ;;  %v2536_v3 = vmul.f32 0.5, %v2512_v45  ;;  %v10052_v13 = vunpack.c.l.bf16 %v10049_v34  ;;  %3565 = vmatpush1.bf16.msra.mxu0 %v6213_v39  ;;  %3638 = vmatpush1.bf16.msra.mxu1 %v6216_v18 }
 0x26d   :  { %v2442_v29 = vadd.f32 %v8502_v48, %v10051_v25  ;;  %6621 = vtanh.f32 %v2447_v59  ;;  %v6604_v31 = vpop.eup %6603  ;;  %v5839_v55 = vpack.c.bf16 %v1959_v41, %v1958_v54  ;;  %v2528_v56 = vmul.f32 0.5, %v2504_v52 }
 0x26e   :  { %v6606_v48 = vpop.eup %6605  ;;  %v2514_v16 = vadd.f32 1.0, %v6604_v31  ;;  %v2446_v42 = vadd.f32 %v8523_v2, %v10052_v13  ;;  %v5844_v15 = vpack.c.bf16 %v2593_v14, %v2592_v63  ;;  %v2531_v38 = vmul.f32 0.5, %v2507_v11  ;;  %v6221_v13 = vld [vmem:[%s9929_s2 + $0x4] ss:$16 sps:$4 sm:$0xff]  }
 0x26f   :  { %v6608_v21 = vpop.eup %6607  ;;  %v2565_v43 = vmul.f32 %v2536_v3, %v10053_v33  ;;  %5951 = vst [vmem:[%s9933_s4 + $0x38] sm:$0xff] %v5839_v55   ;;  %v2468_v46 = vmul.f32 0.5, %v2442_v29  ;;  %6623 = vtanh.f32 %v8700_v9  ;;  %v2594_v1 = vmul.f32 %v6606_v48, %v2528_v56  ;;  %4190 = vmatprep.subr.bf16.mxu0 %v6221_v13  ;;  %v6227_v56 = vld [vmem:[%s9929_s2 + $0x24] ss:$16 sps:$4 sm:$0xff]   ;;  %v6225_v33 = vld [vmem:[%s9929_s2 + $0x20] ss:$16 sps:$4 sm:$0xff]  }
 0x270   :  { %v6610_v58 = vpop.eup %6609  ;;  %v2538_v24 = vmul.f32 0.5, %v2514_v16  ;;  %v2515_v40 = vadd.f32 1.0, %v6608_v21  ;;  %5952 = vst [vmem:[%s9934_s5 + $0x40] sm:$0xff] %v5844_v15   ;;  %v2471_v37 = vmul.f32 0.5, %v2446_v42  ;;  %v6219_v42 = vld [vmem:[%s9929_s2] ss:$16 sps:$4 sm:$0xff]  }
 0x271   :  { %v6612_v2 = vpop.eup %6611  ;;  %v8738_v61 = vadd.f32 %v2573_v8, %v2565_v43  ;;  %v2595_v10 = vmul.f32 %v6610_v58, %v2531_v38  ;;  %v6224_v21 = vld [vmem:[%s9929_s2 + $0xc] ss:$16 sps:$4 sm:$0xff]   ;;  %v6228_v43 = vld [vmem:[%s9929_s2 + $0x28] ss:$16 sps:$4 sm:$0xff]   ;;  %v6233_v58 = vld [vmem:[%s9929_s2 + $0x44] ss:$16 sps:$4 sm:$0xff]  }
 0x272   :  { %v6614_v23 = vpop.eup %6613  ;;  %v2539_v27 = vmul.f32 0.5, %v2515_v40  ;;  %v2574_v36 = vmul.f32 %v6612_v2, %v2538_v24  ;;  %2973 = vmatmul.mubr.bf16.gmra.mrb[76].mxu0 %v5839_v55  ;;  %3046 = vmatmul.mubr.bf16.gmra.mrb[76].mxu1 %v5839_v55  ;;  %v6230_v38 = vld [vmem:[%s9929_s2 + $0x2c] ss:$16 sps:$4 sm:$0xff]   ;;  %v6234_v40 = vld [vmem:[%s9929_s2 + $0x48] ss:$16 sps:$4 sm:$0xff]  }
 0x273   :  { %v6616_v60 = vpop.eup %6615  ;;  %6625 = vtanh.f32 %v8738_v61  ;;  %v2517_v22 = vadd.f32 1.0, %v6614_v23  ;;  %v5849_v50 = vpack.c.bf16 %v2595_v10, %v2594_v1  ;;  %3582 = vmatprep.mubr.bf16.mxu0 %v9978_v4  ;;  %3655 = vmatprep.mubr.bf16.mxu1 %v9978_v4  ;;  %v6236_v24 = vld [vmem:[%s9929_s2 + $0x4c] ss:$16 sps:$4 sm:$0xff]   ;;  %v6239_v2 = vld [vmem:[%s9929_s2 + $0x64] ss:$16 sps:$4 sm:$0xff]  }
 0x274   :  { %v6618_v26 = vpop.eup %6617  ;;  %v2566_v17 = vmul.f32 %v2539_v27, %v10054_v0  ;;  %6627 = vtanh.f32 %v2468_v46  ;;  %v2510_v52 = vadd.f32 1.0, %v6616_v60  ;;  %4263 = vmatprep.subr.bf16.mxu1 %v6224_v21  ;;  %v6231_v46 = vld [vmem:[%s9929_s2 + $0x40] ss:$16 sps:$4 sm:$0xff]   ;;  %v6242_v1 = vld [vmem:[%s9929_s2 + $0x6c] ss:$16 sps:$4 sm:$0xff]  }
 0x275   :  { %v2541_v28 = vmul.f32 0.5, %v2517_v22  ;;  %5953 = vst [vmem:[%s9934_s5 + $0x48] sm:$0xff] %v5849_v50   ;;  %6629 = vtanh.f32 %v2471_v37  ;;  %v2513_v32 = vadd.f32 1.0, %v6618_v26  ;;  %v6237_v10 = vld [vmem:[%s9929_s2 + $0x60] ss:$16 sps:$4 sm:$0xff]  }
 0x276   :  { %v6620_v62 = vpop.eup %6619  ;;  %v8747_v19 = vadd.f32 %v2574_v36, %v2566_v17  ;;  %v2534_v11 = vmul.f32 0.5, %v2510_v52  ;;  %v6240_v23 = vld [vmem:[%s9929_s2 + $0x68] ss:$16 sps:$4 sm:$0xff]   ;;  %v6245_v27 = vld [vmem:[%s9929_s2 + $0x84] ss:$16 sps:$4 sm:$0xff]  }
 0x277   :  { %v6622_v34 = vpop.eup %6621  ;;  %v2518_v59 = vadd.f32 1.0, %v6620_v62  ;;  %v2537_v8 = vmul.f32 0.5, %v2513_v32  ;;  %v6243_v36 = vld [vmem:[%s9929_s2 + $0x80] ss:$16 sps:$4 sm:$0xff]   ;;  %v6246_v37 = vld [vmem:[%s9929_s2 + $0x88] ss:$16 sps:$4 sm:$0xff]  }
 0x278   :  { %v2575_v5 = vmul.f32 %v6622_v34, %v2541_v28  ;;  %6631 = vtanh.f32 %v8747_v19  ;;  %v6248_v60 = vld [vmem:[%s9929_s2 + $0x8c] ss:$16 sps:$4 sm:$0xff]   ;;  %v6251_v22 = vld [vmem:[%s9929_s2 + $0xa4] ss:$16 sps:$4 sm:$0xff]   ;;  %v6249_v26 = vld [vmem:[%s9929_s2 + $0xa0] ss:$16 sps:$4 sm:$0xff]  }
 0x279   :  { %v2542_v44 = vmul.f32 0.5, %v2518_v59  ;;  %v6624_v6 = vpop.eup %6623  ;;  %v6252_v0 = vld [vmem:[%s9929_s2 + $0xa8] ss:$16 sps:$4 sm:$0xff]   ;;  %v6257_v17 = vld [vmem:[%s9929_s2 + $0xc4] ss:$16 sps:$4 sm:$0xff]  }
 0x27a   :  { %3583 = vmatmul.mubr.bf16.vlgmr.msra.gmra.mrb[80].mxu0 %v5844_v15  ;;  %3656 = vmatmul.mubr.bf16.vlgmr.msra.gmra.mrb[80].mxu1 %v5844_v15  ;;  %v2596_v45 = vmul.f32 %v6624_v6, %v2534_v11  ;;  %v6222_v15 = vld [vmem:[%s9929_s2 + $0x8] ss:$16 sps:$4 sm:$0xff]   ;;  %v6255_v62 = vld [vmem:[%s9929_s2 + $0xc0] ss:$16 sps:$4 sm:$0xff]   ;;  %v6260_v34 = vld [vmem:[%s9929_s2 + $0xcc] ss:$16 sps:$4 sm:$0xff]  }
 0x27b   :  { %v2567_v49 = vmul.f32 %v2542_v44, %v10055_v47  ;;  %3592 = vmatprep.mubr.bf16.mxu0 %v9978_v4  ;;  %3665 = vmatprep.mubr.bf16.mxu1 %v9978_v4  ;;  %v6258_v28 = vld [vmem:[%s9929_s2 + $0xc8] ss:$16 sps:$4 sm:$0xff]   ;;  %v6263_v59 = vld [vmem:[%s9929_s2 + $0xe4] ss:$16 sps:$4 sm:$0xff]   ;;  %v6261_v52 = vld [vmem:[%s9929_s2 + $0xe0] ss:$16 sps:$4 sm:$0xff]  }
 0x27c   :  { %4191 = vmatpush1.bf16.msra.mxu0 %v6219_v42  ;;  %4264 = vmatpush1.bf16.msra.mxu1 %v6222_v15  ;;  %v6264_v32 = vld [vmem:[%s9929_s2 + $0xe8] ss:$16 sps:$4 sm:$0xff]   ;;  %v6269_v44 = vld [vmem:[%s9930_s3 + $0x4] ss:$16 sps:$4 sm:$0xff]   ;;  %v6272_v47 = vld [vmem:[%s9930_s3 + $0xc] ss:$16 sps:$4 sm:$0xff]  }
 0x27d   :  { %v8751_v57 = vadd.f32 %v2575_v5, %v2567_v49  ;;  %v6626_v30 = vpop.eup %6625  ;;  %4192 = vmatprep.subr.bf16.mxu0 %v6227_v56  ;;  %4265 = vmatprep.subr.bf16.mxu1 %v6230_v38  ;;  %v6266_v5 = vld [vmem:[%s9929_s2 + $0xec] ss:$16 sps:$4 sm:$0xff]   ;;  %v5485_v49 = vld [vmem:[%s9931_s0 + $0x100] sm:$0xff]  ;;  %v5487_v11 = vld [vmem:[%s9931_s0 + $0x110] sm:$0xff] }
 0x27e   :  { %v2597_v54 = vmul.f32 %v6626_v30, %v2537_v8  ;;  %v6628_v41 = vpop.eup %6627  ;;  %v8876_v6 = vld [vmem:[%s9931_s0 + $0x108] sm:$0xff]  ;;  %v8884_v8 = vld [vmem:[%s9931_s0 + $0x118] sm:$0xff]  ;;  %v8889_v30 = vld [vmem:[%s9931_s0 + $0x120] sm:$0xff] }
 0x27f   :  { %10056 = vst [vmem:[#allocation6_spill] sm:$0xff] %v8751_v57  ;;  %6633 = vtanh.f32 %v8751_v57  ;;  %v6630_v25 = vpop.eup %6629  ;;  %v2516_v63 = vadd.f32 1.0, %v6628_v41  ;;  %v2676_v41 = vunpack.c.l.bf16 %v8876_v6  ;;  %v2683_v42 = vunpack.c.h.bf16 %v8889_v30  ;;  %v8926_v15 = vld [vmem:[%s9931_s0 + $0x150] sm:$0xff] }
 0x280   :  { %v5854_v29 = vpack.c.bf16 %v2597_v54, %v2596_v45  ;;  %v2519_v14 = vadd.f32 1.0, %v6630_v25  ;;  %4193 = vmatpush1.bf16.msra.mxu0 %v6225_v33  ;;  %4266 = vmatpush1.bf16.msra.mxu1 %v6228_v43  ;;  %v8894_v45 = vld [vmem:[%s9931_s0 + $0x128] sm:$0xff]  ;;  %v2674_v54 = vunpack.c.l.bf16 %v5485_v49  ;;  %v2675_v25 = vunpack.c.h.bf16 %v5485_v49 }
 0x281   :  { %v2540_v3 = vmul.f32 0.5, %v2516_v63  ;;  %4194 = vmatprep.subr.bf16.mxu0 %v6233_v58  ;;  %4267 = vmatprep.subr.bf16.mxu1 %v6236_v24  ;;  %v8905_v63 = vld [vmem:[%s9931_s0 + $0x138] sm:$0xff]  ;;  %v2684_v13 = vunpack.c.l.bf16 %v8894_v45  ;;  %v2685_v38 = vunpack.c.h.bf16 %v8894_v45 }
 0x282   :  { %5954 = vst [vmem:[%s9934_s5 + $0x50] sm:$0xff] %v5854_v29   ;;  %3593 = vmatmul.mubr.bf16.gmra.mrb[84].mxu0 %v5849_v50  ;;  %3666 = vmatmul.mubr.bf16.gmra.mrb[84].mxu1 %v5849_v50  ;;  %v6632_v31 = vpop.eup %6631  ;;  %v2543_v55 = vmul.f32 0.5, %v2519_v14  ;;  %v6254_v50 = vld [vmem:[%s9929_s2 + $0xac] ss:$16 sps:$4 sm:$0xff]   ;;  %v2677_v14 = vunpack.c.h.bf16 %v8876_v6  ;;  %v2688_v43 = vunpack.c.l.bf16 %v8905_v63 }
 0x283   :  { %3602 = vmatprep.mubr.bf16.mxu0 %v9978_v4  ;;  %3675 = vmatprep.mubr.bf16.mxu1 %v9978_v4  ;;  %v2598_v18 = vmul.f32 %v6632_v31, %v2540_v3  ;;  %v2678_v31 = vunpack.c.l.bf16 %v5487_v11  ;;  %v2680_v3 = vunpack.c.l.bf16 %v8884_v8  ;;  %v8935_v24 = vld [vmem:[%s9931_s0 + $0x158] sm:$0xff] }
 0x284   :  { %4195 = vmatpush1.bf16.msra.mxu0 %v6231_v46  ;;  %4268 = vmatpush1.bf16.msra.mxu1 %v6234_v40  ;;  %v8965_v6 = vld [vmem:[%s9931_s0 + $0x178] sm:$0xff] }
 0x285   :  { %4196 = vmatprep.subr.bf16.mxu0 %v6239_v2  ;;  %4269 = vmatprep.subr.bf16.mxu1 %v6242_v1  ;;  %v2689_v1 = vunpack.c.h.bf16 %v8905_v63  ;;  %v9081_v63 = vld [vmem:[%s9932_s1 + $0xe8] sm:$0xff] }
 0x288   :  { %4197 = vmatpush1.bf16.msra.mxu0 %v6237_v10  ;;  %4270 = vmatpush1.bf16.msra.mxu1 %v6240_v23 }
 0x289   :  { %v6634_v39 = vpop.eup %6633  ;;  %4198 = vmatprep.subr.bf16.mxu0 %v6245_v27  ;;  %4271 = vmatprep.subr.bf16.mxu1 %v6248_v60  ;;  %v8943_v27 = vld [vmem:[%s9931_s0 + $0x160] sm:$0xff] }
 0x28a   :  { %v2599_v48 = vmul.f32 %v6634_v39, %v2543_v55  ;;  %3603 = vmatmul.mubr.bf16.gmra.mrb[88].mxu0 %v5854_v29  ;;  %3676 = vmatmul.mubr.bf16.gmra.mrb[88].mxu1 %v5854_v29  ;;  %v8900_v29 = vld [vmem:[%s9931_s0 + $0x130] sm:$0xff]  ;;  %v2679_v55 = vunpack.c.h.bf16 %v5487_v11  ;;  %v8912_v39 = vld [vmem:[%s9931_s0 + $0x140] sm:$0xff] }
 0x28b   :  { %3612 = vmatprep.mubr.bf16.mxu0 %v9978_v4  ;;  %3685 = vmatprep.mubr.bf16.mxu1 %v9978_v4  ;;  %v2686_v33 = vunpack.c.l.bf16 %v8900_v29  ;;  %v2687_v58 = vunpack.c.h.bf16 %v8900_v29  ;;  %v2690_v10 = vunpack.c.l.bf16 %v8912_v39  ;;  %v9058_v29 = vld [vmem:[%s9932_s1 + $0xd0] sm:$0xff] }
 0x28c   :  { %v5859_v16 = vpack.c.bf16 %v2599_v48, %v2598_v18  ;;  %4199 = vmatpush1.bf16.msra.mxu0 %v6243_v36  ;;  %4272 = vmatpush1.bf16.msra.mxu1 %v6246_v37  ;;  %v8917_v18 = vld [vmem:[%s9931_s0 + $0x148] sm:$0xff]  ;;  %v2681_v48 = vunpack.c.h.bf16 %v8884_v8 }
 0x28d   :  { %4200 = vmatprep.subr.bf16.mxu0 %v6251_v22  ;;  %4273 = vmatprep.subr.bf16.mxu1 %v6254_v50  ;;  %v2692_v23 = vunpack.c.l.bf16 %v8917_v18  ;;  %v2691_v22 = vunpack.c.h.bf16 %v8912_v39  ;;  %v2693_v50 = vunpack.c.h.bf16 %v8917_v18  ;;  %v10062_v18 = vunpack.c.h.bf16 %v8935_v24 }
 0x28e   :  { %5955 = vst [vmem:[%s9934_s5 + $0x58] sm:$0xff] %v5859_v16  }
 0x290   :  { %4201 = vmatpush1.bf16.msra.mxu0 %v6249_v26  ;;  %4274 = vmatpush1.bf16.msra.mxu1 %v6252_v0  ;;  %v2694_v26 = vunpack.c.l.bf16 %v8926_v15  ;;  %v8951_v0 = vld [vmem:[%s9931_s0 + $0x168] sm:$0xff] }
 0x291   :  { %4202 = vmatprep.subr.bf16.mxu0 %v6257_v17  ;;  %4275 = vmatprep.subr.bf16.mxu1 %v6260_v34 }
 0x292   :  { %3613 = vmatmul.mubr.bf16.gmra.mrb[92].mxu0 %v5859_v16  ;;  %3686 = vmatmul.mubr.bf16.gmra.mrb[92].mxu1 %v5859_v16  ;;  %v2682_v16 = vunpack.c.l.bf16 %v8889_v30 }
 0x293   :  { %4222 = vmatprep.mubr.bf16.mxu0 %v9978_v4  ;;  %4295 = vmatprep.mubr.bf16.mxu1 %v9978_v4 }
 0x294   :  { %4203 = vmatpush1.bf16.msra.mxu0 %v6255_v62  ;;  %4276 = vmatpush1.bf16.msra.mxu1 %v6258_v28 }
 0x295   :  { %4204 = vmatprep.subr.bf16.mxu0 %v6263_v59  ;;  %4277 = vmatprep.subr.bf16.mxu1 %v6266_v5  ;;  %v2695_v5 = vunpack.c.h.bf16 %v8926_v15  ;;  %v10061_v15 = vunpack.c.l.bf16 %v8935_v24 }
 0x298   :  { %4205 = vmatpush1.bf16.msra.mxu0 %v6261_v52  ;;  %4278 = vmatpush1.bf16.msra.mxu1 %v6264_v32  ;;  %v8958_v52 = vld [vmem:[%s9931_s0 + $0x170] sm:$0xff] }
 0x299   :  { %4829 = vmatprep.subr.bf16.mxu0 %v6269_v44  ;;  %4902 = vmatprep.subr.bf16.mxu1 %v6272_v47 }
 0x322   :  { %v2944_v21 = vpop.f32.mrb[64].mxu0  ;;  %v3017_v56 = vpop.f32.mrb[64].mxu1 }
 0x323   :  { %v3056_v46 = vadd.f32 %v2944_v21, %v2674_v54  ;;  %v2946_v40 = vpop.f32.mrb[65].mxu0  ;;  %v3019_v2 = vpop.f32.mrb[65].mxu1 }
 0x324   :  { %v3057_v36 = vadd.f32 %v2946_v40, %v2675_v25  ;;  %v2948_v37 = vpop.f32.mrb[66].mxu0  ;;  %v3021_v60 = vpop.f32.mrb[66].mxu1  ;;  %v3059_v11 = vadd.f32 %v3019_v2, %v2677_v14  ;;  %v8979_v40 = vld [vmem:[%s9932_s1 + $0x88] sm:$0xff]  ;;  %v3058_v14 = vadd.f32 %v3017_v56, %v2676_v41  ;;  %v8997_v56 = vld [vmem:[%s9932_s1 + $0xa0] sm:$0xff] }
 0x325   :  { %v3088_v17 = vmul.f32 0.5, %v3056_v46  ;;  %v3060_v62 = vadd.f32 %v2948_v37, %v2678_v31  ;;  %v2950_v28 = vpop.f32.mrb[67].mxu0  ;;  %v3023_v34 = vpop.f32.mrb[67].mxu1  ;;  %v8974_v46 = vld [vmem:[%s9932_s1 + $0x80] sm:$0xff]  ;;  %v8986_v37 = vld [vmem:[%s9932_s1 + $0x90] sm:$0xff] }
 0x326   :  { %v3089_v32 = vmul.f32 0.5, %v3057_v36  ;;  %v3061_v44 = vadd.f32 %v2950_v28, %v2679_v55  ;;  %v3063_v28 = vadd.f32 %v3023_v34, %v2681_v48  ;;  %v9013_v34 = vld [vmem:[%s9932_s1 + $0xb0] sm:$0xff] }
 0x327   :  { %6635 = vtanh.f32 %v3088_v17  ;;  %v3091_v8 = vmul.f32 0.5, %v3060_v62  ;;  %v8991_v17 = vld [vmem:[%s9932_s1 + $0x98] sm:$0xff]  ;;  %v3062_v62 = vadd.f32 %v3021_v60, %v2680_v3  ;;  %v9026_v60 = vld [vmem:[%s9932_s1 + $0xc0] sm:$0xff] }
 0x328   :  { %v3092_v25 = vmul.f32 0.5, %v3061_v44  ;;  %6637 = vtanh.f32 %v3089_v32  ;;  %v3090_v44 = vmul.f32 0.5, %v3058_v14  ;;  %v9033_v14 = vld [vmem:[%s9932_s1 + $0xc8] sm:$0xff] }
 0x329   :  { %6639 = vtanh.f32 %v3091_v8  ;;  %v9005_v8 = vld [vmem:[%s9932_s1 + $0xa8] sm:$0xff]  ;;  %v3093_v48 = vmul.f32 0.5, %v3062_v62 }
 0x32a   :  { %6641 = vtanh.f32 %v3059_v11  ;;  %v9018_v11 = vld [vmem:[%s9932_s1 + $0xb8] sm:$0xff] }
 0x32b   :  { %6643 = vtanh.f32 %v3092_v25 }
 0x32c   :  { %6645 = vtanh.f32 %v3063_v28 }
 0x32d   :  { %6647 = vtanh.f32 %v3090_v44 }
 0x32e   :  { %6649 = vtanh.f32 %v3093_v48 }
 0x330   :  { %v2954_v2 = vpop.f32.mrb[68].mxu0  ;;  %v3027_v32 = vpop.f32.mrb[68].mxu1 }
 0x331   :  { %v3064_v25 = vadd.f32 %v2954_v2, %v2682_v16  ;;  %v2956_v3 = vpop.f32.mrb[69].mxu0  ;;  %v3029_v41 = vpop.f32.mrb[69].mxu1  ;;  %v3066_v28 = vadd.f32 %v3027_v32, %v2684_v13 }
 0x332   :  { %v3065_v21 = vadd.f32 %v2956_v3, %v2683_v42  ;;  %v2958_v36 = vpop.f32.mrb[70].mxu0  ;;  %v3031_v54 = vpop.f32.mrb[70].mxu1  ;;  %v3067_v47 = vadd.f32 %v3029_v41, %v2685_v38 }
 0x333   :  { %v6636_v16 = vpop.eup %6635  ;;  %v3094_v2 = vmul.f32 0.5, %v3064_v25  ;;  %v3068_v55 = vadd.f32 %v2958_v36, %v2686_v33  ;;  %v2960_v62 = vpop.f32.mrb[71].mxu0  ;;  %v3070_v38 = vadd.f32 %v3031_v54, %v2688_v43  ;;  %v9074_v43 = vld [vmem:[%s9932_s1 + $0xe0] sm:$0xff] }
 0x334   :  { %v3033_v59 = vpop.f32.mrb[71].mxu1  ;;  %v3136_v30 = vadd.f32 1.0, %v6636_v16  ;;  %v3095_v42 = vmul.f32 0.5, %v3065_v21  ;;  %v3069_v3 = vadd.f32 %v2960_v62, %v2687_v58  ;;  %v6638_v31 = vpop.eup %6637 }
 0x335   :  { %6651 = vtanh.f32 %v3094_v2  ;;  %v3097_v44 = vmul.f32 0.5, %v3068_v55  ;;  %v6640_v49 = vpop.eup %6639  ;;  %v3137_v36 = vadd.f32 1.0, %v6638_v31  ;;  %v9066_v31 = vld [vmem:[%s9932_s1 + $0xd8] sm:$0xff]  ;;  %v3071_v32 = vadd.f32 %v3033_v59, %v2689_v1 }
 0x336   :  { %v3160_v33 = vmul.f32 0.5, %v3136_v30  ;;  %v3098_v16 = vmul.f32 0.5, %v3069_v3  ;;  %v6642_v58 = vpop.eup %6641  ;;  %v3139_v21 = vadd.f32 1.0, %v6640_v49  ;;  %6653 = vtanh.f32 %v3095_v42  ;;  %v10057_v2 = vld [vmem:[#allocation11_spill] sm:$0xff] }
 0x337   :  { %v6644_v45 = vpop.eup %6643  ;;  %v3161_v13 = vmul.f32 0.5, %v3137_v36  ;;  %6655 = vtanh.f32 %v3097_v44  ;;  %v3096_v42 = vmul.f32 0.5, %v3066_v28  ;;  %v3099_v36 = vmul.f32 0.5, %v3070_v38  ;;  %v9101_v38 = vld [vmem:[%s9932_s1 + $0xf8] sm:$0xff] }
 0x338   :  { %v3208_v41 = vmul.f32 %v6642_v58, %v3160_v33  ;;  %v3163_v48 = vmul.f32 0.5, %v3139_v21  ;;  %v3140_v49 = vadd.f32 1.0, %v6644_v45  ;;  %6657 = vtanh.f32 %v3067_v47  ;;  %v6646_v54 = vpop.eup %6645  ;;  %v9088_v33 = vld [vmem:[%s9932_s1 + $0xf0] sm:$0xff] }
 0x339   :  { %v3200_v30 = vmul.f32 %v3161_v13, %v10057_v2  ;;  %6659 = vtanh.f32 %v3098_v16  ;;  %v6648_v45 = vpop.eup %6647  ;;  %v10059_v13 = vld [vmem:[#allocation12_spill] sm:$0xff] }
 0x33a   :  { %v3164_v1 = vmul.f32 0.5, %v3140_v49  ;;  %v3209_v59 = vmul.f32 %v6646_v54, %v3163_v48  ;;  %6661 = vtanh.f32 %v3071_v32 }
 0x33b   :  { %v9090_v28 = vadd.f32 %v3208_v41, %v3200_v30  ;;  %v6650_v41 = vpop.eup %6649  ;;  %6663 = vtanh.f32 %v3096_v42 }
 0x33c   :  { %v3201_v48 = vmul.f32 %v3164_v1, %v10059_v13  ;;  %6665 = vtanh.f32 %v3099_v36 }
 0x33d   :  { %10058 = vst [vmem:[#allocation7_spill] sm:$0xff] %v9090_v28  ;;  %v2964_v16 = vpop.f32.mrb[72].mxu0  ;;  %v3037_v58 = vpop.f32.mrb[72].mxu1  ;;  %6667 = vtanh.f32 %v9090_v28 }
 0x33e   :  { %v3072_v49 = vadd.f32 %v2964_v16, %v2690_v10  ;;  %v2966_v54 = vpop.f32.mrb[73].mxu0  ;;  %v3039_v2 = vpop.f32.mrb[73].mxu1  ;;  %v9107_v3 = vadd.f32 %v3209_v59, %v3201_v48 }
 0x33f   :  { %v3073_v32 = vadd.f32 %v2966_v54, %v2691_v22  ;;  %v2968_v30 = vpop.f32.mrb[74].mxu0  ;;  %v3041_v1 = vpop.f32.mrb[74].mxu1  ;;  %v3075_v21 = vadd.f32 %v3039_v2, %v2693_v50 }
 0x340   :  { %v6652_v13 = vpop.eup %6651  ;;  %10060 = vst [vmem:[#allocation14_spill] sm:$0xff] %v9107_v3  ;;  %v3100_v44 = vmul.f32 0.5, %v3072_v49  ;;  %v3076_v47 = vadd.f32 %v2968_v30, %v2694_v26  ;;  %v2970_v42 = vpop.f32.mrb[75].mxu0  ;;  %v3074_v26 = vadd.f32 %v3037_v58, %v2692_v23 }
 0x341   :  { %v3043_v62 = vpop.f32.mrb[75].mxu1  ;;  %v3142_v39 = vadd.f32 1.0, %v6652_v13  ;;  %v3101_v22 = vmul.f32 0.5, %v3073_v32  ;;  %v6654_v10 = vpop.eup %6653  ;;  %v3077_v59 = vadd.f32 %v2970_v42, %v2695_v5  ;;  %v3138_v32 = vadd.f32 1.0, %v6648_v45 }
 0x342   :  { %v3103_v16 = vmul.f32 0.5, %v3076_v47  ;;  %v6656_v50 = vpop.eup %6655  ;;  %v3143_v2 = vadd.f32 1.0, %v6654_v10  ;;  %6669 = vtanh.f32 %v3100_v44  ;;  %v3078_v5 = vadd.f32 %v3041_v1, %v10061_v15 }
 0x343   :  { %v3166_v49 = vmul.f32 0.5, %v3142_v39  ;;  %v6658_v36 = vpop.eup %6657  ;;  %v3145_v30 = vadd.f32 1.0, %v6656_v50  ;;  %6671 = vtanh.f32 %v3075_v21  ;;  %v3104_v13 = vmul.f32 0.5, %v3077_v59  ;;  %v10063_v21 = vld [vmem:[#allocation13_spill] sm:$0xff] }
 0x344   :  { %v6660_v54 = vpop.eup %6659  ;;  %v3167_v55 = vmul.f32 0.5, %v3143_v2  ;;  %6673 = vtanh.f32 %v3101_v22  ;;  %v3079_v23 = vadd.f32 %v3043_v62, %v10062_v18  ;;  %v3102_v50 = vmul.f32 0.5, %v3074_v26  ;;  %v10067_v26 = vld [vmem:[#allocation15_spill] sm:$0xff] }
 0x345   :  { %v3210_v47 = vmul.f32 %v6658_v36, %v3166_v49  ;;  %v2974_v42 = vpop.f32.mrb[76].mxu0  ;;  %v3047_v48 = vpop.f32.mrb[76].mxu1  ;;  %v3169_v39 = vmul.f32 0.5, %v3145_v30  ;;  %v3146_v10 = vadd.f32 1.0, %v6660_v54  ;;  %6675 = vtanh.f32 %v3103_v16 }
 0x346   :  { %v2976_v44 = vpop.f32.mrb[77].mxu0  ;;  %v3049_v58 = vpop.f32.mrb[77].mxu1  ;;  %6677 = vtanh.f32 %v9107_v3  ;;  %v3202_v59 = vmul.f32 %v3167_v55, %v10063_v21  ;;  %v10064_v22 = vunpack.c.l.bf16 %v8943_v27  ;;  %v3141_v36 = vadd.f32 1.0, %v6650_v41 }
 0x347   :  { %v6662_v45 = vpop.eup %6661  ;;  %v2978_v1 = vpop.f32.mrb[78].mxu0  ;;  %v3170_v30 = vmul.f32 0.5, %v3146_v10  ;;  %6679 = vtanh.f32 %v3104_v13  ;;  %v3105_v18 = vmul.f32 0.5, %v3078_v5  ;;  %v10066_v3 = vunpack.c.h.bf16 %v8943_v27 }
 0x348   :  { %v3080_v49 = vadd.f32 %v2974_v42, %v10064_v22  ;;  %v3051_v2 = vpop.f32.mrb[78].mxu1  ;;  %v3211_v54 = vmul.f32 %v6662_v45, %v3169_v39  ;;  %v2980_v16 = vpop.f32.mrb[79].mxu0  ;;  %v9128_v15 = vadd.f32 %v3210_v47, %v3202_v59  ;;  %6681 = vtanh.f32 %v3079_v23 }
 0x349   :  { %v3053_v24 = vpop.f32.mrb[79].mxu1  ;;  %v6664_v62 = vpop.eup %6663  ;;  %v3081_v55 = vadd.f32 %v2976_v44, %v10066_v3  ;;  %v3203_v21 = vmul.f32 %v3170_v30, %v10067_v26  ;;  %v10068_v42 = vunpack.c.l.bf16 %v8951_v0  ;;  %v10069_v41 = vunpack.c.l.bf16 %v8958_v52 }
 0x34a   :  { %10065 = vst [vmem:[#allocation8_spill] sm:$0xff] %v9128_v15  ;;  %v3106_v25 = vmul.f32 0.5, %v3080_v49  ;;  %v6666_v13 = vpop.eup %6665  ;;  %6683 = vtanh.f32 %v3102_v50  ;;  %v10070_v47 = vunpack.c.h.bf16 %v8958_v52  ;;  %v9142_v27 = vmul.f32 0.5, %v3138_v32 }
 0x34b   :  { %v3082_v22 = vadd.f32 %v3047_v48, %v10068_v42  ;;  %v3084_v39 = vadd.f32 %v2978_v1, %v10069_v41  ;;  %v3107_v10 = vmul.f32 0.5, %v3081_v55  ;;  %v9140_v59 = vpop.eup %6667  ;;  %v9144_v3 = vadd.f32 %v3211_v54, %v3203_v21 }
 0x34c   :  { %v3085_v45 = vadd.f32 %v2980_v16, %v10070_v47  ;;  %6685 = vtanh.f32 %v3106_v25  ;;  %v10072_v48 = vunpack.c.h.bf16 %v8951_v0  ;;  %v6670_v44 = vpop.eup %6669  ;;  %v9148_v49 = vmul.f32 0.5, %v3141_v36 }
 0x34d   :  { %10071 = vst [vmem:[#allocation9_spill] sm:$0xff] %v9144_v3  ;;  %v9150_v50 = vadd.f32 1.0, %v6664_v62  ;;  %6687 = vtanh.f32 %v3105_v18  ;;  %v3109_v52 = vmul.f32 0.5, %v3084_v39  ;;  %v3584_v1 = vpop.f32.mrb[80].mxu0  ;;  %v3657_v30 = vpop.f32.mrb[80].mxu1  ;;  %v3148_v32 = vadd.f32 1.0, %v6670_v44 }
 0x34e   :  { %v3083_v23 = vadd.f32 %v3049_v58, %v10072_v48  ;;  %v6672_v16 = vpop.eup %6671  ;;  %6689 = vtanh.f32 %v9128_v15  ;;  %v3108_v55 = vmul.f32 0.5, %v3082_v22  ;;  %v10073_v54 = vunpack.c.l.bf16 %v8974_v46  ;;  %v3586_v26 = vpop.f32.mrb[81].mxu0 }
 0x34f   :  { %v3659_v0 = vpop.f32.mrb[81].mxu1  ;;  %v6674_v58 = vpop.eup %6673  ;;  %6691 = vtanh.f32 %v3107_v10  ;;  %v10074_v36 = vunpack.c.l.bf16 %v8965_v6  ;;  %v3110_v21 = vmul.f32 0.5, %v3085_v45  ;;  %v10075_v18 = vunpack.c.h.bf16 %v8974_v46 }
 0x350   :  { %v3696_v25 = vadd.f32 %v3584_v1, %v10073_v54  ;;  %v3588_v41 = vpop.f32.mrb[82].mxu0  ;;  %v9159_v39 = vpop.f32.mrb[82].mxu1  ;;  %v3172_v48 = vmul.f32 0.5, %v3148_v32  ;;  %v3149_v22 = vadd.f32 1.0, %v6674_v58  ;;  %6693 = vtanh.f32 %v3083_v23 }
 0x351   :  { %v3086_v62 = vadd.f32 %v3051_v2, %v10074_v36  ;;  %v3697_v42 = vadd.f32 %v3586_v26, %v10075_v18  ;;  %v6676_v47 = vpop.eup %6675  ;;  %v10076_v44 = vunpack.c.h.bf16 %v8965_v6  ;;  %v3590_v54 = vpop.f32.mrb[83].mxu0  ;;  %v3147_v15 = vadd.f32 1.0, %v6666_v13 }
 0x352   :  { %v3663_v5 = vpop.f32.mrb[83].mxu1  ;;  %v9163_v10 = vpop.eup %6677  ;;  %v3151_v2 = vadd.f32 1.0, %v6676_v47  ;;  %6695 = vtanh.f32 %v3109_v52  ;;  %v3728_v45 = vmul.f32 0.5, %v3696_v25  ;;  %v3173_v26 = vmul.f32 0.5, %v3149_v22 }
 0x353   :  { %v3087_v1 = vadd.f32 %v3053_v24, %v10076_v44  ;;  %v6680_v46 = vpop.eup %6679  ;;  %v3212_v36 = vmul.f32 %v6672_v16, %v3172_v48  ;;  %6697 = vtanh.f32 %v3108_v55  ;;  %v10077_v18 = vunpack.c.l.bf16 %v8979_v40 }
 0x354   :  { %v3175_v58 = vmul.f32 0.5, %v3151_v2  ;;  %v3152_v23 = vadd.f32 1.0, %v6680_v46  ;;  %6699 = vtanh.f32 %v3110_v21  ;;  %v3729_v6 = vmul.f32 0.5, %v3697_v42  ;;  %v6682_v24 = vpop.eup %6681 }
 0x355   :  { %v3698_v32 = vadd.f32 %v3657_v30, %v10077_v18  ;;  %v3204_v44 = vmul.f32 %v3173_v26, %v8411_v53  ;;  %v3111_v28 = vmul.f32 0.5, %v3086_v62  ;;  %6701 = vtanh.f32 %v3087_v1  ;;  %v6684_v25 = vpop.eup %6683  ;;  %v3594_v30 = vpop.f32.mrb[84].mxu0  ;;  %v10082_v26 = vld [vmem:[#allocation4_spill] sm:$0xff] }
 0x356   :  { %v10078_v13 = vunpack.c.l.bf16 %v8986_v37  ;;  %v3176_v47 = vmul.f32 0.5, %v3152_v23  ;;  %v3213_v22 = vmul.f32 %v6682_v24, %v3175_v58  ;;  %6703 = vtanh.f32 %v3728_v45  ;;  %v3667_v48 = vpop.f32.mrb[84].mxu1  ;;  %v6686_v2 = vpop.eup %6685 }
 0x357   :  { %v10079_v16 = vunpack.c.h.bf16 %v8979_v40  ;;  %6705 = vtanh.f32 %v9144_v3  ;;  %v9173_v21 = vadd.f32 %v3212_v36, %v3204_v44  ;;  %v10081_v62 = vunpack.c.h.bf16 %v8986_v37  ;;  %v3596_v1 = vpop.f32.mrb[85].mxu0  ;;  %v6688_v46 = vpop.eup %6687 }
 0x358   :  { %v3700_v52 = vadd.f32 %v3588_v41, %v10078_v13  ;;  %v3669_v41 = vpop.f32.mrb[85].mxu1  ;;  %v3205_v18 = vmul.f32 %v3176_v47, %v10082_v26  ;;  %v3154_v45 = vadd.f32 1.0, %v6686_v2  ;;  %v3730_v58 = vmul.f32 0.5, %v3698_v32  ;;  %v3598_v40 = vpop.f32.mrb[86].mxu0 }
 0x359   :  { %v3699_v55 = vadd.f32 %v3659_v0, %v10079_v16  ;;  %10080 = vst [vmem:[#allocation10_spill] sm:$0xff] %v9173_v21  ;;  %v3701_v42 = vadd.f32 %v3590_v54, %v10081_v62  ;;  %6707 = vtanh.f32 %v3729_v6  ;;  %v9178_v0 = vpop.f32.mrb[86].mxu1  ;;  %v9180_v23 = vpop.eup %6689  ;;  %v9183_v36 = vmul.f32 0.5, %v9150_v50 }
 0x35a   :  { %v3731_v53 = vmul.f32 0.5, %v3700_v52  ;;  %v3150_v24 = vadd.f32 1.0, %v6684_v25  ;;  %6709 = vtanh.f32 %v3111_v28  ;;  %v9185_v54 = vpop.f32.mrb[87].mxu0  ;;  %v9187_v44 = vpop.f32.mrb[87].mxu1  ;;  %v9189_v52 = vadd.f32 %v3213_v22, %v3205_v18 }
 0x35b   :  { %v3732_v37 = vmul.f32 0.5, %v3701_v42  ;;  %v6692_v13 = vpop.eup %6691  ;;  %v3178_v32 = vmul.f32 0.5, %v3154_v45  ;;  %6711 = vtanh.f32 %v3699_v55  ;;  %v10084_v6 = vunpack.c.l.bf16 %v8997_v56 }
 0x35c   :  { %10083 = vst [vmem:[#allocation11_spill] sm:$0xff] %v9189_v52  ;;  %v6694_v16 = vpop.eup %6693  ;;  %v9193_v2 = vmul.f32 0.5, %v3147_v15  ;;  %v3155_v50 = vadd.f32 1.0, %v6692_v13  ;;  %6713 = vtanh.f32 %v3731_v53  ;;  %v10085_v28 = vunpack.c.h.bf16 %v8991_v17 }
 0x35d   :  { %v3704_v47 = vadd.f32 %v3594_v30, %v10084_v6  ;;  %v6696_v62 = vpop.eup %6695  ;;  %v3214_v42 = vmul.f32 %v6694_v16, %v3178_v32  ;;  %6715 = vtanh.f32 %v3730_v58  ;;  %v10086_v22 = vunpack.c.h.bf16 %v8997_v56  ;;  %v3604_v32 = vpop.f32.mrb[88].mxu0  ;;  %v10089_v16 = vld [vmem:[#allocation5_spill] sm:$0xff] }
 0x35e   :  { %v3703_v25 = vadd.f32 %v3663_v5, %v10085_v28  ;;  %v9199_v45 = vpop.eup %6697  ;;  %6717 = vtanh.f32 %v9173_v21  ;;  %v3179_v55 = vmul.f32 0.5, %v3155_v50  ;;  %v3157_v30 = vadd.f32 1.0, %v6696_v62  ;;  %v9211_v6 = vpop.f32.mrb[88].mxu1 }
 0x35f   :  { %v3734_v26 = vmul.f32 0.5, %v3704_v47  ;;  %v3705_v18 = vadd.f32 %v3596_v1, %v10086_v22  ;;  %v3232_v15 = vmul.f32 %v9140_v59, %v9142_v27  ;;  %v6700_v53 = vpop.eup %6699  ;;  %v9204_v13 = vmul.f32 0.5, %v3150_v24  ;;  %v9214_v59 = vpop.f32.mrb[89].mxu0 }
 0x360   :  { %v10087_v5 = vunpack.c.l.bf16 %v8991_v17  ;;  %6719 = vtanh.f32 %v3732_v37  ;;  %v10088_v56 = vunpack.c.l.bf16 %v9005_v8  ;;  %v6702_v47 = vpop.eup %6701  ;;  %v3206_v50 = vmul.f32 %v3179_v55, %v10089_v16  ;;  %v9216_v27 = vpop.f32.mrb[89].mxu1 }
 0x361   :  { %v3181_v28 = vmul.f32 0.5, %v3157_v30  ;;  %v3158_v62 = vadd.f32 1.0, %v6700_v53  ;;  %6721 = vtanh.f32 %v3703_v25  ;;  %v6704_v17 = vpop.eup %6703  ;;  %v10090_v24 = vunpack.c.h.bf16 %v9005_v8 }
 0x362   :  { %v3702_v58 = vadd.f32 %v9159_v39, %v10087_v5  ;;  %v3706_v1 = vadd.f32 %v3667_v48, %v10088_v56  ;;  %6723 = vtanh.f32 %v3734_v26  ;;  %v3735_v39 = vmul.f32 0.5, %v3705_v18  ;;  %v9222_v5 = vpop.f32.mrb[90].mxu0  ;;  %v9224_v56 = vpop.f32.mrb[90].mxu1 }
 0x363   :  { %v3707_v37 = vadd.f32 %v3669_v41, %v10090_v24  ;;  %v10091_v48 = vunpack.c.l.bf16 %v9013_v34  ;;  %v9226_v55 = vpop.eup %6705  ;;  %v9228_v25 = vadd.f32 %v3214_v42, %v3206_v50  ;;  %v3182_v30 = vmul.f32 0.5, %v3158_v62  ;;  %v9230_v21 = vpop.f32.mrb[91].mxu0 }
 0x364   :  { %v3215_v53 = vmul.f32 %v6702_v47, %v3181_v28  ;;  %v3776_v16 = vadd.f32 1.0, %v6704_v17  ;;  %v9232_v26 = vpop.f32.mrb[91].mxu1  ;;  %v6708_v8 = vpop.eup %6707  ;;  %v3153_v41 = vadd.f32 1.0, %v6688_v46  ;;  %6725 = vtanh.f32 %v9189_v52  ;;  %v6267_v46 = vld [vmem:[%s9930_s3] ss:$16 sps:$4 sm:$0xff]  }
 0x365   :  { %v3708_v22 = vadd.f32 %v3598_v40, %v10091_v48  ;;  %v3733_v40 = vmul.f32 0.5, %v3702_v58  ;;  %v6710_v24 = vpop.eup %6709  ;;  %v3207_v48 = vmul.f32 %v3182_v30, %v8482_v35  ;;  %v3777_v57 = vadd.f32 1.0, %v6708_v8 }
 0x366   :  { %v3800_v3 = vmul.f32 0.5, %v3776_v16  ;;  %v3736_v42 = vmul.f32 0.5, %v3706_v1  ;;  %v6712_v50 = vpop.eup %6711  ;;  %6727 = vtanh.f32 %v3735_v39  ;;  %v10092_v47 = vunpack.c.l.bf16 %v9018_v11 }
 0x367   :  { %v3737_v18 = vmul.f32 0.5, %v3708_v22  ;;  %v3233_v62 = vmul.f32 %v9163_v10, %v9148_v49  ;;  %v10093_v58 = vunpack.c.h.bf16 %v9013_v34  ;;  %v6714_v17 = vpop.eup %6713  ;;  %v9247_v22 = vadd.f32 %v3215_v53, %v3207_v48  ;;  %v6275_v49 = vld [vmem:[%s9930_s3 + $0x24] ss:$16 sps:$4 sm:$0xff]  }
 0x368   :  { %v3710_v28 = vadd.f32 %v9178_v0, %v10092_v47  ;;  %v3801_v1 = vmul.f32 0.5, %v3777_v57  ;;  %v3848_v39 = vmul.f32 %v6712_v50, %v3800_v3  ;;  %6729 = vtanh.f32 %v3707_v37  ;;  %v6270_v0 = vld [vmem:[%s9930_s3 + $0x8] ss:$16 sps:$4 sm:$0xff]   ;;  %v9255_v10 = vpop.eup %6715  ;;  %v6278_v57 = vld [vmem:[%s9930_s3 + $0x2c] ss:$16 sps:$4 sm:$0xff]   ;;  %v9260_v3 = vpop.f32.mrb[92].mxu0 }
 0x369   :  { %v3709_v35 = vadd.f32 %v9185_v54, %v10093_v58  ;;  %v3779_v30 = vadd.f32 1.0, %v6714_v17  ;;  %6731 = vtanh.f32 %v3737_v18  ;;  %v5864_v34 = vpack.c.bf16 %v3233_v62, %v3232_v15  ;;  %v9262_v37 = vpop.f32.mrb[92].mxu1  ;;  %v9264_v53 = vpop.eup %6717  ;;  %v6273_v15 = vld [vmem:[%s9930_s3 + $0x20] ss:$16 sps:$4 sm:$0xff]  }
 0x36a   :  { %v3840_v16 = vmul.f32 %v3801_v1, %v8553_v12  ;;  %6733 = vtanh.f32 %v3733_v40  ;;  %v10094_v8 = vunpack.c.h.bf16 %v9018_v11  ;;  %v10095_v18 = vunpack.c.l.bf16 %v9026_v60  ;;  %v9275_v47 = vpop.f32.mrb[93].mxu0  ;;  %v9277_v62 = vpop.f32.mrb[93].mxu1 }
 0x36b   :  { %v3738_v54 = vmul.f32 0.5, %v3709_v35  ;;  %v6720_v58 = vpop.eup %6719  ;;  %v3156_v35 = vadd.f32 1.0, %v9199_v45  ;;  %v3159_v12 = vadd.f32 1.0, %v6710_v24  ;;  %v3803_v40 = vmul.f32 0.5, %v3779_v30  ;;  %5956 = vst [vmem:[%s9933_s4 + $0x40] sm:$0xff] %v5864_v34   ;;  %4223 = vmatmul.mubr.bf16.vlgmr.msra.gmra.mrb[96].mxu0 %v5864_v34  ;;  %4296 = vmatmul.mubr.bf16.vlgmr.msra.gmra.mrb[96].mxu1 %v5864_v34  ;;  %v9283_v11 = vpop.f32.mrb[94].mxu0 }
 0x36c   :  { %v3711_v48 = vadd.f32 %v9187_v44, %v10094_v8  ;;  %v3712_v50 = vadd.f32 %v3604_v32, %v10095_v18  ;;  %6735 = vtanh.f32 %v3736_v42  ;;  %v9285_v44 = vpop.f32.mrb[94].mxu1  ;;  %v6722_v32 = vpop.eup %6721  ;;  %v9287_v17 = vadd.f32 %v3848_v39, %v3840_v16  ;;  %4830 = vmatpush1.bf16.msra.mxu0 %v6267_v46  ;;  %4903 = vmatpush1.bf16.msra.mxu1 %v6270_v0  ;;  %v6276_v45 = vld [vmem:[%s9930_s3 + $0x28] ss:$16 sps:$4 sm:$0xff]   ;;  %v6281_v46 = vld [vmem:[%s9930_s3 + $0x44] ss:$16 sps:$4 sm:$0xff]  }
 0x36d   :  { %v3780_v1 = vadd.f32 1.0, %v6720_v58  ;;  %6737 = vtanh.f32 %v3738_v54  ;;  %v9292_v42 = vpop.f32.mrb[95].mxu0  ;;  %v9294_v30 = vpop.f32.mrb[95].mxu1  ;;  %v9296_v8 = vmul.f32 0.5, %v3153_v41  ;;  %v3849_v18 = vmul.f32 %v6722_v32, %v3803_v40  ;;  %4831 = vmatprep.subr.bf16.mxu0 %v6275_v49  ;;  %4904 = vmatprep.subr.bf16.mxu1 %v6278_v57  ;;  %v6284_v39 = vld [vmem:[%s9930_s3 + $0x4c] ss:$16 sps:$4 sm:$0xff]  }
 0x36e   :  { %v3740_v24 = vmul.f32 0.5, %v3712_v50  ;;  %v6724_v34 = vpop.eup %6723  ;;  %v3739_v52 = vmul.f32 0.5, %v3710_v28  ;;  %6739 = vtanh.f32 %v3711_v48  ;;  %v10096_v41 = vunpack.c.h.bf16 %v9026_v60  ;;  %4232 = vmatprep.mubr.bf16.mxu0 %v9978_v4  ;;  %4305 = vmatprep.mubr.bf16.mxu1 %v9978_v4 }
 0x36f   :  { %6741 = vtanh.f32 %v9228_v25  ;;  %v3804_v0 = vmul.f32 0.5, %v3780_v1  ;;  %v3782_v54 = vadd.f32 1.0, %v6724_v34  ;;  %v9310_v28 = vpop.eup %6725  ;;  %v9312_v49 = vmul.f32 0.5, %v3156_v35  ;;  %v6279_v35 = vld [vmem:[%s9930_s3 + $0x40] ss:$16 sps:$4 sm:$0xff]  }
 0x370   :  { %v3713_v16 = vadd.f32 %v9214_v59, %v10096_v41  ;;  %6743 = vtanh.f32 %v3740_v24  ;;  %v10097_v57 = vunpack.c.h.bf16 %v9033_v14  ;;  %v10098_v50 = vunpack.c.l.bf16 %v9058_v29  ;;  %4832 = vmatpush1.bf16.msra.mxu0 %v6273_v15  ;;  %4905 = vmatpush1.bf16.msra.mxu1 %v6276_v45  ;;  %v6728_v32 = vpop.eup %6727  ;;  %v6290_v15 = vld [vmem:[%s9930_s3 + $0x6c] ss:$16 sps:$4 sm:$0xff]  }
 0x371   :  { %v9320_v60 = vmul.f32 0.5, %v3159_v12  ;;  %6745 = vtanh.f32 %v9247_v22  ;;  %v3841_v59 = vmul.f32 %v3804_v0, %v8592_v7  ;;  %v3806_v40 = vmul.f32 0.5, %v3782_v54  ;;  %4833 = vmatprep.subr.bf16.mxu0 %v6281_v46  ;;  %4906 = vmatprep.subr.bf16.mxu1 %v6284_v39  ;;  %v6287_v7 = vld [vmem:[%s9930_s3 + $0x64] ss:$16 sps:$4 sm:$0xff]  }
 0x372   :  { %v3715_v48 = vadd.f32 %v9216_v27, %v10097_v57  ;;  %v3716_v58 = vadd.f32 %v9222_v5, %v10098_v50  ;;  %v6282_v27 = vld [vmem:[%s9930_s3 + $0x48] ss:$16 sps:$4 sm:$0xff]   ;;  %6747 = vtanh.f32 %v3739_v52  ;;  %v10099_v5 = vunpack.c.l.bf16 %v9033_v14  ;;  %v6730_v45 = vpop.eup %6729 }
 0x373   :  { %v3741_v1 = vmul.f32 0.5, %v3713_v16  ;;  %v9339_v34 = vadd.f32 %v3849_v18, %v3841_v59  ;;  %v3783_v52 = vadd.f32 1.0, %v6728_v32  ;;  %v3234_v14 = vmul.f32 %v9180_v23, %v9183_v36  ;;  %v6285_v23 = vld [vmem:[%s9930_s3 + $0x60] ss:$16 sps:$4 sm:$0xff]  }
 0x374   :  { %v3714_v12 = vadd.f32 %v9211_v6, %v10099_v5  ;;  %v3743_v24 = vmul.f32 0.5, %v3716_v58  ;;  %6749 = vtanh.f32 %v3715_v48  ;;  %v6732_v6 = vpop.eup %6731  ;;  %v3850_v0 = vmul.f32 %v6730_v45, %v3806_v40  ;;  %4834 = vmatpush1.bf16.msra.mxu0 %v6279_v35  ;;  %4907 = vmatpush1.bf16.msra.mxu1 %v6282_v27  ;;  %v6293_v35 = vld [vmem:[%s9930_s3 + $0x84] ss:$16 sps:$4 sm:$0xff]   ;;  %v6296_v27 = vld [vmem:[%s9930_s3 + $0x8c] ss:$16 sps:$4 sm:$0xff]  }
 0x375   :  { %6751 = vtanh.f32 %v3741_v1  ;;  %v3235_v46 = vmul.f32 %v9226_v55, %v9193_v2  ;;  %v10100_v39 = vunpack.c.h.bf16 %v9058_v29  ;;  %v6734_v41 = vpop.eup %6733  ;;  %v3807_v18 = vmul.f32 0.5, %v3783_v52  ;;  %v6288_v29 = vld [vmem:[%s9930_s3 + $0x68] ss:$16 sps:$4 sm:$0xff]   ;;  %4835 = vmatprep.subr.bf16.mxu0 %v6287_v7  ;;  %4908 = vmatprep.subr.bf16.mxu1 %v6290_v15 }
 0x376   :  { %6753 = vtanh.f32 %v9287_v17  ;;  %v3785_v16 = vadd.f32 1.0, %v6732_v6  ;;  %v10101_v57 = vunpack.c.h.bf16 %v9066_v31  ;;  %v10102_v55 = vunpack.c.l.bf16 %v9074_v43  ;;  %v6294_v45 = vld [vmem:[%s9930_s3 + $0x88] ss:$16 sps:$4 sm:$0xff]  }
 0x377   :  { %v3717_v54 = vadd.f32 %v9230_v21, %v10100_v39  ;;  %v6736_v21 = vpop.eup %6735  ;;  %6755 = vtanh.f32 %v3743_v24  ;;  %v5869_v36 = vpack.c.bf16 %v3235_v46, %v3234_v14  ;;  %v3842_v58 = vmul.f32 %v3807_v18, %v8624_v51  ;;  %v6302_v46 = vld [vmem:[%s9930_s3 + $0xac] ss:$16 sps:$4 sm:$0xff]  }
 0x378   :  { %v3719_v48 = vadd.f32 %v9232_v26, %v10101_v57  ;;  %v3720_v26 = vadd.f32 %v9260_v3, %v10102_v55  ;;  %v6738_v50 = vpop.eup %6737  ;;  %6757 = vtanh.f32 %v9339_v34  ;;  %v3809_v59 = vmul.f32 0.5, %v3785_v16  ;;  %4836 = vmatpush1.bf16.msra.mxu0 %v6285_v23  ;;  %4909 = vmatpush1.bf16.msra.mxu1 %v6288_v29  ;;  %v6297_v29 = vld [vmem:[%s9930_s3 + $0xa0] ss:$16 sps:$4 sm:$0xff]  }
 0x379   :  { %v3744_v2 = vmul.f32 0.5, %v3717_v54  ;;  %v3742_v40 = vmul.f32 0.5, %v3714_v12  ;;  %v6740_v32 = vpop.eup %6739  ;;  %v3778_v5 = vadd.f32 1.0, %v9255_v10  ;;  %v3786_v1 = vadd.f32 1.0, %v6738_v50  ;;  %5957 = vst [vmem:[%s9933_s4 + $0x48] sm:$0xff] %v5869_v36   ;;  %4233 = vmatmul.mubr.bf16.gmra.mrb[100].mxu0 %v5869_v36  ;;  %4306 = vmatmul.mubr.bf16.gmra.mrb[100].mxu1 %v5869_v36 }
 0x37a   :  { %v3746_v51 = vmul.f32 0.5, %v3720_v26  ;;  %v9373_v3 = vpop.eup %6741  ;;  %v9375_v12 = vadd.f32 %v3850_v0, %v3842_v58  ;;  %v3851_v24 = vmul.f32 %v6740_v32, %v3809_v59  ;;  %v10103_v7 = vunpack.c.l.bf16 %v9066_v31  ;;  %v6291_v10 = vld [vmem:[%s9930_s3 + $0x80] ss:$16 sps:$4 sm:$0xff]   ;;  %4242 = vmatprep.mubr.bf16.mxu0 %v9978_v4  ;;  %4315 = vmatprep.mubr.bf16.mxu1 %v9978_v4  ;;  %v6305_v59 = vld [vmem:[%s9930_s3 + $0xc4] ss:$16 sps:$4 sm:$0xff]  }
 0x37b   :  { %6759 = vtanh.f32 %v3744_v2  ;;  %v6744_v52 = vpop.eup %6743  ;;  %v3781_v14 = vadd.f32 1.0, %v6734_v41  ;;  %v3810_v6 = vmul.f32 0.5, %v3786_v1  ;;  %v10104_v0 = vunpack.c.h.bf16 %v9074_v43  ;;  %4837 = vmatprep.subr.bf16.mxu0 %v6293_v35  ;;  %4910 = vmatprep.subr.bf16.mxu1 %v6296_v27 }
 0x37c   :  { %v3718_v15 = vadd.f32 %v9224_v56, %v10103_v7  ;;  %6761 = vtanh.f32 %v3719_v48  ;;  %v6299_v56 = vld [vmem:[%s9930_s3 + $0xa4] ss:$16 sps:$4 sm:$0xff]   ;;  %v6746_v39 = vpop.eup %6745  ;;  %v3788_v54 = vadd.f32 1.0, %v6744_v52  ;;  %v10105_v41 = vunpack.c.h.bf16 %v9081_v63  ;;  %4838 = vmatpush1.bf16.msra.mxu0 %v6291_v10  ;;  %4911 = vmatpush1.bf16.msra.mxu1 %v6294_v45 }
 0x37d   :  { %6763 = vtanh.f32 %v3746_v51  ;;  %v3721_v31 = vadd.f32 %v9275_v47, %v10104_v0  ;;  %v10106_v47 = vunpack.c.l.bf16 %v9088_v33  ;;  %v6748_v16 = vpop.eup %6747  ;;  %v3802_v57 = vmul.f32 0.5, %v3778_v5  ;;  %4839 = vmatprep.subr.bf16.mxu0 %v6299_v56  ;;  %4912 = vmatprep.subr.bf16.mxu1 %v6302_v46  ;;  %v6311_v56 = vld [vmem:[%s9930_s3 + $0xe4] ss:$16 sps:$4 sm:$0xff]   ;;  %v6314_v46 = vld [vmem:[%s9930_s3 + $0xec] ss:$16 sps:$4 sm:$0xff]  }
 0x37e   :  { %6765 = vtanh.f32 %v3742_v40  ;;  %v3723_v43 = vadd.f32 %v9277_v62, %v10105_v41  ;;  %v3843_v48 = vmul.f32 %v3810_v6, %v8668_v20  ;;  %v6750_v36 = vpop.eup %6749  ;;  %v3812_v2 = vmul.f32 0.5, %v3788_v54  ;;  %v6308_v40 = vld [vmem:[%s9930_s3 + $0xcc] ss:$16 sps:$4 sm:$0xff]  }
 0x37f   :  { %v3724_v18 = vadd.f32 %v9283_v11, %v10106_v47  ;;  %6767 = vtanh.f32 %v9375_v12  ;;  %v3747_v23 = vmul.f32 0.5, %v3721_v31  ;;  %v3745_v62 = vmul.f32 0.5, %v3718_v15  ;;  %v6300_v11 = vld [vmem:[%s9930_s3 + $0xa8] ss:$16 sps:$4 sm:$0xff]   ;;  %v6752_v26 = vpop.eup %6751 }
 0x380   :  { %6769 = vtanh.f32 %v3723_v43  ;;  %v3805_v50 = vmul.f32 0.5, %v3781_v14  ;;  %v9411_v58 = vadd.f32 1.0, %v6736_v21  ;;  %v9413_v20 = vadd.f32 %v3851_v24, %v3843_v48  ;;  %v6754_v35 = vpop.eup %6753  ;;  %4840 = vmatpush1.bf16.msra.mxu0 %v6297_v29  ;;  %4913 = vmatpush1.bf16.msra.mxu1 %v6300_v11 }
 0x381   :  { %v3749_v55 = vmul.f32 0.5, %v3724_v18  ;;  %6771 = vtanh.f32 %v3747_v23  ;;  %v3789_v27 = vadd.f32 1.0, %v6752_v26  ;;  %v3852_v32 = vmul.f32 %v6750_v36, %v3812_v2  ;;  %v6756_v5 = vpop.eup %6755  ;;  %4841 = vmatprep.subr.bf16.mxu0 %v6305_v59  ;;  %4914 = vmatprep.subr.bf16.mxu1 %v6308_v40 }
 0x382   :  { %v3236_v21 = vmul.f32 %v9264_v53, %v9204_v13  ;;  %v3237_v1 = vmul.f32 %v9310_v28, %v9296_v8  ;;  %v10107_v51 = vunpack.c.h.bf16 %v9088_v33  ;;  %v10108_v7 = vunpack.c.h.bf16 %v9101_v38  ;;  %v6758_v10 = vpop.eup %6757 }
 0x383   :  { %6773 = vtanh.f32 %v3749_v55  ;;  %v3787_v45 = vadd.f32 1.0, %v6748_v16  ;;  %v3813_v52 = vmul.f32 0.5, %v3789_v27  ;;  %v3791_v14 = vadd.f32 1.0, %v6756_v5 }
 0x384   :  { %6775 = vtanh.f32 %v9413_v20  ;;  %v3725_v24 = vadd.f32 %v9292_v42, %v10107_v51  ;;  %v3727_v15 = vadd.f32 %v9294_v30, %v10108_v7  ;;  %v10109_v53 = vunpack.c.l.bf16 %v9081_v63  ;;  %v6303_v42 = vld [vmem:[%s9930_s3 + $0xc0] ss:$16 sps:$4 sm:$0xff]   ;;  %v6306_v30 = vld [vmem:[%s9930_s3 + $0xc8] ss:$16 sps:$4 sm:$0xff]  }
 0x385   :  { %6777 = vtanh.f32 %v3745_v62  ;;  %v6760_v13 = vpop.eup %6759  ;;  %v5874_v28 = vpack.c.bf16 %v3237_v1, %v3236_v21  ;;  %v3844_v0 = vmul.f32 %v3813_v52, %v8700_v9  ;;  %v3815_v31 = vmul.f32 0.5, %v3791_v14  ;;  %4842 = vmatpush1.bf16.msra.mxu0 %v6303_v42  ;;  %4915 = vmatpush1.bf16.msra.mxu1 %v6306_v30 }
 0x386   :  { %v3722_v8 = vadd.f32 %v9262_v37, %v10109_v53  ;;  %v3750_v33 = vmul.f32 0.5, %v3725_v24  ;;  %6779 = vtanh.f32 %v3727_v15  ;;  %v6762_v6 = vpop.eup %6761  ;;  %v3792_v63 = vadd.f32 1.0, %v6760_v13  ;;  %4843 = vmatprep.subr.bf16.mxu0 %v6311_v56  ;;  %4916 = vmatprep.subr.bf16.mxu1 %v6314_v46 }
 0x387   :  { %v3239_v37 = vmul.f32 %v6746_v39, %v9320_v60  ;;  %v6764_v54 = vpop.eup %6763  ;;  %5958 = vst [vmem:[%s9933_s4 + $0x50] sm:$0xff] %v5874_v28   ;;  %4243 = vmatmul.mubr.bf16.gmra.mrb[104].mxu0 %v5874_v28  ;;  %4316 = vmatmul.mubr.bf16.gmra.mrb[104].mxu1 %v5874_v28  ;;  %v3238_v9 = vmul.f32 %v9373_v3, %v9312_v49  ;;  %v10110_v23 = vunpack.c.l.bf16 %v9101_v38  ;;  %v6309_v49 = vld [vmem:[%s9930_s3 + $0xe0] ss:$16 sps:$4 sm:$0xff]   ;;  %v6312_v3 = vld [vmem:[%s9930_s3 + $0xe8] ss:$16 sps:$4 sm:$0xff]   ;;  %v3811_v11 = vmul.f32 0.5, %v3787_v45 }
 0x388   :  { %6781 = vtanh.f32 %v3750_v33  ;;  %v3872_v60 = vmul.f32 %v6754_v35, %v3802_v57  ;;  %v3873_v39 = vmul.f32 %v6758_v10, %v3805_v50  ;;  %v6766_v41 = vpop.eup %6765  ;;  %v9454_v43 = vadd.f32 %v3852_v32, %v3844_v0  ;;  %4252 = vmatprep.mubr.bf16.mxu0 %v9978_v4  ;;  %4325 = vmatprep.mubr.bf16.mxu1 %v9978_v4  ;;  %v10111_v28 = vld [vmem:[#allocation6_spill] sm:$0xff] }
 0x389   :  { %v3816_v47 = vmul.f32 0.5, %v3792_v63  ;;  %v3853_v18 = vmul.f32 %v6762_v6, %v3815_v31  ;;  %v3794_v16 = vadd.f32 1.0, %v6764_v54  ;;  %v6768_v48 = vpop.eup %6767  ;;  %v3726_v29 = vadd.f32 %v9285_v44, %v10110_v23  ;;  %4844 = vmatpush1.bf16.msra.mxu0 %v6309_v49  ;;  %4917 = vmatpush1.bf16.msra.mxu1 %v6312_v3  ;;  %v5613_v23 = vld [vmem:[%s9931_s0 + $0x180] sm:$0xff]  ;;  %v9526_v3 = vld [vmem:[%s9931_s0 + $0x1a8] sm:$0xff] }
 0x38a   :  { %v5879_v36 = vpack.c.bf16 %v3239_v37, %v3238_v9  ;;  %v5884_v57 = vpack.c.bf16 %v3873_v39, %v3872_v60  ;;  %v6770_v2 = vpop.eup %6769  ;;  %v3808_v44 = vmul.f32 0.5, %v9411_v58  ;;  %6783 = vtanh.f32 %v9454_v43  ;;  %v9521_v49 = vld [vmem:[%s9931_s0 + $0x1a0] sm:$0xff] }
 0x38b   :  { %v3845_v62 = vmul.f32 %v3816_v47, %v8738_v61  ;;  %v3818_v55 = vmul.f32 0.5, %v3794_v16  ;;  %v6772_v38 = vpop.eup %6771  ;;  %v3748_v35 = vmul.f32 0.5, %v3722_v8  ;;  %v3751_v58 = vmul.f32 0.5, %v3726_v29  ;;  %v5614_v29 = vld [vmem:[%s9931_s0 + $0x188] sm:$0xff] }
 0x38c   :  { %5959 = vst [vmem:[%s9933_s4 + $0x58] sm:$0xff] %v5879_v36   ;;  %5960 = vst [vmem:[%s9934_s5 + $0x20] sm:$0xff] %v5884_v57   ;;  %v3795_v61 = vadd.f32 1.0, %v6772_v38  ;;  %v3874_v5 = vmul.f32 %v6768_v48, %v3808_v44  ;;  %v3790_v13 = vadd.f32 1.0, %v6766_v41  ;;  %v9531_v38 = vld [vmem:[%s9931_s0 + $0x1b0] sm:$0xff]  ;;  %v9536_v44 = vld [vmem:[%s9931_s0 + $0x1b8] sm:$0xff] }
 0x38d   :  { %v6774_v26 = vpop.eup %6773  ;;  %v9476_v50 = vadd.f32 %v3853_v18, %v3845_v62  ;;  %v3854_v59 = vmul.f32 %v6770_v2, %v3818_v55  ;;  %v3956_v2 = vunpack.c.l.bf16 %v5614_v29  ;;  %v3955_v62 = vunpack.c.h.bf16 %v5613_v23 }
 0x38e   :  { %v6776_v40 = vpop.eup %6775  ;;  %v3797_v27 = vadd.f32 1.0, %v6774_v26  ;;  %v3819_v21 = vmul.f32 0.5, %v3795_v61  ;;  %v3814_v42 = vmul.f32 0.5, %v3790_v13  ;;  %v3957_v55 = vunpack.c.h.bf16 %v5614_v29  ;;  %v9595_v29 = vld [vmem:[%s9931_s0 + $0x1f8] sm:$0xff] }
 0x38f   :  { %v6778_v32 = vpop.eup %6777  ;;  %6785 = vtanh.f32 %v9476_v50  ;;  %v3875_v1 = vmul.f32 %v6776_v40, %v3811_v11  ;;  %4253 = vmatmul.mubr.bf16.gmra.mrb[108].mxu0 %v5879_v36  ;;  %4326 = vmatmul.mubr.bf16.gmra.mrb[108].mxu1 %v5879_v36  ;;  %v5615_v36 = vld [vmem:[%s9931_s0 + $0x190] sm:$0xff]  ;;  %v9543_v40 = vld [vmem:[%s9931_s0 + $0x1c0] sm:$0xff] }
 0x390   :  { %v6780_v51 = vpop.eup %6779  ;;  %v3821_v24 = vmul.f32 0.5, %v3797_v27  ;;  %v3846_v7 = vmul.f32 %v3819_v21, %v8747_v19  ;;  %4861 = vmatprep.mubr.bf16.mxu0 %v9978_v4  ;;  %4934 = vmatprep.mubr.bf16.mxu1 %v9978_v4  ;;  %6787 = vtanh.f32 %v3748_v35  ;;  %v3793_v53 = vadd.f32 1.0, %v6778_v32  ;;  %v9548_v35 = vld [vmem:[%s9931_s0 + $0x1c8] sm:$0xff] }
 0x391   :  { %v5889_v15 = vpack.c.bf16 %v3875_v1, %v3874_v5  ;;  %6789 = vtanh.f32 %v3751_v58  ;;  %v3958_v11 = vunpack.c.l.bf16 %v5615_v36  ;;  %v3959_v61 = vunpack.c.h.bf16 %v5615_v36  ;;  %v9557_v5 = vld [vmem:[%s9931_s0 + $0x1d0] sm:$0xff]  ;;  %v9562_v1 = vld [vmem:[%s9931_s0 + $0x1d8] sm:$0xff] }
 0x392   :  { %v6782_v10 = vpop.eup %6781  ;;  %v3855_v45 = vmul.f32 %v6780_v51, %v3821_v24  ;;  %v9482_v52 = vadd.f32 %v3854_v59, %v3846_v7  ;;  %v3817_v30 = vmul.f32 0.5, %v3793_v53  ;;  %v3962_v27 = vunpack.c.l.bf16 %v9521_v49 }
 0x393   :  { %v3798_v14 = vadd.f32 1.0, %v6782_v10  ;;  %5961 = vst [vmem:[%s9934_s5 + $0x28] sm:$0xff] %v5889_v15   ;;  %v3964_v58 = vunpack.c.l.bf16 %v9526_v3  ;;  %v3963_v32 = vunpack.c.h.bf16 %v9521_v49  ;;  %v3965_v21 = vunpack.c.h.bf16 %v9526_v3 }
 0x394   :  { %v6784_v19 = vpop.eup %6783  ;;  %6791 = vtanh.f32 %v9482_v52  ;;  %v3966_v7 = vunpack.c.l.bf16 %v9531_v38  ;;  %v3967_v10 = vunpack.c.h.bf16 %v9531_v38 }
 0x395   :  { %v3822_v8 = vmul.f32 0.5, %v3798_v14  ;;  %v3876_v31 = vmul.f32 %v6784_v19, %v3814_v42  ;;  %v3972_v19 = vunpack.c.l.bf16 %v9548_v35 }
 0x397   :  { %v3847_v33 = vmul.f32 %v3822_v8, %v10111_v28  ;;  %4862 = vmatmul.mubr.bf16.vlgmr.msra.gmra.mrb[112].mxu0 %v5884_v57  ;;  %4935 = vmatmul.mubr.bf16.vlgmr.msra.gmra.mrb[112].mxu1 %v5884_v57  ;;  %v3954_v57 = vunpack.c.l.bf16 %v5613_v23  ;;  %v3970_v8 = vunpack.c.l.bf16 %v9543_v40  ;;  %v3971_v28 = vunpack.c.h.bf16 %v9543_v40  ;;  %v9590_v23 = vld [vmem:[%s9931_s0 + $0x1f0] sm:$0xff] }
 0x398   :  { %4871 = vmatprep.mubr.bf16.mxu0 %v9978_v4  ;;  %4944 = vmatprep.mubr.bf16.mxu1 %v9978_v4 }
 0x399   :  { %v6786_v6 = vpop.eup %6785  ;;  %v9489_v0 = vadd.f32 %v3855_v45, %v3847_v33  ;;  %v3969_v45 = vunpack.c.h.bf16 %v9536_v44  ;;  %v9574_v33 = vld [vmem:[%s9931_s0 + $0x1e0] sm:$0xff] }
 0x39a   :  { %v3877_v63 = vmul.f32 %v6786_v6, %v3817_v30  ;;  %v6788_v37 = vpop.eup %6787 }
 0x39b   :  { %6793 = vtanh.f32 %v9489_v0  ;;  %v6790_v46 = vpop.eup %6789  ;;  %v3796_v54 = vadd.f32 1.0, %v6788_v37  ;;  %v3976_v37 = vunpack.c.l.bf16 %v9562_v1 }
 0x39c   :  { %v5894_v56 = vpack.c.bf16 %v3877_v63, %v3876_v31  ;;  %v3799_v9 = vadd.f32 1.0, %v6790_v46  ;;  %v3973_v31 = vunpack.c.h.bf16 %v9548_v35  ;;  %v3974_v63 = vunpack.c.l.bf16 %v9557_v5 }
 0x39d   :  { %v3820_v39 = vmul.f32 0.5, %v3796_v54 }
 0x39e   :  { %5962 = vst [vmem:[%s9934_s5 + $0x30] sm:$0xff] %v5894_v56   ;;  %v6792_v60 = vpop.eup %6791  ;;  %v3823_v41 = vmul.f32 0.5, %v3799_v9 }
 0x39f   :  { %4872 = vmatmul.mubr.bf16.gmra.mrb[116].mxu0 %v5889_v15  ;;  %4945 = vmatmul.mubr.bf16.gmra.mrb[116].mxu1 %v5889_v15  ;;  %v3878_v18 = vmul.f32 %v6792_v60, %v3820_v39  ;;  %v3968_v15 = vunpack.c.l.bf16 %v9536_v44  ;;  %v3975_v39 = vunpack.c.h.bf16 %v9557_v5 }
 0x3a0   :  { %4881 = vmatprep.mubr.bf16.mxu0 %v9978_v4  ;;  %4954 = vmatprep.mubr.bf16.mxu1 %v9978_v4 }
 0x3a5   :  { %v6794_v47 = vpop.eup %6793 }
 0x3a6   :  { %v3879_v16 = vmul.f32 %v6794_v47, %v3823_v41  ;;  %v9583_v41 = vld [vmem:[%s9931_s0 + $0x1e8] sm:$0xff] }
 0x3a7   :  { %4882 = vmatmul.mubr.bf16.gmra.mrb[120].mxu0 %v5894_v56  ;;  %4955 = vmatmul.mubr.bf16.gmra.mrb[120].mxu1 %v5894_v56 }
 0x3a8   :  { %v5899_v48 = vpack.c.bf16 %v3879_v16, %v3878_v18  ;;  %4891 = vmatprep.mubr.bf16.mxu0 %v9978_v4  ;;  %4964 = vmatprep.mubr.bf16.mxu1 %v9978_v4  ;;  %v9516_v4 = vld [vmem:[%s9931_s0 + $0x198] sm:$0xff]  ;;  %v3977_v16 = vunpack.c.h.bf16 %v9562_v1 }
 0x3a9   :  { %v3960_v26 = vunpack.c.l.bf16 %v9516_v4  ;;  %v3961_v59 = vunpack.c.h.bf16 %v9516_v4 }
 0x3aa   :  { %5963 = vst [vmem:[%s9934_s5 + $0x38] sm:$0xff] %v5899_v48  }
 0x3af   :  { %4892 = vmatmul.mubr.bf16.gmra.mrb[124].mxu0 %v5899_v48  ;;  %4965 = vmatmul.mubr.bf16.gmra.mrb[124].mxu1 %v5899_v48  ;;  %v3978_v48 = vunpack.c.l.bf16 %v9574_v33 }
 0x43e   :  { %v4224_v51 = vpop.f32.mrb[96].mxu0  ;;  %v4297_v24 = vpop.f32.mrb[96].mxu1 }
 0x43f   :  { %v4336_v14 = vadd.f32 %v4224_v51, %v3954_v57  ;;  %v4226_v13 = vpop.f32.mrb[97].mxu0  ;;  %v4299_v53 = vpop.f32.mrb[97].mxu1  ;;  %v4338_v46 = vadd.f32 %v4297_v24, %v3956_v2  ;;  %v9603_v51 = vld [vmem:[%s9932_s1] sm:$0xff]  ;;  %v9608_v24 = vld [vmem:[%s9932_s1 + $0x8] sm:$0xff] }
 0x440   :  { %v4337_v42 = vadd.f32 %v4226_v13, %v3955_v62  ;;  %v4228_v30 = vpop.f32.mrb[98].mxu0  ;;  %v4301_v6 = vpop.f32.mrb[98].mxu1  ;;  %v4339_v36 = vadd.f32 %v4299_v53, %v3957_v55  ;;  %v3980_v62 = vunpack.c.l.bf16 %v9583_v41  ;;  %v9615_v13 = vld [vmem:[%s9932_s1 + $0x10] sm:$0xff] }
 0x441   :  { %v4368_v56 = vmul.f32 0.5, %v4336_v14  ;;  %v4340_v54 = vadd.f32 %v4228_v30, %v3958_v11  ;;  %v4230_v9 = vpop.f32.mrb[99].mxu0  ;;  %v4303_v60 = vpop.f32.mrb[99].mxu1  ;;  %v4342_v57 = vadd.f32 %v4301_v6, %v3960_v26  ;;  %v3979_v11 = vunpack.c.h.bf16 %v9574_v33  ;;  %v9622_v6 = vld [vmem:[%s9932_s1 + $0x18] sm:$0xff]  ;;  %v9645_v30 = vld [vmem:[%s9932_s1 + $0x30] sm:$0xff] }
 0x442   :  { %v4369_v47 = vmul.f32 0.5, %v4337_v42  ;;  %v4341_v18 = vadd.f32 %v4230_v9, %v3959_v61  ;;  %v4370_v55 = vmul.f32 0.5, %v4338_v46  ;;  %v4343_v53 = vadd.f32 %v4303_v60, %v3961_v59  ;;  %v9629_v9 = vld [vmem:[%s9932_s1 + $0x20] sm:$0xff]  ;;  %v9634_v59 = vld [vmem:[%s9932_s1 + $0x28] sm:$0xff] }
 0x443   :  { %6795 = vtanh.f32 %v4368_v56  ;;  %v4371_v4 = vmul.f32 0.5, %v4340_v54  ;;  %v4373_v56 = vmul.f32 0.5, %v4342_v57 }
 0x444   :  { %v4372_v2 = vmul.f32 0.5, %v4341_v18  ;;  %6797 = vtanh.f32 %v4369_v47 }
 0x445   :  { %6799 = vtanh.f32 %v4371_v4 }
 0x446   :  { %6801 = vtanh.f32 %v4339_v36 }
 0x447   :  { %6803 = vtanh.f32 %v4372_v2  ;;  %v9650_v2 = vld [vmem:[%s9932_s1 + $0x38] sm:$0xff] }
 0x448   :  { %6805 = vtanh.f32 %v4370_v55 }
 0x449   :  { %6807 = vtanh.f32 %v4343_v53  ;;  %v9663_v53 = vld [vmem:[%s9932_s1 + $0x40] sm:$0xff] }
 0x44a   :  { %6809 = vtanh.f32 %v4373_v56 }
 0x44c   :  { %v4234_v47 = vpop.f32.mrb[100].mxu0  ;;  %v4307_v18 = vpop.f32.mrb[100].mxu1 }
 0x44d   :  { %v4344_v57 = vadd.f32 %v4234_v47, %v3962_v27  ;;  %v4346_v60 = vadd.f32 %v4307_v18, %v3964_v58  ;;  %v4236_v54 = vpop.f32.mrb[101].mxu0  ;;  %v4309_v46 = vpop.f32.mrb[101].mxu1 }
 0x44e   :  { %v4345_v36 = vadd.f32 %v4236_v54, %v3963_v32  ;;  %v4347_v56 = vadd.f32 %v4309_v46, %v3965_v21  ;;  %v4238_v4 = vpop.f32.mrb[102].mxu0  ;;  %v4311_v27 = vpop.f32.mrb[102].mxu1  ;;  %v9681_v54 = vld [vmem:[%s9932_s1 + $0x48] sm:$0xff] }
 0x44f   :  { %v6796_v18 = vpop.eup %6795  ;;  %v4374_v55 = vmul.f32 0.5, %v4344_v57  ;;  %v4348_v42 = vadd.f32 %v4238_v4, %v3966_v7  ;;  %v4240_v61 = vpop.f32.mrb[103].mxu0  ;;  %v4376_v7 = vmul.f32 0.5, %v4346_v60  ;;  %v4350_v26 = vadd.f32 %v4311_v27, %v3968_v15  ;;  %v9690_v60 = vld [vmem:[%s9932_s1 + $0x50] sm:$0xff]  ;;  %v9697_v27 = vld [vmem:[%s9932_s1 + $0x58] sm:$0xff] }
 0x450   :  { %v4313_v14 = vpop.f32.mrb[103].mxu1  ;;  %v4416_v32 = vadd.f32 1.0, %v6796_v18  ;;  %v4375_v3 = vmul.f32 0.5, %v4345_v36  ;;  %v4349_v21 = vadd.f32 %v4240_v61, %v3967_v10  ;;  %v6798_v57 = vpop.eup %6797 }
 0x451   :  { %6811 = vtanh.f32 %v4374_v55  ;;  %v4377_v4 = vmul.f32 0.5, %v4348_v42  ;;  %v6800_v49 = vpop.eup %6799  ;;  %v4417_v36 = vadd.f32 1.0, %v6798_v57  ;;  %v9702_v57 = vld [vmem:[%s9932_s1 + $0x60] sm:$0xff] }
 0x452   :  { %v4440_v18 = vmul.f32 0.5, %v4416_v32  ;;  %6813 = vtanh.f32 %v4347_v56  ;;  %v4378_v38 = vmul.f32 0.5, %v4349_v21  ;;  %v6802_v10 = vpop.eup %6801  ;;  %v4419_v61 = vadd.f32 1.0, %v6800_v49 }
 0x453   :  { %6815 = vtanh.f32 %v4375_v3  ;;  %v6804_v42 = vpop.eup %6803  ;;  %v4441_v55 = vmul.f32 0.5, %v4417_v36  ;;  %v4351_v56 = vadd.f32 %v4313_v14, %v3969_v45  ;;  %v4379_v21 = vmul.f32 0.5, %v4350_v26 }
 0x454   :  { %v4488_v15 = vmul.f32 %v6802_v10, %v4440_v18  ;;  %6817 = vtanh.f32 %v4377_v4  ;;  %v6806_v49 = vpop.eup %6805  ;;  %v4443_v32 = vmul.f32 0.5, %v4419_v61  ;;  %v4420_v3 = vadd.f32 1.0, %v6804_v42  ;;  %v10112_v4 = vld [vmem:[#allocation7_spill] sm:$0xff] }
 0x455   :  { %6819 = vtanh.f32 %v4376_v7  ;;  %v6808_v18 = vpop.eup %6807  ;;  %v4480_v36 = vmul.f32 %v4441_v55, %v10112_v4  ;;  %v4613_v45 = vunpack.c.l.bf16 %v9690_v60  ;;  %v10113_v4 = vld [vmem:[#allocation14_spill] sm:$0xff] }
 0x456   :  { %6821 = vtanh.f32 %v4378_v38  ;;  %v6810_v14 = vpop.eup %6809  ;;  %v4444_v10 = vmul.f32 0.5, %v4420_v3  ;;  %v4489_v58 = vmul.f32 %v6808_v18, %v4443_v32  ;;  %v4418_v38 = vadd.f32 1.0, %v6806_v49 }
 0x457   :  { %v4496_v7 = vadd.f32 %v4488_v15, %v4480_v36  ;;  %6823 = vtanh.f32 %v4351_v56  ;;  %v4421_v61 = vadd.f32 1.0, %v6810_v14 }
 0x458   :  { %v4481_v44 = vmul.f32 %v4444_v10, %v10113_v4  ;;  %6825 = vtanh.f32 %v4379_v21 }
 0x459   :  { %6827 = vtanh.f32 %v4496_v7 }
 0x45a   :  { %v4244_v42 = vpop.f32.mrb[104].mxu0  ;;  %v4317_v46 = vpop.f32.mrb[104].mxu1  ;;  %v4497_v49 = vadd.f32 %v4489_v58, %v4481_v44 }
 0x45b   :  { %v4352_v3 = vadd.f32 %v4244_v42, %v3970_v8  ;;  %v4246_v32 = vpop.f32.mrb[105].mxu0  ;;  %v4319_v18 = vpop.f32.mrb[105].mxu1  ;;  %v4354_v15 = vadd.f32 %v4317_v46, %v3972_v19  ;;  %v4442_v46 = vmul.f32 0.5, %v4418_v38 }
 0x45c   :  { %v4353_v56 = vadd.f32 %v4246_v32, %v3971_v28  ;;  %v4248_v36 = vpop.f32.mrb[106].mxu0  ;;  %v4321_v47 = vpop.f32.mrb[106].mxu1  ;;  %v4355_v21 = vadd.f32 %v4319_v18, %v3973_v31  ;;  %6829 = vtanh.f32 %v4497_v49 }
 0x45d   :  { %v6812_v55 = vpop.eup %6811  ;;  %v4380_v26 = vmul.f32 0.5, %v4352_v3  ;;  %v4356_v8 = vadd.f32 %v4248_v36, %v3974_v63  ;;  %v4250_v10 = vpop.f32.mrb[107].mxu0  ;;  %v4358_v40 = vadd.f32 %v4321_v47, %v3976_v37  ;;  %v4382_v3 = vmul.f32 0.5, %v4354_v15 }
 0x45e   :  { %v4323_v7 = vpop.f32.mrb[107].mxu1  ;;  %v6814_v14 = vpop.eup %6813  ;;  %v4422_v42 = vadd.f32 1.0, %v6812_v55  ;;  %v4381_v4 = vmul.f32 0.5, %v4353_v56  ;;  %v4357_v35 = vadd.f32 %v4250_v10, %v3975_v39  ;;  %v4445_v55 = vmul.f32 0.5, %v4421_v61 }
 0x45f   :  { %v6816_v28 = vpop.eup %6815  ;;  %v4383_v58 = vmul.f32 0.5, %v4356_v8  ;;  %6831 = vtanh.f32 %v4380_v26  ;;  %v4385_v38 = vmul.f32 0.5, %v4358_v40  ;;  %v4359_v39 = vadd.f32 %v4323_v7, %v3977_v16 }
 0x460   :  { %v6818_v31 = vpop.eup %6817  ;;  %v4446_v44 = vmul.f32 0.5, %v4422_v42  ;;  %v4423_v63 = vadd.f32 1.0, %v6816_v28  ;;  %6833 = vtanh.f32 %v4355_v21  ;;  %v4384_v56 = vmul.f32 0.5, %v4357_v35  ;;  %v10114_v42 = vld [vmem:[#allocation8_spill] sm:$0xff] }
 0x461   :  { %v6820_v32 = vpop.eup %6819  ;;  %v4425_v18 = vadd.f32 1.0, %v6818_v31  ;;  %6835 = vtanh.f32 %v4381_v4 }
 0x462   :  { %v6822_v37 = vpop.eup %6821  ;;  %v4447_v47 = vmul.f32 0.5, %v4423_v63  ;;  %v4490_v36 = vmul.f32 %v6814_v14, %v4446_v44  ;;  %v4254_v49 = vpop.f32.mrb[108].mxu0  ;;  %6837 = vtanh.f32 %v4383_v58  ;;  %v4424_v61 = vadd.f32 1.0, %v6820_v32 }
 0x463   :  { %v4327_v8 = vpop.f32.mrb[108].mxu1  ;;  %v4449_v19 = vmul.f32 0.5, %v4425_v18  ;;  %v4426_v5 = vadd.f32 1.0, %v6822_v37  ;;  %v4256_v26 = vpop.f32.mrb[109].mxu0  ;;  %6839 = vtanh.f32 %v4382_v3  ;;  %v4360_v14 = vadd.f32 %v4254_v49, %v3978_v48  ;;  %v10115_v48 = vld [vmem:[#allocation9_spill] sm:$0xff] }
 0x464   :  { %v4329_v15 = vpop.f32.mrb[109].mxu1  ;;  %v6824_v10 = vpop.eup %6823  ;;  %v4482_v21 = vmul.f32 %v4447_v47, %v10114_v42  ;;  %6841 = vtanh.f32 %v4384_v56  ;;  %v4362_v1 = vadd.f32 %v4327_v8, %v3980_v62  ;;  %v4361_v3 = vadd.f32 %v4256_v26, %v3979_v11 }
 0x465   :  { %v4258_v4 = vpop.f32.mrb[110].mxu0  ;;  %v4331_v40 = vpop.f32.mrb[110].mxu1  ;;  %v4450_v35 = vmul.f32 0.5, %v4426_v5  ;;  %v4491_v31 = vmul.f32 %v6824_v10, %v4449_v19  ;;  %6843 = vtanh.f32 %v4385_v38  ;;  %v4386_v63 = vmul.f32 0.5, %v4360_v14 }
 0x466   :  { %v6826_v28 = vpop.eup %6825  ;;  %v4260_v16 = vpop.f32.mrb[111].mxu0  ;;  %v4498_v44 = vadd.f32 %v4490_v36, %v4482_v21  ;;  %6845 = vtanh.f32 %v4359_v39  ;;  %v4388_v37 = vmul.f32 0.5, %v4362_v1  ;;  %v4387_v19 = vmul.f32 0.5, %v4361_v3 }
 0x467   :  { %v4333_v7 = vpop.f32.mrb[111].mxu1  ;;  %v6828_v58 = vpop.eup %6827  ;;  %v4483_v18 = vmul.f32 %v4450_v35, %v10115_v48  ;;  %v10116_v56 = vunpack.c.l.bf16 %v9590_v23  ;;  %v10117_v62 = vunpack.c.l.bf16 %v9595_v29  ;;  %v10118_v38 = vunpack.c.h.bf16 %v9583_v41 }
 0x468   :  { %v4512_v32 = vmul.f32 %v6828_v58, %v4442_v46  ;;  %6847 = vtanh.f32 %v4498_v44  ;;  %v6830_v8 = vpop.eup %6829  ;;  %v10119_v11 = vunpack.c.h.bf16 %v9590_v23  ;;  %v4427_v26 = vadd.f32 1.0, %v6826_v28 }
 0x469   :  { %v4364_v47 = vadd.f32 %v4258_v4, %v10116_v56  ;;  %v4366_v49 = vadd.f32 %v4331_v40, %v10117_v62  ;;  %v4499_v36 = vadd.f32 %v4491_v31, %v4483_v18  ;;  %6849 = vtanh.f32 %v4386_v63  ;;  %v6832_v5 = vpop.eup %6831 }
 0x46a   :  { %v4363_v33 = vadd.f32 %v4329_v15, %v10118_v38  ;;  %v4365_v46 = vadd.f32 %v4260_v16, %v10119_v11  ;;  %v4513_v39 = vmul.f32 %v6830_v8, %v4445_v55  ;;  %6851 = vtanh.f32 %v4388_v37  ;;  %v4863_v42 = vpop.f32.mrb[112].mxu0  ;;  %v4936_v21 = vpop.f32.mrb[112].mxu1 }
 0x46b   :  { %v4389_v10 = vmul.f32 0.5, %v4364_v47  ;;  %v6834_v14 = vpop.eup %6833  ;;  %6853 = vtanh.f32 %v4499_v36  ;;  %v4428_v4 = vadd.f32 1.0, %v6832_v5  ;;  %v4391_v40 = vmul.f32 0.5, %v4366_v49  ;;  %v4865_v1 = vpop.f32.mrb[113].mxu0 }
 0x46c   :  { %v10120_v35 = vunpack.c.l.bf16 %v9603_v51  ;;  %v4938_v41 = vpop.f32.mrb[113].mxu1  ;;  %v6836_v15 = vpop.eup %6835  ;;  %v5904_v58 = vpack.c.bf16 %v4513_v39, %v4512_v32  ;;  %6855 = vtanh.f32 %v4387_v19  ;;  %v4390_v23 = vmul.f32 0.5, %v4365_v46 }
 0x46d   :  { %v10121_v55 = vunpack.c.l.bf16 %v9608_v24  ;;  %v4867_v16 = vpop.f32.mrb[114].mxu0  ;;  %v9749_v44 = vpop.f32.mrb[114].mxu1  ;;  %v4452_v3 = vmul.f32 0.5, %v4428_v4  ;;  %v4429_v48 = vadd.f32 1.0, %v6836_v15  ;;  %6857 = vtanh.f32 %v4363_v33 }
 0x46e   :  { %v4975_v31 = vadd.f32 %v4863_v42, %v10120_v35  ;;  %v6838_v63 = vpop.eup %6837  ;;  %v10122_v18 = vunpack.c.h.bf16 %v9595_v29  ;;  %v4869_v56 = vpop.f32.mrb[115].mxu0  ;;  %5964 = vst [vmem:[%s9933_s4 + $0x60] sm:$0xff] %v5904_v58   ;;  %v4448_v32 = vmul.f32 0.5, %v4424_v61  ;;  %6859 = vtanh.f32 %v4389_v10 }
 0x46f   :  { %v4977_v28 = vadd.f32 %v4936_v21, %v10121_v55  ;;  %v9753_v47 = vpop.f32.mrb[115].mxu1  ;;  %v6840_v62 = vpop.eup %6839  ;;  %v4431_v19 = vadd.f32 1.0, %v6838_v63  ;;  %v4453_v36 = vmul.f32 0.5, %v4429_v48  ;;  %v4492_v38 = vmul.f32 %v6834_v14, %v4452_v3  ;;  %v10124_v21 = vld [vmem:[#allocation10_spill] sm:$0xff] }
 0x470   :  { %v4367_v37 = vadd.f32 %v4333_v7, %v10122_v18  ;;  %v5007_v49 = vmul.f32 0.5, %v4975_v31  ;;  %v6842_v8 = vpop.eup %6841  ;;  %6861 = vtanh.f32 %v4391_v40  ;;  %v10123_v46 = vunpack.c.h.bf16 %v9603_v51 }
 0x471   :  { %v5009_v33 = vmul.f32 0.5, %v4977_v28  ;;  %v6844_v11 = vpop.eup %6843  ;;  %v4455_v29 = vmul.f32 0.5, %v4431_v19  ;;  %v4432_v7 = vadd.f32 1.0, %v6842_v8  ;;  %6863 = vtanh.f32 %v4390_v23 }
 0x472   :  { %v4976_v5 = vadd.f32 %v4865_v1, %v10123_v46  ;;  %v6846_v39 = vpop.eup %6845  ;;  %v4451_v42 = vmul.f32 0.5, %v4427_v26  ;;  %v4484_v4 = vmul.f32 %v4453_v36, %v10124_v21  ;;  %6865 = vtanh.f32 %v4367_v37  ;;  %v4873_v15 = vpop.f32.mrb[116].mxu0 }
 0x473   :  { %v10125_v61 = vunpack.c.h.bf16 %v9608_v24  ;;  %v6848_v35 = vpop.eup %6847  ;;  %v4456_v31 = vmul.f32 0.5, %v4432_v7  ;;  %v4493_v14 = vmul.f32 %v6846_v39, %v4455_v29  ;;  %6867 = vtanh.f32 %v5007_v49  ;;  %v4946_v58 = vpop.f32.mrb[116].mxu1 }
 0x474   :  { %v5008_v40 = vmul.f32 0.5, %v4976_v5  ;;  %v6850_v55 = vpop.eup %6849  ;;  %v4514_v23 = vmul.f32 %v6848_v35, %v4448_v32  ;;  %v4500_v28 = vadd.f32 %v4492_v38, %v4484_v4  ;;  %6869 = vtanh.f32 %v5009_v33  ;;  %v4875_v1 = vpop.f32.mrb[117].mxu0  ;;  %v9775_v32 = vld [vmem:[%s9932_s1 + $0x68] sm:$0xff] }
 0x475   :  { %v4978_v10 = vadd.f32 %v4938_v41, %v10125_v61  ;;  %v10126_v51 = vunpack.c.l.bf16 %v9615_v13  ;;  %v9765_v63 = vpop.f32.mrb[117].mxu1  ;;  %v6852_v3 = vpop.eup %6851  ;;  %v4430_v24 = vadd.f32 1.0, %v6840_v62  ;;  %v10127_v41 = vld [vmem:[#allocation11_spill] sm:$0xff]  ;;  %v4434_v18 = vadd.f32 1.0, %v6850_v55 }
 0x476   :  { %v4485_v48 = vmul.f32 %v4456_v31, %v10127_v41  ;;  %6871 = vtanh.f32 %v5008_v40  ;;  %v9768_v37 = vpop.f32.mrb[118].mxu0  ;;  %v9770_v19 = vpop.f32.mrb[118].mxu1  ;;  %v10128_v36 = vunpack.c.h.bf16 %v9615_v13  ;;  %v10129_v4 = vunpack.c.l.bf16 %v9622_v6 }
 0x477   :  { %v4979_v26 = vadd.f32 %v4867_v16, %v10126_v51  ;;  %v6854_v49 = vpop.eup %6853  ;;  %6873 = vtanh.f32 %v4500_v28  ;;  %v4433_v16 = vadd.f32 1.0, %v6844_v11  ;;  %v9779_v38 = vpop.f32.mrb[119].mxu0  ;;  %v4458_v5 = vmul.f32 0.5, %v4434_v18 }
 0x478   :  { %v4980_v62 = vadd.f32 %v4869_v56, %v10128_v36  ;;  %v9781_v33 = vpop.f32.mrb[119].mxu1  ;;  %v6856_v29 = vpop.eup %6855  ;;  %v4515_v7 = vmul.f32 %v6854_v49, %v4451_v42  ;;  %v4501_v46 = vadd.f32 %v4493_v14, %v4485_v48  ;;  %6875 = vtanh.f32 %v4978_v10 }
 0x479   :  { %v5010_v8 = vmul.f32 0.5, %v4979_v26  ;;  %v6858_v39 = vpop.eup %6857  ;;  %v4435_v21 = vadd.f32 1.0, %v6856_v29  ;;  %v4981_v11 = vadd.f32 %v9749_v44, %v10129_v4  ;;  %v4620_v61 = vunpack.c.h.bf16 %v9775_v32 }
 0x47a   :  { %v6860_v13 = vpop.eup %6859  ;;  %v5909_v56 = vpack.c.bf16 %v4515_v7, %v4514_v23  ;;  %v4494_v35 = vmul.f32 %v6858_v39, %v4458_v5  ;;  %v5011_v31 = vmul.f32 0.5, %v4980_v62  ;;  %v4454_v42 = vmul.f32 0.5, %v4430_v24  ;;  %v9797_v48 = vpop.f32.mrb[120].mxu0 }
 0x47b   :  { %6877 = vtanh.f32 %v5010_v8  ;;  %v9787_v40 = vpop.eup %6861  ;;  %v4459_v14 = vmul.f32 0.5, %v4435_v21  ;;  %v4437_v55 = vadd.f32 1.0, %v6860_v13  ;;  %v10130_v10 = vunpack.c.h.bf16 %v9622_v6  ;;  %v9799_v24 = vpop.f32.mrb[120].mxu1 }
 0x47c   :  { %6879 = vtanh.f32 %v4501_v46  ;;  %v6864_v51 = vpop.eup %6863  ;;  %5965 = vst [vmem:[%s9933_s4 + $0x68] sm:$0xff] %v5909_v56   ;;  %v4457_v44 = vmul.f32 0.5, %v4433_v16  ;;  %v4436_v26 = vadd.f32 1.0, %v6852_v3  ;;  %v10131_v23 = vunpack.c.l.bf16 %v9629_v9  ;;  %v9802_v8 = vpop.f32.mrb[121].mxu0 }
 0x47d   :  { %v4982_v28 = vadd.f32 %v9753_v47, %v10130_v10  ;;  %6881 = vtanh.f32 %v5011_v31  ;;  %v6866_v18 = vpop.eup %6865  ;;  %v4486_v6 = vmul.f32 %v4459_v14, %v9228_v25  ;;  %v4461_v49 = vmul.f32 0.5, %v4437_v55  ;;  %v9804_v36 = vpop.f32.mrb[121].mxu1 }
 0x47e   :  { %v4983_v41 = vadd.f32 %v4873_v15, %v10131_v23  ;;  %v4438_v47 = vadd.f32 1.0, %v6864_v51  ;;  %v6868_v16 = vpop.eup %6867  ;;  %v5012_v3 = vmul.f32 0.5, %v4981_v11  ;;  %v10132_v29 = vunpack.c.l.bf16 %v9634_v59  ;;  %v9810_v5 = vpop.f32.mrb[122].mxu0 }
 0x47f   :  { %6883 = vtanh.f32 %v4982_v28  ;;  %v10133_v7 = vunpack.c.h.bf16 %v9629_v9  ;;  %v9812_v39 = vpop.f32.mrb[122].mxu1  ;;  %v6870_v25 = vpop.eup %6869  ;;  %v4502_v21 = vadd.f32 %v4494_v35, %v4486_v6  ;;  %v4495_v13 = vmul.f32 %v6866_v18, %v4461_v49 }
 0x480   :  { %v5013_v62 = vmul.f32 0.5, %v4983_v41  ;;  %v4985_v15 = vadd.f32 %v4946_v58, %v10132_v29  ;;  %v4462_v4 = vmul.f32 0.5, %v4438_v47  ;;  %v5055_v56 = vadd.f32 1.0, %v6868_v16  ;;  %v9814_v31 = vpop.f32.mrb[123].mxu0  ;;  %v9816_v14 = vpop.f32.mrb[123].mxu1 }
 0x481   :  { %v4984_v46 = vadd.f32 %v4875_v1, %v10133_v7  ;;  %v6872_v11 = vpop.eup %6871  ;;  %v9818_v55 = vmul.f32 0.5, %v4436_v26  ;;  %v10134_v9 = vunpack.c.h.bf16 %v9634_v59  ;;  %v10135_v6 = vunpack.c.l.bf16 %v9645_v30 }
 0x482   :  { %6885 = vtanh.f32 %v5013_v62  ;;  %v6874_v10 = vpop.eup %6873  ;;  %v4487_v35 = vmul.f32 %v4462_v4, %v9247_v22  ;;  %v5079_v28 = vmul.f32 0.5, %v5055_v56  ;;  %v5056_v51 = vadd.f32 1.0, %v6872_v11 }
 0x483   :  { %v5014_v58 = vmul.f32 0.5, %v4984_v46  ;;  %v4986_v1 = vadd.f32 %v9765_v63, %v10134_v9  ;;  %6887 = vtanh.f32 %v4502_v21  ;;  %v6876_v23 = vpop.eup %6875  ;;  %v4516_v41 = vmul.f32 %v6874_v10, %v4454_v42  ;;  %v9830_v42 = vpop.f32.mrb[124].mxu0 }
 0x484   :  { %6889 = vtanh.f32 %v5012_v3  ;;  %v5015_v18 = vmul.f32 0.5, %v4985_v15  ;;  %v4987_v26 = vadd.f32 %v9768_v37, %v10135_v6  ;;  %v4503_v47 = vadd.f32 %v4495_v13, %v4487_v35  ;;  %v9832_v3 = vpop.f32.mrb[124].mxu1  ;;  %v9838_v4 = vpop.f32.mrb[125].mxu0 }
 0x485   :  { %v6878_v49 = vpop.eup %6877  ;;  %v5080_v16 = vmul.f32 0.5, %v5056_v51  ;;  %v5127_v59 = vmul.f32 %v6876_v23, %v5079_v28  ;;  %6891 = vtanh.f32 %v5014_v58  ;;  %v10136_v22 = vunpack.c.l.bf16 %v9650_v2  ;;  %v9840_v13 = vpop.f32.mrb[125].mxu1 }
 0x486   :  { %v6880_v63 = vpop.eup %6879  ;;  %v5058_v62 = vadd.f32 1.0, %v6878_v49  ;;  %6893 = vtanh.f32 %v4986_v1  ;;  %v5016_v29 = vmul.f32 0.5, %v4987_v26  ;;  %v10137_v46 = vunpack.c.h.bf16 %v9645_v30  ;;  %v9843_v9 = vpop.f32.mrb[126].mxu0 }
 0x487   :  { %v4989_v7 = vadd.f32 %v9770_v19, %v10136_v22  ;;  %v4517_v15 = vmul.f32 %v6880_v63, %v4457_v44  ;;  %6895 = vtanh.f32 %v4503_v47  ;;  %v5119_v37 = vmul.f32 %v5080_v16, %v9287_v17  ;;  %v6882_v56 = vpop.eup %6881  ;;  %v9845_v44 = vpop.f32.mrb[126].mxu1 }
 0x488   :  { %v4988_v21 = vadd.f32 %v9779_v38, %v10137_v46  ;;  %v4439_v11 = vadd.f32 1.0, %v9787_v40  ;;  %v5057_v19 = vadd.f32 1.0, %v6870_v25  ;;  %v5082_v58 = vmul.f32 0.5, %v5058_v62  ;;  %v9847_v38 = vpop.f32.mrb[127].mxu0  ;;  %v9849_v28 = vpop.f32.mrb[127].mxu1 }
 0x489   :  { %6897 = vtanh.f32 %v5016_v29  ;;  %v6884_v1 = vpop.eup %6883  ;;  %v5914_v17 = vpack.c.bf16 %v4517_v15, %v4516_v41  ;;  %v5135_v10 = vadd.f32 %v5127_v59, %v5119_v37  ;;  %v5059_v30 = vadd.f32 1.0, %v6882_v56 }
 0x48a   :  { %v5017_v35 = vmul.f32 0.5, %v4988_v21  ;;  %v5128_v51 = vmul.f32 %v6884_v1, %v5082_v58  ;;  %6899 = vtanh.f32 %v5015_v18  ;;  %v5018_v23 = vmul.f32 0.5, %v4989_v7 }
 0x48b   :  { %v10138_v40 = vunpack.c.h.bf16 %v9650_v2  ;;  %5966 = vst [vmem:[%s9933_s4 + $0x70] sm:$0xff] %v5914_v17   ;;  %6901 = vtanh.f32 %v5135_v10  ;;  %v5083_v41 = vmul.f32 0.5, %v5059_v30  ;;  %v10139_v6 = vunpack.c.l.bf16 %v9663_v53  ;;  %v9866_v2 = vld [vmem:[%s9932_s1 + $0x70] sm:$0xff] }
 0x48c   :  { %v10140_v49 = vunpack.c.l.bf16 %v9681_v54  ;;  %6903 = vtanh.f32 %v5017_v35  ;;  %v10141_v18 = vunpack.c.h.bf16 %v9663_v53  ;;  %v10142_v59 = vunpack.c.h.bf16 %v9681_v54 }
 0x48d   :  { %v4990_v25 = vadd.f32 %v9781_v33, %v10138_v40  ;;  %v4991_v26 = vadd.f32 %v9797_v48, %v10139_v6  ;;  %v6886_v33 = vpop.eup %6885  ;;  %v4995_v48 = vadd.f32 %v9810_v5, %v4613_v45  ;;  %v5120_v62 = vmul.f32 %v5083_v41, %v9339_v34 }
 0x48e   :  { %v4993_v47 = vadd.f32 %v9799_v24, %v10140_v49  ;;  %v4992_v16 = vadd.f32 %v9802_v8, %v10141_v18  ;;  %v4994_v63 = vadd.f32 %v9804_v36, %v10142_v59  ;;  %v6888_v24 = vpop.eup %6887  ;;  %v5061_v29 = vadd.f32 1.0, %v6886_v33 }
 0x48f   :  { %6905 = vtanh.f32 %v4990_v25  ;;  %v5019_v22 = vmul.f32 0.5, %v4991_v26  ;;  %v6890_v7 = vpop.eup %6889  ;;  %v4518_v15 = vmul.f32 %v6888_v24, %v9818_v55  ;;  %v4621_v8 = vunpack.c.l.bf16 %v9866_v2 }
 0x490   :  { %6907 = vtanh.f32 %v5018_v23  ;;  %v5020_v53 = vmul.f32 0.5, %v4992_v16  ;;  %v6892_v54 = vpop.eup %6891  ;;  %v4463_v37 = vmul.f32 0.5, %v4439_v11  ;;  %v5136_v36 = vadd.f32 %v5128_v51, %v5120_v62 }
 0x491   :  { %v5085_v46 = vmul.f32 0.5, %v5061_v29  ;;  %6909 = vtanh.f32 %v5019_v22  ;;  %v6894_v21 = vpop.eup %6893  ;;  %v5062_v45 = vadd.f32 1.0, %v6892_v54  ;;  %v5021_v5 = vmul.f32 0.5, %v4993_v47 }
 0x492   :  { %6911 = vtanh.f32 %v4994_v63  ;;  %v5022_v34 = vmul.f32 0.5, %v4995_v48  ;;  %v6896_v56 = vpop.eup %6895  ;;  %v5081_v58 = vmul.f32 0.5, %v5057_v19  ;;  %v10143_v55 = vunpack.c.h.bf16 %v9690_v60 }
 0x493   :  { %6913 = vtanh.f32 %v5136_v36  ;;  %v5129_v1 = vmul.f32 %v6894_v21, %v5085_v46  ;;  %v6898_v10 = vpop.eup %6897  ;;  %v4519_v30 = vmul.f32 %v6896_v56, %v4463_v37  ;;  %v5086_v35 = vmul.f32 0.5, %v5062_v45 }
 0x494   :  { %v4996_v17 = vadd.f32 %v9814_v31, %v10143_v55  ;;  %6915 = vtanh.f32 %v5020_v53  ;;  %v10144_v11 = vunpack.c.l.bf16 %v9697_v27  ;;  %v5064_v23 = vadd.f32 1.0, %v6898_v10  ;;  %v6900_v41 = vpop.eup %6899 }
 0x495   :  { %6917 = vtanh.f32 %v5022_v34  ;;  %v10145_v25 = vunpack.c.h.bf16 %v9697_v27  ;;  %v5919_v6 = vpack.c.bf16 %v4519_v30, %v4518_v15  ;;  %v5121_v60 = vmul.f32 %v5086_v35, %v9375_v12  ;;  %v6902_v49 = vpop.eup %6901 }
 0x496   :  { %v4997_v51 = vadd.f32 %v9812_v39, %v10144_v11  ;;  %v5023_v40 = vmul.f32 0.5, %v4996_v17  ;;  %6919 = vtanh.f32 %v5021_v5  ;;  %v10146_v31 = vunpack.c.l.bf16 %v9702_v57  ;;  %v6904_v18 = vpop.eup %6903 }
 0x497   :  { %v4998_v19 = vadd.f32 %v9816_v14, %v10145_v25  ;;  %v5060_v47 = vadd.f32 1.0, %v6890_v7  ;;  %v5088_v33 = vmul.f32 0.5, %v5064_v23  ;;  %v4622_v39 = vunpack.c.h.bf16 %v9866_v2  ;;  %5967 = vst [vmem:[%s9933_s4 + $0x78] sm:$0xff] %v5919_v6   ;;  %v4592_v7 = vld [vmem:[%s9932_s1 + $0x78] sm:$0xff] }
 0x498   :  { %v4999_v26 = vadd.f32 %v9830_v42, %v10146_v31  ;;  %6921 = vtanh.f32 %v5023_v40  ;;  %v5151_v27 = vmul.f32 %v6902_v49, %v5081_v58  ;;  %v5137_v14 = vadd.f32 %v5129_v1, %v5121_v60 }
 0x499   :  { %v5024_v16 = vmul.f32 0.5, %v4997_v51  ;;  %v6906_v59 = vpop.eup %6905  ;;  %v5065_v63 = vadd.f32 1.0, %v6904_v18  ;;  %6923 = vtanh.f32 %v4998_v19  ;;  %v4619_v42 = vunpack.c.l.bf16 %v9775_v32 }
 0x49a   :  { %v5025_v12 = vmul.f32 0.5, %v4999_v26  ;;  %v10147_v48 = vunpack.c.h.bf16 %v9702_v57  ;;  %v6908_v62 = vpop.eup %6907  ;;  %6925 = vtanh.f32 %v5137_v14  ;;  %v5130_v2 = vmul.f32 %v6906_v59, %v5088_v33 }
 0x49b   :  { %v5002_v29 = vadd.f32 %v9840_v13, %v4620_v61  ;;  %v5003_v22 = vadd.f32 %v9843_v9, %v4621_v8  ;;  %v6910_v15 = vpop.eup %6909  ;;  %v5084_v53 = vmul.f32 0.5, %v5060_v47  ;;  %v5089_v54 = vmul.f32 0.5, %v5065_v63 }
 0x49c   :  { %v5000_v24 = vadd.f32 %v9838_v4, %v10147_v48  ;;  %6927 = vtanh.f32 %v5025_v12  ;;  %v6912_v37 = vpop.eup %6911  ;;  %v5067_v4 = vadd.f32 1.0, %v6910_v15  ;;  %v5004_v46 = vadd.f32 %v9847_v38, %v4622_v39 }
 0x49d   :  { %6929 = vtanh.f32 %v5024_v16  ;;  %v5028_v36 = vmul.f32 0.5, %v5003_v22  ;;  %v6914_v32 = vpop.eup %6913  ;;  %v5122_v61 = vmul.f32 %v5089_v54, %v9413_v20  ;;  %v4624_v13 = vunpack.c.h.bf16 %v4592_v7 }
 0x49e   :  { %v5026_v57 = vmul.f32 0.5, %v5000_v24  ;;  %v6916_v9 = vpop.eup %6915  ;;  %v5152_v8 = vmul.f32 %v6914_v32, %v5084_v53  ;;  %v5091_v21 = vmul.f32 0.5, %v5067_v4  ;;  %v5029_v45 = vmul.f32 0.5, %v5004_v46 }
 0x49f   :  { %v6918_v5 = vpop.eup %6917  ;;  %v5063_v34 = vadd.f32 1.0, %v6900_v41  ;;  %v5138_v56 = vadd.f32 %v5130_v2, %v5122_v61  ;;  %v5068_v58 = vadd.f32 1.0, %v6916_v9  ;;  %v5001_v38 = vadd.f32 %v9832_v3, %v4619_v42 }
 0x4a0   :  { %6931 = vtanh.f32 %v5026_v57  ;;  %v6920_v1 = vpop.eup %6919  ;;  %v5924_v55 = vpack.c.bf16 %v5152_v8, %v5151_v27  ;;  %v5131_v17 = vmul.f32 %v6912_v37, %v5091_v21  ;;  %v5070_v10 = vadd.f32 1.0, %v6918_v5 }
 0x4a1   :  { %6933 = vtanh.f32 %v5002_v29  ;;  %v5092_v20 = vmul.f32 0.5, %v5068_v58  ;;  %v4623_v35 = vunpack.c.l.bf16 %v4592_v7  ;;  %v5006_v11 = vadd.f32 %v9849_v28, %v4624_v13 }
 0x4a2   :  { %6935 = vtanh.f32 %v5028_v36  ;;  %v6922_v30 = vpop.eup %6921  ;;  %5925 = vst [vmem:[%s9934_s5] sm:$0xff] %v5924_v55   ;;  %v5094_v51 = vmul.f32 0.5, %v5070_v10  ;;  %v5087_v25 = vmul.f32 0.5, %v5063_v34  ;;  %v5027_v60 = vmul.f32 0.5, %v5001_v38 }
 0x4a3   :  { %6937 = vtanh.f32 %v5138_v56  ;;  %v5071_v23 = vadd.f32 1.0, %v6922_v30  ;;  %v6924_v40 = vpop.eup %6923  ;;  %v5123_v19 = vmul.f32 %v5092_v20, %v9454_v43  ;;  %v5066_v49 = vadd.f32 1.0, %v6908_v62 }
 0x4a4   :  { %6939 = vtanh.f32 %v5029_v45  ;;  %v6926_v41 = vpop.eup %6925  ;;  %v5132_v6 = vmul.f32 %v6924_v40, %v5094_v51  ;;  %v5005_v47 = vadd.f32 %v9845_v44, %v4623_v35  ;;  %v5069_v22 = vadd.f32 1.0, %v6920_v1 }
 0x4a5   :  { %6941 = vtanh.f32 %v5006_v11  ;;  %v5095_v3 = vmul.f32 0.5, %v5071_v23  ;;  %v5153_v26 = vmul.f32 %v6926_v41, %v5087_v25  ;;  %v5139_v28 = vadd.f32 %v5131_v17, %v5123_v19 }
 0x4a6   :  { %v6928_v31 = vpop.eup %6927  ;;  %v5090_v63 = vmul.f32 0.5, %v5066_v49  ;;  %v5030_v42 = vmul.f32 0.5, %v5005_v47  ;;  %v5093_v46 = vmul.f32 0.5, %v5069_v22 }
 0x4a7   :  { %v6930_v33 = vpop.eup %6929  ;;  %v5124_v39 = vmul.f32 %v5095_v3, %v9476_v50  ;;  %v5073_v18 = vadd.f32 1.0, %v6928_v31  ;;  %6943 = vtanh.f32 %v5139_v28 }
 0x4a8   :  { %6945 = vtanh.f32 %v5027_v60  ;;  %v5072_v4 = vadd.f32 1.0, %v6930_v33 }
 0x4a9   :  { %v5140_v16 = vadd.f32 %v5132_v6, %v5124_v39  ;;  %v5097_v43 = vmul.f32 0.5, %v5073_v18 }
 0x4aa   :  { %v6932_v27 = vpop.eup %6931  ;;  %v5096_v9 = vmul.f32 0.5, %v5072_v4 }
 0x4ab   :  { %v6934_v14 = vpop.eup %6933  ;;  %v5074_v12 = vadd.f32 1.0, %v6932_v27  ;;  %6947 = vtanh.f32 %v5140_v16 }
 0x4ac   :  { %v6936_v59 = vpop.eup %6935  ;;  %v5133_v24 = vmul.f32 %v6934_v14, %v5097_v43  ;;  %6949 = vtanh.f32 %v5030_v42 }
 0x4ad   :  { %v5098_v48 = vmul.f32 0.5, %v5074_v12  ;;  %v5076_v62 = vadd.f32 1.0, %v6936_v59  ;;  %v6938_v2 = vpop.eup %6937 }
 0x4ae   :  { %v6940_v44 = vpop.eup %6939  ;;  %v5154_v29 = vmul.f32 %v6938_v2, %v5090_v63 }
 0x4af   :  { %v5125_v50 = vmul.f32 %v5098_v48, %v9482_v52  ;;  %v5100_v7 = vmul.f32 0.5, %v5076_v62  ;;  %v6942_v15 = vpop.eup %6941  ;;  %v5077_v53 = vadd.f32 1.0, %v6940_v44 }
 0x4b0   :  { %v5929_v54 = vpack.c.bf16 %v5154_v29, %v5153_v26 }
 0x4b1   :  { %v5141_v57 = vadd.f32 %v5133_v24, %v5125_v50  ;;  %v5134_v37 = vmul.f32 %v6942_v15, %v5100_v7  ;;  %v5101_v36 = vmul.f32 0.5, %v5077_v53  ;;  %v6944_v32 = vpop.eup %6943 }
 0x4b2   :  { %5968 = vst [vmem:[%s9934_s5 + $0x8] sm:$0xff] %v5929_v54   ;;  %v6946_v13 = vpop.eup %6945  ;;  %v5155_v52 = vmul.f32 %v6944_v32, %v5093_v46 }
 0x4b3   :  { %6951 = vtanh.f32 %v5141_v57  ;;  %v5126_v61 = vmul.f32 %v5101_v36, %v9489_v0  ;;  %v5075_v5 = vadd.f32 1.0, %v6946_v13 }
 0x4b5   :  { %v5142_v8 = vadd.f32 %v5134_v37, %v5126_v61  ;;  %v6948_v21 = vpop.eup %6947  ;;  %v5099_v58 = vmul.f32 0.5, %v5075_v5 }
 0x4b6   :  { %v5156_v45 = vmul.f32 %v6948_v21, %v5096_v9  ;;  %v6950_v34 = vpop.eup %6949 }
 0x4b7   :  { %6953 = vtanh.f32 %v5142_v8  ;;  %v5078_v55 = vadd.f32 1.0, %v6950_v34 }
 0x4b8   :  { %v5934_v56 = vpack.c.bf16 %v5156_v45, %v5155_v52 }
 0x4b9   :  { %v5102_v10 = vmul.f32 0.5, %v5078_v55 }
 0x4ba   :  { %5969 = vst [vmem:[%s9934_s5 + $0x10] sm:$0xff] %v5934_v56  }
 0x4bd   :  { %v6952_v1 = vpop.eup %6951 }
 0x4be   :  { %v5157_v17 = vmul.f32 %v6952_v1, %v5099_v58 }
 0x4c1   :  { %v6954_v0 = vpop.eup %6953 }
 0x4c2   :  { %v5158_v38 = vmul.f32 %v6954_v0, %v5102_v10 }
 0x4c4   :  { %v5939_v30 = vpack.c.bf16 %v5158_v38, %v5157_v17 }
 0x4c6   :  { %5970 = vst [vmem:[%s9934_s5 + $0x18] sm:$0xff] %v5939_v30  }

// kernel: elmo_forward.21
= control target key start
LH: loop header
LB: loop body
LE: loop exit
PB: predicated region body
PF: predicated region fallthrough
CT: control target
= control target key end

     0   :  { %v7178_v1 = vmov 0   ;;  %v7180_v38 = vmov 0.0|0.0   ;;  %s7172_s2 = inlined_call_operand.vmem [shape: bf16[128,512], index: 2, kind: input, shape index: {}]   ;;  %s7173_s3 = inlined_call_operand.vmem [shape: bf16[128,512], index: 3, kind: input, shape index: {}]   ;;  %s7174_s0 = inlined_call_operand.vmem [shape: bf16[7,8,512], index: 0, kind: input, shape index: {}]   ;;  %s7175_s1 = inlined_call_operand.vmem [shape: bf16[7,8,512], index: 1, kind: input, shape index: {}]   ;;  %s7176_s4 = inlined_call_operand.vmem [shape: bf16[7,8,128], index: 4, kind: output, shape index: {0}]   ;;  %s7177_s5 = inlined_call_operand.vmem [shape: bf16[7,8,128], index: 5, kind: output, shape index: {1}]  }
   0x1   :  { %v5433_v0 = vld [vmem:[%s7172_s2 + $0x4] ss:$16 sps:$4 sm:$0xff]   ;;  %260 = vmatprep.mubr.bf16.mxu0 %v7178_v1  ;;  %301 = vmatprep.mubr.bf16.mxu1 %v7178_v1  ;;  %v5440_v2 = vld [vmem:[%s7172_s2] ss:$16 sps:$4 sm:$0xff]   ;;  %v5446_v3 = vld [vmem:[%s7172_s2 + $0xc] ss:$16 sps:$4 sm:$0xff]  }
   0x2   :  { %228 = vmatprep.subr.bf16.mxu0 %v5433_v0  ;;  %v5452_v4 = vld [vmem:[%s7172_s2 + $0x24] ss:$16 sps:$4 sm:$0xff]   ;;  %v5457_v5 = vld [vmem:[%s7172_s2 + $0x8] ss:$16 sps:$4 sm:$0xff]   ;;  %v5462_v6 = vld [vmem:[%s7172_s2 + $0x20] ss:$16 sps:$4 sm:$0xff]   ;;  %269 = vmatprep.subr.bf16.mxu1 %v5446_v3 }
   0x3   :  { %229 = vmatpush1.bf16.msra.mxu0 %v5440_v2  ;;  %v5468_v7 = vld [vmem:[%s7172_s2 + $0x2c] ss:$16 sps:$4 sm:$0xff]   ;;  %270 = vmatpush1.bf16.msra.mxu1 %v5457_v5  ;;  %v5475_v8 = vld [vmem:[%s7172_s2 + $0x44] ss:$16 sps:$4 sm:$0xff]   ;;  %v5481_v9 = vld [vmem:[%s7172_s2 + $0x28] ss:$16 sps:$4 sm:$0xff]  }
   0x4   :  { %230 = vmatprep.subr.bf16.mxu0 %v5452_v4  ;;  %271 = vmatprep.subr.bf16.mxu1 %v5468_v7  ;;  %v5486_v10 = vld [vmem:[%s7172_s2 + $0x40] ss:$16 sps:$4 sm:$0xff]   ;;  %v5492_v11 = vld [vmem:[%s7172_s2 + $0x4c] ss:$16 sps:$4 sm:$0xff]   ;;  %v5498_v12 = vld [vmem:[%s7172_s2 + $0x64] ss:$16 sps:$4 sm:$0xff]  }
   0x5   :  { %v5504_v13 = vld [vmem:[%s7172_s2 + $0x48] ss:$16 sps:$4 sm:$0xff]   ;;  %v5510_v14 = vld [vmem:[%s7172_s2 + $0x6c] ss:$16 sps:$4 sm:$0xff]   ;;  %v5516_v15 = vld [vmem:[%s7172_s2 + $0x60] ss:$16 sps:$4 sm:$0xff]  }
   0x6   :  { %v5522_v16 = vld [vmem:[%s7172_s2 + $0x84] ss:$16 sps:$4 sm:$0xff]   ;;  %v5528_v17 = vld [vmem:[%s7172_s2 + $0x68] ss:$16 sps:$4 sm:$0xff]   ;;  %v5534_v18 = vld [vmem:[%s7172_s2 + $0x8c] ss:$16 sps:$4 sm:$0xff]  }
   0x7   :  { %231 = vmatpush1.bf16.msra.mxu0 %v5462_v6  ;;  %272 = vmatpush1.bf16.msra.mxu1 %v5481_v9  ;;  %v5540_v19 = vld [vmem:[%s7172_s2 + $0x80] ss:$16 sps:$4 sm:$0xff]   ;;  %v5546_v20 = vld [vmem:[%s7172_s2 + $0xa4] ss:$16 sps:$4 sm:$0xff]   ;;  %v5552_v21 = vld [vmem:[%s7172_s2 + $0x88] ss:$16 sps:$4 sm:$0xff]  }
   0x8   :  { %232 = vmatprep.subr.bf16.mxu0 %v5475_v8  ;;  %273 = vmatprep.subr.bf16.mxu1 %v5492_v11  ;;  %v5558_v22 = vld [vmem:[%s7172_s2 + $0xac] ss:$16 sps:$4 sm:$0xff]   ;;  %v5564_v23 = vld [vmem:[%s7172_s2 + $0xa0] ss:$16 sps:$4 sm:$0xff]   ;;  %v5570_v24 = vld [vmem:[%s7172_s2 + $0xc4] ss:$16 sps:$4 sm:$0xff]  }
   0x9   :  { %v5576_v25 = vld [vmem:[%s7172_s2 + $0xa8] ss:$16 sps:$4 sm:$0xff]   ;;  %v5582_v26 = vld [vmem:[%s7172_s2 + $0xcc] ss:$16 sps:$4 sm:$0xff]   ;;  %v5588_v27 = vld [vmem:[%s7172_s2 + $0xc0] ss:$16 sps:$4 sm:$0xff]  }
   0xa   :  { %v5594_v28 = vld [vmem:[%s7172_s2 + $0xe4] ss:$16 sps:$4 sm:$0xff]   ;;  %v5600_v29 = vld [vmem:[%s7172_s2 + $0xc8] ss:$16 sps:$4 sm:$0xff]   ;;  %v5606_v30 = vld [vmem:[%s7172_s2 + $0xec] ss:$16 sps:$4 sm:$0xff]  }
   0xb   :  { %233 = vmatpush1.bf16.msra.mxu0 %v5486_v10  ;;  %274 = vmatpush1.bf16.msra.mxu1 %v5504_v13  ;;  %v5612_v31 = vld [vmem:[%s7172_s2 + $0xe0] ss:$16 sps:$4 sm:$0xff]   ;;  %v5618_v32 = vld [vmem:[%s7173_s3 + $0x4] ss:$16 sps:$4 sm:$0xff]   ;;  %v5624_v33 = vld [vmem:[%s7172_s2 + $0xe8] ss:$16 sps:$4 sm:$0xff]  }
   0xc   :  { %234 = vmatprep.subr.bf16.mxu0 %v5498_v12  ;;  %275 = vmatprep.subr.bf16.mxu1 %v5510_v14  ;;  %v5630_v34 = vld [vmem:[%s7173_s3 + $0xc] ss:$16 sps:$4 sm:$0xff]   ;;  %v5636_v35 = vld [vmem:[%s7173_s3] ss:$16 sps:$4 sm:$0xff]   ;;  %v5642_v36 = vld [vmem:[%s7173_s3 + $0x24] ss:$16 sps:$4 sm:$0xff]  }
   0xd   :  { %v5648_v37 = vld [vmem:[%s7173_s3 + $0x8] ss:$16 sps:$4 sm:$0xff]   ;;  %v5655_v39 = vld [vmem:[%s7173_s3 + $0x2c] ss:$16 sps:$4 sm:$0xff]   ;;  %v5661_v40 = vld [vmem:[%s7173_s3 + $0x20] ss:$16 sps:$4 sm:$0xff]  }
   0xe   :  { %v5669_v41 = vld [vmem:[%s7173_s3 + $0x44] ss:$16 sps:$4 sm:$0xff]   ;;  %v5675_v42 = vld [vmem:[%s7173_s3 + $0x28] ss:$16 sps:$4 sm:$0xff]   ;;  %v5682_v43 = vld [vmem:[%s7173_s3 + $0x4c] ss:$16 sps:$4 sm:$0xff]  }
   0xf   :  { %235 = vmatpush1.bf16.msra.mxu0 %v5516_v15  ;;  %276 = vmatpush1.bf16.msra.mxu1 %v5528_v17  ;;  %v5688_v44 = vld [vmem:[%s7173_s3 + $0x40] ss:$16 sps:$4 sm:$0xff]   ;;  %v5694_v45 = vld [vmem:[%s7173_s3 + $0x64] ss:$16 sps:$4 sm:$0xff]   ;;  %v5700_v46 = vld [vmem:[%s7173_s3 + $0x48] ss:$16 sps:$4 sm:$0xff]  }
  0x10   :  { %236 = vmatprep.subr.bf16.mxu0 %v5522_v16  ;;  %277 = vmatprep.subr.bf16.mxu1 %v5534_v18  ;;  %v5706_v47 = vld [vmem:[%s7173_s3 + $0x60] ss:$16 sps:$4 sm:$0xff]   ;;  %v5711_v48 = vld [vmem:[%s7173_s3 + $0x6c] ss:$16 sps:$4 sm:$0xff]   ;;  %v5716_v49 = vld [vmem:[%s7173_s3 + $0x84] ss:$16 sps:$4 sm:$0xff]  }
  0x11   :  { %v5722_v50 = vld [vmem:[%s7173_s3 + $0x68] ss:$16 sps:$4 sm:$0xff]   ;;  %v5728_v51 = vld [vmem:[%s7173_s3 + $0x8c] ss:$16 sps:$4 sm:$0xff]   ;;  %v5734_v52 = vld [vmem:[%s7173_s3 + $0x80] ss:$16 sps:$4 sm:$0xff]  }
  0x12   :  { %v5740_v53 = vld [vmem:[%s7173_s3 + $0xa4] ss:$16 sps:$4 sm:$0xff]   ;;  %v5746_v54 = vld [vmem:[%s7173_s3 + $0x88] ss:$16 sps:$4 sm:$0xff]   ;;  %v5752_v55 = vld [vmem:[%s7173_s3 + $0xac] ss:$16 sps:$4 sm:$0xff]  }
  0x13   :  { %237 = vmatpush1.bf16.msra.mxu0 %v5540_v19  ;;  %278 = vmatpush1.bf16.msra.mxu1 %v5552_v21  ;;  %v5758_v56 = vld [vmem:[%s7173_s3 + $0xa0] ss:$16 sps:$4 sm:$0xff]   ;;  %v5764_v57 = vld [vmem:[%s7173_s3 + $0xc4] ss:$16 sps:$4 sm:$0xff]   ;;  %v5770_v58 = vld [vmem:[%s7173_s3 + $0xa8] ss:$16 sps:$4 sm:$0xff]  }
  0x14   :  { %238 = vmatprep.subr.bf16.mxu0 %v5546_v20  ;;  %279 = vmatprep.subr.bf16.mxu1 %v5558_v22  ;;  %v5776_v59 = vld [vmem:[%s7173_s3 + $0xcc] ss:$16 sps:$4 sm:$0xff]   ;;  %v5782_v60 = vld [vmem:[%s7173_s3 + $0xc0] ss:$16 sps:$4 sm:$0xff]   ;;  %v5788_v61 = vld [vmem:[%s7173_s3 + $0xe4] ss:$16 sps:$4 sm:$0xff]  }
  0x15   :  { %7200 = vst [vmem:[#allocation4_spill] sm:$0xff] %v5776_v59  ;;  %7201 = vst [vmem:[#allocation5_spill] sm:$0xff] %v5782_v60  ;;  %v5794_v62 = vld [vmem:[%s7173_s3 + $0xc8] ss:$16 sps:$4 sm:$0xff]   ;;  %v5800_v63 = vld [vmem:[%s7173_s3 + $0xec] ss:$16 sps:$4 sm:$0xff]  }
  0x17   :  { %239 = vmatpush1.bf16.msra.mxu0 %v5564_v23  ;;  %280 = vmatpush1.bf16.msra.mxu1 %v5576_v25 }
  0x18   :  { %240 = vmatprep.subr.bf16.mxu0 %v5570_v24  ;;  %281 = vmatprep.subr.bf16.mxu1 %v5582_v26 }
  0x1b   :  { %241 = vmatpush1.bf16.msra.mxu0 %v5588_v27  ;;  %282 = vmatpush1.bf16.msra.mxu1 %v5600_v29 }
  0x1c   :  { %242 = vmatprep.subr.bf16.mxu0 %v5594_v28  ;;  %283 = vmatprep.subr.bf16.mxu1 %v5606_v30 }
  0x1f   :  { %243 = vmatpush1.bf16.msra.mxu0 %v5612_v31  ;;  %284 = vmatpush1.bf16.msra.mxu1 %v5624_v33 }
  0x20   :  { %538 = vmatprep.subr.bf16.mxu0 %v5618_v32  ;;  %579 = vmatprep.subr.bf16.mxu1 %v5630_v34 }
  0x22   :  { %261 = vmatmul.mubr.bf16.vlgmr.msra.gmra.mrb[0].mxu0 %v7180_v38  ;;  %302 = vmatmul.mubr.bf16.vlgmr.msra.gmra.mrb[0].mxu1 %v7180_v38  ;;  %v5813_v38 = vld [vmem:[%s7173_s3 + $0xe8] ss:$16 sps:$4 sm:$0xff]  }
  0x23   :  { %539 = vmatpush1.bf16.msra.mxu0 %v5636_v35  ;;  %570 = vmatprep.mubr.bf16.mxu0 %v7178_v1 }
  0x24   :  { %540 = vmatprep.subr.bf16.mxu0 %v5642_v36  ;;  %580 = vmatpush1.bf16.msra.mxu1 %v5648_v37 }
  0x25   :  { %611 = vmatprep.mubr.bf16.mxu1 %v7178_v1  ;;  %581 = vmatprep.subr.bf16.mxu1 %v5655_v39  ;;  %v5806_v1 = vld [vmem:[%s7173_s3 + $0xe0] ss:$16 sps:$4 sm:$0xff]  }
  0x27   :  { %541 = vmatpush1.bf16.msra.mxu0 %v5661_v40 }
  0x28   :  { %542 = vmatprep.subr.bf16.mxu0 %v5669_v41  ;;  %582 = vmatpush1.bf16.msra.mxu1 %v5675_v42 }
  0x29   :  { %583 = vmatprep.subr.bf16.mxu1 %v5682_v43 }
  0x2b   :  { %543 = vmatpush1.bf16.msra.mxu0 %v5688_v44 }
  0x2c   :  { %544 = vmatprep.subr.bf16.mxu0 %v5694_v45  ;;  %584 = vmatpush1.bf16.msra.mxu1 %v5700_v46 }
  0x2d   :  { %585 = vmatprep.subr.bf16.mxu1 %v5711_v48 }
  0x2f   :  { %545 = vmatpush1.bf16.msra.mxu0 %v5706_v47 }
  0x30   :  { %546 = vmatprep.subr.bf16.mxu0 %v5716_v49  ;;  %586 = vmatpush1.bf16.msra.mxu1 %v5722_v50 }
  0x31   :  { %587 = vmatprep.subr.bf16.mxu1 %v5728_v51 }
  0x33   :  { %547 = vmatpush1.bf16.msra.mxu0 %v5734_v52 }
  0x34   :  { %548 = vmatprep.subr.bf16.mxu0 %v5740_v53  ;;  %588 = vmatpush1.bf16.msra.mxu1 %v5746_v54 }
  0x35   :  { %589 = vmatprep.subr.bf16.mxu1 %v5752_v55 }
  0x37   :  { %549 = vmatpush1.bf16.msra.mxu0 %v5758_v56 }
  0x38   :  { %550 = vmatprep.subr.bf16.mxu0 %v5764_v57  ;;  %590 = vmatpush1.bf16.msra.mxu1 %v5770_v58 }
  0x39   :  { %591 = vmatprep.subr.bf16.mxu1 %v5776_v59  ;;  %v7202_v59 = vmov 0.0|0.0  }
  0x3b   :  { %551 = vmatpush1.bf16.msra.mxu0 %v5782_v60  ;;  %v7203_v60 = vmov 0  }
  0x3c   :  { %552 = vmatprep.subr.bf16.mxu0 %v5788_v61  ;;  %592 = vmatpush1.bf16.msra.mxu1 %v5794_v62 }
  0x3d   :  { %593 = vmatprep.subr.bf16.mxu1 %v5800_v63 }
  0x3f   :  { %553 = vmatpush1.bf16.msra.mxu0 %v5806_v1 }
  0x40   :  { %849 = vmatprep.subr.bf16.mxu0 %v5433_v0  ;;  %594 = vmatpush1.bf16.msra.mxu1 %v5813_v38  ;;  %v28_v0 = vld [vmem:[%s7174_s0] sm:$0xff] }
  0x41   :  { %890 = vmatprep.subr.bf16.mxu1 %v5446_v3  ;;  %v29_v3 = vld [vmem:[%s7174_s0 + $0x8] sm:$0xff] }
  0x42   :  { %571 = vmatmul.mubr.bf16.vlgmr.msra.gmra.mrb[4].mxu0 %v7202_v59 }
  0x43   :  { %850 = vmatpush1.bf16.msra.mxu0 %v5440_v2  ;;  %881 = vmatprep.mubr.bf16.mxu0 %v7203_v60  ;;  %v30_v2 = vunpack.c.l.bf16 %v28_v0 }
  0x44   :  { %612 = vmatmul.mubr.bf16.vlgmr.msra.gmra.mrb[4].mxu1 %v7202_v59  ;;  %851 = vmatprep.subr.bf16.mxu0 %v5452_v4  ;;  %v31_v4 = vunpack.c.h.bf16 %v28_v0  ;;  %v338_v59 = vld [vmem:[%s7175_s1 + $0x8] sm:$0xff] }
  0x45   :  { %891 = vmatpush1.bf16.msra.mxu1 %v5457_v5  ;;  %922 = vmatprep.mubr.bf16.mxu1 %v7203_v60 }
  0x46   :  { %892 = vmatprep.subr.bf16.mxu1 %v5468_v7 }
  0x47   :  { %852 = vmatpush1.bf16.msra.mxu0 %v5462_v6  ;;  %v33_v6 = vunpack.c.h.bf16 %v29_v3 }
  0x48   :  { %853 = vmatprep.subr.bf16.mxu0 %v5475_v8 }
  0x49   :  { %893 = vmatpush1.bf16.msra.mxu1 %v5481_v9 }
  0x4a   :  { %894 = vmatprep.subr.bf16.mxu1 %v5492_v11 }
  0x4b   :  { %854 = vmatpush1.bf16.msra.mxu0 %v5486_v10 }
  0x4c   :  { %855 = vmatprep.subr.bf16.mxu0 %v5498_v12 }
  0x4d   :  { %895 = vmatpush1.bf16.msra.mxu1 %v5504_v13 }
  0x4e   :  { %896 = vmatprep.subr.bf16.mxu1 %v5510_v14 }
  0x4f   :  { %856 = vmatpush1.bf16.msra.mxu0 %v5516_v15 }
  0x50   :  { %857 = vmatprep.subr.bf16.mxu0 %v5522_v16 }
  0x51   :  { %897 = vmatpush1.bf16.msra.mxu1 %v5528_v17 }
  0x52   :  { %898 = vmatprep.subr.bf16.mxu1 %v5534_v18  ;;  %v32_v18 = vunpack.c.l.bf16 %v29_v3 }
  0x53   :  { %858 = vmatpush1.bf16.msra.mxu0 %v5540_v19 }
  0x54   :  { %859 = vmatprep.subr.bf16.mxu0 %v5546_v20 }
  0x55   :  { %899 = vmatpush1.bf16.msra.mxu1 %v5552_v21 }
  0x56   :  { %900 = vmatprep.subr.bf16.mxu1 %v5558_v22 }
  0x57   :  { %860 = vmatpush1.bf16.msra.mxu0 %v5564_v23 }
  0x58   :  { %861 = vmatprep.subr.bf16.mxu0 %v5570_v24 }
  0x59   :  { %901 = vmatpush1.bf16.msra.mxu1 %v5576_v25 }
  0x5a   :  { %902 = vmatprep.subr.bf16.mxu1 %v5582_v26 }
  0x5b   :  { %862 = vmatpush1.bf16.msra.mxu0 %v5588_v27 }
  0x5c   :  { %863 = vmatprep.subr.bf16.mxu0 %v5594_v28 }
  0x5d   :  { %903 = vmatpush1.bf16.msra.mxu1 %v5600_v29 }
  0x5e   :  { %904 = vmatprep.subr.bf16.mxu1 %v5606_v30 }
  0x5f   :  { %864 = vmatpush1.bf16.msra.mxu0 %v5612_v31 }
  0x60   :  { %1160 = vmatprep.subr.bf16.mxu0 %v5618_v32  ;;  %v337_v32 = vld [vmem:[%s7175_s1] sm:$0xff] }
  0x61   :  { %905 = vmatpush1.bf16.msra.mxu1 %v5624_v33 }
  0x62   :  { %1201 = vmatprep.subr.bf16.mxu1 %v5630_v34  ;;  %v339_v34 = vunpack.c.l.bf16 %v337_v32 }
  0xf5   :  { %v262_v5 = vpop.f32.mrb[0].mxu0  ;;  %v303_v11 = vpop.f32.mrb[0].mxu1 }
  0xf6   :  { %v310_v7 = vadd.f32 %v262_v5, %v30_v2  ;;  %v264_v8 = vpop.f32.mrb[1].mxu0  ;;  %v305_v14 = vpop.f32.mrb[1].mxu1  ;;  %v312_v20 = vadd.f32 %v303_v11, %v32_v18  ;;  %v340_v2 = vunpack.c.h.bf16 %v337_v32  ;;  %v6020_v32 = vld [vmem:[%s7172_s2 + $0x8c] ss:$16 sps:$4 sm:$0xff]  }
  0xf7   :  { %v311_v9 = vadd.f32 %v264_v8, %v31_v4  ;;  %v266_v10 = vpop.f32.mrb[2].mxu0  ;;  %v313_v16 = vadd.f32 %v305_v14, %v33_v6  ;;  %v307_v17 = vpop.f32.mrb[2].mxu1  ;;  %v342_v4 = vunpack.c.h.bf16 %v338_v59 }
  0xf8   :  { %v314_v12 = vmul.f32 0.5, %v310_v7  ;;  %v267_v13 = vpop.f32.mrb[3].mxu0  ;;  %v308_v19 = vpop.f32.mrb[3].mxu1  ;;  %v316_v21 = vmul.f32 0.5, %v312_v20 }
  0xf9   :  { %v315_v15 = vmul.f32 0.5, %v311_v9  ;;  %v341_v19 = vunpack.c.l.bf16 %v338_v59  ;;  %v6039_v59 = vld [vmem:[%s7172_s2 + $0xa0] ss:$16 sps:$4 sm:$0xff]  }
  0xfa   :  { %5258 = vtanh.f32 %v314_v12 }
  0xfb   :  { %5260 = vtanh.f32 %v315_v15 }
  0xfc   :  { %5262 = vtanh.f32 %v313_v16 }
  0xfd   :  { %5264 = vtanh.f32 %v316_v21 }
 0x104   :  { %v5259_v22 = vpop.eup %5258 }
 0x105   :  { %v5261_v23 = vpop.eup %5260  ;;  %v320_v24 = vadd.f32 1.0, %v5259_v22 }
 0x106   :  { %v321_v25 = vadd.f32 1.0, %v5261_v23  ;;  %v5263_v26 = vpop.eup %5262 }
 0x107   :  { %v323_v27 = vmul.f32 0.5, %v320_v24  ;;  %v5265_v33 = vpop.eup %5264 }
 0x108   :  { %v324_v28 = vmul.f32 0.5, %v321_v25  ;;  %v322_v0 = vadd.f32 1.0, %v5265_v33  ;;  %v6025_v33 = vld [vmem:[%s7172_s2 + $0x80] ss:$16 sps:$4 sm:$0xff]  }
 0x109   :  { %v329_v29 = vmul.f32 %v5263_v26, %v323_v27  ;;  %v5991_v26 = vld [vmem:[%s7172_s2 + $0x64] ss:$16 sps:$4 sm:$0xff]   ;;  %v5996_v27 = vld [vmem:[%s7172_s2 + $0x6c] ss:$16 sps:$4 sm:$0xff]  }
 0x10a   :  { %v328_v30 = vmul.f32 0.0, %v324_v28  ;;  %v325_v7 = vmul.f32 0.5, %v322_v0  ;;  %v6001_v28 = vld [vmem:[%s7172_s2 + $0x60] ss:$16 sps:$4 sm:$0xff]   ;;  %v6044_v0 = vld [vmem:[%s7172_s2 + $0xa4] ss:$16 sps:$4 sm:$0xff]  }
 0x10c   :  { %v5864_v31 = vadd.f32 %v329_v29, %v328_v30  ;;  %v6006_v29 = vld [vmem:[%s7172_s2 + $0x68] ss:$16 sps:$4 sm:$0xff]   ;;  %v6015_v30 = vld [vmem:[%s7172_s2 + $0x84] ss:$16 sps:$4 sm:$0xff]  }
 0x10e   :  { %5266 = vtanh.f32 %v5864_v31 }
 0x115   :  { %v572_v3 = vpop.f32.mrb[4].mxu0 }
 0x116   :  { %v620_v5 = vadd.f32 %v572_v3, %v339_v34  ;;  %v574_v6 = vpop.f32.mrb[5].mxu0  ;;  %v6030_v34 = vld [vmem:[%s7172_s2 + $0x88] ss:$16 sps:$4 sm:$0xff]   ;;  %v6054_v3 = vld [vmem:[%s7172_s2 + $0xac] ss:$16 sps:$4 sm:$0xff]  }
 0x117   :  { %v621_v8 = vadd.f32 %v574_v6, %v340_v2  ;;  %v576_v9 = vpop.f32.mrb[6].mxu0  ;;  %v613_v10 = vpop.f32.mrb[4].mxu1  ;;  %v6049_v2 = vld [vmem:[%s7172_s2 + $0xa8] ss:$16 sps:$4 sm:$0xff]   ;;  %v6073_v6 = vld [vmem:[%s7172_s2 + $0xc0] ss:$16 sps:$4 sm:$0xff]  }
 0x118   :  { %v5267_v11 = vpop.eup %5266  ;;  %v624_v12 = vmul.f32 0.5, %v620_v5  ;;  %v577_v13 = vpop.f32.mrb[7].mxu0  ;;  %v622_v22 = vadd.f32 %v613_v10, %v341_v19  ;;  %v6068_v5 = vld [vmem:[%s7172_s2 + $0xcc] ss:$16 sps:$4 sm:$0xff]   ;;  %v6097_v10 = vld [vmem:[%s7172_s2 + $0xe0] ss:$16 sps:$4 sm:$0xff]  }
 0x119   :  { %v615_v14 = vpop.f32.mrb[5].mxu1  ;;  %v625_v15 = vmul.f32 0.5, %v621_v8  ;;  %v332_v18 = vmul.f32 %v5267_v11, %v325_v7  ;;  %v6078_v7 = vld [vmem:[%s7172_s2 + $0xc8] ss:$16 sps:$4 sm:$0xff]   ;;  %v6087_v8 = vld [vmem:[%s7172_s2 + $0xe4] ss:$16 sps:$4 sm:$0xff]  }
 0x11a   :  { %v623_v16 = vadd.f32 %v615_v14, %v342_v4  ;;  %v617_v17 = vpop.f32.mrb[6].mxu1  ;;  %5268 = vtanh.f32 %v624_v12  ;;  %v626_v23 = vmul.f32 0.5, %v622_v22  ;;  %v6063_v4 = vld [vmem:[%s7172_s2 + $0xc4] ss:$16 sps:$4 sm:$0xff]   ;;  %v6092_v9 = vld [vmem:[%s7172_s2 + $0xec] ss:$16 sps:$4 sm:$0xff]  }
 0x11b   :  { %v618_v20 = vpop.f32.mrb[7].mxu1  ;;  %5270 = vtanh.f32 %v625_v15  ;;  %v335_v21 = vpack.c.bf16 %v332_v18, %v332_v18  ;;  %v6102_v11 = vld [vmem:[%s7172_s2 + $0xe8] ss:$16 sps:$4 sm:$0xff]   ;;  %v6111_v12 = vld [vmem:[%s7173_s3 + $0x4] ss:$16 sps:$4 sm:$0xff]  }
 0x11c   :  { %5272 = vtanh.f32 %v623_v16  ;;  %v6116_v13 = vld [vmem:[%s7173_s3 + $0xc] ss:$16 sps:$4 sm:$0xff]   ;;  %v4452_v14 = vld [vmem:[%s7174_s0 + $0x10] sm:$0xff] }
 0x11d   :  { %336 = vst [vmem:[%s7176_s4] sm:$0xf] %v335_v21  ;;  %882 = vmatmul.mubr.bf16.vlgmr.msra.gmra.mrb[8].mxu0 %v335_v21  ;;  %923 = vmatmul.mubr.bf16.vlgmr.msra.gmra.mrb[8].mxu1 %v335_v21  ;;  %5274 = vtanh.f32 %v626_v23  ;;  %v651_v15 = vunpack.c.l.bf16 %v4452_v14  ;;  %v4453_v16 = vld [vmem:[%s7174_s0 + $0x18] sm:$0xff]  ;;  %v652_v17 = vunpack.c.h.bf16 %v4452_v14 }
 0x11e   :  { %1161 = vmatpush1.bf16.msra.mxu0 %v5636_v35  ;;  %1202 = vmatpush1.bf16.msra.mxu1 %v5648_v37  ;;  %v654_v22 = vunpack.c.h.bf16 %v4453_v16 }
 0x11f   :  { %1162 = vmatprep.subr.bf16.mxu0 %v5642_v36  ;;  %1203 = vmatprep.subr.bf16.mxu1 %v5655_v39 }
 0x120   :  { %1192 = vmatprep.mubr.bf16.mxu0 %v7203_v60  ;;  %1233 = vmatprep.mubr.bf16.mxu1 %v7203_v60 }
 0x122   :  { %1163 = vmatpush1.bf16.msra.mxu0 %v5661_v40  ;;  %1204 = vmatpush1.bf16.msra.mxu1 %v5675_v42 }
 0x123   :  { %1164 = vmatprep.subr.bf16.mxu0 %v5669_v41  ;;  %1205 = vmatprep.subr.bf16.mxu1 %v5682_v43 }
 0x124   :  { %v5269_v35 = vpop.eup %5268 }
 0x125   :  { %v5271_v24 = vpop.eup %5270  ;;  %v630_v37 = vadd.f32 1.0, %v5269_v35 }
 0x126   :  { %v631_v25 = vadd.f32 1.0, %v5271_v24  ;;  %1165 = vmatpush1.bf16.msra.mxu0 %v5688_v44  ;;  %1206 = vmatpush1.bf16.msra.mxu1 %v5700_v46  ;;  %v5273_v36 = vpop.eup %5272  ;;  %v7204_v46 = vld [vmem:[#allocation4_spill] sm:$0xff] }
 0x127   :  { %v633_v39 = vmul.f32 0.5, %v630_v37  ;;  %1166 = vmatprep.subr.bf16.mxu0 %v5694_v45  ;;  %1207 = vmatprep.subr.bf16.mxu1 %v5711_v48  ;;  %v5275_v44 = vpop.eup %5274 }
 0x128   :  { %v634_v40 = vmul.f32 0.5, %v631_v25  ;;  %v632_v45 = vadd.f32 1.0, %v5275_v44 }
 0x129   :  { %v640_v42 = vmul.f32 %v5273_v36, %v633_v39 }
 0x12a   :  { %v639_v41 = vmul.f32 0.0, %v634_v40  ;;  %1167 = vmatpush1.bf16.msra.mxu0 %v5706_v47  ;;  %1208 = vmatpush1.bf16.msra.mxu1 %v5722_v50  ;;  %v7205_v47 = vld [vmem:[#allocation5_spill] sm:$0xff]  ;;  %v635_v48 = vmul.f32 0.5, %v632_v45 }
 0x12b   :  { %1168 = vmatprep.subr.bf16.mxu0 %v5716_v49  ;;  %1209 = vmatprep.subr.bf16.mxu1 %v5728_v51 }
 0x12c   :  { %v5894_v43 = vadd.f32 %v640_v42, %v639_v41  ;;  %v653_v41 = vunpack.c.l.bf16 %v4453_v16  ;;  %v4487_v16 = vld [vmem:[%s7175_s1 + $0x10] sm:$0xff] }
 0x12e   :  { %5276 = vtanh.f32 %v5894_v43  ;;  %1169 = vmatpush1.bf16.msra.mxu0 %v5734_v52  ;;  %1210 = vmatpush1.bf16.msra.mxu1 %v5746_v54  ;;  %v5919_v52 = vld [vmem:[%s7172_s2 + $0x4] ss:$16 sps:$4 sm:$0xff]  }
 0x12f   :  { %1170 = vmatprep.subr.bf16.mxu0 %v5740_v53  ;;  %1211 = vmatprep.subr.bf16.mxu1 %v5752_v55  ;;  %v5934_v53 = vld [vmem:[%s7172_s2 + $0x8] ss:$16 sps:$4 sm:$0xff]   ;;  %v5943_v54 = vld [vmem:[%s7172_s2 + $0x24] ss:$16 sps:$4 sm:$0xff]   ;;  %v5948_v55 = vld [vmem:[%s7172_s2 + $0x2c] ss:$16 sps:$4 sm:$0xff]  }
 0x132   :  { %1171 = vmatpush1.bf16.msra.mxu0 %v5758_v56  ;;  %1212 = vmatpush1.bf16.msra.mxu1 %v5770_v58  ;;  %v5953_v56 = vld [vmem:[%s7172_s2 + $0x20] ss:$16 sps:$4 sm:$0xff]   ;;  %v5967_v58 = vld [vmem:[%s7172_s2 + $0x44] ss:$16 sps:$4 sm:$0xff]  }
 0x133   :  { %1172 = vmatprep.subr.bf16.mxu0 %v5764_v57  ;;  %1213 = vmatprep.subr.bf16.mxu1 %v7204_v46  ;;  %v5958_v57 = vld [vmem:[%s7172_s2 + $0x28] ss:$16 sps:$4 sm:$0xff]  }
 0x136   :  { %1173 = vmatpush1.bf16.msra.mxu0 %v7205_v47  ;;  %1214 = vmatpush1.bf16.msra.mxu1 %v5794_v62  ;;  %v5977_v62 = vld [vmem:[%s7172_s2 + $0x40] ss:$16 sps:$4 sm:$0xff]  }
 0x137   :  { %1174 = vmatprep.subr.bf16.mxu0 %v5788_v61  ;;  %1215 = vmatprep.subr.bf16.mxu1 %v5800_v63  ;;  %v5972_v61 = vld [vmem:[%s7172_s2 + $0x4c] ss:$16 sps:$4 sm:$0xff]   ;;  %v5982_v63 = vld [vmem:[%s7172_s2 + $0x48] ss:$16 sps:$4 sm:$0xff]  }
 0x138   :  { %v5277_v49 = vpop.eup %5276 }
 0x139   :  { %v643_v50 = vmul.f32 %v5277_v49, %v635_v48 }
 0x13a   :  { %1175 = vmatpush1.bf16.msra.mxu0 %v5806_v1  ;;  %1216 = vmatpush1.bf16.msra.mxu1 %v5813_v38  ;;  %v5924_v1 = vld [vmem:[%s7172_s2 + $0xc] ss:$16 sps:$4 sm:$0xff]   ;;  %v5929_v38 = vld [vmem:[%s7172_s2] ss:$16 sps:$4 sm:$0xff]  }
 0x13b   :  { %v646_v51 = vpack.c.bf16 %v643_v50, %v643_v50  ;;  %1471 = vmatprep.subr.bf16.mxu0 %v5919_v52  ;;  %1512 = vmatprep.subr.bf16.mxu1 %v5924_v1 }
 0x13d   :  { %647 = vst [vmem:[%s7177_s5] sm:$0xf] %v646_v51  ;;  %1193 = vmatmul.mubr.bf16.vlgmr.msra.gmra.mrb[12].mxu0 %v646_v51  ;;  %1234 = vmatmul.mubr.bf16.vlgmr.msra.gmra.mrb[12].mxu1 %v646_v51 }
 0x13e   :  { %1503 = vmatprep.mubr.bf16.mxu0 %v7203_v60  ;;  %1544 = vmatprep.mubr.bf16.mxu1 %v7203_v60 }
 0x13f   :  { %1472 = vmatpush1.bf16.msra.mxu0 %v5929_v38  ;;  %1513 = vmatpush1.bf16.msra.mxu1 %v5934_v53 }
 0x140   :  { %1473 = vmatprep.subr.bf16.mxu0 %v5943_v54  ;;  %1514 = vmatprep.subr.bf16.mxu1 %v5948_v55 }
 0x143   :  { %1474 = vmatpush1.bf16.msra.mxu0 %v5953_v56  ;;  %1515 = vmatpush1.bf16.msra.mxu1 %v5958_v57 }
 0x144   :  { %1475 = vmatprep.subr.bf16.mxu0 %v5967_v58  ;;  %1516 = vmatprep.subr.bf16.mxu1 %v5972_v61 }
 0x147   :  { %1476 = vmatpush1.bf16.msra.mxu0 %v5977_v62  ;;  %1517 = vmatpush1.bf16.msra.mxu1 %v5982_v63 }
 0x148   :  { %1477 = vmatprep.subr.bf16.mxu0 %v5991_v26  ;;  %1518 = vmatprep.subr.bf16.mxu1 %v5996_v27 }
 0x14b   :  { %1478 = vmatpush1.bf16.msra.mxu0 %v6001_v28  ;;  %1519 = vmatpush1.bf16.msra.mxu1 %v6006_v29 }
 0x14c   :  { %1479 = vmatprep.subr.bf16.mxu0 %v6015_v30  ;;  %1520 = vmatprep.subr.bf16.mxu1 %v6020_v32 }
 0x14f   :  { %1480 = vmatpush1.bf16.msra.mxu0 %v6025_v33  ;;  %1521 = vmatpush1.bf16.msra.mxu1 %v6030_v34 }
 0x150   :  { %1481 = vmatprep.subr.bf16.mxu0 %v6044_v0  ;;  %1522 = vmatprep.subr.bf16.mxu1 %v6054_v3 }
 0x153   :  { %1482 = vmatpush1.bf16.msra.mxu0 %v6039_v59  ;;  %1523 = vmatpush1.bf16.msra.mxu1 %v6049_v2 }
 0x154   :  { %1483 = vmatprep.subr.bf16.mxu0 %v6063_v4  ;;  %1524 = vmatprep.subr.bf16.mxu1 %v6068_v5 }
 0x157   :  { %1484 = vmatpush1.bf16.msra.mxu0 %v6073_v6  ;;  %1525 = vmatpush1.bf16.msra.mxu1 %v6078_v7 }
 0x158   :  { %1485 = vmatprep.subr.bf16.mxu0 %v6087_v8  ;;  %1526 = vmatprep.subr.bf16.mxu1 %v6092_v9 }
 0x15b   :  { %1486 = vmatpush1.bf16.msra.mxu0 %v6097_v10  ;;  %1527 = vmatpush1.bf16.msra.mxu1 %v6102_v11 }
 0x15c   :  { %1782 = vmatprep.subr.bf16.mxu0 %v6111_v12  ;;  %1823 = vmatprep.subr.bf16.mxu1 %v6116_v13 }
 0x1f0   :  { %v883_v18 = vpop.f32.mrb[8].mxu0  ;;  %v924_v19 = vpop.f32.mrb[8].mxu1 }
 0x1f1   :  { %v931_v20 = vadd.f32 %v883_v18, %v651_v15  ;;  %v885_v21 = vpop.f32.mrb[9].mxu0  ;;  %v926_v23 = vpop.f32.mrb[9].mxu1  ;;  %v933_v44 = vadd.f32 %v924_v19, %v653_v41 }
 0x1f2   :  { %v932_v35 = vadd.f32 %v885_v21, %v652_v17  ;;  %v887_v24 = vpop.f32.mrb[10].mxu0  ;;  %v928_v37 = vpop.f32.mrb[10].mxu1  ;;  %v934_v42 = vadd.f32 %v926_v23, %v654_v22  ;;  %v4488_v21 = vld [vmem:[%s7175_s1 + $0x18] sm:$0xff]  ;;  %v963_v22 = vunpack.c.h.bf16 %v4487_v16 }
 0x1f3   :  { %v935_v25 = vmul.f32 0.5, %v931_v20  ;;  %v888_v36 = vpop.f32.mrb[11].mxu0  ;;  %v929_v39 = vpop.f32.mrb[11].mxu1  ;;  %v937_v45 = vmul.f32 0.5, %v933_v44  ;;  %v962_v20 = vunpack.c.l.bf16 %v4487_v16  ;;  %v6149_v16 = vld [vmem:[%s7173_s3 + $0x24] ss:$16 sps:$4 sm:$0xff]  }
 0x1f4   :  { %v936_v40 = vmul.f32 0.5, %v932_v35 }
 0x1f5   :  { %5278 = vtanh.f32 %v935_v25  ;;  %v965_v25 = vunpack.c.h.bf16 %v4488_v21 }
 0x1f6   :  { %5280 = vtanh.f32 %v936_v40 }
 0x1f7   :  { %5282 = vtanh.f32 %v934_v42 }
 0x1f8   :  { %5284 = vtanh.f32 %v937_v45 }
 0x1ff   :  { %v5279_v46 = vpop.eup %5278 }
 0x200   :  { %v941_v47 = vadd.f32 1.0, %v5279_v46  ;;  %v5281_v48 = vpop.eup %5280 }
 0x201   :  { %v942_v50 = vadd.f32 1.0, %v5281_v48  ;;  %v5283_v51 = vpop.eup %5282 }
 0x202   :  { %v944_v49 = vmul.f32 0.5, %v941_v47  ;;  %v5285_v19 = vpop.eup %5284 }
 0x203   :  { %v945_v14 = vmul.f32 0.5, %v942_v50  ;;  %v943_v23 = vadd.f32 1.0, %v5285_v19  ;;  %v6154_v19 = vld [vmem:[%s7173_s3 + $0x2c] ss:$16 sps:$4 sm:$0xff]  }
 0x204   :  { %v950_v15 = vmul.f32 %v5283_v51, %v944_v49  ;;  %v964_v51 = vunpack.c.l.bf16 %v4488_v21  ;;  %v6164_v21 = vld [vmem:[%s7173_s3 + $0x20] ss:$16 sps:$4 sm:$0xff]  }
 0x205   :  { %v949_v17 = vmul.f32 %v945_v14, %v5864_v31  ;;  %v946_v41 = vmul.f32 0.5, %v943_v23  ;;  %v6139_v14 = vld [vmem:[%s7173_s3] ss:$16 sps:$4 sm:$0xff]   ;;  %v6176_v23 = vld [vmem:[%s7173_s3 + $0x44] ss:$16 sps:$4 sm:$0xff]  }
 0x207   :  { %v6127_v18 = vadd.f32 %v950_v15, %v949_v17  ;;  %v6144_v15 = vld [vmem:[%s7173_s3 + $0x8] ss:$16 sps:$4 sm:$0xff]  }
 0x209   :  { %5286 = vtanh.f32 %v6127_v18 }
 0x210   :  { %v1194_v35 = vpop.f32.mrb[12].mxu0  ;;  %v1235_v24 = vpop.f32.mrb[12].mxu1 }
 0x211   :  { %v1242_v37 = vadd.f32 %v1194_v35, %v962_v20  ;;  %v1196_v31 = vpop.f32.mrb[13].mxu0  ;;  %v1237_v36 = vpop.f32.mrb[13].mxu1  ;;  %v1244_v20 = vadd.f32 %v1235_v24, %v964_v51  ;;  %v6181_v35 = vld [vmem:[%s7173_s3 + $0x4c] ss:$16 sps:$4 sm:$0xff]  }
 0x212   :  { %v1243_v39 = vadd.f32 %v1196_v31, %v963_v22  ;;  %v1198_v40 = vpop.f32.mrb[14].mxu0  ;;  %v1239_v42 = vpop.f32.mrb[14].mxu1  ;;  %v1245_v49 = vadd.f32 %v1237_v36, %v965_v25  ;;  %v6169_v22 = vld [vmem:[%s7173_s3 + $0x28] ss:$16 sps:$4 sm:$0xff]   ;;  %v6202_v36 = vld [vmem:[%s7173_s3 + $0x64] ss:$16 sps:$4 sm:$0xff]  }
 0x213   :  { %v1246_v44 = vmul.f32 0.5, %v1242_v37  ;;  %v1199_v45 = vpop.f32.mrb[15].mxu0  ;;  %v1240_v46 = vpop.f32.mrb[15].mxu1  ;;  %v1248_v24 = vmul.f32 0.5, %v1244_v20  ;;  %v6190_v37 = vld [vmem:[%s7173_s3 + $0x40] ss:$16 sps:$4 sm:$0xff]  }
 0x214   :  { %v5287_v47 = vpop.eup %5286  ;;  %v1247_v48 = vmul.f32 0.5, %v1243_v39  ;;  %v6195_v31 = vld [vmem:[%s7173_s3 + $0x48] ss:$16 sps:$4 sm:$0xff]   ;;  %v6207_v39 = vld [vmem:[%s7173_s3 + $0x6c] ss:$16 sps:$4 sm:$0xff]  }
 0x215   :  { %5288 = vtanh.f32 %v1246_v44  ;;  %v953_v50 = vmul.f32 %v5287_v47, %v946_v41  ;;  %v6214_v45 = vld [vmem:[%s7173_s3 + $0x60] ss:$16 sps:$4 sm:$0xff]   ;;  %v6219_v46 = vld [vmem:[%s7173_s3 + $0x68] ss:$16 sps:$4 sm:$0xff]  }
 0x216   :  { %5290 = vtanh.f32 %v1247_v48  ;;  %v6226_v48 = vld [vmem:[%s7173_s3 + $0x84] ss:$16 sps:$4 sm:$0xff]   ;;  %v6239_v20 = vld [vmem:[%s7173_s3 + $0x80] ss:$16 sps:$4 sm:$0xff]  }
 0x217   :  { %v956_v17 = vpack.c.bf16 %v953_v50, %v953_v50  ;;  %5292 = vtanh.f32 %v1245_v49  ;;  %v6231_v49 = vld [vmem:[%s7173_s3 + $0x8c] ss:$16 sps:$4 sm:$0xff]  }
 0x218   :  { %5294 = vtanh.f32 %v1248_v24  ;;  %v6244_v24 = vld [vmem:[%s7173_s3 + $0x88] ss:$16 sps:$4 sm:$0xff]  }
 0x219   :  { %4486 = vst [vmem:[%s7176_s4 + $0x4] sm:$0xf] %v956_v17  ;;  %1504 = vmatmul.mubr.bf16.vlgmr.msra.gmra.mrb[16].mxu0 %v956_v17  ;;  %1545 = vmatmul.mubr.bf16.vlgmr.msra.gmra.mrb[16].mxu1 %v956_v17  ;;  %7206 = vst [vmem:[#allocation4_spill] sm:$0xff] %v6244_v24 }
 0x21a   :  { %1783 = vmatpush1.bf16.msra.mxu0 %v6139_v14  ;;  %1824 = vmatpush1.bf16.msra.mxu1 %v6144_v15 }
 0x21b   :  { %1784 = vmatprep.subr.bf16.mxu0 %v6149_v16  ;;  %1825 = vmatprep.subr.bf16.mxu1 %v6154_v19 }
 0x21c   :  { %1814 = vmatprep.mubr.bf16.mxu0 %v7203_v60  ;;  %1855 = vmatprep.mubr.bf16.mxu1 %v7203_v60 }
 0x21e   :  { %1785 = vmatpush1.bf16.msra.mxu0 %v6164_v21  ;;  %1826 = vmatpush1.bf16.msra.mxu1 %v6169_v22 }
 0x21f   :  { %v5289_v25 = vpop.eup %5288  ;;  %1786 = vmatprep.subr.bf16.mxu0 %v6176_v23  ;;  %1827 = vmatprep.subr.bf16.mxu1 %v6181_v35 }
 0x220   :  { %v1252_v40 = vadd.f32 1.0, %v5289_v25  ;;  %v5291_v42 = vpop.eup %5290  ;;  %v6256_v25 = vld [vmem:[%s7173_s3 + $0xac] ss:$16 sps:$4 sm:$0xff]  }
 0x221   :  { %v1253_v44 = vadd.f32 1.0, %v5291_v42  ;;  %v5293_v47 = vpop.eup %5292  ;;  %7208 = vst [vmem:[#allocation6_spill] sm:$0xff] %v6256_v25  ;;  %v6266_v42 = vld [vmem:[%s7173_s3 + $0xa0] ss:$16 sps:$4 sm:$0xff]  }
 0x222   :  { %v1255_v41 = vmul.f32 0.5, %v1252_v40  ;;  %1787 = vmatpush1.bf16.msra.mxu0 %v6190_v37  ;;  %1828 = vmatpush1.bf16.msra.mxu1 %v6195_v31  ;;  %7209 = vst [vmem:[#allocation7_spill] sm:$0xff] %v6266_v42 }
 0x223   :  { %1788 = vmatprep.subr.bf16.mxu0 %v6202_v36  ;;  %1829 = vmatprep.subr.bf16.mxu1 %v6207_v39  ;;  %v1256_v50 = vmul.f32 0.5, %v1253_v44  ;;  %v6278_v44 = vld [vmem:[%s7173_s3 + $0xc4] ss:$16 sps:$4 sm:$0xff]  }
 0x224   :  { %v1261_v51 = vmul.f32 %v5293_v47, %v1255_v41  ;;  %v6271_v41 = vld [vmem:[%s7173_s3 + $0xa8] ss:$16 sps:$4 sm:$0xff]   ;;  %7211 = vst [vmem:[#allocation9_spill] sm:$0xff] %v6278_v44  ;;  %v6283_v47 = vld [vmem:[%s7173_s3 + $0xcc] ss:$16 sps:$4 sm:$0xff]  }
 0x225   :  { %v1260_v17 = vmul.f32 %v1256_v50, %v5894_v43  ;;  %v6251_v43 = vld [vmem:[%s7173_s3 + $0xa4] ss:$16 sps:$4 sm:$0xff]   ;;  %7210 = vst [vmem:[#allocation8_spill] sm:$0xff] %v6271_v41  ;;  %7212 = vst [vmem:[#allocation10_spill] sm:$0xff] %v6283_v47  ;;  %v5295_v50 = vpop.eup %5294 }
 0x226   :  { %1789 = vmatpush1.bf16.msra.mxu0 %v6214_v45  ;;  %1830 = vmatpush1.bf16.msra.mxu1 %v6219_v46  ;;  %7207 = vst [vmem:[#allocation5_spill] sm:$0xff] %v6251_v43 }
 0x227   :  { %1790 = vmatprep.subr.bf16.mxu0 %v6226_v48  ;;  %1831 = vmatprep.subr.bf16.mxu1 %v6231_v49  ;;  %v6258_v40 = vadd.f32 %v1261_v51, %v1260_v17  ;;  %v6290_v51 = vld [vmem:[%s7173_s3 + $0xc0] ss:$16 sps:$4 sm:$0xff]   ;;  %v6295_v17 = vld [vmem:[%s7173_s3 + $0xc8] ss:$16 sps:$4 sm:$0xff]  }
 0x228   :  { %7213 = vst [vmem:[#allocation11_spill] sm:$0xff] %v6295_v17 }
 0x229   :  { %5296 = vtanh.f32 %v6258_v40 }
 0x22a   :  { %1791 = vmatpush1.bf16.msra.mxu0 %v6239_v20  ;;  %1832 = vmatpush1.bf16.msra.mxu1 %v6244_v24 }
 0x22b   :  { %1792 = vmatprep.subr.bf16.mxu0 %v6251_v43  ;;  %1833 = vmatprep.subr.bf16.mxu1 %v6256_v25  ;;  %v1254_v25 = vadd.f32 1.0, %v5295_v50  ;;  %v6314_v50 = vld [vmem:[%s7173_s3 + $0xe0] ss:$16 sps:$4 sm:$0xff]  }
 0x22e   :  { %1793 = vmatpush1.bf16.msra.mxu0 %v6266_v42  ;;  %1834 = vmatpush1.bf16.msra.mxu1 %v6271_v41  ;;  %v6302_v42 = vld [vmem:[%s7173_s3 + $0xe4] ss:$16 sps:$4 sm:$0xff]   ;;  %v6307_v41 = vld [vmem:[%s7173_s3 + $0xec] ss:$16 sps:$4 sm:$0xff]  }
 0x22f   :  { %1794 = vmatprep.subr.bf16.mxu0 %v6278_v44  ;;  %1835 = vmatprep.subr.bf16.mxu1 %v6283_v47  ;;  %v6319_v47 = vld [vmem:[%s7173_s3 + $0xe8] ss:$16 sps:$4 sm:$0xff]   ;;  %v1257_v44 = vmul.f32 0.5, %v1254_v25 }
 0x232   :  { %1795 = vmatpush1.bf16.msra.mxu0 %v6290_v51  ;;  %1836 = vmatpush1.bf16.msra.mxu1 %v6295_v17 }
 0x233   :  { %1796 = vmatprep.subr.bf16.mxu0 %v6302_v42  ;;  %1837 = vmatprep.subr.bf16.mxu1 %v6307_v41  ;;  %v5297_v43 = vpop.eup %5296 }
 0x234   :  { %v1264_v24 = vmul.f32 %v5297_v43, %v1257_v44 }
 0x236   :  { %1797 = vmatpush1.bf16.msra.mxu0 %v6314_v50  ;;  %1838 = vmatpush1.bf16.msra.mxu1 %v6319_v47  ;;  %v1267_v17 = vpack.c.bf16 %v1264_v24, %v1264_v24  ;;  %v4558_v24 = vld [vmem:[%s7175_s1 + $0x28] sm:$0xff] }
 0x237   :  { %2093 = vmatprep.subr.bf16.mxu0 %v5919_v52  ;;  %2134 = vmatprep.subr.bf16.mxu1 %v5924_v1  ;;  %v4522_v52 = vld [vmem:[%s7174_s0 + $0x20] sm:$0xff] }
 0x238   :  { %4521 = vst [vmem:[%s7177_s5 + $0x4] sm:$0xf] %v1267_v17  ;;  %v1273_v1 = vunpack.c.l.bf16 %v4522_v52 }
 0x239   :  { %1815 = vmatmul.mubr.bf16.vlgmr.msra.gmra.mrb[20].mxu0 %v1267_v17  ;;  %1856 = vmatmul.mubr.bf16.vlgmr.msra.gmra.mrb[20].mxu1 %v1267_v17 }
 0x23a   :  { %2094 = vmatpush1.bf16.msra.mxu0 %v5929_v38  ;;  %2135 = vmatpush1.bf16.msra.mxu1 %v5934_v53  ;;  %v4523_v38 = vld [vmem:[%s7174_s0 + $0x28] sm:$0xff]  ;;  %v1274_v53 = vunpack.c.h.bf16 %v4522_v52 }
 0x23b   :  { %2095 = vmatprep.subr.bf16.mxu0 %v5943_v54  ;;  %2136 = vmatprep.subr.bf16.mxu1 %v5948_v55 }
 0x23c   :  { %2125 = vmatprep.mubr.bf16.mxu0 %v7203_v60  ;;  %2166 = vmatprep.mubr.bf16.mxu1 %v7203_v60 }
 0x23e   :  { %2096 = vmatpush1.bf16.msra.mxu0 %v5953_v56  ;;  %2137 = vmatpush1.bf16.msra.mxu1 %v5958_v57 }
 0x23f   :  { %2097 = vmatprep.subr.bf16.mxu0 %v5967_v58  ;;  %2138 = vmatprep.subr.bf16.mxu1 %v5972_v61  ;;  %v1276_v58 = vunpack.c.h.bf16 %v4523_v38 }
 0x242   :  { %2098 = vmatpush1.bf16.msra.mxu0 %v5977_v62  ;;  %2139 = vmatpush1.bf16.msra.mxu1 %v5982_v63 }
 0x243   :  { %2099 = vmatprep.subr.bf16.mxu0 %v5991_v26  ;;  %2140 = vmatprep.subr.bf16.mxu1 %v5996_v27 }
 0x246   :  { %2100 = vmatpush1.bf16.msra.mxu0 %v6001_v28  ;;  %2141 = vmatpush1.bf16.msra.mxu1 %v6006_v29 }
 0x247   :  { %2101 = vmatprep.subr.bf16.mxu0 %v6015_v30  ;;  %2142 = vmatprep.subr.bf16.mxu1 %v6020_v32 }
 0x24a   :  { %2102 = vmatpush1.bf16.msra.mxu0 %v6025_v33  ;;  %2143 = vmatpush1.bf16.msra.mxu1 %v6030_v34  ;;  %v1275_v33 = vunpack.c.l.bf16 %v4523_v38 }
 0x24b   :  { %2103 = vmatprep.subr.bf16.mxu0 %v6044_v0  ;;  %2144 = vmatprep.subr.bf16.mxu1 %v6054_v3 }
 0x24e   :  { %2104 = vmatpush1.bf16.msra.mxu0 %v6039_v59  ;;  %2145 = vmatpush1.bf16.msra.mxu1 %v6049_v2 }
 0x24f   :  { %2105 = vmatprep.subr.bf16.mxu0 %v6063_v4  ;;  %2146 = vmatprep.subr.bf16.mxu1 %v6068_v5 }
 0x252   :  { %2106 = vmatpush1.bf16.msra.mxu0 %v6073_v6  ;;  %2147 = vmatpush1.bf16.msra.mxu1 %v6078_v7 }
 0x253   :  { %2107 = vmatprep.subr.bf16.mxu0 %v6087_v8  ;;  %2148 = vmatprep.subr.bf16.mxu1 %v6092_v9 }
 0x256   :  { %2108 = vmatpush1.bf16.msra.mxu0 %v6097_v10  ;;  %2149 = vmatpush1.bf16.msra.mxu1 %v6102_v11  ;;  %v4557_v11 = vld [vmem:[%s7175_s1 + $0x20] sm:$0xff] }
 0x257   :  { %2404 = vmatprep.subr.bf16.mxu0 %v6111_v12  ;;  %2445 = vmatprep.subr.bf16.mxu1 %v6116_v13  ;;  %v1584_v13 = vunpack.c.l.bf16 %v4557_v11  ;;  %v1585_v43 = vunpack.c.h.bf16 %v4557_v11  ;;  %v6490_v11 = vld [vmem:[%s7172_s2 + $0x48] ss:$16 sps:$4 sm:$0xff]  }
 0x2ec   :  { %v1505_v54 = vpop.f32.mrb[16].mxu0  ;;  %v1546_v55 = vpop.f32.mrb[16].mxu1 }
 0x2ed   :  { %v1553_v56 = vadd.f32 %v1505_v54, %v1273_v1  ;;  %v1507_v57 = vpop.f32.mrb[17].mxu0  ;;  %v1548_v61 = vpop.f32.mrb[17].mxu1  ;;  %v1555_v34 = vadd.f32 %v1546_v55, %v1275_v33  ;;  %v1587_v1 = vunpack.c.h.bf16 %v4558_v24 }
 0x2ee   :  { %v1554_v62 = vadd.f32 %v1507_v57, %v1274_v53  ;;  %v1509_v63 = vpop.f32.mrb[18].mxu0  ;;  %v1550_v26 = vpop.f32.mrb[18].mxu1  ;;  %v1556_v32 = vadd.f32 %v1548_v61, %v1276_v58 }
 0x2ef   :  { %v1557_v27 = vmul.f32 0.5, %v1553_v56  ;;  %v1510_v28 = vpop.f32.mrb[19].mxu0  ;;  %v1551_v29 = vpop.f32.mrb[19].mxu1  ;;  %v1559_v59 = vmul.f32 0.5, %v1555_v34 }
 0x2f0   :  { %v1558_v30 = vmul.f32 0.5, %v1554_v62  ;;  %v1586_v28 = vunpack.c.l.bf16 %v4558_v24  ;;  %v6509_v24 = vld [vmem:[%s7172_s2 + $0x60] ss:$16 sps:$4 sm:$0xff]  }
 0x2f1   :  { %5298 = vtanh.f32 %v1557_v27 }
 0x2f2   :  { %5300 = vtanh.f32 %v1558_v30 }
 0x2f3   :  { %5302 = vtanh.f32 %v1556_v32 }
 0x2f4   :  { %5304 = vtanh.f32 %v1559_v59  ;;  %v7221_v59 = vld [vmem:[#allocation11_spill] sm:$0xff] }
 0x2fb   :  { %v5299_v0 = vpop.eup %5298 }
 0x2fc   :  { %v1563_v2 = vadd.f32 1.0, %v5299_v0  ;;  %v5301_v3 = vpop.eup %5300 }
 0x2fd   :  { %v1564_v5 = vadd.f32 1.0, %v5301_v3  ;;  %v5303_v6 = vpop.eup %5302 }
 0x2fe   :  { %v1566_v4 = vmul.f32 0.5, %v1563_v2  ;;  %v5305_v12 = vpop.eup %5304 }
 0x2ff   :  { %v1567_v7 = vmul.f32 0.5, %v1564_v5  ;;  %v1565_v25 = vadd.f32 1.0, %v5305_v12  ;;  %v6461_v5 = vld [vmem:[%s7172_s2 + $0x20] ss:$16 sps:$4 sm:$0xff]   ;;  %v6499_v12 = vld [vmem:[%s7172_s2 + $0x64] ss:$16 sps:$4 sm:$0xff]  }
 0x300   :  { %v1572_v8 = vmul.f32 %v5303_v6, %v1566_v4  ;;  %v6456_v4 = vld [vmem:[%s7172_s2 + $0x2c] ss:$16 sps:$4 sm:$0xff]   ;;  %v6466_v6 = vld [vmem:[%s7172_s2 + $0x28] ss:$16 sps:$4 sm:$0xff]  }
 0x301   :  { %v1571_v9 = vmul.f32 %v1567_v7, %v6127_v18  ;;  %v1568_v56 = vmul.f32 0.5, %v1565_v25  ;;  %v6475_v7 = vld [vmem:[%s7172_s2 + $0x44] ss:$16 sps:$4 sm:$0xff]  }
 0x302   :  { %v6523_v25 = vld [vmem:[%s7172_s2 + $0x84] ss:$16 sps:$4 sm:$0xff]  }
 0x303   :  { %v6371_v10 = vadd.f32 %v1572_v8, %v1571_v9  ;;  %v6480_v8 = vld [vmem:[%s7172_s2 + $0x4c] ss:$16 sps:$4 sm:$0xff]   ;;  %v6485_v9 = vld [vmem:[%s7172_s2 + $0x40] ss:$16 sps:$4 sm:$0xff]  }
 0x305   :  { %5306 = vtanh.f32 %v6371_v10 }
 0x30c   :  { %v1816_v44 = vpop.f32.mrb[20].mxu0  ;;  %v1857_v17 = vpop.f32.mrb[20].mxu1 }
 0x30d   :  { %v1864_v52 = vadd.f32 %v1816_v44, %v1584_v13  ;;  %v1818_v18 = vpop.f32.mrb[21].mxu0  ;;  %v1859_v38 = vpop.f32.mrb[21].mxu1  ;;  %v1866_v30 = vadd.f32 %v1857_v17, %v1586_v28  ;;  %v6504_v13 = vld [vmem:[%s7172_s2 + $0x6c] ss:$16 sps:$4 sm:$0xff]   ;;  %v6533_v17 = vld [vmem:[%s7172_s2 + $0x80] ss:$16 sps:$4 sm:$0xff]  }
 0x30e   :  { %v1865_v53 = vadd.f32 %v1818_v18, %v1585_v43  ;;  %v1820_v54 = vpop.f32.mrb[22].mxu0  ;;  %v1861_v55 = vpop.f32.mrb[22].mxu1  ;;  %v1867_v26 = vadd.f32 %v1859_v38, %v1587_v1  ;;  %v6514_v43 = vld [vmem:[%s7172_s2 + $0x68] ss:$16 sps:$4 sm:$0xff]   ;;  %v6528_v44 = vld [vmem:[%s7172_s2 + $0x8c] ss:$16 sps:$4 sm:$0xff]  }
 0x30f   :  { %v1868_v57 = vmul.f32 0.5, %v1864_v52  ;;  %v1821_v58 = vpop.f32.mrb[23].mxu0  ;;  %v1862_v61 = vpop.f32.mrb[23].mxu1  ;;  %v1870_v32 = vmul.f32 0.5, %v1866_v30  ;;  %v6538_v52 = vld [vmem:[%s7172_s2 + $0x88] ss:$16 sps:$4 sm:$0xff]  }
 0x310   :  { %v5307_v62 = vpop.eup %5306  ;;  %v1869_v63 = vmul.f32 0.5, %v1865_v53  ;;  %v6547_v18 = vld [vmem:[%s7172_s2 + $0xa0] ss:$16 sps:$4 sm:$0xff]   ;;  %v6552_v1 = vld [vmem:[%s7172_s2 + $0xa4] ss:$16 sps:$4 sm:$0xff]   ;;  %v4593_v30 = vld [vmem:[%s7174_s0 + $0x38] sm:$0xff] }
 0x311   :  { %5308 = vtanh.f32 %v1868_v57  ;;  %v1575_v27 = vmul.f32 %v5307_v62, %v1568_v56  ;;  %v6557_v38 = vld [vmem:[%s7172_s2 + $0xa8] ss:$16 sps:$4 sm:$0xff]   ;;  %v6562_v53 = vld [vmem:[%s7172_s2 + $0xac] ss:$16 sps:$4 sm:$0xff]   ;;  %v6571_v54 = vld [vmem:[%s7172_s2 + $0xc4] ss:$16 sps:$4 sm:$0xff]  }
 0x312   :  { %5310 = vtanh.f32 %v1869_v63  ;;  %v6576_v55 = vld [vmem:[%s7172_s2 + $0xcc] ss:$16 sps:$4 sm:$0xff]   ;;  %v6581_v56 = vld [vmem:[%s7172_s2 + $0xc0] ss:$16 sps:$4 sm:$0xff]   ;;  %v6586_v57 = vld [vmem:[%s7172_s2 + $0xc8] ss:$16 sps:$4 sm:$0xff]  }
 0x313   :  { %v1578_v29 = vpack.c.bf16 %v1575_v27, %v1575_v27  ;;  %5312 = vtanh.f32 %v1867_v26  ;;  %v6595_v58 = vld [vmem:[%s7172_s2 + $0xe4] ss:$16 sps:$4 sm:$0xff]   ;;  %v6600_v61 = vld [vmem:[%s7172_s2 + $0xec] ss:$16 sps:$4 sm:$0xff]   ;;  %v6605_v62 = vld [vmem:[%s7172_s2 + $0xe0] ss:$16 sps:$4 sm:$0xff]  }
 0x314   :  { %5314 = vtanh.f32 %v1870_v32  ;;  %v6610_v63 = vld [vmem:[%s7172_s2 + $0xe8] ss:$16 sps:$4 sm:$0xff]   ;;  %v6619_v26 = vld [vmem:[%s7173_s3 + $0x4] ss:$16 sps:$4 sm:$0xff]   ;;  %v6624_v27 = vld [vmem:[%s7173_s3 + $0xc] ss:$16 sps:$4 sm:$0xff]  }
 0x315   :  { %4556 = vst [vmem:[%s7176_s4 + $0x8] sm:$0xf] %v1578_v29  ;;  %2126 = vmatmul.mubr.bf16.vlgmr.msra.gmra.mrb[24].mxu0 %v1578_v29  ;;  %2167 = vmatmul.mubr.bf16.vlgmr.msra.gmra.mrb[24].mxu1 %v1578_v29  ;;  %v4592_v28 = vld [vmem:[%s7174_s0 + $0x30] sm:$0xff] }
 0x316   :  { %2405 = vmatpush1.bf16.msra.mxu0 %v6139_v14  ;;  %2446 = vmatpush1.bf16.msra.mxu1 %v6144_v15  ;;  %v1895_v29 = vunpack.c.l.bf16 %v4592_v28  ;;  %v1896_v32 = vunpack.c.h.bf16 %v4592_v28 }
 0x317   :  { %2406 = vmatprep.subr.bf16.mxu0 %v6149_v16  ;;  %2447 = vmatprep.subr.bf16.mxu1 %v6154_v19 }
 0x318   :  { %2436 = vmatprep.mubr.bf16.mxu0 %v7203_v60  ;;  %2477 = vmatprep.mubr.bf16.mxu1 %v7203_v60 }
 0x31a   :  { %2407 = vmatpush1.bf16.msra.mxu0 %v6164_v21  ;;  %2448 = vmatpush1.bf16.msra.mxu1 %v6169_v22 }
 0x31b   :  { %v5309_v33 = vpop.eup %5308  ;;  %2408 = vmatprep.subr.bf16.mxu0 %v6176_v23  ;;  %2449 = vmatprep.subr.bf16.mxu1 %v6181_v35 }
 0x31c   :  { %v1874_v14 = vadd.f32 1.0, %v5309_v33  ;;  %v5311_v15 = vpop.eup %5310 }
 0x31d   :  { %v1875_v16 = vadd.f32 1.0, %v5311_v15  ;;  %v5313_v19 = vpop.eup %5312 }
 0x31e   :  { %v1877_v34 = vmul.f32 0.5, %v1874_v14  ;;  %2409 = vmatpush1.bf16.msra.mxu0 %v6190_v37  ;;  %2450 = vmatpush1.bf16.msra.mxu1 %v6195_v31  ;;  %v7214_v37 = vld [vmem:[#allocation4_spill] sm:$0xff]  ;;  %v7215_v31 = vld [vmem:[#allocation5_spill] sm:$0xff] }
 0x31f   :  { %2410 = vmatprep.subr.bf16.mxu0 %v6202_v36  ;;  %2451 = vmatprep.subr.bf16.mxu1 %v6207_v39  ;;  %v1878_v21 = vmul.f32 0.5, %v1875_v16  ;;  %v7216_v36 = vld [vmem:[#allocation6_spill] sm:$0xff]  ;;  %v5315_v39 = vpop.eup %5314  ;;  %v1898_v16 = vunpack.c.h.bf16 %v4593_v30 }
 0x320   :  { %v1883_v22 = vmul.f32 %v5313_v19, %v1877_v34 }
 0x321   :  { %v1882_v23 = vmul.f32 %v1878_v21, %v6258_v40  ;;  %v7219_v40 = vld [vmem:[#allocation9_spill] sm:$0xff] }
 0x322   :  { %2411 = vmatpush1.bf16.msra.mxu0 %v6214_v45  ;;  %2452 = vmatpush1.bf16.msra.mxu1 %v6219_v46  ;;  %v7217_v45 = vld [vmem:[#allocation7_spill] sm:$0xff]  ;;  %v7218_v46 = vld [vmem:[#allocation8_spill] sm:$0xff] }
 0x323   :  { %2412 = vmatprep.subr.bf16.mxu0 %v6226_v48  ;;  %2453 = vmatprep.subr.bf16.mxu1 %v6231_v49  ;;  %v6402_v35 = vadd.f32 %v1883_v22, %v1882_v23  ;;  %v1876_v48 = vadd.f32 1.0, %v5315_v39  ;;  %v7220_v49 = vld [vmem:[#allocation10_spill] sm:$0xff] }
 0x325   :  { %5316 = vtanh.f32 %v6402_v35 }
 0x326   :  { %2413 = vmatpush1.bf16.msra.mxu0 %v6239_v20  ;;  %2454 = vmatpush1.bf16.msra.mxu1 %v7214_v37  ;;  %v1879_v20 = vmul.f32 0.5, %v1876_v48 }
 0x327   :  { %2414 = vmatprep.subr.bf16.mxu0 %v7215_v31  ;;  %2455 = vmatprep.subr.bf16.mxu1 %v7216_v36 }
 0x32a   :  { %2415 = vmatpush1.bf16.msra.mxu0 %v7217_v45  ;;  %2456 = vmatpush1.bf16.msra.mxu1 %v7218_v46  ;;  %v1897_v46 = vunpack.c.l.bf16 %v4593_v30  ;;  %v4627_v30 = vld [vmem:[%s7175_s1 + $0x30] sm:$0xff] }
 0x32b   :  { %2416 = vmatprep.subr.bf16.mxu0 %v7219_v40  ;;  %2457 = vmatprep.subr.bf16.mxu1 %v7220_v49 }
 0x32e   :  { %2417 = vmatpush1.bf16.msra.mxu0 %v6290_v51  ;;  %2458 = vmatpush1.bf16.msra.mxu1 %v7221_v59  ;;  %v6442_v51 = vld [vmem:[%s7172_s2 + $0x8] ss:$16 sps:$4 sm:$0xff]  }
 0x32f   :  { %2418 = vmatprep.subr.bf16.mxu0 %v6302_v42  ;;  %2459 = vmatprep.subr.bf16.mxu1 %v6307_v41  ;;  %v5317_v0 = vpop.eup %5316  ;;  %v6427_v42 = vld [vmem:[%s7172_s2 + $0x4] ss:$16 sps:$4 sm:$0xff]   ;;  %v6432_v41 = vld [vmem:[%s7172_s2 + $0xc] ss:$16 sps:$4 sm:$0xff]  }
 0x330   :  { %v1886_v2 = vmul.f32 %v5317_v0, %v1879_v20 }
 0x332   :  { %2419 = vmatpush1.bf16.msra.mxu0 %v6314_v50  ;;  %2460 = vmatpush1.bf16.msra.mxu1 %v6319_v47  ;;  %v1889_v3 = vpack.c.bf16 %v1886_v2, %v1886_v2  ;;  %v6437_v47 = vld [vmem:[%s7172_s2] ss:$16 sps:$4 sm:$0xff]   ;;  %v6451_v50 = vld [vmem:[%s7172_s2 + $0x24] ss:$16 sps:$4 sm:$0xff]  }
 0x333   :  { %2715 = vmatprep.subr.bf16.mxu0 %v6427_v42  ;;  %2756 = vmatprep.subr.bf16.mxu1 %v6432_v41 }
 0x334   :  { %4591 = vst [vmem:[%s7177_s5 + $0x8] sm:$0xf] %v1889_v3 }
 0x335   :  { %2437 = vmatmul.mubr.bf16.vlgmr.msra.gmra.mrb[28].mxu0 %v1889_v3  ;;  %2478 = vmatmul.mubr.bf16.vlgmr.msra.gmra.mrb[28].mxu1 %v1889_v3 }
 0x336   :  { %2747 = vmatprep.mubr.bf16.mxu0 %v7203_v60  ;;  %2788 = vmatprep.mubr.bf16.mxu1 %v7203_v60 }
 0x337   :  { %2716 = vmatpush1.bf16.msra.mxu0 %v6437_v47  ;;  %2757 = vmatpush1.bf16.msra.mxu1 %v6442_v51 }
 0x338   :  { %2717 = vmatprep.subr.bf16.mxu0 %v6451_v50  ;;  %2758 = vmatprep.subr.bf16.mxu1 %v6456_v4 }
 0x33b   :  { %2718 = vmatpush1.bf16.msra.mxu0 %v6461_v5  ;;  %2759 = vmatpush1.bf16.msra.mxu1 %v6466_v6 }
 0x33c   :  { %2719 = vmatprep.subr.bf16.mxu0 %v6475_v7  ;;  %2760 = vmatprep.subr.bf16.mxu1 %v6480_v8 }
 0x33f   :  { %2720 = vmatpush1.bf16.msra.mxu0 %v6485_v9  ;;  %2761 = vmatpush1.bf16.msra.mxu1 %v6490_v11 }
 0x340   :  { %2721 = vmatprep.subr.bf16.mxu0 %v6499_v12  ;;  %2762 = vmatprep.subr.bf16.mxu1 %v6504_v13 }
 0x343   :  { %2722 = vmatpush1.bf16.msra.mxu0 %v6509_v24  ;;  %2763 = vmatpush1.bf16.msra.mxu1 %v6514_v43 }
 0x344   :  { %2723 = vmatprep.subr.bf16.mxu0 %v6523_v25  ;;  %2764 = vmatprep.subr.bf16.mxu1 %v6528_v44 }
 0x347   :  { %2724 = vmatpush1.bf16.msra.mxu0 %v6533_v17  ;;  %2765 = vmatpush1.bf16.msra.mxu1 %v6538_v52 }
 0x348   :  { %2725 = vmatprep.subr.bf16.mxu0 %v6552_v1  ;;  %2766 = vmatprep.subr.bf16.mxu1 %v6562_v53 }
 0x34b   :  { %2726 = vmatpush1.bf16.msra.mxu0 %v6547_v18  ;;  %2767 = vmatpush1.bf16.msra.mxu1 %v6557_v38 }
 0x34c   :  { %2727 = vmatprep.subr.bf16.mxu0 %v6571_v54  ;;  %2768 = vmatprep.subr.bf16.mxu1 %v6576_v55 }
 0x34f   :  { %2728 = vmatpush1.bf16.msra.mxu0 %v6581_v56  ;;  %2769 = vmatpush1.bf16.msra.mxu1 %v6586_v57 }
 0x350   :  { %2729 = vmatprep.subr.bf16.mxu0 %v6595_v58  ;;  %2770 = vmatprep.subr.bf16.mxu1 %v6600_v61 }
 0x353   :  { %2730 = vmatpush1.bf16.msra.mxu0 %v6605_v62  ;;  %2771 = vmatpush1.bf16.msra.mxu1 %v6610_v63 }
 0x354   :  { %3026 = vmatprep.subr.bf16.mxu0 %v6619_v26  ;;  %3067 = vmatprep.subr.bf16.mxu1 %v6624_v27 }
 0x3e8   :  { %v2127_v33 = vpop.f32.mrb[24].mxu0  ;;  %v2168_v14 = vpop.f32.mrb[24].mxu1 }
 0x3e9   :  { %v2175_v15 = vadd.f32 %v2127_v33, %v1895_v29  ;;  %v2129_v34 = vpop.f32.mrb[25].mxu0  ;;  %v2170_v19 = vpop.f32.mrb[25].mxu1  ;;  %v2177_v48 = vadd.f32 %v2168_v14, %v1897_v46 }
 0x3ea   :  { %v2176_v21 = vadd.f32 %v2129_v34, %v1896_v32  ;;  %v2131_v22 = vpop.f32.mrb[26].mxu0  ;;  %v2172_v23 = vpop.f32.mrb[26].mxu1  ;;  %v2178_v45 = vadd.f32 %v2170_v19, %v1898_v16  ;;  %v4628_v34 = vld [vmem:[%s7175_s1 + $0x38] sm:$0xff]  ;;  %v2207_v16 = vunpack.c.h.bf16 %v4627_v30 }
 0x3eb   :  { %v2179_v37 = vmul.f32 0.5, %v2175_v15  ;;  %v2132_v31 = vpop.f32.mrb[27].mxu0  ;;  %v2173_v36 = vpop.f32.mrb[27].mxu1  ;;  %v2181_v40 = vmul.f32 0.5, %v2177_v48  ;;  %v2206_v15 = vunpack.c.l.bf16 %v4627_v30  ;;  %v6657_v30 = vld [vmem:[%s7173_s3 + $0x24] ss:$16 sps:$4 sm:$0xff]  }
 0x3ec   :  { %v2180_v39 = vmul.f32 0.5, %v2176_v21 }
 0x3ed   :  { %5318 = vtanh.f32 %v2179_v37  ;;  %v2209_v37 = vunpack.c.h.bf16 %v4628_v34 }
 0x3ee   :  { %5320 = vtanh.f32 %v2180_v39 }
 0x3ef   :  { %5322 = vtanh.f32 %v2178_v45 }
 0x3f0   :  { %5324 = vtanh.f32 %v2181_v40 }
 0x3f7   :  { %v5319_v49 = vpop.eup %5318 }
 0x3f8   :  { %v2185_v59 = vadd.f32 1.0, %v5319_v49  ;;  %v5321_v20 = vpop.eup %5320 }
 0x3f9   :  { %v2186_v2 = vadd.f32 1.0, %v5321_v20  ;;  %v5323_v3 = vpop.eup %5322 }
 0x3fa   :  { %v2188_v0 = vmul.f32 0.5, %v2185_v59  ;;  %v5325_v14 = vpop.eup %5324 }
 0x3fb   :  { %v2189_v28 = vmul.f32 0.5, %v2186_v2  ;;  %v2187_v19 = vadd.f32 1.0, %v5325_v14  ;;  %v6662_v14 = vld [vmem:[%s7173_s3 + $0x2c] ss:$16 sps:$4 sm:$0xff]  }
 0x3fc   :  { %v2194_v29 = vmul.f32 %v5323_v3, %v2188_v0  ;;  %v2208_v3 = vunpack.c.l.bf16 %v4628_v34  ;;  %v6672_v34 = vld [vmem:[%s7173_s3 + $0x20] ss:$16 sps:$4 sm:$0xff]  }
 0x3fd   :  { %v2193_v32 = vmul.f32 %v2189_v28, %v6371_v10  ;;  %v2190_v46 = vmul.f32 0.5, %v2187_v19  ;;  %v6647_v28 = vld [vmem:[%s7173_s3] ss:$16 sps:$4 sm:$0xff]   ;;  %v6684_v19 = vld [vmem:[%s7173_s3 + $0x44] ss:$16 sps:$4 sm:$0xff]  }
 0x3ff   :  { %v6635_v33 = vadd.f32 %v2194_v29, %v2193_v32  ;;  %v6652_v29 = vld [vmem:[%s7173_s3 + $0x8] ss:$16 sps:$4 sm:$0xff]  }
 0x401   :  { %5326 = vtanh.f32 %v6635_v33 }
 0x408   :  { %v2438_v21 = vpop.f32.mrb[28].mxu0  ;;  %v2479_v22 = vpop.f32.mrb[28].mxu1 }
 0x409   :  { %v2486_v23 = vadd.f32 %v2438_v21, %v2206_v15  ;;  %v2440_v10 = vpop.f32.mrb[29].mxu0  ;;  %v2481_v31 = vpop.f32.mrb[29].mxu1  ;;  %v2488_v15 = vadd.f32 %v2479_v22, %v2208_v3  ;;  %v6689_v21 = vld [vmem:[%s7173_s3 + $0x4c] ss:$16 sps:$4 sm:$0xff]  }
 0x40a   :  { %v2487_v36 = vadd.f32 %v2440_v10, %v2207_v16  ;;  %v2442_v39 = vpop.f32.mrb[30].mxu0  ;;  %v2483_v45 = vpop.f32.mrb[30].mxu1  ;;  %v2489_v0 = vadd.f32 %v2481_v31, %v2209_v37  ;;  %v6677_v16 = vld [vmem:[%s7173_s3 + $0x28] ss:$16 sps:$4 sm:$0xff]   ;;  %v6710_v31 = vld [vmem:[%s7173_s3 + $0x64] ss:$16 sps:$4 sm:$0xff]  }
 0x40b   :  { %v2490_v48 = vmul.f32 0.5, %v2486_v23  ;;  %v2443_v40 = vpop.f32.mrb[31].mxu0  ;;  %v2484_v49 = vpop.f32.mrb[31].mxu1  ;;  %v2492_v22 = vmul.f32 0.5, %v2488_v15  ;;  %v6698_v23 = vld [vmem:[%s7173_s3 + $0x40] ss:$16 sps:$4 sm:$0xff]  }
 0x40c   :  { %v5327_v59 = vpop.eup %5326  ;;  %v2491_v20 = vmul.f32 0.5, %v2487_v36  ;;  %v6703_v10 = vld [vmem:[%s7173_s3 + $0x48] ss:$16 sps:$4 sm:$0xff]   ;;  %v6715_v36 = vld [vmem:[%s7173_s3 + $0x6c] ss:$16 sps:$4 sm:$0xff]  }
 0x40d   :  { %5328 = vtanh.f32 %v2490_v48  ;;  %v2197_v2 = vmul.f32 %v5327_v59, %v2190_v46  ;;  %v6722_v40 = vld [vmem:[%s7173_s3 + $0x60] ss:$16 sps:$4 sm:$0xff]   ;;  %v6727_v49 = vld [vmem:[%s7173_s3 + $0x68] ss:$16 sps:$4 sm:$0xff]  }
 0x40e   :  { %5330 = vtanh.f32 %v2491_v20  ;;  %v6734_v20 = vld [vmem:[%s7173_s3 + $0x84] ss:$16 sps:$4 sm:$0xff]   ;;  %v6747_v15 = vld [vmem:[%s7173_s3 + $0x80] ss:$16 sps:$4 sm:$0xff]  }
 0x40f   :  { %v2200_v32 = vpack.c.bf16 %v2197_v2, %v2197_v2  ;;  %5332 = vtanh.f32 %v2489_v0  ;;  %v6739_v0 = vld [vmem:[%s7173_s3 + $0x8c] ss:$16 sps:$4 sm:$0xff]  }
 0x410   :  { %5334 = vtanh.f32 %v2492_v22  ;;  %v6752_v22 = vld [vmem:[%s7173_s3 + $0x88] ss:$16 sps:$4 sm:$0xff]  }
 0x411   :  { %4626 = vst [vmem:[%s7176_s4 + $0xc] sm:$0xf] %v2200_v32  ;;  %2748 = vmatmul.mubr.bf16.vlgmr.msra.gmra.mrb[32].mxu0 %v2200_v32  ;;  %2789 = vmatmul.mubr.bf16.vlgmr.msra.gmra.mrb[32].mxu1 %v2200_v32  ;;  %7222 = vst [vmem:[#allocation4_spill] sm:$0xff] %v6752_v22 }
 0x412   :  { %3027 = vmatpush1.bf16.msra.mxu0 %v6647_v28  ;;  %3068 = vmatpush1.bf16.msra.mxu1 %v6652_v29 }
 0x413   :  { %3028 = vmatprep.subr.bf16.mxu0 %v6657_v30  ;;  %3069 = vmatprep.subr.bf16.mxu1 %v6662_v14 }
 0x414   :  { %3058 = vmatprep.mubr.bf16.mxu0 %v7203_v60  ;;  %3099 = vmatprep.mubr.bf16.mxu1 %v7203_v60 }
 0x416   :  { %3029 = vmatpush1.bf16.msra.mxu0 %v6672_v34  ;;  %3070 = vmatpush1.bf16.msra.mxu1 %v6677_v16 }
 0x417   :  { %v5329_v37 = vpop.eup %5328  ;;  %3030 = vmatprep.subr.bf16.mxu0 %v6684_v19  ;;  %3071 = vmatprep.subr.bf16.mxu1 %v6689_v21 }
 0x418   :  { %v2496_v39 = vadd.f32 1.0, %v5329_v37  ;;  %v5331_v45 = vpop.eup %5330  ;;  %v6764_v37 = vld [vmem:[%s7173_s3 + $0xac] ss:$16 sps:$4 sm:$0xff]  }
 0x419   :  { %v2497_v48 = vadd.f32 1.0, %v5331_v45  ;;  %v5333_v59 = vpop.eup %5332  ;;  %7224 = vst [vmem:[#allocation6_spill] sm:$0xff] %v6764_v37  ;;  %v6774_v45 = vld [vmem:[%s7173_s3 + $0xa0] ss:$16 sps:$4 sm:$0xff]  }
 0x41a   :  { %v2499_v46 = vmul.f32 0.5, %v2496_v39  ;;  %3031 = vmatpush1.bf16.msra.mxu0 %v6698_v23  ;;  %3072 = vmatpush1.bf16.msra.mxu1 %v6703_v10  ;;  %7225 = vst [vmem:[#allocation7_spill] sm:$0xff] %v6774_v45 }
 0x41b   :  { %3032 = vmatprep.subr.bf16.mxu0 %v6710_v31  ;;  %3073 = vmatprep.subr.bf16.mxu1 %v6715_v36  ;;  %v2500_v2 = vmul.f32 0.5, %v2497_v48  ;;  %v6786_v48 = vld [vmem:[%s7173_s3 + $0xc4] ss:$16 sps:$4 sm:$0xff]  }
 0x41c   :  { %v2505_v3 = vmul.f32 %v5333_v59, %v2499_v46  ;;  %v6779_v46 = vld [vmem:[%s7173_s3 + $0xa8] ss:$16 sps:$4 sm:$0xff]   ;;  %7227 = vst [vmem:[#allocation9_spill] sm:$0xff] %v6786_v48  ;;  %v6791_v59 = vld [vmem:[%s7173_s3 + $0xcc] ss:$16 sps:$4 sm:$0xff]  }
 0x41d   :  { %v2504_v32 = vmul.f32 %v2500_v2, %v6402_v35  ;;  %v6759_v35 = vld [vmem:[%s7173_s3 + $0xa4] ss:$16 sps:$4 sm:$0xff]   ;;  %7226 = vst [vmem:[#allocation8_spill] sm:$0xff] %v6779_v46  ;;  %7228 = vst [vmem:[#allocation10_spill] sm:$0xff] %v6791_v59  ;;  %v5335_v2 = vpop.eup %5334 }
 0x41e   :  { %3033 = vmatpush1.bf16.msra.mxu0 %v6722_v40  ;;  %3074 = vmatpush1.bf16.msra.mxu1 %v6727_v49  ;;  %7223 = vst [vmem:[#allocation5_spill] sm:$0xff] %v6759_v35 }
 0x41f   :  { %3034 = vmatprep.subr.bf16.mxu0 %v6734_v20  ;;  %3075 = vmatprep.subr.bf16.mxu1 %v6739_v0  ;;  %v6766_v39 = vadd.f32 %v2505_v3, %v2504_v32  ;;  %v6798_v3 = vld [vmem:[%s7173_s3 + $0xc0] ss:$16 sps:$4 sm:$0xff]   ;;  %v6803_v32 = vld [vmem:[%s7173_s3 + $0xc8] ss:$16 sps:$4 sm:$0xff]  }
 0x420   :  { %7229 = vst [vmem:[#allocation11_spill] sm:$0xff] %v6803_v32 }
 0x421   :  { %5336 = vtanh.f32 %v6766_v39 }
 0x422   :  { %3035 = vmatpush1.bf16.msra.mxu0 %v6747_v15  ;;  %3076 = vmatpush1.bf16.msra.mxu1 %v6752_v22 }
 0x423   :  { %3036 = vmatprep.subr.bf16.mxu0 %v6759_v35  ;;  %3077 = vmatprep.subr.bf16.mxu1 %v6764_v37  ;;  %v2498_v37 = vadd.f32 1.0, %v5335_v2  ;;  %v6822_v2 = vld [vmem:[%s7173_s3 + $0xe0] ss:$16 sps:$4 sm:$0xff]  }
 0x426   :  { %3037 = vmatpush1.bf16.msra.mxu0 %v6774_v45  ;;  %3078 = vmatpush1.bf16.msra.mxu1 %v6779_v46  ;;  %v6810_v45 = vld [vmem:[%s7173_s3 + $0xe4] ss:$16 sps:$4 sm:$0xff]   ;;  %v6815_v46 = vld [vmem:[%s7173_s3 + $0xec] ss:$16 sps:$4 sm:$0xff]  }
 0x427   :  { %3038 = vmatprep.subr.bf16.mxu0 %v6786_v48  ;;  %3079 = vmatprep.subr.bf16.mxu1 %v6791_v59  ;;  %v6827_v59 = vld [vmem:[%s7173_s3 + $0xe8] ss:$16 sps:$4 sm:$0xff]   ;;  %v2501_v48 = vmul.f32 0.5, %v2498_v37 }
 0x42a   :  { %3039 = vmatpush1.bf16.msra.mxu0 %v6798_v3  ;;  %3080 = vmatpush1.bf16.msra.mxu1 %v6803_v32 }
 0x42b   :  { %3040 = vmatprep.subr.bf16.mxu0 %v6810_v45  ;;  %3081 = vmatprep.subr.bf16.mxu1 %v6815_v46  ;;  %v5337_v35 = vpop.eup %5336 }
 0x42c   :  { %v2508_v22 = vmul.f32 %v5337_v35, %v2501_v48 }
 0x42e   :  { %3041 = vmatpush1.bf16.msra.mxu0 %v6822_v2  ;;  %3082 = vmatpush1.bf16.msra.mxu1 %v6827_v59  ;;  %v2511_v32 = vpack.c.bf16 %v2508_v22, %v2508_v22  ;;  %v4698_v22 = vld [vmem:[%s7175_s1 + $0x48] sm:$0xff] }
 0x42f   :  { %3337 = vmatprep.subr.bf16.mxu0 %v6427_v42  ;;  %3378 = vmatprep.subr.bf16.mxu1 %v6432_v41  ;;  %v4662_v42 = vld [vmem:[%s7174_s0 + $0x40] sm:$0xff] }
 0x430   :  { %4661 = vst [vmem:[%s7177_s5 + $0xc] sm:$0xf] %v2511_v32  ;;  %v2517_v41 = vunpack.c.l.bf16 %v4662_v42 }
 0x431   :  { %3059 = vmatmul.mubr.bf16.vlgmr.msra.gmra.mrb[36].mxu0 %v2511_v32  ;;  %3100 = vmatmul.mubr.bf16.vlgmr.msra.gmra.mrb[36].mxu1 %v2511_v32 }
 0x432   :  { %3338 = vmatpush1.bf16.msra.mxu0 %v6437_v47  ;;  %3379 = vmatpush1.bf16.msra.mxu1 %v6442_v51  ;;  %v4663_v47 = vld [vmem:[%s7174_s0 + $0x48] sm:$0xff]  ;;  %v2518_v51 = vunpack.c.h.bf16 %v4662_v42 }
 0x433   :  { %3339 = vmatprep.subr.bf16.mxu0 %v6451_v50  ;;  %3380 = vmatprep.subr.bf16.mxu1 %v6456_v4 }
 0x434   :  { %3369 = vmatprep.mubr.bf16.mxu0 %v7203_v60  ;;  %3410 = vmatprep.mubr.bf16.mxu1 %v7203_v60 }
 0x436   :  { %3340 = vmatpush1.bf16.msra.mxu0 %v6461_v5  ;;  %3381 = vmatpush1.bf16.msra.mxu1 %v6466_v6 }
 0x437   :  { %3341 = vmatprep.subr.bf16.mxu0 %v6475_v7  ;;  %3382 = vmatprep.subr.bf16.mxu1 %v6480_v8  ;;  %v2520_v7 = vunpack.c.h.bf16 %v4663_v47 }
 0x43a   :  { %3342 = vmatpush1.bf16.msra.mxu0 %v6485_v9  ;;  %3383 = vmatpush1.bf16.msra.mxu1 %v6490_v11 }
 0x43b   :  { %3343 = vmatprep.subr.bf16.mxu0 %v6499_v12  ;;  %3384 = vmatprep.subr.bf16.mxu1 %v6504_v13 }
 0x43e   :  { %3344 = vmatpush1.bf16.msra.mxu0 %v6509_v24  ;;  %3385 = vmatpush1.bf16.msra.mxu1 %v6514_v43 }
 0x43f   :  { %3345 = vmatprep.subr.bf16.mxu0 %v6523_v25  ;;  %3386 = vmatprep.subr.bf16.mxu1 %v6528_v44 }
 0x442   :  { %3346 = vmatpush1.bf16.msra.mxu0 %v6533_v17  ;;  %3387 = vmatpush1.bf16.msra.mxu1 %v6538_v52  ;;  %v2519_v17 = vunpack.c.l.bf16 %v4663_v47 }
 0x443   :  { %3347 = vmatprep.subr.bf16.mxu0 %v6552_v1  ;;  %3388 = vmatprep.subr.bf16.mxu1 %v6562_v53 }
 0x446   :  { %3348 = vmatpush1.bf16.msra.mxu0 %v6547_v18  ;;  %3389 = vmatpush1.bf16.msra.mxu1 %v6557_v38 }
 0x447   :  { %3349 = vmatprep.subr.bf16.mxu0 %v6571_v54  ;;  %3390 = vmatprep.subr.bf16.mxu1 %v6576_v55 }
 0x44a   :  { %3350 = vmatpush1.bf16.msra.mxu0 %v6581_v56  ;;  %3391 = vmatpush1.bf16.msra.mxu1 %v6586_v57 }
 0x44b   :  { %3351 = vmatprep.subr.bf16.mxu0 %v6595_v58  ;;  %3392 = vmatprep.subr.bf16.mxu1 %v6600_v61 }
 0x44e   :  { %3352 = vmatpush1.bf16.msra.mxu0 %v6605_v62  ;;  %3393 = vmatpush1.bf16.msra.mxu1 %v6610_v63  ;;  %v4697_v63 = vld [vmem:[%s7175_s1 + $0x40] sm:$0xff] }
 0x44f   :  { %3648 = vmatprep.subr.bf16.mxu0 %v6619_v26  ;;  %3689 = vmatprep.subr.bf16.mxu1 %v6624_v27  ;;  %v2828_v27 = vunpack.c.l.bf16 %v4697_v63  ;;  %v2829_v35 = vunpack.c.h.bf16 %v4697_v63  ;;  %v5177_v63 = vld [vmem:[%s7172_s2 + $0x48] ss:$16 sps:$4 sm:$0xff]  }
 0x4e4   :  { %v2749_v50 = vpop.f32.mrb[32].mxu0  ;;  %v2790_v4 = vpop.f32.mrb[32].mxu1 }
 0x4e5   :  { %v2797_v5 = vadd.f32 %v2749_v50, %v2517_v41  ;;  %v2751_v6 = vpop.f32.mrb[33].mxu0  ;;  %v2792_v8 = vpop.f32.mrb[33].mxu1  ;;  %v2799_v52 = vadd.f32 %v2790_v4, %v2519_v17  ;;  %v2831_v41 = vunpack.c.h.bf16 %v4698_v22 }
 0x4e6   :  { %v2798_v9 = vadd.f32 %v2751_v6, %v2518_v51  ;;  %v2753_v11 = vpop.f32.mrb[34].mxu0  ;;  %v2794_v12 = vpop.f32.mrb[34].mxu1  ;;  %v2800_v44 = vadd.f32 %v2792_v8, %v2520_v7 }
 0x4e7   :  { %v2801_v13 = vmul.f32 0.5, %v2797_v5  ;;  %v2754_v24 = vpop.f32.mrb[35].mxu0  ;;  %v2795_v43 = vpop.f32.mrb[35].mxu1  ;;  %v2803_v18 = vmul.f32 0.5, %v2799_v52 }
 0x4e8   :  { %v2802_v25 = vmul.f32 0.5, %v2798_v9  ;;  %v2830_v24 = vunpack.c.l.bf16 %v4698_v22  ;;  %v5180_v22 = vld [vmem:[%s7172_s2 + $0x60] ss:$16 sps:$4 sm:$0xff]  }
 0x4e9   :  { %5338 = vtanh.f32 %v2801_v13 }
 0x4ea   :  { %5340 = vtanh.f32 %v2802_v25 }
 0x4eb   :  { %5342 = vtanh.f32 %v2800_v44 }
 0x4ec   :  { %5344 = vtanh.f32 %v2803_v18  ;;  %v7237_v18 = vld [vmem:[#allocation11_spill] sm:$0xff] }
 0x4f3   :  { %v5339_v1 = vpop.eup %5338 }
 0x4f4   :  { %v2807_v38 = vadd.f32 1.0, %v5339_v1  ;;  %v5341_v53 = vpop.eup %5340 }
 0x4f5   :  { %v2808_v55 = vadd.f32 1.0, %v5341_v53  ;;  %v5343_v56 = vpop.eup %5342 }
 0x4f6   :  { %v2810_v54 = vmul.f32 0.5, %v2807_v38  ;;  %v5345_v26 = vpop.eup %5344 }
 0x4f7   :  { %v2811_v57 = vmul.f32 0.5, %v2808_v55  ;;  %v2809_v37 = vadd.f32 1.0, %v5345_v26  ;;  %v5168_v55 = vld [vmem:[%s7172_s2 + $0x20] ss:$16 sps:$4 sm:$0xff]   ;;  %v5182_v26 = vld [vmem:[%s7172_s2 + $0x64] ss:$16 sps:$4 sm:$0xff]  }
 0x4f8   :  { %v2816_v58 = vmul.f32 %v5343_v56, %v2810_v54  ;;  %v5173_v54 = vld [vmem:[%s7172_s2 + $0x2c] ss:$16 sps:$4 sm:$0xff]   ;;  %v5171_v56 = vld [vmem:[%s7172_s2 + $0x28] ss:$16 sps:$4 sm:$0xff]  }
 0x4f9   :  { %v2815_v61 = vmul.f32 %v2811_v57, %v6635_v33  ;;  %v2812_v5 = vmul.f32 0.5, %v2809_v37  ;;  %v5176_v57 = vld [vmem:[%s7172_s2 + $0x44] ss:$16 sps:$4 sm:$0xff]  }
 0x4fa   :  { %v5188_v37 = vld [vmem:[%s7172_s2 + $0x84] ss:$16 sps:$4 sm:$0xff]  }
 0x4fb   :  { %v6879_v62 = vadd.f32 %v2816_v58, %v2815_v61  ;;  %v5179_v58 = vld [vmem:[%s7172_s2 + $0x4c] ss:$16 sps:$4 sm:$0xff]   ;;  %v5174_v61 = vld [vmem:[%s7172_s2 + $0x40] ss:$16 sps:$4 sm:$0xff]  }
 0x4fd   :  { %5346 = vtanh.f32 %v6879_v62 }
 0x504   :  { %v3060_v48 = vpop.f32.mrb[36].mxu0  ;;  %v3101_v32 = vpop.f32.mrb[36].mxu1 }
 0x505   :  { %v3108_v42 = vadd.f32 %v3060_v48, %v2828_v27  ;;  %v3062_v33 = vpop.f32.mrb[37].mxu0  ;;  %v3103_v47 = vpop.f32.mrb[37].mxu1  ;;  %v3110_v25 = vadd.f32 %v3101_v32, %v2830_v24  ;;  %v5185_v27 = vld [vmem:[%s7172_s2 + $0x6c] ss:$16 sps:$4 sm:$0xff]   ;;  %v5186_v32 = vld [vmem:[%s7172_s2 + $0x80] ss:$16 sps:$4 sm:$0xff]  }
 0x506   :  { %v3109_v51 = vadd.f32 %v3062_v33, %v2829_v35  ;;  %v3064_v50 = vpop.f32.mrb[38].mxu0  ;;  %v3105_v4 = vpop.f32.mrb[38].mxu1  ;;  %v3111_v12 = vadd.f32 %v3103_v47, %v2831_v41  ;;  %v5183_v35 = vld [vmem:[%s7172_s2 + $0x68] ss:$16 sps:$4 sm:$0xff]   ;;  %v5191_v48 = vld [vmem:[%s7172_s2 + $0x8c] ss:$16 sps:$4 sm:$0xff]  }
 0x507   :  { %v3112_v6 = vmul.f32 0.5, %v3108_v42  ;;  %v3065_v7 = vpop.f32.mrb[39].mxu0  ;;  %v3106_v8 = vpop.f32.mrb[39].mxu1  ;;  %v3114_v44 = vmul.f32 0.5, %v3110_v25  ;;  %v5189_v42 = vld [vmem:[%s7172_s2 + $0x88] ss:$16 sps:$4 sm:$0xff]  }
 0x508   :  { %v5347_v9 = vpop.eup %5346  ;;  %v3113_v11 = vmul.f32 0.5, %v3109_v51  ;;  %v5192_v33 = vld [vmem:[%s7172_s2 + $0xa0] ss:$16 sps:$4 sm:$0xff]   ;;  %v5194_v41 = vld [vmem:[%s7172_s2 + $0xa4] ss:$16 sps:$4 sm:$0xff]   ;;  %v4733_v25 = vld [vmem:[%s7174_s0 + $0x58] sm:$0xff] }
 0x509   :  { %5348 = vtanh.f32 %v3112_v6  ;;  %v2819_v13 = vmul.f32 %v5347_v9, %v2812_v5  ;;  %v5195_v47 = vld [vmem:[%s7172_s2 + $0xa8] ss:$16 sps:$4 sm:$0xff]   ;;  %v5197_v51 = vld [vmem:[%s7172_s2 + $0xac] ss:$16 sps:$4 sm:$0xff]   ;;  %v5200_v50 = vld [vmem:[%s7172_s2 + $0xc4] ss:$16 sps:$4 sm:$0xff]  }
 0x50a   :  { %5350 = vtanh.f32 %v3113_v11  ;;  %v5203_v4 = vld [vmem:[%s7172_s2 + $0xcc] ss:$16 sps:$4 sm:$0xff]   ;;  %v5198_v5 = vld [vmem:[%s7172_s2 + $0xc0] ss:$16 sps:$4 sm:$0xff]   ;;  %v5201_v6 = vld [vmem:[%s7172_s2 + $0xc8] ss:$16 sps:$4 sm:$0xff]  }
 0x50b   :  { %v2822_v43 = vpack.c.bf16 %v2819_v13, %v2819_v13  ;;  %5352 = vtanh.f32 %v3111_v12  ;;  %v5206_v7 = vld [vmem:[%s7172_s2 + $0xe4] ss:$16 sps:$4 sm:$0xff]   ;;  %v5209_v8 = vld [vmem:[%s7172_s2 + $0xec] ss:$16 sps:$4 sm:$0xff]   ;;  %v5204_v9 = vld [vmem:[%s7172_s2 + $0xe0] ss:$16 sps:$4 sm:$0xff]  }
 0x50c   :  { %5354 = vtanh.f32 %v3114_v44  ;;  %v5207_v11 = vld [vmem:[%s7172_s2 + $0xe8] ss:$16 sps:$4 sm:$0xff]   ;;  %v5212_v12 = vld [vmem:[%s7173_s3 + $0x4] ss:$16 sps:$4 sm:$0xff]   ;;  %v5215_v13 = vld [vmem:[%s7173_s3 + $0xc] ss:$16 sps:$4 sm:$0xff]  }
 0x50d   :  { %4696 = vst [vmem:[%s7176_s4 + $0x10] sm:$0xf] %v2822_v43  ;;  %3370 = vmatmul.mubr.bf16.vlgmr.msra.gmra.mrb[40].mxu0 %v2822_v43  ;;  %3411 = vmatmul.mubr.bf16.vlgmr.msra.gmra.mrb[40].mxu1 %v2822_v43  ;;  %v4732_v24 = vld [vmem:[%s7174_s0 + $0x50] sm:$0xff] }
 0x50e   :  { %3649 = vmatpush1.bf16.msra.mxu0 %v6647_v28  ;;  %3690 = vmatpush1.bf16.msra.mxu1 %v6652_v29  ;;  %v3139_v43 = vunpack.c.l.bf16 %v4732_v24  ;;  %v3140_v44 = vunpack.c.h.bf16 %v4732_v24  ;;  %v5219_v24 = vld [vmem:[%s7173_s3 + $0x28] ss:$16 sps:$4 sm:$0xff]  }
 0x50f   :  { %3650 = vmatprep.subr.bf16.mxu0 %v6657_v30  ;;  %3691 = vmatprep.subr.bf16.mxu1 %v6662_v14 }
 0x510   :  { %3680 = vmatprep.mubr.bf16.mxu0 %v7203_v60  ;;  %3721 = vmatprep.mubr.bf16.mxu1 %v7203_v60 }
 0x512   :  { %3651 = vmatpush1.bf16.msra.mxu0 %v6672_v34  ;;  %3692 = vmatpush1.bf16.msra.mxu1 %v6677_v16 }
 0x513   :  { %v5349_v17 = vpop.eup %5348  ;;  %3652 = vmatprep.subr.bf16.mxu0 %v6684_v19  ;;  %3693 = vmatprep.subr.bf16.mxu1 %v6689_v21 }
 0x514   :  { %v3118_v28 = vadd.f32 1.0, %v5349_v17  ;;  %v5351_v29 = vpop.eup %5350 }
 0x515   :  { %v3119_v30 = vadd.f32 1.0, %v5351_v29  ;;  %v5353_v14 = vpop.eup %5352 }
 0x516   :  { %v3121_v52 = vmul.f32 0.5, %v3118_v28  ;;  %3653 = vmatpush1.bf16.msra.mxu0 %v6698_v23  ;;  %3694 = vmatpush1.bf16.msra.mxu1 %v6703_v10  ;;  %v7230_v23 = vld [vmem:[#allocation4_spill] sm:$0xff]  ;;  %v7231_v10 = vld [vmem:[#allocation5_spill] sm:$0xff] }
 0x517   :  { %3654 = vmatprep.subr.bf16.mxu0 %v6710_v31  ;;  %3695 = vmatprep.subr.bf16.mxu1 %v6715_v36  ;;  %v3122_v34 = vmul.f32 0.5, %v3119_v30  ;;  %v7232_v31 = vld [vmem:[#allocation6_spill] sm:$0xff]  ;;  %v5355_v36 = vpop.eup %5354  ;;  %v3142_v30 = vunpack.c.h.bf16 %v4733_v25 }
 0x518   :  { %v3127_v16 = vmul.f32 %v5353_v14, %v3121_v52 }
 0x519   :  { %v3126_v19 = vmul.f32 %v3122_v34, %v6766_v39  ;;  %v7235_v39 = vld [vmem:[#allocation9_spill] sm:$0xff] }
 0x51a   :  { %3655 = vmatpush1.bf16.msra.mxu0 %v6722_v40  ;;  %3696 = vmatpush1.bf16.msra.mxu1 %v6727_v49  ;;  %v7233_v40 = vld [vmem:[#allocation7_spill] sm:$0xff]  ;;  %v7234_v49 = vld [vmem:[#allocation8_spill] sm:$0xff] }
 0x51b   :  { %3656 = vmatprep.subr.bf16.mxu0 %v6734_v20  ;;  %3697 = vmatprep.subr.bf16.mxu1 %v6739_v0  ;;  %v6910_v21 = vadd.f32 %v3127_v16, %v3126_v19  ;;  %v3120_v20 = vadd.f32 1.0, %v5355_v36  ;;  %v7236_v0 = vld [vmem:[#allocation10_spill] sm:$0xff] }
 0x51d   :  { %5356 = vtanh.f32 %v6910_v21 }
 0x51e   :  { %3657 = vmatpush1.bf16.msra.mxu0 %v6747_v15  ;;  %3698 = vmatpush1.bf16.msra.mxu1 %v7230_v23  ;;  %v3123_v15 = vmul.f32 0.5, %v3120_v20 }
 0x51f   :  { %3658 = vmatprep.subr.bf16.mxu0 %v7231_v10  ;;  %3699 = vmatprep.subr.bf16.mxu1 %v7232_v31 }
 0x522   :  { %3659 = vmatpush1.bf16.msra.mxu0 %v7233_v40  ;;  %3700 = vmatpush1.bf16.msra.mxu1 %v7234_v49  ;;  %v3141_v49 = vunpack.c.l.bf16 %v4733_v25  ;;  %v5227_v25 = vld [vmem:[%s7173_s3 + $0x4c] ss:$16 sps:$4 sm:$0xff]  }
 0x523   :  { %3660 = vmatprep.subr.bf16.mxu0 %v7235_v39  ;;  %3701 = vmatprep.subr.bf16.mxu1 %v7236_v0 }
 0x526   :  { %3661 = vmatpush1.bf16.msra.mxu0 %v6798_v3  ;;  %3702 = vmatpush1.bf16.msra.mxu1 %v7237_v18  ;;  %v5165_v3 = vld [vmem:[%s7172_s2 + $0x8] ss:$16 sps:$4 sm:$0xff]  }
 0x527   :  { %3662 = vmatprep.subr.bf16.mxu0 %v6810_v45  ;;  %3703 = vmatprep.subr.bf16.mxu1 %v6815_v46  ;;  %v5357_v1 = vpop.eup %5356  ;;  %v5164_v45 = vld [vmem:[%s7172_s2 + $0x4] ss:$16 sps:$4 sm:$0xff]   ;;  %v5167_v46 = vld [vmem:[%s7172_s2 + $0xc] ss:$16 sps:$4 sm:$0xff]  }
 0x528   :  { %v3130_v38 = vmul.f32 %v5357_v1, %v3123_v15 }
 0x52a   :  { %3663 = vmatpush1.bf16.msra.mxu0 %v6822_v2  ;;  %3704 = vmatpush1.bf16.msra.mxu1 %v6827_v59  ;;  %v3133_v53 = vpack.c.bf16 %v3130_v38, %v3130_v38  ;;  %v5162_v59 = vld [vmem:[%s7172_s2] ss:$16 sps:$4 sm:$0xff]   ;;  %v5170_v2 = vld [vmem:[%s7172_s2 + $0x24] ss:$16 sps:$4 sm:$0xff]  }
 0x52b   :  { %3959 = vmatprep.subr.bf16.mxu0 %v5164_v45  ;;  %4000 = vmatprep.subr.bf16.mxu1 %v5167_v46 }
 0x52c   :  { %4731 = vst [vmem:[%s7177_s5 + $0x10] sm:$0xf] %v3133_v53 }
 0x52d   :  { %3681 = vmatmul.mubr.bf16.vlgmr.msra.gmra.mrb[44].mxu0 %v3133_v53  ;;  %3722 = vmatmul.mubr.bf16.vlgmr.msra.gmra.mrb[44].mxu1 %v3133_v53 }
 0x52e   :  { %3991 = vmatprep.mubr.bf16.mxu0 %v7203_v60  ;;  %4032 = vmatprep.mubr.bf16.mxu1 %v7203_v60 }
 0x52f   :  { %3960 = vmatpush1.bf16.msra.mxu0 %v5162_v59  ;;  %4001 = vmatpush1.bf16.msra.mxu1 %v5165_v3 }
 0x530   :  { %3961 = vmatprep.subr.bf16.mxu0 %v5170_v2  ;;  %4002 = vmatprep.subr.bf16.mxu1 %v5173_v54  ;;  %v4767_v2 = vld [vmem:[%s7175_s1 + $0x50] sm:$0xff] }
 0x533   :  { %3962 = vmatpush1.bf16.msra.mxu0 %v5168_v55  ;;  %4003 = vmatpush1.bf16.msra.mxu1 %v5171_v56  ;;  %v3450_v55 = vunpack.c.l.bf16 %v4767_v2  ;;  %v4768_v56 = vld [vmem:[%s7175_s1 + $0x58] sm:$0xff] }
 0x534   :  { %3963 = vmatprep.subr.bf16.mxu0 %v5176_v57  ;;  %4004 = vmatprep.subr.bf16.mxu1 %v5179_v58  ;;  %v3451_v57 = vunpack.c.h.bf16 %v4767_v2  ;;  %v5249_v2 = vld [vmem:[%s7173_s3 + $0xc8] ss:$16 sps:$4 sm:$0xff]  }
 0x537   :  { %3964 = vmatpush1.bf16.msra.mxu0 %v5174_v61  ;;  %4005 = vmatpush1.bf16.msra.mxu1 %v5177_v63 }
 0x538   :  { %3965 = vmatprep.subr.bf16.mxu0 %v5182_v26  ;;  %4006 = vmatprep.subr.bf16.mxu1 %v5185_v27  ;;  %v3453_v27 = vunpack.c.h.bf16 %v4768_v56 }
 0x53b   :  { %3966 = vmatpush1.bf16.msra.mxu0 %v5180_v22  ;;  %4007 = vmatpush1.bf16.msra.mxu1 %v5183_v35 }
 0x53c   :  { %3967 = vmatprep.subr.bf16.mxu0 %v5188_v37  ;;  %4008 = vmatprep.subr.bf16.mxu1 %v5191_v48 }
 0x53f   :  { %3968 = vmatpush1.bf16.msra.mxu0 %v5186_v32  ;;  %4009 = vmatpush1.bf16.msra.mxu1 %v5189_v42 }
 0x540   :  { %3969 = vmatprep.subr.bf16.mxu0 %v5194_v41  ;;  %4010 = vmatprep.subr.bf16.mxu1 %v5197_v51 }
 0x543   :  { %3970 = vmatpush1.bf16.msra.mxu0 %v5192_v33  ;;  %4011 = vmatpush1.bf16.msra.mxu1 %v5195_v47 }
 0x544   :  { %3971 = vmatprep.subr.bf16.mxu0 %v5200_v50  ;;  %4012 = vmatprep.subr.bf16.mxu1 %v5203_v4 }
 0x547   :  { %3972 = vmatpush1.bf16.msra.mxu0 %v5198_v5  ;;  %4013 = vmatpush1.bf16.msra.mxu1 %v5201_v6  ;;  %v3452_v5 = vunpack.c.l.bf16 %v4768_v56  ;;  %v5210_v6 = vld [vmem:[%s7173_s3] ss:$16 sps:$4 sm:$0xff]   ;;  %v5257_v56 = vld [vmem:[%s7173_s3 + $0xec] ss:$16 sps:$4 sm:$0xff]  }
 0x548   :  { %3973 = vmatprep.subr.bf16.mxu0 %v5206_v7  ;;  %4014 = vmatprep.subr.bf16.mxu1 %v5209_v8  ;;  %v5213_v7 = vld [vmem:[%s7173_s3 + $0x8] ss:$16 sps:$4 sm:$0xff]  }
 0x54b   :  { %3974 = vmatpush1.bf16.msra.mxu0 %v5204_v9  ;;  %4015 = vmatpush1.bf16.msra.mxu1 %v5207_v11  ;;  %v5218_v9 = vld [vmem:[%s7173_s3 + $0x24] ss:$16 sps:$4 sm:$0xff]   ;;  %v5221_v11 = vld [vmem:[%s7173_s3 + $0x2c] ss:$16 sps:$4 sm:$0xff]  }
 0x54c   :  { %4270 = vmatprep.subr.bf16.mxu0 %v5212_v12  ;;  %4311 = vmatprep.subr.bf16.mxu1 %v5215_v13  ;;  %v5216_v13 = vld [vmem:[%s7173_s3 + $0x20] ss:$16 sps:$4 sm:$0xff]  }
 0x5e0   :  { %v3371_v17 = vpop.f32.mrb[40].mxu0  ;;  %v3412_v28 = vpop.f32.mrb[40].mxu1 }
 0x5e1   :  { %v3419_v29 = vadd.f32 %v3371_v17, %v3139_v43  ;;  %v3373_v52 = vpop.f32.mrb[41].mxu0  ;;  %v3414_v14 = vpop.f32.mrb[41].mxu1  ;;  %v3421_v20 = vadd.f32 %v3412_v28, %v3141_v49  ;;  %v5224_v43 = vld [vmem:[%s7173_s3 + $0x44] ss:$16 sps:$4 sm:$0xff]   ;;  %v5222_v17 = vld [vmem:[%s7173_s3 + $0x40] ss:$16 sps:$4 sm:$0xff]  }
 0x5e2   :  { %v3420_v34 = vadd.f32 %v3373_v52, %v3140_v44  ;;  %v3375_v16 = vpop.f32.mrb[42].mxu0  ;;  %v3416_v19 = vpop.f32.mrb[42].mxu1  ;;  %v3422_v40 = vadd.f32 %v3414_v14, %v3142_v30  ;;  %v5225_v28 = vld [vmem:[%s7173_s3 + $0x48] ss:$16 sps:$4 sm:$0xff]   ;;  %v5230_v52 = vld [vmem:[%s7173_s3 + $0x64] ss:$16 sps:$4 sm:$0xff]  }
 0x5e3   :  { %v3423_v23 = vmul.f32 0.5, %v3419_v29  ;;  %v3376_v10 = vpop.f32.mrb[43].mxu0  ;;  %v3417_v31 = vpop.f32.mrb[43].mxu1  ;;  %v3425_v39 = vmul.f32 0.5, %v3421_v20  ;;  %v5228_v19 = vld [vmem:[%s7173_s3 + $0x60] ss:$16 sps:$4 sm:$0xff]  }
 0x5e4   :  { %v3424_v36 = vmul.f32 0.5, %v3420_v34  ;;  %v5236_v31 = vld [vmem:[%s7173_s3 + $0x84] ss:$16 sps:$4 sm:$0xff]  }
 0x5e5   :  { %5358 = vtanh.f32 %v3423_v23  ;;  %v5231_v23 = vld [vmem:[%s7173_s3 + $0x68] ss:$16 sps:$4 sm:$0xff]  }
 0x5e6   :  { %5360 = vtanh.f32 %v3424_v36  ;;  %v5239_v36 = vld [vmem:[%s7173_s3 + $0x8c] ss:$16 sps:$4 sm:$0xff]  }
 0x5e7   :  { %5362 = vtanh.f32 %v3422_v40 }
 0x5e8   :  { %5364 = vtanh.f32 %v3425_v39  ;;  %v5234_v39 = vld [vmem:[%s7173_s3 + $0x80] ss:$16 sps:$4 sm:$0xff]  }
 0x5ef   :  { %v5359_v0 = vpop.eup %5358 }
 0x5f0   :  { %v3429_v18 = vadd.f32 1.0, %v5359_v0  ;;  %v5361_v15 = vpop.eup %5360  ;;  %v5237_v0 = vld [vmem:[%s7173_s3 + $0x88] ss:$16 sps:$4 sm:$0xff]  }
 0x5f1   :  { %v3430_v38 = vadd.f32 1.0, %v5361_v15  ;;  %v5363_v53 = vpop.eup %5362 }
 0x5f2   :  { %v3432_v1 = vmul.f32 0.5, %v3429_v18  ;;  %v5365_v54 = vpop.eup %5364  ;;  %v5242_v18 = vld [vmem:[%s7173_s3 + $0xa4] ss:$16 sps:$4 sm:$0xff]  }
 0x5f3   :  { %v3433_v45 = vmul.f32 0.5, %v3430_v38  ;;  %v3431_v58 = vadd.f32 1.0, %v5365_v54  ;;  %v5243_v38 = vld [vmem:[%s7173_s3 + $0xa8] ss:$16 sps:$4 sm:$0xff]  }
 0x5f4   :  { %v3438_v46 = vmul.f32 %v5363_v53, %v3432_v1  ;;  %v5240_v1 = vld [vmem:[%s7173_s3 + $0xa0] ss:$16 sps:$4 sm:$0xff]   ;;  %v5248_v53 = vld [vmem:[%s7173_s3 + $0xc4] ss:$16 sps:$4 sm:$0xff]  }
 0x5f5   :  { %v3437_v59 = vmul.f32 %v3433_v45, %v6879_v62  ;;  %v3434_v32 = vmul.f32 0.5, %v3431_v58  ;;  %v5251_v45 = vld [vmem:[%s7173_s3 + $0xcc] ss:$16 sps:$4 sm:$0xff]   ;;  %v5255_v58 = vld [vmem:[%s7173_s3 + $0xe8] ss:$16 sps:$4 sm:$0xff]  }
 0x5f7   :  { %v7041_v3 = vadd.f32 %v3438_v46, %v3437_v59  ;;  %v5246_v59 = vld [vmem:[%s7173_s3 + $0xc0] ss:$16 sps:$4 sm:$0xff]  }
 0x5f9   :  { %5366 = vtanh.f32 %v7041_v3 }
 0x600   :  { %v3682_v61 = vpop.f32.mrb[44].mxu0  ;;  %v3723_v63 = vpop.f32.mrb[44].mxu1 }
 0x601   :  { %v3730_v26 = vadd.f32 %v3682_v61, %v3450_v55  ;;  %v3684_v62 = vpop.f32.mrb[45].mxu0  ;;  %v3725_v22 = vpop.f32.mrb[45].mxu1  ;;  %v3732_v12 = vadd.f32 %v3723_v63, %v3452_v5  ;;  %v5254_v55 = vld [vmem:[%s7173_s3 + $0xe4] ss:$16 sps:$4 sm:$0xff]  }
 0x602   :  { %v3731_v35 = vadd.f32 %v3684_v62, %v3451_v57  ;;  %v3686_v37 = vpop.f32.mrb[46].mxu0  ;;  %v3727_v48 = vpop.f32.mrb[46].mxu1  ;;  %v3733_v50 = vadd.f32 %v3725_v22, %v3453_v27  ;;  %v5252_v57 = vld [vmem:[%s7173_s3 + $0xe0] ss:$16 sps:$4 sm:$0xff]  }
 0x603   :  { %v3734_v42 = vmul.f32 0.5, %v3730_v26  ;;  %v3687_v33 = vpop.f32.mrb[47].mxu0  ;;  %v3728_v41 = vpop.f32.mrb[47].mxu1  ;;  %v3736_v44 = vmul.f32 0.5, %v3732_v12  ;;  %v4802_v27 = vld [vmem:[%s7174_s0 + $0x60] sm:$0xff] }
 0x604   :  { %v5367_v47 = vpop.eup %5366  ;;  %v3735_v51 = vmul.f32 0.5, %v3731_v35  ;;  %v3761_v22 = vunpack.c.l.bf16 %v4802_v27  ;;  %v4803_v35 = vld [vmem:[%s7174_s0 + $0x68] sm:$0xff]  ;;  %v3762_v37 = vunpack.c.h.bf16 %v4802_v27 }
 0x605   :  { %5368 = vtanh.f32 %v3734_v42  ;;  %v3441_v4 = vmul.f32 %v5367_v47, %v3434_v32  ;;  %v3764_v41 = vunpack.c.h.bf16 %v4803_v35 }
 0x606   :  { %5370 = vtanh.f32 %v3735_v51 }
 0x607   :  { %v3444_v8 = vpack.c.bf16 %v3441_v4, %v3441_v4  ;;  %5372 = vtanh.f32 %v3733_v50 }
 0x608   :  { %5374 = vtanh.f32 %v3736_v44 }
 0x609   :  { %4766 = vst [vmem:[%s7176_s4 + $0x14] sm:$0xf] %v3444_v8  ;;  %3992 = vmatmul.mubr.bf16.vlgmr.msra.gmra.mrb[48].mxu0 %v3444_v8  ;;  %4033 = vmatmul.mubr.bf16.vlgmr.msra.gmra.mrb[48].mxu1 %v3444_v8 }
 0x60a   :  { %4271 = vmatpush1.bf16.msra.mxu0 %v5210_v6  ;;  %4312 = vmatpush1.bf16.msra.mxu1 %v5213_v7 }
 0x60b   :  { %4272 = vmatprep.subr.bf16.mxu0 %v5218_v9  ;;  %4313 = vmatprep.subr.bf16.mxu1 %v5221_v11  ;;  %v3763_v11 = vunpack.c.l.bf16 %v4803_v35 }
 0x60c   :  { %4302 = vmatprep.mubr.bf16.mxu0 %v7203_v60  ;;  %4343 = vmatprep.mubr.bf16.mxu1 %v7203_v60  ;;  %v5233_v60 = vld [vmem:[%s7173_s3 + $0x6c] ss:$16 sps:$4 sm:$0xff]  }
 0x60e   :  { %4273 = vmatpush1.bf16.msra.mxu0 %v5216_v13  ;;  %4314 = vmatpush1.bf16.msra.mxu1 %v5219_v24 }
 0x60f   :  { %v5369_v29 = vpop.eup %5368  ;;  %4274 = vmatprep.subr.bf16.mxu0 %v5224_v43  ;;  %4315 = vmatprep.subr.bf16.mxu1 %v5227_v25 }
 0x610   :  { %v3740_v30 = vadd.f32 1.0, %v5369_v29  ;;  %v5371_v14 = vpop.eup %5370 }
 0x611   :  { %v3741_v16 = vadd.f32 1.0, %v5371_v14  ;;  %v5373_v10 = vpop.eup %5372  ;;  %v4837_v14 = vld [vmem:[%s7175_s1 + $0x60] sm:$0xff] }
 0x612   :  { %v3743_v34 = vmul.f32 0.5, %v3740_v30  ;;  %4275 = vmatpush1.bf16.msra.mxu0 %v5222_v17  ;;  %4316 = vmatpush1.bf16.msra.mxu1 %v5225_v28  ;;  %v5375_v46 = vpop.eup %5374 }
 0x613   :  { %4276 = vmatprep.subr.bf16.mxu0 %v5230_v52  ;;  %4317 = vmatprep.subr.bf16.mxu1 %v5233_v60  ;;  %v3744_v40 = vmul.f32 0.5, %v3741_v16  ;;  %v3742_v54 = vadd.f32 1.0, %v5375_v46  ;;  %v4072_v16 = vunpack.c.l.bf16 %v4837_v14 }
 0x614   :  { %v3749_v49 = vmul.f32 %v5373_v10, %v3743_v34 }
 0x615   :  { %v3748_v20 = vmul.f32 %v3744_v40, %v6910_v21  ;;  %v5245_v21 = vld [vmem:[%s7173_s3 + $0xac] ss:$16 sps:$4 sm:$0xff]   ;;  %v3745_v61 = vmul.f32 0.5, %v3742_v54 }
 0x616   :  { %4277 = vmatpush1.bf16.msra.mxu0 %v5228_v19  ;;  %4318 = vmatpush1.bf16.msra.mxu1 %v5231_v23  ;;  %v4838_v19 = vld [vmem:[%s7175_s1 + $0x68] sm:$0xff]  ;;  %v4073_v23 = vunpack.c.h.bf16 %v4837_v14 }
 0x617   :  { %4278 = vmatprep.subr.bf16.mxu0 %v5236_v31  ;;  %4319 = vmatprep.subr.bf16.mxu1 %v5239_v36  ;;  %v7116_v15 = vadd.f32 %v3749_v49, %v3748_v20  ;;  %v4075_v20 = vunpack.c.h.bf16 %v4838_v19  ;;  %v4074_v54 = vunpack.c.l.bf16 %v4838_v19 }
 0x619   :  { %5376 = vtanh.f32 %v7116_v15 }
 0x61a   :  { %4279 = vmatpush1.bf16.msra.mxu0 %v5234_v39  ;;  %4320 = vmatpush1.bf16.msra.mxu1 %v5237_v0 }
 0x61b   :  { %4280 = vmatprep.subr.bf16.mxu0 %v5242_v18  ;;  %4321 = vmatprep.subr.bf16.mxu1 %v5245_v21 }
 0x61e   :  { %4281 = vmatpush1.bf16.msra.mxu0 %v5240_v1  ;;  %4322 = vmatpush1.bf16.msra.mxu1 %v5243_v38 }
 0x61f   :  { %4282 = vmatprep.subr.bf16.mxu0 %v5248_v53  ;;  %4323 = vmatprep.subr.bf16.mxu1 %v5251_v45 }
 0x622   :  { %4283 = vmatpush1.bf16.msra.mxu0 %v5246_v59  ;;  %4324 = vmatpush1.bf16.msra.mxu1 %v5249_v2 }
 0x623   :  { %4284 = vmatprep.subr.bf16.mxu0 %v5254_v55  ;;  %4325 = vmatprep.subr.bf16.mxu1 %v5257_v56  ;;  %v5377_v63 = vpop.eup %5376 }
 0x624   :  { %v3752_v26 = vmul.f32 %v5377_v63, %v3745_v61 }
 0x626   :  { %4285 = vmatpush1.bf16.msra.mxu0 %v5252_v57  ;;  %4326 = vmatpush1.bf16.msra.mxu1 %v5255_v58  ;;  %v3755_v62 = vpack.c.bf16 %v3752_v26, %v3752_v26 }
 0x628   :  { %4801 = vst [vmem:[%s7177_s5 + $0x14] sm:$0xf] %v3755_v62 }
 0x629   :  { %4303 = vmatmul.mubr.bf16.vlgmr.msra.gmra.mrb[52].mxu0 %v3755_v62  ;;  %4344 = vmatmul.mubr.bf16.vlgmr.msra.gmra.mrb[52].mxu1 %v3755_v62 }
 0x6dc   :  { %v3993_v48 = vpop.f32.mrb[48].mxu0  ;;  %v4034_v32 = vpop.f32.mrb[48].mxu1 }
 0x6dd   :  { %v4041_v42 = vadd.f32 %v3993_v48, %v3761_v22  ;;  %v3995_v33 = vpop.f32.mrb[49].mxu0  ;;  %v4036_v47 = vpop.f32.mrb[49].mxu1  ;;  %v4043_v12 = vadd.f32 %v4034_v32, %v3763_v11 }
 0x6de   :  { %v4042_v51 = vadd.f32 %v3995_v33, %v3762_v37  ;;  %v3997_v50 = vpop.f32.mrb[50].mxu0  ;;  %v4038_v4 = vpop.f32.mrb[50].mxu1  ;;  %v4044_v9 = vadd.f32 %v4036_v47, %v3764_v41 }
 0x6df   :  { %v4045_v5 = vmul.f32 0.5, %v4041_v42  ;;  %v3998_v6 = vpop.f32.mrb[51].mxu0  ;;  %v4039_v7 = vpop.f32.mrb[51].mxu1  ;;  %v4047_v13 = vmul.f32 0.5, %v4043_v12 }
 0x6e0   :  { %v4046_v8 = vmul.f32 0.5, %v4042_v51 }
 0x6e1   :  { %5378 = vtanh.f32 %v4045_v5 }
 0x6e2   :  { %5380 = vtanh.f32 %v4046_v8 }
 0x6e3   :  { %5382 = vtanh.f32 %v4044_v9 }
 0x6e4   :  { %5384 = vtanh.f32 %v4047_v13 }
 0x6eb   :  { %v5379_v24 = vpop.eup %5378 }
 0x6ec   :  { %v4051_v43 = vadd.f32 1.0, %v5379_v24  ;;  %v5381_v25 = vpop.eup %5380 }
 0x6ed   :  { %v4052_v17 = vadd.f32 1.0, %v5381_v25  ;;  %v5383_v28 = vpop.eup %5382 }
 0x6ee   :  { %v4054_v44 = vmul.f32 0.5, %v4051_v43  ;;  %v5385_v34 = vpop.eup %5384 }
 0x6ef   :  { %v4055_v29 = vmul.f32 0.5, %v4052_v17  ;;  %v4053_v10 = vadd.f32 1.0, %v5385_v34 }
 0x6f0   :  { %v4060_v52 = vmul.f32 %v5383_v28, %v4054_v44 }
 0x6f1   :  { %v4059_v60 = vmul.f32 %v4055_v29, %v7041_v3  ;;  %v4056_v21 = vmul.f32 0.5, %v4053_v10 }
 0x6f3   :  { %v4061_v30 = vadd.f32 %v4060_v52, %v4059_v60 }
 0x6f5   :  { %5386 = vtanh.f32 %v4061_v30 }
 0x6fc   :  { %v4304_v31 = vpop.f32.mrb[52].mxu0  ;;  %v4345_v36 = vpop.f32.mrb[52].mxu1 }
 0x6fd   :  { %v4352_v40 = vadd.f32 %v4304_v31, %v4072_v16  ;;  %v4306_v49 = vpop.f32.mrb[53].mxu0  ;;  %v4347_v3 = vpop.f32.mrb[53].mxu1  ;;  %v4354_v56 = vadd.f32 %v4345_v36, %v4074_v54 }
 0x6fe   :  { %v4353_v39 = vadd.f32 %v4306_v49, %v4073_v23  ;;  %v4308_v0 = vpop.f32.mrb[54].mxu0  ;;  %v4349_v18 = vpop.f32.mrb[54].mxu1  ;;  %v4355_v2 = vadd.f32 %v4347_v3, %v4075_v20 }
 0x6ff   :  { %v4356_v1 = vmul.f32 0.5, %v4352_v40  ;;  %v4309_v38 = vpop.f32.mrb[55].mxu0  ;;  %v4350_v53 = vpop.f32.mrb[55].mxu1  ;;  %v4358_v57 = vmul.f32 0.5, %v4354_v56 }
 0x700   :  { %v5387_v45 = vpop.eup %5386  ;;  %v4357_v46 = vmul.f32 0.5, %v4353_v39 }
 0x701   :  { %v4063_v59 = vmul.f32 %v5387_v45, %v4056_v21  ;;  %5388 = vtanh.f32 %v4356_v1 }
 0x702   :  { %5390 = vtanh.f32 %v4357_v46 }
 0x703   :  { %v4066_v55 = vpack.c.bf16 %v4063_v59, %v4063_v59  ;;  %5392 = vtanh.f32 %v4355_v2 }
 0x704   :  { %5394 = vtanh.f32 %v4358_v57 }
 0x705   :  { %4836 = vst [vmem:[%s7176_s4 + $0x18] sm:$0xf] %v4066_v55 }
 0x70b   :  { %v5389_v58 = vpop.eup %5388 }
 0x70c   :  { %v4362_v61 = vadd.f32 1.0, %v5389_v58  ;;  %v5391_v63 = vpop.eup %5390 }
 0x70d   :  { %v4363_v62 = vadd.f32 1.0, %v5391_v63  ;;  %v5393_v27 = vpop.eup %5392 }
 0x70e   :  { %v4365_v26 = vmul.f32 0.5, %v4362_v61  ;;  %v5395_v32 = vpop.eup %5394 }
 0x70f   :  { %v4366_v22 = vmul.f32 0.5, %v4363_v62  ;;  %v4364_v42 = vadd.f32 1.0, %v5395_v32 }
 0x710   :  { %v4371_v35 = vmul.f32 %v5393_v27, %v4365_v26 }
 0x711   :  { %v4370_v37 = vmul.f32 %v4366_v22, %v7116_v15  ;;  %v4367_v33 = vmul.f32 0.5, %v4364_v42 }
 0x713   :  { %v4372_v48 = vadd.f32 %v4371_v35, %v4370_v37 }
 0x715   :  { %5396 = vtanh.f32 %v4372_v48 }
 0x71f   :  { %v5397_v41 = vpop.eup %5396 }
 0x720   :  { %v4374_v47 = vmul.f32 %v5397_v41, %v4367_v33 }
 0x722   :  { %v4377_v51 = vpack.c.bf16 %v4374_v47, %v4374_v47 }
 0x724   :  { %4871 = vst [vmem:[%s7177_s5 + $0x18] sm:$0xf] %v4377_v51 }

</bundles_post_ra>
